<compile_context>
chip_gen: v6e
topology: v6e:2x2x1
jax: 0.10.0
libtpu: 0.0.40
codegen_flags: <defaults>
</compile_context>

<pallas_src>
import numpy as np
import jax
import jax.numpy as jnp
from jax.experimental import pallas as pl
from jax.experimental.pallas import tpu as pltpu


# Stats layout written by the kernel (first 8 lanes of a 128-wide row).
_S_FWD, _S_BWD, _S_CA, _S_CB, _S_CAF, _S_CBF, _S_CBB, _S_CAB = range(8)
_NUM_STATS = 8
_STATS_PAD = 128  # lane-dense output row


# ----------------------------------------------------------------------------
# Host-side precomputed, grid-invariant tables (hoisted out of the kernel).
# ----------------------------------------------------------------------------
def _build_distance_tables(h, w):
    hw = h * w
    idx = jnp.arange(hw, dtype=jnp.int32)
    r = (idx // w).astype(jnp.float32)
    c = (idx % w).astype(jnp.float32)
    d2 = (r[:, None] - r[None, :]) ** 2 + (c[:, None] - c[None, :]) ** 2  # exact ints
    nbr = jnp.where(d2 == 1.0, 1.0, 0.0) - 5.0 * jnp.where(d2 == 0.0, 1.0, 0.0)
    return d2.astype(jnp.float32), nbr.astype(jnp.float32)


# ----------------------------------------------------------------------------
# Fused kernel: argmax one-hot + per-class masked min-distance reductions.
# One grid step = one batch item, all classes.
# ----------------------------------------------------------------------------
def _mhd_stats_kernel(pred_ref, lab_ref, d2_ref, nbr_ref, out_ref):
    x = pred_ref[0]        # (C, HW) raw logits
    lab = lab_ref[0]       # (C, HW) one-hot labels
    d2 = d2_ref[...]       # (HW, HW) squared pixel distances (resident)
    nbr = nbr_ref[...]     # (HW, HW) 4-neighbour matrix minus 5*identity
    num_classes, hw = x.shape

    # argmax over classes on raw logits (first-index tie-break, like torch).
    cmax = jnp.max(x, axis=0, keepdims=True)                       # (1, HW)
    cls = jax.lax.broadcasted_iota(jnp.int32, (num_classes, hw), 0)
    amax = jnp.min(jnp.where(x >= cmax, cls, num_classes),
                   axis=0, keepdims=True)                          # (1, HW)

    BIG = jnp.float32(1e30)   # sqrt(BIG)~3e15; host gates these out via counts
    lane = jax.lax.broadcasted_iota(jnp.int32, (1, _STATS_PAD), 1)

    rows = []
    for j in range(num_classes):
        a = (amax == j).astype(jnp.float32)      # (1, HW) predicted mask
        b = lab[j:j + 1, :]                      # (1, HW) label mask
        af = a * (1.0 - b)                       # A \ B   (forward sources)
        bb = b * (1.0 - a)                       # B \ A   (backward sources)

        # Boundary test, column-oriented (target pixel q on sublanes):
        #   s[q] = (#4-neighbours of q in mask) - 5*mask[q];  boundary <=> s < -1.5
        s_b = jnp.sum(nbr * b, axis=1, keepdims=True)    # (HW, 1)
        s_a = jnp.sum(nbr * a, axis=1, keepdims=True)    # (HW, 1)
        bnd_b = s_b < -1.5                               # boundary(labels)
        bnd_a = s_a < -1.5                               # boundary(pred)

        # Masked min over the target set (sublane axis); sqrt AFTER the reduce.
        min_f = jnp.min(jnp.where(bnd_b, d2, BIG), axis=0, keepdims=True)  # (1, HW)
        min_b = jnp.min(jnp.where(bnd_a, d2, BIG), axis=0, keepdims=True)  # (1, HW)

        sum_fwd = jnp.sum(af * jnp.sqrt(min_f), axis=1, keepdims=True)     # (1, 1)
        sum_bwd = jnp.sum(bb * jnp.sqrt(min_b), axis=1, keepdims=True)
        cnt_a = jnp.sum(a, axis=1, keepdims=True)
        cnt_b = jnp.sum(b, axis=1, keepdims=True)
        cnt_af = jnp.sum(af, axis=1, keepdims=True)
        cnt_bf = jnp.sum(bnd_b.astype(jnp.float32), axis=0, keepdims=True)
        cnt_bb = jnp.sum(bb, axis=1, keepdims=True)
        cnt_ab = jnp.sum(bnd_a.astype(jnp.float32), axis=0, keepdims=True)

        row = jnp.zeros((1, _STATS_PAD), jnp.float32)
        for k, v in enumerate([sum_fwd, sum_bwd, cnt_a, cnt_b,
                               cnt_af, cnt_bf, cnt_bb, cnt_ab]):
            row = jnp.where(lane == k, v, row)
        rows.append(row)

    out_ref[0] = jnp.concatenate(rows, axis=0)   # (C, 128) lane-dense store


def hausdorff_stats(pred_flat, lab_flat, d2, nbr):
    # pred_flat, lab_flat: (N, C, HW); d2, nbr: (HW, HW)
    n, c, hw = pred_flat.shape
    return pl.pallas_call(
        _mhd_stats_kernel,
        out_shape=jax.ShapeDtypeStruct((n, c, _STATS_PAD), jnp.float32),
        grid=(n,),
        in_specs=[
            pl.BlockSpec((1, c, hw), lambda i: (i, 0, 0)),
            pl.BlockSpec((1, c, hw), lambda i: (i, 0, 0)),
            pl.BlockSpec((hw, hw), lambda i: (0, 0)),   # resident D2
            pl.BlockSpec((hw, hw), lambda i: (0, 0)),   # resident NBR
        ],
        out_specs=pl.BlockSpec((1, c, _STATS_PAD), lambda i: (i, 0, 0)),
        compiler_params=pltpu.CompilerParams(
            dimension_semantics=("parallel",)),
    )(pred_flat, lab_flat, d2, nbr)


# ----------------------------------------------------------------------------
# Host-side scalar bookkeeping (exact Hausdorff_Dist semantics; O(N*C) work).
# ----------------------------------------------------------------------------
def _hausdorff_from_stats(stats, h, w, num_classes, ignore_class_index,
                          ignore_failed_hd):
    batch_size = stats.shape[0]
    failed_hd_counter = np.zeros(shape=(num_classes + 2,))
    HD = np.zeros(shape=(batch_size, num_classes + 2), dtype=np.float32)
    for i in range(batch_size):
        for j in range(num_classes):
            if j == ignore_class_index:
                continue
            s = stats[i, j]
            if s[_S_CA] == 0:
                failed_hd_counter[j] += 1
                HD[i, j] = np.nan if ignore_failed_hd else np.array((h + w) / 4)
                continue
            # mean(min_dists) * len(list_a_forward) / |A|  ==  sum_fwd / |A|
            if s[_S_CAF] > 0 and s[_S_CBF] > 0:
                hd_ij_forward = s[_S_FWD] / s[_S_CA]
            else:
                hd_ij_forward = 0.0
            if s[_S_CBB] > 0 and s[_S_CAB] > 0:
                hd_ij_backward = s[_S_BWD] / s[_S_CB]
            else:
                hd_ij_backward = 0.0
            HD[i, j] = np.max([hd_ij_forward, hd_ij_backward])
    HD[:, -2] = np.mean(HD[:, :-2], axis=1)
    HD[:, -1] = np.mean(HD[:, :-3], axis=1)
    failed_hd_counter[-2] = np.mean(failed_hd_counter[:-2])
    failed_hd_counter[-1] = np.mean(failed_hd_counter[1:-2])
    return HD, failed_hd_counter


def modified_hausdorff_forward(predictions, labels, PARAMS):
    """predictions: (N, C, H, W) float logits; labels: (N, C, H, W) one-hot."""
    ignore_class_index = PARAMS['HD_IGNORE_CLASS_INDEX']
    ignore_failed_hd = PARAMS['IGNORE_FAILED_HD']
    n, c, h, w = predictions.shape
    assert h == w, "reference get_boundary assumes square images"
    hw = h * w

    pred_flat = jnp.reshape(predictions.astype(jnp.float32), (n, c, hw))
    lab_flat = jnp.reshape(labels.astype(jnp.float32), (n, c, hw))
    d2, nbr = _build_distance_tables(h, w)

    stats = jax.block_until_ready(hausdorff_stats(pred_flat, lab_flat, d2, nbr))
    stats_np = np.asarray(stats)[:, :, :_NUM_STATS]

    return _hausdorff_from_stats(stats_np, h, w, c,
                                 ignore_class_index, ignore_failed_hd)


# ----------------------------------------------------------------------------
# Pure-numpy reference (mirrors the PyTorch module) for a correctness check.
# ----------------------------------------------------------------------------
def _get_boundary_np(img):
    new = np.copy(img)
    new[:img.shape[0] - 1, :] += img[1:, :]
    new[1:, :] += img[:img.shape[0] - 1, :]
    new[:, :img.shape[0] - 1] += img[:, 1:]
    new[:, 1:] += img[:, :img.shape[0] - 1]
    return img * (5 - new)


def _cdist_np(a, b):
    d = a[:, None, :].astype(np.float64) - b[None, :, :].astype(np.float64)
    return np.sqrt(np.sum(d * d, axis=-1))


def _reference_forward(pred, lab, PARAMS):
    ignore = PARAMS['HD_IGNORE_CLASS_INDEX']
    ignore_failed = PARAMS['IGNORE_FAILED_HD']
    n, c, h, w = pred.shape
    am = np.argmax(pred, axis=1)
    A = (am[:, None, :, :] == np.arange(c)[None, :, None, None]).astype(np.float32)
    failed = np.zeros((c + 2,))
    HD = np.zeros((n, c + 2), dtype=np.float32)
    for i in range(n):
        for j in range(c):
            if j == ignore:
                continue
            img_a, img_b = A[i, j], lab[i, j]
            if not np.any(img_a):
                failed[j] += 1
                HD[i, j] = np.nan if ignore_failed else np.array((h + w) / 4)
                continue
            la_f = np.argwhere(img_a * (1 - img_b))
            lb_f = np.argwhere(_get_boundary_np(img_b))
            lb_b = np.argwhere(img_b * (1 - img_a))
            la_b = np.argwhere(_get_boundary_np(img_a))
            if len(la_f) > 0 and len(lb_f) > 0:
                dm = _cdist_np(la_f, lb_f)
                hd_f = np.mean(np.min(dm, axis=1)) * len(la_f) / len(np.argwhere(img_a))
            else:
                hd_f = 0.0
            if len(lb_b) > 0 and len(la_b) > 0:
                dm = _cdist_np(lb_b, la_b)
                hd_b = np.mean(np.min(dm, axis=1)) * len(lb_b) / len(np.argwhere(img_b))
            else:
                hd_b = 0.0
            HD[i, j] = np.max([hd_f, hd_b])
    HD[:, -2] = np.mean(HD[:, :-2], axis=1)
    HD[:, -1] = np.mean(HD[:, :-3], axis=1)
    failed[-2] = np.mean(failed[:-2])
    failed[-1] = np.mean(failed[1:-2])
    return HD, failed


if __name__ == "__main__":
    key = jax.random.PRNGKey(0)
    k1, k2 = jax.random.split(key)

    N, C, H, W = 2, 4, 16, 16
    PARAMS = {'HD_IGNORE_CLASS_INDEX': 0, 'IGNORE_FAILED_HD': False}

    predictions = jax.random.normal(k1, (N, C, H, W), dtype=jnp.float32)
    label_map = jax.random.randint(k2, (N, H, W), 0, C)
    labels_onehot = jnp.transpose(
        jax.nn.one_hot(label_map, C, dtype=jnp.float32), (0, 3, 1, 2))

    HD, failed = modified_hausdorff_forward(predictions, labels_onehot, PARAMS)

    HD_ref, failed_ref = _reference_forward(
        np.asarray(predictions), np.asarray(labels_onehot), PARAMS)

    assert HD.shape == (N, C + 2)
    assert failed.shape == (C + 2,)
    assert np.all(np.isfinite(HD)) and np.all(np.isfinite(failed))
    assert np.allclose(HD, HD_ref, rtol=1e-3, atol=1e-3), (HD, HD_ref)
    assert np.allclose(failed, failed_ref), (failed, failed_ref)

    print("KERNEL_OK")
</pallas_src>

<mosaic_0001>
module attributes {stable_mosaic.version = 11 : i64} {
  func.func @_mhd_stats_kernel(%arg0: i32, %arg1: memref<1x4x256xf32, #tpu.memory_space<vmem>>, %arg2: memref<1x4x256xf32, #tpu.memory_space<vmem>>, %arg3: memref<256x256xf32, #tpu.memory_space<vmem>>, %arg4: memref<256x256xf32, #tpu.memory_space<vmem>>, %arg5: memref<1x4x128xf32, #tpu.memory_space<vmem>>) attributes {dimension_semantics = [#tpu.dimension_semantics<parallel>], iteration_bounds = array<i64: 2>, scalar_prefetch = 0 : i64, scratch_operands = 0 : i64, tpu.core_type = #tpu.core_type<tc>, window_params = [{transform_indices = @transform_0, window_bounds = array<i64: 1, 4, 256>}, {transform_indices = @transform_1, window_bounds = array<i64: 1, 4, 256>}, {pipeline_mode = #tpu.pipeline_mode<synchronous>, transform_indices = @transform_2, window_bounds = array<i64: 256, 256>}, {pipeline_mode = #tpu.pipeline_mode<synchronous>, transform_indices = @transform_3, window_bounds = array<i64: 256, 256>}, {transform_indices = @transform_4, window_bounds = array<i64: 1, 4, 128>}]} {
    %c0 = arith.constant 0 : index
    %c0_0 = arith.constant 0 : index
    %c0_1 = arith.constant 0 : index
    %0 = vector.load %arg1[%c0, %c0_0, %c0_1] : memref<1x4x256xf32, #tpu.memory_space<vmem>>, vector<1x4x256xf32>
    %1 = vector.shape_cast %0 : vector<1x4x256xf32> to vector<4x256xf32>
    %c0_2 = arith.constant 0 : index
    %c0_3 = arith.constant 0 : index
    %c0_4 = arith.constant 0 : index
    %2 = vector.load %arg2[%c0_2, %c0_3, %c0_4] : memref<1x4x256xf32, #tpu.memory_space<vmem>>, vector<1x4x256xf32>
    %3 = vector.shape_cast %2 : vector<1x4x256xf32> to vector<4x256xf32>
    %c0_5 = arith.constant 0 : index
    %c0_6 = arith.constant 0 : index
    %4 = vector.load %arg3[%c0_5, %c0_6] : memref<256x256xf32, #tpu.memory_space<vmem>>, vector<256x256xf32>
    %c0_7 = arith.constant 0 : index
    %c0_8 = arith.constant 0 : index
    %5 = vector.load %arg4[%c0_7, %c0_8] : memref<256x256xf32, #tpu.memory_space<vmem>>, vector<256x256xf32>
    %cst = arith.constant dense<0xFF800000> : vector<256xf32>
    %6 = vector.multi_reduction <maximumf>, %1, %cst [0] : vector<4x256xf32> to vector<256xf32>
    %7 = vector.shape_cast %6 : vector<256xf32> to vector<1x256xf32>
    %8 = tpu.iota {dimensions = array<i32: 0>} : vector<4x256xi32>
    %9 = vector.broadcast %7 : vector<1x256xf32> to vector<4x256xf32>
    %10 = arith.cmpf oge, %1, %9 : vector<4x256xf32>
    %c4_i32 = arith.constant 4 : i32
    %11 = vector.broadcast %c4_i32 : i32 to vector<4x256xi32>
    %12 = arith.select %10, %8, %11 : vector<4x256xi1>, vector<4x256xi32>
    %cst_9 = arith.constant dense<2147483647> : vector<256xi32>
    %13 = vector.multi_reduction <minsi>, %12, %cst_9 [0] : vector<4x256xi32> to vector<256xi32>
    %14 = vector.shape_cast %13 : vector<256xi32> to vector<1x256xi32>
    %15 = tpu.iota {dimensions = array<i32: 1>} : vector<1x128xi32>
    %c0_i32 = arith.constant 0 : i32
    %16 = vector.broadcast %c0_i32 : i32 to vector<1x256xi32>
    %17 = arith.cmpi eq, %14, %16 : vector<1x256xi32>
    %18 = arith.extui %17 : vector<1x256xi1> to vector<1x256xi32>
    %19 = arith.sitofp %18 : vector<1x256xi32> to vector<1x256xf32>
    %20 = vector.extract_strided_slice %3 {offsets = [0, 0], sizes = [1, 256], strides = [1, 1]} : vector<4x256xf32> to vector<1x256xf32>
    %cst_10 = arith.constant 1.000000e+00 : f32
    %21 = vector.broadcast %cst_10 : f32 to vector<1x256xf32>
    %22 = arith.subf %21, %20 : vector<1x256xf32>
    %23 = arith.mulf %19, %22 : vector<1x256xf32>
    %cst_11 = arith.constant 1.000000e+00 : f32
    %24 = vector.broadcast %cst_11 : f32 to vector<1x256xf32>
    %25 = arith.subf %24, %19 : vector<1x256xf32>
    %26 = arith.mulf %20, %25 : vector<1x256xf32>
    %27 = vector.broadcast %20 : vector<1x256xf32> to vector<256x256xf32>
    %28 = arith.mulf %5, %27 : vector<256x256xf32>
    %cst_12 = arith.constant dense<0.000000e+00> : vector<256xf32>
    %29 = vector.multi_reduction <add>, %28, %cst_12 [1] : vector<256x256xf32> to vector<256xf32>
    %30 = vector.shape_cast %29 : vector<256xf32> to vector<256x1xf32>
    %31 = vector.broadcast %19 : vector<1x256xf32> to vector<256x256xf32>
    %32 = arith.mulf %5, %31 : vector<256x256xf32>
    %cst_13 = arith.constant dense<0.000000e+00> : vector<256xf32>
    %33 = vector.multi_reduction <add>, %32, %cst_13 [1] : vector<256x256xf32> to vector<256xf32>
    %34 = vector.shape_cast %33 : vector<256xf32> to vector<256x1xf32>
    %cst_14 = arith.constant -1.500000e+00 : f32
    %35 = vector.broadcast %cst_14 : f32 to vector<256x1xf32>
    %36 = arith.cmpf olt, %30, %35 : vector<256x1xf32>
    %cst_15 = arith.constant -1.500000e+00 : f32
    %37 = vector.broadcast %cst_15 : f32 to vector<256x1xf32>
    %38 = arith.cmpf olt, %34, %37 : vector<256x1xf32>
    %cst_16 = arith.constant 1.000000e+30 : f32
    %39 = vector.shape_cast %36 : vector<256x1xi1> to vector<256x1xi1>
    %40 = vector.broadcast %39 : vector<256x1xi1> to vector<256x256xi1>
    %41 = vector.broadcast %cst_16 : f32 to vector<256x256xf32>
    %42 = arith.select %40, %4, %41 : vector<256x256xi1>, vector<256x256xf32>
    %cst_17 = arith.constant dense<0x7F800000> : vector<256xf32>
    %43 = vector.multi_reduction <minimumf>, %42, %cst_17 [0] : vector<256x256xf32> to vector<256xf32>
    %44 = vector.shape_cast %43 : vector<256xf32> to vector<1x256xf32>
    %cst_18 = arith.constant 1.000000e+30 : f32
    %45 = vector.shape_cast %38 : vector<256x1xi1> to vector<256x1xi1>
    %46 = vector.broadcast %45 : vector<256x1xi1> to vector<256x256xi1>
    %47 = vector.broadcast %cst_18 : f32 to vector<256x256xf32>
    %48 = arith.select %46, %4, %47 : vector<256x256xi1>, vector<256x256xf32>
    %cst_19 = arith.constant dense<0x7F800000> : vector<256xf32>
    %49 = vector.multi_reduction <minimumf>, %48, %cst_19 [0] : vector<256x256xf32> to vector<256xf32>
    %50 = vector.shape_cast %49 : vector<256xf32> to vector<1x256xf32>
    %51 = math.sqrt %44 : vector<1x256xf32>
    %52 = arith.mulf %23, %51 : vector<1x256xf32>
    %cst_20 = arith.constant dense<0.000000e+00> : vector<1xf32>
    %53 = vector.multi_reduction <add>, %52, %cst_20 [1] : vector<1x256xf32> to vector<1xf32>
    %54 = vector.shape_cast %53 : vector<1xf32> to vector<1x1xf32>
    %55 = math.sqrt %50 : vector<1x256xf32>
    %56 = arith.mulf %26, %55 : vector<1x256xf32>
    %cst_21 = arith.constant dense<0.000000e+00> : vector<1xf32>
    %57 = vector.multi_reduction <add>, %56, %cst_21 [1] : vector<1x256xf32> to vector<1xf32>
    %58 = vector.shape_cast %57 : vector<1xf32> to vector<1x1xf32>
    %cst_22 = arith.constant dense<0.000000e+00> : vector<1xf32>
    %59 = vector.multi_reduction <add>, %19, %cst_22 [1] : vector<1x256xf32> to vector<1xf32>
    %60 = vector.shape_cast %59 : vector<1xf32> to vector<1x1xf32>
    %cst_23 = arith.constant dense<0.000000e+00> : vector<1xf32>
    %61 = vector.multi_reduction <add>, %20, %cst_23 [1] : vector<1x256xf32> to vector<1xf32>
    %62 = vector.shape_cast %61 : vector<1xf32> to vector<1x1xf32>
    %cst_24 = arith.constant dense<0.000000e+00> : vector<1xf32>
    %63 = vector.multi_reduction <add>, %23, %cst_24 [1] : vector<1x256xf32> to vector<1xf32>
    %64 = vector.shape_cast %63 : vector<1xf32> to vector<1x1xf32>
    %65 = arith.extui %36 : vector<256x1xi1> to vector<256x1xi32>
    %66 = arith.sitofp %65 : vector<256x1xi32> to vector<256x1xf32>
    %cst_25 = arith.constant dense<0.000000e+00> : vector<1xf32>
    %67 = vector.multi_reduction <add>, %66, %cst_25 [0] : vector<256x1xf32> to vector<1xf32>
    %68 = vector.shape_cast %67 : vector<1xf32> to vector<1x1xf32>
    %cst_26 = arith.constant dense<0.000000e+00> : vector<1xf32>
    %69 = vector.multi_reduction <add>, %26, %cst_26 [1] : vector<1x256xf32> to vector<1xf32>
    %70 = vector.shape_cast %69 : vector<1xf32> to vector<1x1xf32>
    %71 = arith.extui %38 : vector<256x1xi1> to vector<256x1xi32>
    %72 = arith.sitofp %71 : vector<256x1xi32> to vector<256x1xf32>
    %cst_27 = arith.constant dense<0.000000e+00> : vector<1xf32>
    %73 = vector.multi_reduction <add>, %72, %cst_27 [0] : vector<256x1xf32> to vector<1xf32>
    %74 = vector.shape_cast %73 : vector<1xf32> to vector<1x1xf32>
    %cst_28 = arith.constant 0.000000e+00 : f32
    %75 = vector.broadcast %cst_28 : f32 to vector<1x128xf32>
    %c0_i32_29 = arith.constant 0 : i32
    %76 = vector.broadcast %c0_i32_29 : i32 to vector<1x128xi32>
    %77 = arith.cmpi eq, %15, %76 : vector<1x128xi32>
    %78 = vector.shape_cast %54 : vector<1x1xf32> to vector<1x1xf32>
    %79 = vector.broadcast %78 : vector<1x1xf32> to vector<1x128xf32>
    %80 = arith.select %77, %79, %75 : vector<1x128xi1>, vector<1x128xf32>
    %c1_i32 = arith.constant 1 : i32
    %81 = vector.broadcast %c1_i32 : i32 to vector<1x128xi32>
    %82 = arith.cmpi eq, %15, %81 : vector<1x128xi32>
    %83 = vector.shape_cast %58 : vector<1x1xf32> to vector<1x1xf32>
    %84 = vector.broadcast %83 : vector<1x1xf32> to vector<1x128xf32>
    %85 = arith.select %82, %84, %80 : vector<1x128xi1>, vector<1x128xf32>
    %c2_i32 = arith.constant 2 : i32
    %86 = vector.broadcast %c2_i32 : i32 to vector<1x128xi32>
    %87 = arith.cmpi eq, %15, %86 : vector<1x128xi32>
    %88 = vector.shape_cast %60 : vector<1x1xf32> to vector<1x1xf32>
    %89 = vector.broadcast %88 : vector<1x1xf32> to vector<1x128xf32>
    %90 = arith.select %87, %89, %85 : vector<1x128xi1>, vector<1x128xf32>
    %c3_i32 = arith.constant 3 : i32
    %91 = vector.broadcast %c3_i32 : i32 to vector<1x128xi32>
    %92 = arith.cmpi eq, %15, %91 : vector<1x128xi32>
    %93 = vector.shape_cast %62 : vector<1x1xf32> to vector<1x1xf32>
    %94 = vector.broadcast %93 : vector<1x1xf32> to vector<1x128xf32>
    %95 = arith.select %92, %94, %90 : vector<1x128xi1>, vector<1x128xf32>
    %c4_i32_30 = arith.constant 4 : i32
    %96 = vector.broadcast %c4_i32_30 : i32 to vector<1x128xi32>
    %97 = arith.cmpi eq, %15, %96 : vector<1x128xi32>
    %98 = vector.shape_cast %64 : vector<1x1xf32> to vector<1x1xf32>
    %99 = vector.broadcast %98 : vector<1x1xf32> to vector<1x128xf32>
    %100 = arith.select %97, %99, %95 : vector<1x128xi1>, vector<1x128xf32>
    %c5_i32 = arith.constant 5 : i32
    %101 = vector.broadcast %c5_i32 : i32 to vector<1x128xi32>
    %102 = arith.cmpi eq, %15, %101 : vector<1x128xi32>
    %103 = vector.shape_cast %68 : vector<1x1xf32> to vector<1x1xf32>
    %104 = vector.broadcast %103 : vector<1x1xf32> to vector<1x128xf32>
    %105 = arith.select %102, %104, %100 : vector<1x128xi1>, vector<1x128xf32>
    %c6_i32 = arith.constant 6 : i32
    %106 = vector.broadcast %c6_i32 : i32 to vector<1x128xi32>
    %107 = arith.cmpi eq, %15, %106 : vector<1x128xi32>
    %108 = vector.shape_cast %70 : vector<1x1xf32> to vector<1x1xf32>
    %109 = vector.broadcast %108 : vector<1x1xf32> to vector<1x128xf32>
    %110 = arith.select %107, %109, %105 : vector<1x128xi1>, vector<1x128xf32>
    %c7_i32 = arith.constant 7 : i32
    %111 = vector.broadcast %c7_i32 : i32 to vector<1x128xi32>
    %112 = arith.cmpi eq, %15, %111 : vector<1x128xi32>
    %113 = vector.shape_cast %74 : vector<1x1xf32> to vector<1x1xf32>
    %114 = vector.broadcast %113 : vector<1x1xf32> to vector<1x128xf32>
    %115 = arith.select %112, %114, %110 : vector<1x128xi1>, vector<1x128xf32>
    %c1_i32_31 = arith.constant 1 : i32
    %116 = vector.broadcast %c1_i32_31 : i32 to vector<1x256xi32>
    %117 = arith.cmpi eq, %14, %116 : vector<1x256xi32>
    %118 = arith.extui %117 : vector<1x256xi1> to vector<1x256xi32>
    %119 = arith.sitofp %118 : vector<1x256xi32> to vector<1x256xf32>
    %120 = vector.extract_strided_slice %3 {offsets = [1, 0], sizes = [1, 256], strides = [1, 1]} : vector<4x256xf32> to vector<1x256xf32>
    %cst_32 = arith.constant 1.000000e+00 : f32
    %121 = vector.broadcast %cst_32 : f32 to vector<1x256xf32>
    %122 = arith.subf %121, %120 : vector<1x256xf32>
    %123 = arith.mulf %119, %122 : vector<1x256xf32>
    %cst_33 = arith.constant 1.000000e+00 : f32
    %124 = vector.broadcast %cst_33 : f32 to vector<1x256xf32>
    %125 = arith.subf %124, %119 : vector<1x256xf32>
    %126 = arith.mulf %120, %125 : vector<1x256xf32>
    %127 = vector.broadcast %120 : vector<1x256xf32> to vector<256x256xf32>
    %128 = arith.mulf %5, %127 : vector<256x256xf32>
    %cst_34 = arith.constant dense<0.000000e+00> : vector<256xf32>
    %129 = vector.multi_reduction <add>, %128, %cst_34 [1] : vector<256x256xf32> to vector<256xf32>
    %130 = vector.shape_cast %129 : vector<256xf32> to vector<256x1xf32>
    %131 = vector.broadcast %119 : vector<1x256xf32> to vector<256x256xf32>
    %132 = arith.mulf %5, %131 : vector<256x256xf32>
    %cst_35 = arith.constant dense<0.000000e+00> : vector<256xf32>
    %133 = vector.multi_reduction <add>, %132, %cst_35 [1] : vector<256x256xf32> to vector<256xf32>
    %134 = vector.shape_cast %133 : vector<256xf32> to vector<256x1xf32>
    %cst_36 = arith.constant -1.500000e+00 : f32
    %135 = vector.broadcast %cst_36 : f32 to vector<256x1xf32>
    %136 = arith.cmpf olt, %130, %135 : vector<256x1xf32>
    %cst_37 = arith.constant -1.500000e+00 : f32
    %137 = vector.broadcast %cst_37 : f32 to vector<256x1xf32>
    %138 = arith.cmpf olt, %134, %137 : vector<256x1xf32>
    %cst_38 = arith.constant 1.000000e+30 : f32
    %139 = vector.shape_cast %136 : vector<256x1xi1> to vector<256x1xi1>
    %140 = vector.broadcast %139 : vector<256x1xi1> to vector<256x256xi1>
    %141 = vector.broadcast %cst_38 : f32 to vector<256x256xf32>
    %142 = arith.select %140, %4, %141 : vector<256x256xi1>, vector<256x256xf32>
    %cst_39 = arith.constant dense<0x7F800000> : vector<256xf32>
    %143 = vector.multi_reduction <minimumf>, %142, %cst_39 [0] : vector<256x256xf32> to vector<256xf32>
    %144 = vector.shape_cast %143 : vector<256xf32> to vector<1x256xf32>
    %cst_40 = arith.constant 1.000000e+30 : f32
    %145 = vector.shape_cast %138 : vector<256x1xi1> to vector<256x1xi1>
    %146 = vector.broadcast %145 : vector<256x1xi1> to vector<256x256xi1>
    %147 = vector.broadcast %cst_40 : f32 to vector<256x256xf32>
    %148 = arith.select %146, %4, %147 : vector<256x256xi1>, vector<256x256xf32>
    %cst_41 = arith.constant dense<0x7F800000> : vector<256xf32>
    %149 = vector.multi_reduction <minimumf>, %148, %cst_41 [0] : vector<256x256xf32> to vector<256xf32>
    %150 = vector.shape_cast %149 : vector<256xf32> to vector<1x256xf32>
    %151 = math.sqrt %144 : vector<1x256xf32>
    %152 = arith.mulf %123, %151 : vector<1x256xf32>
    %cst_42 = arith.constant dense<0.000000e+00> : vector<1xf32>
    %153 = vector.multi_reduction <add>, %152, %cst_42 [1] : vector<1x256xf32> to vector<1xf32>
    %154 = vector.shape_cast %153 : vector<1xf32> to vector<1x1xf32>
    %155 = math.sqrt %150 : vector<1x256xf32>
    %156 = arith.mulf %126, %155 : vector<1x256xf32>
    %cst_43 = arith.constant dense<0.000000e+00> : vector<1xf32>
    %157 = vector.multi_reduction <add>, %156, %cst_43 [1] : vector<1x256xf32> to vector<1xf32>
    %158 = vector.shape_cast %157 : vector<1xf32> to vector<1x1xf32>
    %cst_44 = arith.constant dense<0.000000e+00> : vector<1xf32>
    %159 = vector.multi_reduction <add>, %119, %cst_44 [1] : vector<1x256xf32> to vector<1xf32>
    %160 = vector.shape_cast %159 : vector<1xf32> to vector<1x1xf32>
    %cst_45 = arith.constant dense<0.000000e+00> : vector<1xf32>
    %161 = vector.multi_reduction <add>, %120, %cst_45 [1] : vector<1x256xf32> to vector<1xf32>
    %162 = vector.shape_cast %161 : vector<1xf32> to vector<1x1xf32>
    %cst_46 = arith.constant dense<0.000000e+00> : vector<1xf32>
    %163 = vector.multi_reduction <add>, %123, %cst_46 [1] : vector<1x256xf32> to vector<1xf32>
    %164 = vector.shape_cast %163 : vector<1xf32> to vector<1x1xf32>
    %165 = arith.extui %136 : vector<256x1xi1> to vector<256x1xi32>
    %166 = arith.sitofp %165 : vector<256x1xi32> to vector<256x1xf32>
    %cst_47 = arith.constant dense<0.000000e+00> : vector<1xf32>
    %167 = vector.multi_reduction <add>, %166, %cst_47 [0] : vector<256x1xf32> to vector<1xf32>
    %168 = vector.shape_cast %167 : vector<1xf32> to vector<1x1xf32>
    %cst_48 = arith.constant dense<0.000000e+00> : vector<1xf32>
    %169 = vector.multi_reduction <add>, %126, %cst_48 [1] : vector<1x256xf32> to vector<1xf32>
    %170 = vector.shape_cast %169 : vector<1xf32> to vector<1x1xf32>
    %171 = arith.extui %138 : vector<256x1xi1> to vector<256x1xi32>
    %172 = arith.sitofp %171 : vector<256x1xi32> to vector<256x1xf32>
    %cst_49 = arith.constant dense<0.000000e+00> : vector<1xf32>
    %173 = vector.multi_reduction <add>, %172, %cst_49 [0] : vector<256x1xf32> to vector<1xf32>
    %174 = vector.shape_cast %173 : vector<1xf32> to vector<1x1xf32>
    %cst_50 = arith.constant 0.000000e+00 : f32
    %175 = vector.broadcast %cst_50 : f32 to vector<1x128xf32>
    %c0_i32_51 = arith.constant 0 : i32
    %176 = vector.broadcast %c0_i32_51 : i32 to vector<1x128xi32>
    %177 = arith.cmpi eq, %15, %176 : vector<1x128xi32>
    %178 = vector.shape_cast %154 : vector<1x1xf32> to vector<1x1xf32>
    %179 = vector.broadcast %178 : vector<1x1xf32> to vector<1x128xf32>
    %180 = arith.select %177, %179, %175 : vector<1x128xi1>, vector<1x128xf32>
    %c1_i32_52 = arith.constant 1 : i32
    %181 = vector.broadcast %c1_i32_52 : i32 to vector<1x128xi32>
    %182 = arith.cmpi eq, %15, %181 : vector<1x128xi32>
    %183 = vector.shape_cast %158 : vector<1x1xf32> to vector<1x1xf32>
    %184 = vector.broadcast %183 : vector<1x1xf32> to vector<1x128xf32>
    %185 = arith.select %182, %184, %180 : vector<1x128xi1>, vector<1x128xf32>
    %c2_i32_53 = arith.constant 2 : i32
    %186 = vector.broadcast %c2_i32_53 : i32 to vector<1x128xi32>
    %187 = arith.cmpi eq, %15, %186 : vector<1x128xi32>
    %188 = vector.shape_cast %160 : vector<1x1xf32> to vector<1x1xf32>
    %189 = vector.broadcast %188 : vector<1x1xf32> to vector<1x128xf32>
    %190 = arith.select %187, %189, %185 : vector<1x128xi1>, vector<1x128xf32>
    %c3_i32_54 = arith.constant 3 : i32
    %191 = vector.broadcast %c3_i32_54 : i32 to vector<1x128xi32>
    %192 = arith.cmpi eq, %15, %191 : vector<1x128xi32>
    %193 = vector.shape_cast %162 : vector<1x1xf32> to vector<1x1xf32>
    %194 = vector.broadcast %193 : vector<1x1xf32> to vector<1x128xf32>
    %195 = arith.select %192, %194, %190 : vector<1x128xi1>, vector<1x128xf32>
    %c4_i32_55 = arith.constant 4 : i32
    %196 = vector.broadcast %c4_i32_55 : i32 to vector<1x128xi32>
    %197 = arith.cmpi eq, %15, %196 : vector<1x128xi32>
    %198 = vector.shape_cast %164 : vector<1x1xf32> to vector<1x1xf32>
    %199 = vector.broadcast %198 : vector<1x1xf32> to vector<1x128xf32>
    %200 = arith.select %197, %199, %195 : vector<1x128xi1>, vector<1x128xf32>
    %c5_i32_56 = arith.constant 5 : i32
    %201 = vector.broadcast %c5_i32_56 : i32 to vector<1x128xi32>
    %202 = arith.cmpi eq, %15, %201 : vector<1x128xi32>
    %203 = vector.shape_cast %168 : vector<1x1xf32> to vector<1x1xf32>
    %204 = vector.broadcast %203 : vector<1x1xf32> to vector<1x128xf32>
    %205 = arith.select %202, %204, %200 : vector<1x128xi1>, vector<1x128xf32>
    %c6_i32_57 = arith.constant 6 : i32
    %206 = vector.broadcast %c6_i32_57 : i32 to vector<1x128xi32>
    %207 = arith.cmpi eq, %15, %206 : vector<1x128xi32>
    %208 = vector.shape_cast %170 : vector<1x1xf32> to vector<1x1xf32>
    %209 = vector.broadcast %208 : vector<1x1xf32> to vector<1x128xf32>
    %210 = arith.select %207, %209, %205 : vector<1x128xi1>, vector<1x128xf32>
    %c7_i32_58 = arith.constant 7 : i32
    %211 = vector.broadcast %c7_i32_58 : i32 to vector<1x128xi32>
    %212 = arith.cmpi eq, %15, %211 : vector<1x128xi32>
    %213 = vector.shape_cast %174 : vector<1x1xf32> to vector<1x1xf32>
    %214 = vector.broadcast %213 : vector<1x1xf32> to vector<1x128xf32>
    %215 = arith.select %212, %214, %210 : vector<1x128xi1>, vector<1x128xf32>
    %c2_i32_59 = arith.constant 2 : i32
    %216 = vector.broadcast %c2_i32_59 : i32 to vector<1x256xi32>
    %217 = arith.cmpi eq, %14, %216 : vector<1x256xi32>
    %218 = arith.extui %217 : vector<1x256xi1> to vector<1x256xi32>
    %219 = arith.sitofp %218 : vector<1x256xi32> to vector<1x256xf32>
    %220 = vector.extract_strided_slice %3 {offsets = [2, 0], sizes = [1, 256], strides = [1, 1]} : vector<4x256xf32> to vector<1x256xf32>
    %cst_60 = arith.constant 1.000000e+00 : f32
    %221 = vector.broadcast %cst_60 : f32 to vector<1x256xf32>
    %222 = arith.subf %221, %220 : vector<1x256xf32>
    %223 = arith.mulf %219, %222 : vector<1x256xf32>
    %cst_61 = arith.constant 1.000000e+00 : f32
    %224 = vector.broadcast %cst_61 : f32 to vector<1x256xf32>
    %225 = arith.subf %224, %219 : vector<1x256xf32>
    %226 = arith.mulf %220, %225 : vector<1x256xf32>
    %227 = vector.broadcast %220 : vector<1x256xf32> to vector<256x256xf32>
    %228 = arith.mulf %5, %227 : vector<256x256xf32>
    %cst_62 = arith.constant dense<0.000000e+00> : vector<256xf32>
    %229 = vector.multi_reduction <add>, %228, %cst_62 [1] : vector<256x256xf32> to vector<256xf32>
    %230 = vector.shape_cast %229 : vector<256xf32> to vector<256x1xf32>
    %231 = vector.broadcast %219 : vector<1x256xf32> to vector<256x256xf32>
    %232 = arith.mulf %5, %231 : vector<256x256xf32>
    %cst_63 = arith.constant dense<0.000000e+00> : vector<256xf32>
    %233 = vector.multi_reduction <add>, %232, %cst_63 [1] : vector<256x256xf32> to vector<256xf32>
    %234 = vector.shape_cast %233 : vector<256xf32> to vector<256x1xf32>
    %cst_64 = arith.constant -1.500000e+00 : f32
    %235 = vector.broadcast %cst_64 : f32 to vector<256x1xf32>
    %236 = arith.cmpf olt, %230, %235 : vector<256x1xf32>
    %cst_65 = arith.constant -1.500000e+00 : f32
    %237 = vector.broadcast %cst_65 : f32 to vector<256x1xf32>
    %238 = arith.cmpf olt, %234, %237 : vector<256x1xf32>
    %cst_66 = arith.constant 1.000000e+30 : f32
    %239 = vector.shape_cast %236 : vector<256x1xi1> to vector<256x1xi1>
    %240 = vector.broadcast %239 : vector<256x1xi1> to vector<256x256xi1>
    %241 = vector.broadcast %cst_66 : f32 to vector<256x256xf32>
    %242 = arith.select %240, %4, %241 : vector<256x256xi1>, vector<256x256xf32>
    %cst_67 = arith.constant dense<0x7F800000> : vector<256xf32>
    %243 = vector.multi_reduction <minimumf>, %242, %cst_67 [0] : vector<256x256xf32> to vector<256xf32>
    %244 = vector.shape_cast %243 : vector<256xf32> to vector<1x256xf32>
    %cst_68 = arith.constant 1.000000e+30 : f32
    %245 = vector.shape_cast %238 : vector<256x1xi1> to vector<256x1xi1>
    %246 = vector.broadcast %245 : vector<256x1xi1> to vector<256x256xi1>
    %247 = vector.broadcast %cst_68 : f32 to vector<256x256xf32>
    %248 = arith.select %246, %4, %247 : vector<256x256xi1>, vector<256x256xf32>
    %cst_69 = arith.constant dense<0x7F800000> : vector<256xf32>
    %249 = vector.multi_reduction <minimumf>, %248, %cst_69 [0] : vector<256x256xf32> to vector<256xf32>
    %250 = vector.shape_cast %249 : vector<256xf32> to vector<1x256xf32>
    %251 = math.sqrt %244 : vector<1x256xf32>
    %252 = arith.mulf %223, %251 : vector<1x256xf32>
    %cst_70 = arith.constant dense<0.000000e+00> : vector<1xf32>
    %253 = vector.multi_reduction <add>, %252, %cst_70 [1] : vector<1x256xf32> to vector<1xf32>
    %254 = vector.shape_cast %253 : vector<1xf32> to vector<1x1xf32>
    %255 = math.sqrt %250 : vector<1x256xf32>
    %256 = arith.mulf %226, %255 : vector<1x256xf32>
    %cst_71 = arith.constant dense<0.000000e+00> : vector<1xf32>
    %257 = vector.multi_reduction <add>, %256, %cst_71 [1] : vector<1x256xf32> to vector<1xf32>
    %258 = vector.shape_cast %257 : vector<1xf32> to vector<1x1xf32>
    %cst_72 = arith.constant dense<0.000000e+00> : vector<1xf32>
    %259 = vector.multi_reduction <add>, %219, %cst_72 [1] : vector<1x256xf32> to vector<1xf32>
    %260 = vector.shape_cast %259 : vector<1xf32> to vector<1x1xf32>
    %cst_73 = arith.constant dense<0.000000e+00> : vector<1xf32>
    %261 = vector.multi_reduction <add>, %220, %cst_73 [1] : vector<1x256xf32> to vector<1xf32>
    %262 = vector.shape_cast %261 : vector<1xf32> to vector<1x1xf32>
    %cst_74 = arith.constant dense<0.000000e+00> : vector<1xf32>
    %263 = vector.multi_reduction <add>, %223, %cst_74 [1] : vector<1x256xf32> to vector<1xf32>
    %264 = vector.shape_cast %263 : vector<1xf32> to vector<1x1xf32>
    %265 = arith.extui %236 : vector<256x1xi1> to vector<256x1xi32>
    %266 = arith.sitofp %265 : vector<256x1xi32> to vector<256x1xf32>
    %cst_75 = arith.constant dense<0.000000e+00> : vector<1xf32>
    %267 = vector.multi_reduction <add>, %266, %cst_75 [0] : vector<256x1xf32> to vector<1xf32>
    %268 = vector.shape_cast %267 : vector<1xf32> to vector<1x1xf32>
    %cst_76 = arith.constant dense<0.000000e+00> : vector<1xf32>
    %269 = vector.multi_reduction <add>, %226, %cst_76 [1] : vector<1x256xf32> to vector<1xf32>
    %270 = vector.shape_cast %269 : vector<1xf32> to vector<1x1xf32>
    %271 = arith.extui %238 : vector<256x1xi1> to vector<256x1xi32>
    %272 = arith.sitofp %271 : vector<256x1xi32> to vector<256x1xf32>
    %cst_77 = arith.constant dense<0.000000e+00> : vector<1xf32>
    %273 = vector.multi_reduction <add>, %272, %cst_77 [0] : vector<256x1xf32> to vector<1xf32>
    %274 = vector.shape_cast %273 : vector<1xf32> to vector<1x1xf32>
    %cst_78 = arith.constant 0.000000e+00 : f32
    %275 = vector.broadcast %cst_78 : f32 to vector<1x128xf32>
    %c0_i32_79 = arith.constant 0 : i32
    %276 = vector.broadcast %c0_i32_79 : i32 to vector<1x128xi32>
    %277 = arith.cmpi eq, %15, %276 : vector<1x128xi32>
    %278 = vector.shape_cast %254 : vector<1x1xf32> to vector<1x1xf32>
    %279 = vector.broadcast %278 : vector<1x1xf32> to vector<1x128xf32>
    %280 = arith.select %277, %279, %275 : vector<1x128xi1>, vector<1x128xf32>
    %c1_i32_80 = arith.constant 1 : i32
    %281 = vector.broadcast %c1_i32_80 : i32 to vector<1x128xi32>
    %282 = arith.cmpi eq, %15, %281 : vector<1x128xi32>
    %283 = vector.shape_cast %258 : vector<1x1xf32> to vector<1x1xf32>
    %284 = vector.broadcast %283 : vector<1x1xf32> to vector<1x128xf32>
    %285 = arith.select %282, %284, %280 : vector<1x128xi1>, vector<1x128xf32>
    %c2_i32_81 = arith.constant 2 : i32
    %286 = vector.broadcast %c2_i32_81 : i32 to vector<1x128xi32>
    %287 = arith.cmpi eq, %15, %286 : vector<1x128xi32>
    %288 = vector.shape_cast %260 : vector<1x1xf32> to vector<1x1xf32>
    %289 = vector.broadcast %288 : vector<1x1xf32> to vector<1x128xf32>
    %290 = arith.select %287, %289, %285 : vector<1x128xi1>, vector<1x128xf32>
    %c3_i32_82 = arith.constant 3 : i32
    %291 = vector.broadcast %c3_i32_82 : i32 to vector<1x128xi32>
    %292 = arith.cmpi eq, %15, %291 : vector<1x128xi32>
    %293 = vector.shape_cast %262 : vector<1x1xf32> to vector<1x1xf32>
    %294 = vector.broadcast %293 : vector<1x1xf32> to vector<1x128xf32>
    %295 = arith.select %292, %294, %290 : vector<1x128xi1>, vector<1x128xf32>
    %c4_i32_83 = arith.constant 4 : i32
    %296 = vector.broadcast %c4_i32_83 : i32 to vector<1x128xi32>
    %297 = arith.cmpi eq, %15, %296 : vector<1x128xi32>
    %298 = vector.shape_cast %264 : vector<1x1xf32> to vector<1x1xf32>
    %299 = vector.broadcast %298 : vector<1x1xf32> to vector<1x128xf32>
    %300 = arith.select %297, %299, %295 : vector<1x128xi1>, vector<1x128xf32>
    %c5_i32_84 = arith.constant 5 : i32
    %301 = vector.broadcast %c5_i32_84 : i32 to vector<1x128xi32>
    %302 = arith.cmpi eq, %15, %301 : vector<1x128xi32>
    %303 = vector.shape_cast %268 : vector<1x1xf32> to vector<1x1xf32>
    %304 = vector.broadcast %303 : vector<1x1xf32> to vector<1x128xf32>
    %305 = arith.select %302, %304, %300 : vector<1x128xi1>, vector<1x128xf32>
    %c6_i32_85 = arith.constant 6 : i32
    %306 = vector.broadcast %c6_i32_85 : i32 to vector<1x128xi32>
    %307 = arith.cmpi eq, %15, %306 : vector<1x128xi32>
    %308 = vector.shape_cast %270 : vector<1x1xf32> to vector<1x1xf32>
    %309 = vector.broadcast %308 : vector<1x1xf32> to vector<1x128xf32>
    %310 = arith.select %307, %309, %305 : vector<1x128xi1>, vector<1x128xf32>
    %c7_i32_86 = arith.constant 7 : i32
    %311 = vector.broadcast %c7_i32_86 : i32 to vector<1x128xi32>
    %312 = arith.cmpi eq, %15, %311 : vector<1x128xi32>
    %313 = vector.shape_cast %274 : vector<1x1xf32> to vector<1x1xf32>
    %314 = vector.broadcast %313 : vector<1x1xf32> to vector<1x128xf32>
    %315 = arith.select %312, %314, %310 : vector<1x128xi1>, vector<1x128xf32>
    %c3_i32_87 = arith.constant 3 : i32
    %316 = vector.broadcast %c3_i32_87 : i32 to vector<1x256xi32>
    %317 = arith.cmpi eq, %14, %316 : vector<1x256xi32>
    %318 = arith.extui %317 : vector<1x256xi1> to vector<1x256xi32>
    %319 = arith.sitofp %318 : vector<1x256xi32> to vector<1x256xf32>
    %320 = vector.extract_strided_slice %3 {offsets = [3, 0], sizes = [1, 256], strides = [1, 1]} : vector<4x256xf32> to vector<1x256xf32>
    %cst_88 = arith.constant 1.000000e+00 : f32
    %321 = vector.broadcast %cst_88 : f32 to vector<1x256xf32>
    %322 = arith.subf %321, %320 : vector<1x256xf32>
    %323 = arith.mulf %319, %322 : vector<1x256xf32>
    %cst_89 = arith.constant 1.000000e+00 : f32
    %324 = vector.broadcast %cst_89 : f32 to vector<1x256xf32>
    %325 = arith.subf %324, %319 : vector<1x256xf32>
    %326 = arith.mulf %320, %325 : vector<1x256xf32>
    %327 = vector.broadcast %320 : vector<1x256xf32> to vector<256x256xf32>
    %328 = arith.mulf %5, %327 : vector<256x256xf32>
    %cst_90 = arith.constant dense<0.000000e+00> : vector<256xf32>
    %329 = vector.multi_reduction <add>, %328, %cst_90 [1] : vector<256x256xf32> to vector<256xf32>
    %330 = vector.shape_cast %329 : vector<256xf32> to vector<256x1xf32>
    %331 = vector.broadcast %319 : vector<1x256xf32> to vector<256x256xf32>
    %332 = arith.mulf %5, %331 : vector<256x256xf32>
    %cst_91 = arith.constant dense<0.000000e+00> : vector<256xf32>
    %333 = vector.multi_reduction <add>, %332, %cst_91 [1] : vector<256x256xf32> to vector<256xf32>
    %334 = vector.shape_cast %333 : vector<256xf32> to vector<256x1xf32>
    %cst_92 = arith.constant -1.500000e+00 : f32
    %335 = vector.broadcast %cst_92 : f32 to vector<256x1xf32>
    %336 = arith.cmpf olt, %330, %335 : vector<256x1xf32>
    %cst_93 = arith.constant -1.500000e+00 : f32
    %337 = vector.broadcast %cst_93 : f32 to vector<256x1xf32>
    %338 = arith.cmpf olt, %334, %337 : vector<256x1xf32>
    %cst_94 = arith.constant 1.000000e+30 : f32
    %339 = vector.shape_cast %336 : vector<256x1xi1> to vector<256x1xi1>
    %340 = vector.broadcast %339 : vector<256x1xi1> to vector<256x256xi1>
    %341 = vector.broadcast %cst_94 : f32 to vector<256x256xf32>
    %342 = arith.select %340, %4, %341 : vector<256x256xi1>, vector<256x256xf32>
    %cst_95 = arith.constant dense<0x7F800000> : vector<256xf32>
    %343 = vector.multi_reduction <minimumf>, %342, %cst_95 [0] : vector<256x256xf32> to vector<256xf32>
    %344 = vector.shape_cast %343 : vector<256xf32> to vector<1x256xf32>
    %cst_96 = arith.constant 1.000000e+30 : f32
    %345 = vector.shape_cast %338 : vector<256x1xi1> to vector<256x1xi1>
    %346 = vector.broadcast %345 : vector<256x1xi1> to vector<256x256xi1>
    %347 = vector.broadcast %cst_96 : f32 to vector<256x256xf32>
    %348 = arith.select %346, %4, %347 : vector<256x256xi1>, vector<256x256xf32>
    %cst_97 = arith.constant dense<0x7F800000> : vector<256xf32>
    %349 = vector.multi_reduction <minimumf>, %348, %cst_97 [0] : vector<256x256xf32> to vector<256xf32>
    %350 = vector.shape_cast %349 : vector<256xf32> to vector<1x256xf32>
    %351 = math.sqrt %344 : vector<1x256xf32>
    %352 = arith.mulf %323, %351 : vector<1x256xf32>
    %cst_98 = arith.constant dense<0.000000e+00> : vector<1xf32>
    %353 = vector.multi_reduction <add>, %352, %cst_98 [1] : vector<1x256xf32> to vector<1xf32>
    %354 = vector.shape_cast %353 : vector<1xf32> to vector<1x1xf32>
    %355 = math.sqrt %350 : vector<1x256xf32>
    %356 = arith.mulf %326, %355 : vector<1x256xf32>
    %cst_99 = arith.constant dense<0.000000e+00> : vector<1xf32>
    %357 = vector.multi_reduction <add>, %356, %cst_99 [1] : vector<1x256xf32> to vector<1xf32>
    %358 = vector.shape_cast %357 : vector<1xf32> to vector<1x1xf32>
    %cst_100 = arith.constant dense<0.000000e+00> : vector<1xf32>
    %359 = vector.multi_reduction <add>, %319, %cst_100 [1] : vector<1x256xf32> to vector<1xf32>
    %360 = vector.shape_cast %359 : vector<1xf32> to vector<1x1xf32>
    %cst_101 = arith.constant dense<0.000000e+00> : vector<1xf32>
    %361 = vector.multi_reduction <add>, %320, %cst_101 [1] : vector<1x256xf32> to vector<1xf32>
    %362 = vector.shape_cast %361 : vector<1xf32> to vector<1x1xf32>
    %cst_102 = arith.constant dense<0.000000e+00> : vector<1xf32>
    %363 = vector.multi_reduction <add>, %323, %cst_102 [1] : vector<1x256xf32> to vector<1xf32>
    %364 = vector.shape_cast %363 : vector<1xf32> to vector<1x1xf32>
    %365 = arith.extui %336 : vector<256x1xi1> to vector<256x1xi32>
    %366 = arith.sitofp %365 : vector<256x1xi32> to vector<256x1xf32>
    %cst_103 = arith.constant dense<0.000000e+00> : vector<1xf32>
    %367 = vector.multi_reduction <add>, %366, %cst_103 [0] : vector<256x1xf32> to vector<1xf32>
    %368 = vector.shape_cast %367 : vector<1xf32> to vector<1x1xf32>
    %cst_104 = arith.constant dense<0.000000e+00> : vector<1xf32>
    %369 = vector.multi_reduction <add>, %326, %cst_104 [1] : vector<1x256xf32> to vector<1xf32>
    %370 = vector.shape_cast %369 : vector<1xf32> to vector<1x1xf32>
    %371 = arith.extui %338 : vector<256x1xi1> to vector<256x1xi32>
    %372 = arith.sitofp %371 : vector<256x1xi32> to vector<256x1xf32>
    %cst_105 = arith.constant dense<0.000000e+00> : vector<1xf32>
    %373 = vector.multi_reduction <add>, %372, %cst_105 [0] : vector<256x1xf32> to vector<1xf32>
    %374 = vector.shape_cast %373 : vector<1xf32> to vector<1x1xf32>
    %cst_106 = arith.constant 0.000000e+00 : f32
    %375 = vector.broadcast %cst_106 : f32 to vector<1x128xf32>
    %c0_i32_107 = arith.constant 0 : i32
    %376 = vector.broadcast %c0_i32_107 : i32 to vector<1x128xi32>
    %377 = arith.cmpi eq, %15, %376 : vector<1x128xi32>
    %378 = vector.shape_cast %354 : vector<1x1xf32> to vector<1x1xf32>
    %379 = vector.broadcast %378 : vector<1x1xf32> to vector<1x128xf32>
    %380 = arith.select %377, %379, %375 : vector<1x128xi1>, vector<1x128xf32>
    %c1_i32_108 = arith.constant 1 : i32
    %381 = vector.broadcast %c1_i32_108 : i32 to vector<1x128xi32>
    %382 = arith.cmpi eq, %15, %381 : vector<1x128xi32>
    %383 = vector.shape_cast %358 : vector<1x1xf32> to vector<1x1xf32>
    %384 = vector.broadcast %383 : vector<1x1xf32> to vector<1x128xf32>
    %385 = arith.select %382, %384, %380 : vector<1x128xi1>, vector<1x128xf32>
    %c2_i32_109 = arith.constant 2 : i32
    %386 = vector.broadcast %c2_i32_109 : i32 to vector<1x128xi32>
    %387 = arith.cmpi eq, %15, %386 : vector<1x128xi32>
    %388 = vector.shape_cast %360 : vector<1x1xf32> to vector<1x1xf32>
    %389 = vector.broadcast %388 : vector<1x1xf32> to vector<1x128xf32>
    %390 = arith.select %387, %389, %385 : vector<1x128xi1>, vector<1x128xf32>
    %c3_i32_110 = arith.constant 3 : i32
    %391 = vector.broadcast %c3_i32_110 : i32 to vector<1x128xi32>
    %392 = arith.cmpi eq, %15, %391 : vector<1x128xi32>
    %393 = vector.shape_cast %362 : vector<1x1xf32> to vector<1x1xf32>
    %394 = vector.broadcast %393 : vector<1x1xf32> to vector<1x128xf32>
    %395 = arith.select %392, %394, %390 : vector<1x128xi1>, vector<1x128xf32>
    %c4_i32_111 = arith.constant 4 : i32
    %396 = vector.broadcast %c4_i32_111 : i32 to vector<1x128xi32>
    %397 = arith.cmpi eq, %15, %396 : vector<1x128xi32>
    %398 = vector.shape_cast %364 : vector<1x1xf32> to vector<1x1xf32>
    %399 = vector.broadcast %398 : vector<1x1xf32> to vector<1x128xf32>
    %400 = arith.select %397, %399, %395 : vector<1x128xi1>, vector<1x128xf32>
    %c5_i32_112 = arith.constant 5 : i32
    %401 = vector.broadcast %c5_i32_112 : i32 to vector<1x128xi32>
    %402 = arith.cmpi eq, %15, %401 : vector<1x128xi32>
    %403 = vector.shape_cast %368 : vector<1x1xf32> to vector<1x1xf32>
    %404 = vector.broadcast %403 : vector<1x1xf32> to vector<1x128xf32>
    %405 = arith.select %402, %404, %400 : vector<1x128xi1>, vector<1x128xf32>
    %c6_i32_113 = arith.constant 6 : i32
    %406 = vector.broadcast %c6_i32_113 : i32 to vector<1x128xi32>
    %407 = arith.cmpi eq, %15, %406 : vector<1x128xi32>
    %408 = vector.shape_cast %370 : vector<1x1xf32> to vector<1x1xf32>
    %409 = vector.broadcast %408 : vector<1x1xf32> to vector<1x128xf32>
    %410 = arith.select %407, %409, %405 : vector<1x128xi1>, vector<1x128xf32>
    %c7_i32_114 = arith.constant 7 : i32
    %411 = vector.broadcast %c7_i32_114 : i32 to vector<1x128xi32>
    %412 = arith.cmpi eq, %15, %411 : vector<1x128xi32>
    %413 = vector.shape_cast %374 : vector<1x1xf32> to vector<1x1xf32>
    %414 = vector.broadcast %413 : vector<1x1xf32> to vector<1x128xf32>
    %415 = arith.select %412, %414, %410 : vector<1x128xi1>, vector<1x128xf32>
    %416 = tpu.concatenate %115, %215, %315, %415 in 0 : vector<1x128xf32>, vector<1x128xf32>, vector<1x128xf32>, vector<1x128xf32> -> vector<4x128xf32>
    %c0_115 = arith.constant 0 : index
    %c0_116 = arith.constant 0 : index
    %c0_117 = arith.constant 0 : index
    %417 = vector.load %arg5[%c0_115, %c0_116, %c0_117] : memref<1x4x128xf32, #tpu.memory_space<vmem>>, vector<1x4x128xf32>
    %418 = vector.shape_cast %417 : vector<1x4x128xf32> to vector<4x128xf32>
    %419 = vector.shape_cast %416 : vector<4x128xf32> to vector<1x4x128xf32>
    tpu.vector_store %arg5[%c0_115, %c0_116, %c0_117], %419 {strides = array<i32>} : memref<1x4x128xf32, #tpu.memory_space<vmem>>, vector<1x4x128xf32>,
    return
  }
  func.func @transform_0(%arg0: i32) -> (i32, i32, i32) {
    %c0_i32 = arith.constant 0 : i32
    %c0_i32_0 = arith.constant 0 : i32
    %c0_i32_1 = arith.constant 0 : i32
    return %arg0, %c0_i32, %c0_i32_0 : i32, i32, i32
  }
  func.func @transform_1(%arg0: i32) -> (i32, i32, i32) {
    %c0_i32 = arith.constant 0 : i32
    %c0_i32_0 = arith.constant 0 : i32
    %c0_i32_1 = arith.constant 0 : i32
    return %arg0, %c0_i32, %c0_i32_0 : i32, i32, i32
  }
  func.func @transform_2(%arg0: i32) -> (i32, i32) {
    %c0_i32 = arith.constant 0 : i32
    %c0_i32_0 = arith.constant 0 : i32
    %c0_i32_1 = arith.constant 0 : i32
    return %c0_i32, %c0_i32_0 : i32, i32
  }
  func.func @transform_3(%arg0: i32) -> (i32, i32) {
    %c0_i32 = arith.constant 0 : i32
    %c0_i32_0 = arith.constant 0 : i32
    %c0_i32_1 = arith.constant 0 : i32
    return %c0_i32, %c0_i32_0 : i32, i32
  }
  func.func @transform_4(%arg0: i32) -> (i32, i32, i32) {
    %c0_i32 = arith.constant 0 : i32
    %c0_i32_0 = arith.constant 0 : i32
    %c0_i32_1 = arith.constant 0 : i32
    return %arg0, %c0_i32, %c0_i32_0 : i32, i32, i32
  }
}

</mosaic_0001>

<bundles_post_ra>
// kernel: tpu_custom_call.1
= control target key start
LH: loop header
LB: loop body
LE: loop exit
PB: predicated region body
PF: predicated region fallthrough
CT: control target
= control target key end

     0   :  { %s10789_s0 = inlined_call_operand.hbm [shape: f32[2,4,256], index: 0, kind: input, shape index: {}]   ;;  %s10790_s1 = inlined_call_operand.hbm [shape: f32[2,4,256], index: 1, kind: input, shape index: {}]   ;;  %s10791_s2 = inlined_call_operand.hbm [shape: f32[256,256], index: 2, kind: input, shape index: {}]   ;;  %s10792_s3 = inlined_call_operand.hbm [shape: f32[256,256], index: 3, kind: input, shape index: {}]   ;;  %s10793_s4 = inlined_call_operand.hbm [shape: f32[2,4,128], index: 4, kind: output, shape index: {}]  }
   0x1   :  { %11149 = sst [smem:[#allocation80_spill]] %s10791_s2 }
   0x2   :  { %9 = vsyncpa [#allocation3], 0 }
   0x3   :  { %11 = vsyncpa [#allocation3 + $0x1], 0 }
   0x4   :  { %12 = vsyncpa [#allocation6], 0 }
   0x5   :  { %14 = vsyncpa [#allocation6 + $0x1], 0 }
   0x6   :  { %15 = vsyncpa [#allocation9], 0 }
   0x7   :  { %16 = vsyncpa [#allocation4], 0 }
   0x8   :  { %18 = vsyncpa [#allocation4 + $0x1], 0  ;;  %s5771_s15 = smov 0   ;;  %s5773_s16 = smov 0  }
   0x9   :  { %s5775_s17 = smov 0   ;;  %s5777_s18 = smov 0  }
   0xa LB: > { %s5792_s19 = sadd.s32 4294967295, %s5735_s18   ;;  %s4895_s20 = sadd.s32 4294967294, %s5735_s18   ;;  %s5735_s18 = sphi %s5777_s18, %s11830_s18   ;;  %s5731_s17 = sphi %s5775_s17, %s11829_s17   ;;  %s5727_s16 = sphi %s5773_s16, %s11828_s16   ;;  %s5723_s15 = sphi %s5771_s15, %s11827_s15  }
   0xb   : > { %p44_p0 = scmp.ne.s32.totalorder %s5727_s16, %s5723_s15  ;;  %p10794_p1 = scmp.eq.s32.totalorder %s5792_s19, 0 }
   0xc   : > { %p142_p3 = scmp.eq.s32.totalorder %s4895_s20, 1  ;;  %p4896_p5 = scmp.ge.s32.totalorder %s5735_s18, 1 }
   0xd   : > { %p5801_p4 = por %p10794_p1, %p44_p0  ;;  %p149_p7 = scmp.lt.s32.totalorder %s5735_s18, 3 }
   0xe   : > { %p5806_p6 = por %p142_p3, %p44_p0  ;;  %s5737_s24 = smov [#allocation7]  }
   0xf   : > { %s11150_s21 = scalar_select %p5801_p4, 1, 0 }
  0x10   : > { %s11151_s22 = scalar_select %p5806_p6, 1, 0 }
  0x11   : > { %p5811_p8 = pnand %p4896_p5, %p149_p7  ;;  %s161_s25 = sshll.u32 %s5737_s24, 4  ;;  %s162_s25 = int_to_ptr.vmem [resolvable:$true] %s161_s25 }
  0x12   : > { %s5738_s27 = smov [#allocation8]   ;;  %s5562_s29 = scalar_lea.vmem %s162_s25, 8192 }
  0x13   : > { %s11152_s23 = scalar_select %p5811_p8, 1, 0 }
  0x14   : > { %p5196_p9 = pneg %p5811_p8  ;;  %s174_s28 = sshll.u32 %s5738_s27, 4  ;;  %s175_s28 = int_to_ptr.vmem [resolvable:$true] %s174_s28 }
  0x15   : > { %p5563_p13 = scmp.ne.s32.totalorder %s162_s25, %s5562_s29  ;;  %p5570_p5 = scmp.lt.s32.totalorder %s162_s25, %s162_s25 }
  0x16   : > { %p5820_p11 = pnand %p5196_p9, %p10794_p1  ;;  %p5571_p7 = scmp.lt.s32.totalorder %s5562_s29, %s5562_s29 }
  0x18   : > { %p5553_p12 = pneg %p5820_p11  ;;  %p5572_p10 = por %p5571_p7, %p5570_p5 }
  0x1a   : > { %p5565_p0 = pnand %p5563_p13, %p5553_p12 }
  0x1c   : > { %p5566_p3 = pneg %p5565_p0 }
  0x1e   : > { %p5573_p9 = pnand %p5572_p10, %p5566_p3 }
  0x20   : > { %5576 = shalt.err (!%p5573_p9)
}
  0x21   : > { %s5739_s30 = smov 256   ;;  %s5740_s5 = smov 16  }
  0x22   : > { %s11154_s2 = sld [smem:[#allocation80_spill]]  ;;  %s5588_s8 = scalar_lea.vmem %s175_s28, 8192 }
  0x23   : > { %p5589_p1 = scmp.ne.s32.totalorder %s175_s28, %s5588_s8  ;;  %p5596_p2 = scmp.lt.s32.totalorder %s175_s28, %s175_s28 }
  0x24   : > { %p5597_p6 = scmp.lt.s32.totalorder %s5588_s8, %s5588_s8 }
  0x25   : > { %p5591_p13 = pnand %p5589_p1, %p5553_p12 }
  0x26   : > { %p5598_p5 = por %p5597_p6, %p5596_p2 }
  0x27   : > { %p5592_p0 = pneg %p5591_p13 }
  0x28   : > { %5199 = dma.hbm_to_vmem [thread:$0]  (!%p5820_p11), %s11154_s2, 8192, %s162_s25, [#allocation6], %s5739_s30, %s5739_s30, %s5740_s5  }
  0x29   : > { %p5599_p10 = pnand %p5598_p5, %p5592_p0 }
  0x2b   : > { %5602 = shalt.err (!%p5599_p10)
}
  0x2c   : > { %5202 = dma.hbm_to_vmem [thread:$0]  (!%p5820_p11), %s10792_s3, 8192, %s175_s28, [#allocation9], %s5739_s30, %s5739_s30, %s5740_s5  }
  0x2d   : > { %s5843_s11 = sadd.s32 1, %s5735_s18   ;;  %s31_s12 = sadd.s32 1, %s5731_s17 }
  0x2e   : > { %s28_s13 = ssub.s32 %s5735_s18, %s5843_s11  ;;  %p38_p1 = scmp.ne.s32.totalorder %s5731_s17, %s5727_s16 }
  0x2f   : > { %p29_p2 = scmp.eq.s32.totalorder %s28_s13, 0  ;;  %p39_p6 = scmp.eq.s32.totalorder %s5735_s18, 0 }
  0x30   : > { %p11155_p12 = scmp.eq.s32.totalorder %s5792_s19, 1  ;;  %p5216_p7 = scmp.lt.s32.totalorder %s5735_s18, 2 }
  0x31   : > { %s5859_s20 = scalar_select %p29_p2, %s5731_s17, %s31_s12  }
  0x32   : > { %p5853_p3 = por %p11155_p12, %p38_p1  ;;  %p40_p9 = por %p39_p6, %p38_p1 }
  0x33   : > { %s188_s24 = sand.u32 1, %s5731_s17   ;;  %s5180_s26 = sshll.u32 %s5735_s18, 7 }
  0x34   : > { %s11156_s14 = scalar_select %p5853_p3, 1, 0 }
  0x35   : > { %s5862_s25 = sshll.u32 %s188_s24, 3  ;;  %s5868_s29 = scalar_lea.hbm %s10789_s0, %s5180_s26 }
  0x36   : > { %s192_s30 = scalar_lea.vmem [#allocation2], %s5862_s25  ;;  %p5873_p11 = pnand %p5216_p7, %p40_p9 }
  0x37   : > { %s200_s5 = sshll.u32 %s192_s30, 4  ;;  %s5880_s9 = scalar_lea.hbm %s10790_s1, %s5180_s26  ;;  %s5871_s5 = int_to_ptr.vmem [resolvable:$true] %s200_s5 }
  0x38   : > { %s207_s10 = sand.u32 1, %s5735_s18   ;;  %s189_s12 = scalar_lea.sflag [#allocation3], %s188_s24 }
  0x39   : > { %s5603_s13 = scalar_lea.hbm %s5868_s29, 128  ;;  %p5605_p0 = pneg %p5873_p11 }
  0x3a   : > { %p5604_p13 = scmp.ne.s32.totalorder %s5868_s29, %s5603_s13  ;;  %s5608_s30 = scalar_lea.hbm %s10789_s0, 256 }
  0x3b   : > { %p5609_p1 = scmp.lt.s32.totalorder %s5868_s29, %s10789_s0  ;;  %p5610_p2 = scmp.lt.s32.totalorder %s5608_s30, %s5603_s13 }
  0x3c   : > { %p5606_p5 = pnand %p5605_p0, %p5604_p13 }
  0x3d   : > { %p5611_p6 = por %p5610_p2, %p5609_p1 }
  0x3e   : > { %p5607_p10 = pneg %p5606_p5 }
  0x40   : > { %p5612_p12 = pnand %p5611_p6, %p5607_p10 }
  0x42   : > { %5615 = shalt.err (!%p5612_p12)
}
  0x43   : > { %s5616_s24 = scalar_lea.vmem %s5871_s5, 128  ;;  %s5741_s26 = smov [#allocation2]  }
  0x44   : > { %p5617_p7 = scmp.ne.s32.totalorder %s5871_s5, %s5616_s24  ;;  %s5621_s8 = sshll.u32 %s5741_s26, 4  ;;  %s5622_s8 = int_to_ptr.vmem [resolvable:$false] %s5621_s8 }
  0x45   : > { %s5623_s27 = scalar_lea.vmem %s5622_s8, 256  ;;  %p5624_p5 = scmp.lt.s32.totalorder %s5871_s5, %s5622_s8 }
  0x46   : > { %p5619_p9 = pnand %p5617_p7, %p5605_p0  ;;  %p5625_p3 = scmp.lt.s32.totalorder %s5623_s27, %s5616_s24 }
  0x48   : > { %p5620_p13 = pneg %p5619_p9  ;;  %p5626_p4 = por %p5625_p3, %p5624_p5 }
  0x4a   : > { %p5627_p1 = pnand %p5626_p4, %p5620_p13 }
  0x4c   : > { %5630 = shalt.err (!%p5627_p1)
}
  0x4d   : > { %5206 = dma.hbm_to_vmem [thread:$0]  (!%p5873_p11), %s5868_s29, 128, %s5871_s5, %s189_s12  }
  0x4e   : > { %s211_s2 = scalar_lea.vmem [#allocation5], %s5862_s25  ;;  %s208_s28 = scalar_lea.sflag [#allocation6], %s207_s10 }
  0x4f   : > { %s219_s13 = sshll.u32 %s211_s2, 4  ;;  %s5631_s30 = scalar_lea.hbm %s5880_s9, 128  ;;  %s220_s13 = int_to_ptr.vmem [resolvable:$true] %s219_s13 }
  0x50   : > { %p5632_p3 = scmp.ne.s32.totalorder %s5880_s9, %s5631_s30  ;;  %s5636_s26 = scalar_lea.hbm %s10790_s1, 256 }
  0x51   : > { %p5637_p2 = scmp.lt.s32.totalorder %s5880_s9, %s10790_s1  ;;  %p5638_p6 = scmp.lt.s32.totalorder %s5636_s26, %s5631_s30 }
  0x52   : > { %p5634_p4 = pnand %p5632_p3, %p5605_p0 }
  0x53   : > { %p5639_p12 = por %p5638_p6, %p5637_p2 }
  0x54   : > { %p5635_p10 = pneg %p5634_p4 }
  0x56   : > { %p5640_p7 = pnand %p5639_p12, %p5635_p10 }
  0x58   : > { %5643 = shalt.err (!%p5640_p7)
}
  0x59   : > { %s5644_s25 = scalar_lea.vmem %s220_s13, 128  ;;  %s5742_s29 = smov [#allocation5]  }
  0x5a   : > { %p5645_p9 = scmp.ne.s32.totalorder %s220_s13, %s5644_s25  ;;  %s5649_s5 = sshll.u32 %s5742_s29, 4  ;;  %s5650_s5 = int_to_ptr.vmem [resolvable:$false] %s5649_s5 }
  0x5b   : > { %s5651_s10 = scalar_lea.vmem %s5650_s5, 256  ;;  %p5652_p1 = scmp.lt.s32.totalorder %s220_s13, %s5650_s5 }
  0x5c   : > { %p5647_p13 = pnand %p5645_p9, %p5605_p0  ;;  %p5653_p3 = scmp.lt.s32.totalorder %s5651_s10, %s5644_s25 }
  0x5e   : > { %p5648_p5 = pneg %p5647_p13  ;;  %p5654_p4 = por %p5653_p3, %p5652_p1 }
  0x60   : > { %p5655_p8 = pnand %p5654_p4, %p5648_p5 }
  0x62   : > { %5658 = shalt.err (!%p5655_p8)
}
  0x63   : > { %5209 = dma.hbm_to_vmem [thread:$0]  (!%p5873_p11), %s5880_s9, 128, %s220_s13, %s208_s28  }
  0x64   : > { %p11158_p10 = scmp.ne.s32.totalorder %s11152_s23, 0 }
  0x66   : > { %228 = sbr.rel (%p11158_p10) target bundleno = 1272 (0x4f8), region = 36 }
  0x6b   : > { %s5931_s12 = sand.u32 1, %s5727_s16   ;;  %p11159_p0 = scmp.ne.s32.totalorder %s11150_s21, 0 }
  0x6c   : > { %s4907_s2 = sshll.u32 %s5931_s12, 3  ;;  %s231_s30 = scalar_lea.sflag [#allocation3], %s5931_s12 }
  0x6d   : > { %s5935_s7 = scalar_lea.vmem [#allocation2], %s4907_s2 }
  0x6e   : > { %5702 = dma.done.wait (%p11159_p0), %s231_s30, 128  }
  0x6f   : > { %5704 = vsyncadd (%p11159_p0), %s231_s30, 4294967168  ;;  %s239_s6 = sand.u32 1, %s5792_s19   ;;  %s5942_s9 = scalar_lea.vmem [#allocation5], %s4907_s2 }
  0x70   : > { %s240_s23 = scalar_lea.sflag [#allocation6], %s239_s6 }
  0x71   : > { %5706 = dma.done.wait (%p11159_p0), %s240_s23, 128  }
  0x72   : > { %5708 = vsyncadd (%p11159_p0), %s240_s23, 4294967168  ;;  %p11160_p8 = scmp.eq.s32.totalorder %s5792_s19, 0 }
  0x74   : > { %5710 = dma.done.wait (%p11160_p8), [#allocation6], 8192   ;;  %p11161_p11 = pmov %p11160_p8 }
  0x75   : > { %p11162_p2 = pmov %p11160_p8 }
  0x76   : > { %5712 = vsyncadd (%p11161_p11), [#allocation6], 4294959104 }
  0x77   : > { %5714 = dma.done.wait (%p11162_p2), [#allocation9], 8192   ;;  %p11163_p6 = pmov %p11162_p2 }
  0x78   : > { %v10798_v0 = vlaneseq  ;;  %v5966_v4 = vld [vmem:[%s5942_s9] sm:$0xff]  ;;  %v5968_v5 = vld [vmem:[#allocation8 + $0x20] sm:$0xff]  ;;  %v5970_v6 = vld [vmem:[#allocation8 + $0x28] sm:$0xff]  ;;  %vm414_vm0 = vcmask 1043456   ;;  %vm11049_vm1 = vcmask 1040384   ;;  %s4911_s21 = sshll.u32 %s5931_s12, 2 }
  0x79   : > { %5716 = vsyncadd (%p11163_p6), [#allocation9], 4294959104  ;;  %11167 = vst [vmem:[#allocation19_spill] sm:$0xff] %v5966_v4  ;;  %v5980_v9 = vld [vmem:[#allocation8] sm:$0xff]  ;;  %v5982_v10 = vld [vmem:[#allocation8 + $0x8] sm:$0xff]  ;;  %s5177_s13 = sshll.u32 %s5792_s19, 6 }
  0x7a   : > { %v5957_v1 = vshrl.u32 %v10798_v0, 7  ;;  %11168 = vst [vmem:[#allocation20_spill] sm:$0xff] %v5980_v9  ;;  %11169 = vst [vmem:[#allocation21_spill] sm:$0xff] %v5982_v10  ;;  %v5984_v11 = vld [vmem:[#allocation8 + $0x30] sm:$0xff]  ;;  %v5994_v14 = vld [vmem:[#allocation8 + $0x38] sm:$0xff]  ;;  %s280_s28 = scalar_lea.vmem [#allocation10], %s4911_s21  ;;  %s10752_s27 = scalar_lea.hbm %s10793_s4, %s5177_s13 }
  0x7b   : > { %11170 = vst [vmem:[#allocation22_spill] sm:$0xff] %v5984_v11  ;;  %11171 = vst [vmem:[#allocation23_spill] sm:$0xff] %v5994_v14  ;;  %v5996_v15 = vld [vmem:[#allocation8 + $0x10] sm:$0xff]  ;;  %v5998_v16 = vld [vmem:[#allocation8 + $0x18] sm:$0xff]  ;;  %s4783_s24 = sshll.u32 %s280_s28, 4  ;;  %s4770_s19 = scalar_lea.sflag [#allocation4], %s5931_s12  ;;  %s4784_s24 = int_to_ptr.vmem [resolvable:$true] %s4783_s24 }
  0x7c   : > { %11164 = vst [vmem:[#allocation16_spill] sm:$0xff] %v5957_v1  ;;  %v5960_v2 = vsub.s32 0, %v5957_v1  ;;  %v5963_v3 = vsub.s32 4, %v5957_v1  ;;  %11172 = vst [vmem:[#allocation24_spill] sm:$0xff] %v5996_v15  ;;  %v6008_v21 = vld [vmem:[#allocation8 + $0x50] sm:$0xff]  ;;  %v6010_v22 = vld [vmem:[#allocation8 + $0x58] sm:$0xff] }
  0x7d   : > { %11173 = vst [vmem:[#allocation25_spill] sm:$0xff] %v5998_v16  ;;  %11174 = vst [vmem:[#allocation26_spill] sm:$0xff] %v6008_v21  ;;  %v6020_v27 = vld [vmem:[#allocation8 + $0x40] sm:$0xff]  ;;  %v6022_v28 = vld [vmem:[#allocation8 + $0x48] sm:$0xff]  ;;  %s5659_s25 = scalar_lea.vmem %s4784_s24, 64  ;;  %p11824_p7 = scmp.ne.s32.totalorder %s11156_s14, 0 }
  0x7e   : > { %11165 = vst [vmem:[#allocation17_spill] sm:$0xff] %v5960_v2  ;;  %11166 = vst [vmem:[#allocation18_spill] sm:$0xff] %v5963_v3  ;;  %v5974_v7 = vrot.slane %v5966_v4, %v5960_v2  ;;  %v5978_v8 = vrot.slane %v5966_v4, %v5963_v3  ;;  %v6032_v37 = vld [vmem:[#allocation8 + $0x70] sm:$0xff]  ;;  %v6034_v38 = vld [vmem:[#allocation8 + $0x78] sm:$0xff]  ;;  %p5660_p12 = scmp.ne.s32.totalorder %s4784_s24, %s5659_s25  ;;  %s5745_s29 = smov [#allocation10]  }
  0x7f   : > { %11175 = vst [vmem:[#allocation27_spill] sm:$0xff] %v6010_v22  ;;  %11176 = vst [vmem:[#allocation28_spill] sm:$0xff] %v6020_v27  ;;  %v6036_v39 = vld [vmem:[#allocation8 + $0x60] sm:$0xff]  ;;  %v6038_v40 = vld [vmem:[#allocation8 + $0x68] sm:$0xff]  ;;  %s5663_s5 = sshll.u32 %s5745_s29, 4  ;;  %s5664_s5 = int_to_ptr.vmem [resolvable:$false] %s5663_s5 }
  0x80   : > { %v5988_v12 = vrot.slane %v5974_v7, %v5960_v2  ;;  %v5992_v13 = vrot.slane %v5978_v8, %v5960_v2  ;;  %11177 = vst [vmem:[#allocation29_spill] sm:$0xff] %v6022_v28  ;;  %11178 = vst [vmem:[#allocation30_spill] sm:$0xff] %v6032_v37  ;;  %v6048_v47 = vld [vmem:[#allocation8 + $0x90] sm:$0xff]  ;;  %v6050_v48 = vld [vmem:[#allocation8 + $0x98] sm:$0xff]  ;;  %p5661_p9 = pnand %p5660_p12, %p11824_p7  ;;  %s5665_s10 = scalar_lea.vmem %s5664_s5, 128 }
  0x81   : > { %11179 = vst [vmem:[#allocation31_spill] sm:$0xff] %v6034_v38  ;;  %11180 = vst [vmem:[#allocation32_spill] sm:$0xff] %v6036_v39  ;;  %v6052_v49 = vld [vmem:[#allocation8 + $0x80] sm:$0xff]  ;;  %v6054_v50 = vld [vmem:[#allocation8 + $0x88] sm:$0xff]  ;;  %p5666_p5 = scmp.lt.s32.totalorder %s4784_s24, %s5664_s5  ;;  %p5667_p1 = scmp.lt.s32.totalorder %s5665_s10, %s5659_s25 }
  0x82   : > { %v517_v17 = vmul.f32 %v5988_v12, %v5968_v5  ;;  %v518_v18 = vmul.f32 %v5992_v13, %v5970_v6  ;;  %v513_v19 = vmul.f32 %v5988_v12, %v5980_v9  ;;  %v514_v20 = vmul.f32 %v5992_v13, %v5982_v10  ;;  %11181 = vst [vmem:[#allocation33_spill] sm:$0xff] %v6038_v40  ;;  %v6064_v57 = vld [vmem:[#allocation8 + $0xb0] sm:$0xff]  ;;  %v6066_v58 = vld [vmem:[#allocation8 + $0xb8] sm:$0xff]  ;;  %v6068_v59 = vld [vmem:[#allocation8 + $0xa0] sm:$0xff]  ;;  %p5662_p13 = pneg %p5661_p9 }
  0x83   : > { %v519_v23 = vmul.f32 %v5988_v12, %v5984_v11  ;;  %v520_v24 = vmul.f32 %v5992_v13, %v5994_v14  ;;  %v515_v25 = vmul.f32 %v5988_v12, %v5996_v15  ;;  %v516_v26 = vmul.f32 %v5992_v13, %v5998_v16  ;;  %11182 = vst [vmem:[#allocation34_spill] sm:$0xff] %v6048_v47  ;;  %v6070_v60 = vld [vmem:[#allocation8 + $0xa8] sm:$0xff]  ;;  %p5668_p3 = por %p5667_p1, %p5666_p5 }
  0x84   : > { %v583_v29 = vadd.f32 %v518_v18, %v517_v17  ;;  %v577_v30 = vadd.f32 %v514_v20, %v513_v19  ;;  %v523_v32 = vmul.f32 %v5988_v12, %v6008_v21  ;;  %v524_v33 = vmul.f32 %v5992_v13, %v6010_v22  ;;  %11183 = vst [vmem:[#allocation35_spill] sm:$0xff] %v6050_v48  ;;  %v6080_v20 = vld [vmem:[#allocation8 + $0xd0] sm:$0xff] }
  0x85   : > { %v586_v31 = vadd.f32 %v520_v24, %v519_v23  ;;  %v580_v34 = vadd.f32 %v516_v26, %v515_v25  ;;  %v521_v35 = vmul.f32 %v5988_v12, %v6020_v27  ;;  %v522_v36 = vmul.f32 %v5992_v13, %v6022_v28  ;;  %11184 = vst [vmem:[#allocation36_spill] sm:$0xff] %v6070_v60  ;;  %v6082_v23 = vld [vmem:[#allocation8 + $0xd8] sm:$0xff]  ;;  %v6084_v24 = vld [vmem:[#allocation8 + $0xc0] sm:$0xff]  ;;  %v6086_v25 = vld [vmem:[#allocation8 + $0xc8] sm:$0xff]  ;;  %p5669_p4 = pnand %p5668_p3, %p5662_p13 }
  0x86   : > { %584 = vadd.xlane.f32.xlu1 %v583_v29  ;;  %578 = vadd.xlane.f32.xlu0 %v577_v30  ;;  %v592_v41 = vadd.f32 %v524_v33, %v523_v32  ;;  %v527_v42 = vmul.f32 %v5988_v12, %v6032_v37  ;;  %v528_v43 = vmul.f32 %v5992_v13, %v6034_v38  ;;  %v6094_v32 = vld [vmem:[#allocation8 + $0xf8] sm:$0xff] }
  0x87   : > { %v589_v44 = vadd.f32 %v522_v36, %v521_v35  ;;  %v525_v45 = vmul.f32 %v5988_v12, %v6036_v39  ;;  %v526_v46 = vmul.f32 %v5992_v13, %v6038_v40  ;;  %v531_v52 = vmul.f32 %v5988_v12, %v6048_v47  ;;  %11185 = vst [vmem:[#allocation37_spill] sm:$0xff] %v6080_v20  ;;  %v6100_v36 = vld [vmem:[#allocation8 + $0xe0] sm:$0xff] }
  0x88   : > { %v598_v51 = vadd.f32 %v528_v43, %v527_v42  ;;  %v532_v53 = vmul.f32 %v5992_v13, %v6050_v48  ;;  %v529_v55 = vmul.f32 %v5988_v12, %v6052_v49  ;;  %v530_v56 = vmul.f32 %v5992_v13, %v6054_v50  ;;  %11186 = vst [vmem:[#allocation38_spill] sm:$0xff] %v6082_v23  ;;  %v6105_v42 = vld [vmem:[%s5935_s7] sm:$0xff] }
  0x89   : > { %v595_v54 = vadd.f32 %v526_v46, %v525_v45  ;;  %v535_v61 = vmul.f32 %v5988_v12, %v6064_v57  ;;  %v536_v62 = vmul.f32 %v5992_v13, %v6066_v58  ;;  %v533_v63 = vmul.f32 %v5988_v12, %v6068_v59  ;;  %11187 = vst [vmem:[#allocation39_spill] sm:$0xff] %v6084_v24 }
  0x8a   : > { %587 = vadd.xlane.f32.xlu1 %v586_v31  ;;  %581 = vadd.xlane.f32.xlu0 %v580_v34  ;;  %v604_v17 = vadd.f32 %v532_v53, %v531_v52  ;;  %v601_v18 = vadd.f32 %v530_v56, %v529_v55  ;;  %v534_v19 = vmul.f32 %v5992_v13, %v6070_v60  ;;  %v6092_v31 = vld [vmem:[#allocation8 + $0xf0] sm:$0xff]  ;;  %v415_v43 = vsel %vm414_vm0, %v6105_v42, -inf  ;;  %v6123_v56 = vld [vmem:[#allocation8 + $0x118] sm:$0xff] }
  0x8b   : > { %11188 = vst [vmem:[#allocation40_spill] sm:$0xff] %v6086_v25  ;;  %v610_v26 = vadd.f32 %v536_v62, %v535_v61  ;;  %v539_v29 = vmul.f32 %v5988_v12, %v6080_v20  ;;  %v540_v30 = vmul.f32 %v5992_v13, %v6082_v23  ;;  %v537_v34 = vmul.f32 %v5988_v12, %v6084_v24  ;;  %v6125_v61 = vld [vmem:[#allocation8 + $0x100] sm:$0xff]  ;;  %v6127_v62 = vld [vmem:[#allocation8 + $0x108] sm:$0xff] }
  0x8c   : > { %v607_v33 = vadd.f32 %v534_v19, %v533_v63  ;;  %v538_v35 = vmul.f32 %v5992_v13, %v6086_v25  ;;  %v1362_v45 = vsel %vm11049_vm1, %v5978_v8, 0.0  ;;  %v543_v46 = vmul.f32 %v5988_v12, %v6092_v31  ;;  %11189 = vst [vmem:[#allocation41_spill] sm:$0xff] %v6125_v61  ;;  %11190 = vst [vmem:[#allocation42_spill] sm:$0xff] %v6127_v62 }
  0x8d   : > { %v541_v52 = vmul.f32 %v5988_v12, %v6100_v36  ;;  %v416_v8 = vrot.slane %v415_v43, 4  ;;  %v412_v63 = vcombine.high %v6105_v42, %v6105_v42  ;;  %v545_v0 = vmul.f32 %v5988_v12, %v6125_v61  ;;  %v6158_v61 = vld [vmem:[#allocation8 + $0x150] sm:$0xff] }
  0x8e   : > { %593 = vadd.xlane.f32.xlu1 %v592_v41  ;;  %590 = vadd.xlane.f32.xlu0 %v589_v44  ;;  %v6102_v41 = vld [vmem:[#allocation8 + $0xe8] sm:$0xff]  ;;  %v1361_v44 = vsel %vm11049_vm1, %v5974_v7, 0.0  ;;  %v616_v7 = vadd.f32 %v540_v30, %v539_v29  ;;  %v613_v55 = vadd.f32 %v538_v35, %v537_v34  ;;  %v548_v34 = vmul.f32 %v5992_v13, %v6123_v56 }
  0x8f   : > { %v542_v53 = vmul.f32 %v5992_v13, %v6102_v41  ;;  %v417_v19 = vmax.f32 %v415_v43, %v416_v8  ;;  %v422_v35 = vsel %vm414_vm0, %v412_v63, -inf  ;;  %v6144_v43 = vld [vmem:[#allocation8 + $0x138] sm:$0xff]  ;;  %v6146_v8 = vld [vmem:[#allocation8 + $0x120] sm:$0xff]  ;;  %11195 = vst [vmem:[#allocation47_spill] sm:$0xff] %v6158_v61 }
  0x90   : > { %11192 = vst [vmem:[#allocation44_spill] sm:$0xff] %v6144_v43  ;;  %11193 = vst [vmem:[#allocation45_spill] sm:$0xff] %v6146_v8  ;;  %v549_v3 = vmul.f32 %v5988_v12, %v6146_v8 }
  0x91   : > { %v619_v30 = vadd.f32 %v542_v53, %v541_v52  ;;  %v6148_v52 = vld [vmem:[#allocation8 + $0x128] sm:$0xff] }
  0x92   : > { %599 = vadd.xlane.f32.xlu1 %v598_v51  ;;  %596 = vadd.xlane.f32.xlu0 %v595_v54  ;;  %v544_v51 = vmul.f32 %v5992_v13, %v6094_v32  ;;  %v6121_v54 = vld [vmem:[#allocation8 + $0x110] sm:$0xff]  ;;  %11194 = vst [vmem:[#allocation46_spill] sm:$0xff] %v6148_v52 }
  0x94   : > { %v622_v29 = vadd.f32 %v544_v51, %v543_v46  ;;  %v418_v46 = vrot.slane %v417_v19, 2  ;;  %v423_v51 = vrot.slane %v422_v35, 4 }
  0x96   : > { %605 = vadd.xlane.f32.xlu1 %v604_v17  ;;  %602 = vadd.xlane.f32.xlu0 %v601_v18  ;;  %v6131_v17 = vadd.f32 %v1362_v45, %v1361_v44  ;;  %v547_v18 = vmul.f32 %v5988_v12, %v6121_v54  ;;  %v546_v44 = vmul.f32 %v5992_v13, %v6127_v62  ;;  %v6142_v45 = vld [vmem:[#allocation8 + $0x130] sm:$0xff] }
  0x97   : > { %v419_v53 = vmax.f32 %v417_v19, %v418_v46  ;;  %v424_v63 = vmax.f32 %v422_v35, %v423_v51  ;;  %v550_v62 = vmul.f32 %v5992_v13, %v6148_v52  ;;  %v6160_v19 = vld [vmem:[#allocation8 + $0x158] sm:$0xff]  ;;  %v6164_v35 = vld [vmem:[#allocation8 + $0x148] sm:$0xff] }
  0x98   : > { %11191 = vst [vmem:[#allocation43_spill] sm:$0xff] %v6131_v17  ;;  %v552_v17 = vmul.f32 %v5992_v13, %v6144_v43  ;;  %v625_v2 = vadd.f32 %v546_v44, %v545_v0  ;;  %11196 = vst [vmem:[#allocation48_spill] sm:$0xff] %v6160_v19  ;;  %v555_v0 = vmul.f32 %v5988_v12, %v6158_v61  ;;  %v6175_v43 = vld [vmem:[#allocation8 + $0x170] sm:$0xff] }
  0x99   : > { %11198 = vst [vmem:[#allocation50_spill] sm:$0xff] %v6164_v35  ;;  %v631_v44 = vadd.f32 %v550_v62, %v549_v3  ;;  %v554_v52 = vmul.f32 %v5992_v13, %v6164_v35  ;;  %11199 = vst [vmem:[#allocation51_spill] sm:$0xff] %v6175_v43 }
  0x9a   : > { %611 = vadd.xlane.f32.xlu1 %v610_v26  ;;  %608 = vadd.xlane.f32.xlu0 %v607_v33  ;;  %v5743_v26 = vmov 839922192  }
  0x9b   : > { %v437_v33 = vunpack.c.l.s4 %v5743_v26  ;;  %v551_v26 = vmul.f32 %v5988_v12, %v6142_v45 }
  0x9d   : > { %v634_v8 = vadd.f32 %v552_v17, %v551_v26  ;;  %v6179_v17 = vld [vmem:[#allocation8 + $0x160] sm:$0xff] }
  0x9e   : > { %617 = vadd.xlane.f32.xlu1 %v616_v7  ;;  %614 = vadd.xlane.f32.xlu0 %v613_v55  ;;  %v438_v7 = vunpack.c.0.s8 %v437_v33  ;;  %v628_v55 = vadd.f32 %v548_v34, %v547_v18  ;;  %v6162_v18 = vld [vmem:[#allocation8 + $0x140] sm:$0xff]  ;;  %v420_v33 = vrot.slane %v419_v53, 1  ;;  %v425_v34 = vrot.slane %v424_v63, 2  ;;  %11201 = vst [vmem:[#allocation53_spill] sm:$0xff] %v6179_v17 }
  0x9f   : > { %11197 = vst [vmem:[#allocation49_spill] sm:$0xff] %v6162_v18  ;;  %v557_v62 = vmul.f32 %v5988_v12, %v6179_v17 }
  0xa0   : > { %v426_v46 = vmax.f32 %v424_v63, %v425_v34  ;;  %v441_v51 = vsub.s32 %v438_v7, %v5957_v1  ;;  %v6177_v63 = vld [vmem:[#allocation8 + $0x178] sm:$0xff]  ;;  %v421_v7 = vmax.f32 %v419_v53, %v420_v33  ;;  %v6181_v34 = vld [vmem:[#allocation8 + $0x168] sm:$0xff] }
  0xa1   : > { %11200 = vst [vmem:[#allocation52_spill] sm:$0xff] %v6177_v63  ;;  %11202 = vst [vmem:[#allocation54_spill] sm:$0xff] %v6181_v34  ;;  %v560_v3 = vmul.f32 %v5992_v13, %v6177_v63  ;;  %v558_v33 = vmul.f32 %v5992_v13, %v6181_v34  ;;  %v6211_v34 = vld [vmem:[#allocation8 + $0x1b8] sm:$0xff] }
  0xa2   : > { %623 = vadd.xlane.f32.xlu1 %v622_v29  ;;  %620 = vadd.xlane.f32.xlu0 %v619_v30  ;;  %v556_v29 = vmul.f32 %v5992_v13, %v6160_v19  ;;  %v553_v30 = vmul.f32 %v5988_v12, %v6162_v18  ;;  %v427_v26 = vrot.slane %v426_v46, 1  ;;  %v442_v61 = vrot.slane %v5957_v1, %v441_v51  ;;  %v6196_v51 = vld [vmem:[#allocation8 + $0x180] sm:$0xff] }
  0xa3   : > { %11205 = vst [vmem:[#allocation57_spill] sm:$0xff] %v6196_v51  ;;  %11208 = vst [vmem:[#allocation60_spill] sm:$0xff] %v6211_v34  ;;  %v568_v63 = vmul.f32 %v5992_v13, %v6211_v34 }
  0xa4   : > { %v428_v19 = vmax.f32 %v426_v46, %v427_v26  ;;  %v640_v18 = vadd.f32 %v556_v29, %v555_v0  ;;  %v637_v53 = vadd.f32 %v554_v52, %v553_v30  ;;  %v6194_v46 = vld [vmem:[#allocation8 + $0x198] sm:$0xff]  ;;  %v6198_v0 = vld [vmem:[#allocation8 + $0x188] sm:$0xff]  ;;  %v561_v52 = vmul.f32 %v5988_v12, %v6196_v51 }
  0xa5   : > { %11204 = vst [vmem:[#allocation56_spill] sm:$0xff] %v6194_v46  ;;  %11206 = vst [vmem:[#allocation58_spill] sm:$0xff] %v6198_v0  ;;  %v562_v30 = vmul.f32 %v5992_v13, %v6198_v0 }
  0xa6   : > { %629 = vadd.xlane.f32.xlu1 %v628_v55  ;;  %626 = vadd.xlane.f32.xlu0 %v625_v2  ;;  %v559_v2 = vmul.f32 %v5988_v12, %v6175_v43  ;;  %v6190_v55 = vld [vmem:[#allocation8 + $0x190] sm:$0xff]  ;;  %v433_v29 = vcombine.low %v421_v7, %v428_v19  ;;  %v643_v7 = vadd.f32 %v558_v33, %v557_v62  ;;  %v6229_v33 = vld [vmem:[#allocation8 + $0x1d8] sm:$0xff] }
  0xa7   : > { %11203 = vst [vmem:[#allocation55_spill] sm:$0xff] %v6190_v55  ;;  %v563_v26 = vmul.f32 %v5988_v12, %v6190_v55  ;;  %11212 = vst [vmem:[#allocation64_spill] sm:$0xff] %v6229_v33 }
  0xa8   : > { %vm435_vm2 = vcmp.ge.f32.partialorder %v6105_v42, %v433_v29  ;;  %v646_v19 = vadd.f32 %v560_v3, %v559_v2  ;;  %v6214_v29 = vld [vmem:[#allocation8 + $0x1a0] sm:$0xff]  ;;  %v6223_v2 = vld [vmem:[#allocation8 + $0x1d0] sm:$0xff] }
  0xa9   : > { %v443_v17 = vsel %vm435_vm2, %v442_v61, 4  ;;  %11209 = vst [vmem:[#allocation61_spill] sm:$0xff] %v6214_v29  ;;  %11211 = vst [vmem:[#allocation63_spill] sm:$0xff] %v6223_v2 }
  0xaa   : > { %635 = vadd.xlane.f32.xlu1 %v634_v8  ;;  %632 = vadd.xlane.f32.xlu0 %v631_v44  ;;  %v564_v8 = vmul.f32 %v5992_v13, %v6194_v46  ;;  %v6209_v44 = vld [vmem:[#allocation8 + $0x1b0] sm:$0xff]  ;;  %v444_v55 = vcombine.high %v443_v17, %v443_v17  ;;  %v445_v42 = vsel %vm414_vm0, %v443_v17, 2147483647  ;;  %v6216_v46 = vld [vmem:[#allocation8 + $0x1a8] sm:$0xff]  ;;  %v565_v17 = vmul.f32 %v5988_v12, %v6214_v29  ;;  %v6243_v29 = vld [vmem:[#allocation8 + $0x1f8] sm:$0xff] }
  0xab   : > { %11207 = vst [vmem:[#allocation59_spill] sm:$0xff] %v6209_v44  ;;  %11210 = vst [vmem:[#allocation62_spill] sm:$0xff] %v6216_v46  ;;  %v446_v51 = vrot.slane %v445_v42, 4  ;;  %v567_v0 = vmul.f32 %v5988_v12, %v6209_v44  ;;  %v566_v62 = vmul.f32 %v5992_v13, %v6216_v46  ;;  %v6231_v44 = vld [vmem:[#allocation8 + $0x1c0] sm:$0xff]  ;;  %v6241_v46 = vld [vmem:[#allocation8 + $0x1f0] sm:$0xff] }
  0xac   : > { %v455_v61 = vsel %vm414_vm0, %v444_v55, 2147483647  ;;  %11213 = vst [vmem:[#allocation65_spill] sm:$0xff] %v6231_v44  ;;  %v6233_v55 = vld [vmem:[#allocation8 + $0x1c8] sm:$0xff]  ;;  %11214 = vst [vmem:[#allocation66_spill] sm:$0xff] %v6241_v46 }
  0xad   : > { %vm447_vm3 = vcmp.lt.s32.totalorder %v445_v42, %v446_v51  ;;  %v456_v3 = vrot.slane %v455_v61, 4 }
  0xae   : > { %641 = vadd.xlane.f32.xlu1 %v640_v18  ;;  %638 = vadd.xlane.f32.xlu0 %v637_v53  ;;  %v652_v18 = vadd.f32 %v564_v8, %v563_v26  ;;  %v649_v53 = vadd.f32 %v562_v30, %v561_v52  ;;  %v448_v34 = vsel %vm447_vm3, %v445_v42, %v446_v51 }
  0xaf   : > { %v449_v26 = vrot.slane %v448_v34, 2  ;;  %vm457_vm4 = vcmp.lt.s32.totalorder %v455_v61, %v456_v3  ;;  %v658_v8 = vadd.f32 %v568_v63, %v567_v0  ;;  %v571_v52 = vmul.f32 %v5988_v12, %v6223_v2  ;;  %v6247_v0 = vld [vmem:[#allocation8 + $0x1e0] sm:$0xff] }
  0xb0   : > { %v458_v30 = vsel %vm457_vm4, %v455_v61, %v456_v3  ;;  %v655_v42 = vadd.f32 %v566_v62, %v565_v17  ;;  %v570_v63 = vmul.f32 %v5992_v13, %v6233_v55  ;;  %v6249_v3 = vld [vmem:[#allocation8 + $0x1e8] sm:$0xff]  ;;  %v576_v2 = vmul.f32 %v5992_v13, %v6243_v29 }
  0xb1   : > { %vm450_vm5 = vcmp.lt.s32.totalorder %v448_v34, %v449_v26  ;;  %v459_v51 = vrot.slane %v458_v30, 2  ;;  %11215 = vst [vmem:[#allocation67_spill] sm:$0xff] %v6249_v3  ;;  %v574_v62 = vmul.f32 %v5992_v13, %v6249_v3 }
  0xb2   : > { %647 = vadd.xlane.f32.xlu1 %v646_v19  ;;  %644 = vadd.xlane.f32.xlu0 %v643_v7  ;;  %v572_v19 = vmul.f32 %v5992_v13, %v6229_v33  ;;  %v569_v7 = vmul.f32 %v5988_v12, %v6231_v44  ;;  %v451_v61 = vsel %vm450_vm5, %v448_v34, %v449_v26 }
  0xb3   : > { %v452_v33 = vrot.slane %v451_v61, 1  ;;  %vm460_vm6 = vcmp.lt.s32.totalorder %v458_v30, %v459_v51  ;;  %v575_v44 = vmul.f32 %v5988_v12, %v6241_v46 }
  0xb4   : > { %v461_v43 = vsel %vm460_vm6, %v458_v30, %v459_v51  ;;  %v661_v34 = vadd.f32 %v570_v63, %v569_v7  ;;  %v10851_v30 = vmov 0.0  }
  0xb5   : > { %vm453_vm7 = vcmp.lt.s32.totalorder %v451_v61, %v452_v33  ;;  %v462_v17 = vrot.slane %v461_v43, 1 }
  0xb6   : > { %653 = vadd.xlane.f32.xlu1 %v652_v18  ;;  %650 = vadd.xlane.f32.xlu0 %v649_v53  ;;  %v664_v18 = vadd.f32 %v572_v19, %v571_v52  ;;  %v573_v53 = vmul.f32 %v5988_v12, %v6247_v0  ;;  %v6259_v26 = vsel %vm453_vm7, %v451_v61, %v452_v33 }
  0xb7   : > { %11216 = vst [vmem:[#allocation68_spill] sm:$0xff] %v6259_v26  ;;  %vm463_vm8 = vcmp.lt.s32.totalorder %v461_v43, %v462_v17  ;;  %vm467_vm9 = vcmp.eq.s32.totalorder %v6259_v26, 0  ;;  %v670_v12 = vadd.f32 %v576_v2, %v575_v44 }
  0xb8   : > { %v6262_v46 = vsel %vm463_vm8, %v461_v43, %v462_v17  ;;  %v6265_v52 = vsel %vm467_vm9, 1.0, %v10851_v30 }
  0xb9   : > { %11217 = vst [vmem:[#allocation69_spill] sm:$0xff] %v6262_v46  ;;  %vm468_vm10 = vcmp.eq.s32.totalorder %v6262_v46, 0  ;;  %v675_v13 = vmul.f32 %v6265_v52, %v5996_v15  ;;  %v673_v43 = vmul.f32 %v6265_v52, %v5980_v9  ;;  %v679_v2 = vmul.f32 %v6265_v52, %v5984_v11 }
  0xba   : > { %659 = vadd.xlane.f32.xlu1 %v658_v8  ;;  %656 = vadd.xlane.f32.xlu0 %v655_v42  ;;  %v667_v8 = vadd.f32 %v574_v62, %v573_v53  ;;  %v6269_v19 = vsel %vm468_vm10, 1.0, %v10851_v30  ;;  %v677_v51 = vmul.f32 %v6265_v52, %v5968_v5  ;;  %v681_v17 = vmul.f32 %v6265_v52, %v6020_v27 }
  0xbb   : > { %v676_v33 = vmul.f32 %v6269_v19, %v5998_v16  ;;  %v674_v44 = vmul.f32 %v6269_v19, %v5982_v10  ;;  %v680_v7 = vmul.f32 %v6269_v19, %v5994_v14  ;;  %v678_v61 = vmul.f32 %v6269_v19, %v5970_v6 }
  0xbc   : > { %v684_v53 = vmul.f32 %v6269_v19, %v6010_v22  ;;  %v698_v30 = vmul.f32 %v6269_v19, %v6086_v25  ;;  %v6362_v46 = vsub.f32 1.0, %v5966_v4 }
  0xbd   : > { %v740_v42 = vadd.f32 %v676_v33, %v675_v13  ;;  %v737_v63 = vadd.f32 %v674_v44, %v673_v43  ;;  %v743_v62 = vadd.f32 %v678_v61, %v677_v51  ;;  %v687_v13 = vmul.f32 %v6265_v52, %v6032_v37 }
  0xbe   : > { %665 = vadd.xlane.f32.xlu1 %v664_v18  ;;  %662 = vadd.xlane.f32.xlu0 %v661_v34  ;;  %v683_v18 = vmul.f32 %v6265_v52, %v6008_v21  ;;  %v746_v34 = vadd.f32 %v680_v7, %v679_v2  ;;  %v688_v43 = vmul.f32 %v6269_v19, %v6034_v38 }
  0xbf   : > { %v685_v44 = vmul.f32 %v6265_v52, %v6036_v39  ;;  %v686_v2 = vmul.f32 %v6269_v19, %v6038_v40  ;;  %v691_v51 = vmul.f32 %v6265_v52, %v6048_v47  ;;  %v689_v61 = vmul.f32 %v6265_v52, %v6052_v49 }
  0xc0   : > { %v758_v7 = vadd.f32 %v688_v43, %v687_v13 }
  0xc2   : > { %671 = vadd.xlane.f32.xlu1 %v670_v12  ;;  %668 = vadd.xlane.f32.xlu0 %v667_v8  ;;  %v682_v12 = vmul.f32 %v6269_v19, %v6022_v28  ;;  %v752_v8 = vadd.f32 %v684_v53, %v683_v18  ;;  %v690_v18 = vmul.f32 %v6269_v19, %v6054_v50 }
  0xc3   : > { %v695_v53 = vmul.f32 %v6265_v52, %v6064_v57 }
  0xc4   : > { %v749_v33 = vadd.f32 %v682_v12, %v681_v17  ;;  %v696_v17 = vmul.f32 %v6269_v19, %v6066_v58 }
  0xc6   : > { %741 = vadd.xlane.f32.xlu1 %v740_v42  ;;  %738 = vadd.xlane.f32.xlu0 %v737_v63  ;;  %v692_v42 = vmul.f32 %v6269_v19, %v6050_v48  ;;  %v755_v63 = vadd.f32 %v686_v2, %v685_v44  ;;  %v770_v13 = vadd.f32 %v696_v17, %v695_v53 }
  0xc7   : > { %v700_v44 = vmul.f32 %v6269_v19, %v6082_v23  ;;  %v697_v2 = vmul.f32 %v6265_v52, %v6084_v24 }
  0xc8   : > { %v764_v12 = vadd.f32 %v692_v42, %v691_v51  ;;  %v6332_v51 = vsub.s32 1, %v5957_v1  ;;  %v6335_v42 = vsub.s32 5, %v5957_v1  ;;  %v707_v1 = vmul.f32 %v6265_v52, %v6121_v54 }
  0xc9   : > { %v773_v17 = vadd.f32 %v698_v30, %v697_v2 }
  0xca   : > { %747 = vadd.xlane.f32.xlu1 %v746_v34  ;;  %744 = vadd.xlane.f32.xlu0 %v743_v62  ;;  %v693_v34 = vmul.f32 %v6265_v52, %v6068_v59  ;;  %v694_v62 = vmul.f32 %v6269_v19, %v6070_v60  ;;  %11219 = vst [vmem:[#allocation71_spill] sm:$0xff] %v6332_v51  ;;  %11220 = vst [vmem:[#allocation72_spill] sm:$0xff] %v6335_v42 }
  0xcc   : > { %v767_v43 = vadd.f32 %v694_v62, %v693_v34  ;;  %v702_v34 = vmul.f32 %v6269_v19, %v6102_v41  ;;  %v6347_v62 = vrot.slane %v5966_v4, %v6332_v51 }
  0xce   : > { %753 = vadd.xlane.f32.xlu1 %v752_v8  ;;  %750 = vadd.xlane.f32.xlu0 %v749_v33  ;;  %v761_v8 = vadd.f32 %v690_v18, %v689_v61  ;;  %v699_v33 = vmul.f32 %v6265_v52, %v6080_v20  ;;  %v704_v61 = vmul.f32 %v6269_v19, %v6094_v32 }
  0xcf   : > { %v701_v18 = vmul.f32 %v6265_v52, %v6100_v36  ;;  %11221 = vst [vmem:[#allocation73_spill] sm:$0xff] %v6347_v62 }
  0xd0   : > { %v776_v53 = vadd.f32 %v700_v44, %v699_v33  ;;  %v11224_v44 = vld [vmem:[#allocation42_spill] sm:$0xff] }
  0xd1   : > { %v779_v30 = vadd.f32 %v702_v34, %v701_v18  ;;  %v706_v2 = vmul.f32 %v6269_v19, %v11224_v44  ;;  %v711_v18 = vmul.f32 %v6265_v52, %v6142_v45 }
  0xd2   : > { %759 = vadd.xlane.f32.xlu1 %v758_v7  ;;  %756 = vadd.xlane.f32.xlu0 %v755_v63  ;;  %v6329_v7 = vadd.f32 %v6269_v19, %v6265_v52  ;;  %v703_v63 = vmul.f32 %v6265_v52, %v6092_v31 }
  0xd4   : > { %11218 = vst [vmem:[#allocation70_spill] sm:$0xff] %v6329_v7  ;;  %v11227_v7 = vld [vmem:[#allocation45_spill] sm:$0xff] }
  0xd5   : > { %v709_v26 = vmul.f32 %v6265_v52, %v11227_v7  ;;  %v11232_v7 = vld [vmem:[#allocation49_spill] sm:$0xff] }
  0xd6   : > { %765 = vadd.xlane.f32.xlu1 %v764_v12  ;;  %762 = vadd.xlane.f32.xlu0 %v761_v8  ;;  %v6351_v12 = vrot.slane %v5966_v4, %v6335_v42  ;;  %v782_v8 = vadd.f32 %v704_v61, %v703_v63  ;;  %v6366_v63 = vrot.slane %v6347_v62, %v6332_v51  ;;  %v11228_v4 = vld [vmem:[#allocation46_spill] sm:$0xff] }
  0xd7   : > { %v710_v62 = vmul.f32 %v6269_v19, %v11228_v4  ;;  %v11231_v4 = vld [vmem:[#allocation48_spill] sm:$0xff] }
  0xd8   : > { %11222 = vst [vmem:[#allocation74_spill] sm:$0xff] %v6351_v12  ;;  %v6370_v61 = vrot.slane %v6351_v12, %v6332_v51  ;;  %v11230_v51 = vld [vmem:[#allocation47_spill] sm:$0xff] }
  0xd9   : > { %v715_v12 = vmul.f32 %v6265_v52, %v11230_v51  ;;  %v791_v3 = vadd.f32 %v710_v62, %v709_v26  ;;  %v1593_v62 = vmul.f32 %v6366_v63, %v6020_v27 }
  0xda   : > { %771 = vadd.xlane.f32.xlu1 %v770_v13  ;;  %768 = vadd.xlane.f32.xlu0 %v767_v43  ;;  %v708_v13 = vmul.f32 %v6269_v19, %v6123_v56  ;;  %v11223_v43 = vld [vmem:[#allocation41_spill] sm:$0xff]  ;;  %v1590_v51 = vmul.f32 %v6370_v61, %v5970_v6 }
  0xdb   : > { %v705_v33 = vmul.f32 %v6265_v52, %v11223_v43  ;;  %11225 = vst [vmem:[#allocation41_spill] sm:$0xff] %v6362_v46 }
  0xdd   : > { %v785_v42 = vadd.f32 %v706_v2, %v705_v33  ;;  %v1591_v33 = vmul.f32 %v6366_v63, %v5984_v11  ;;  %v1592_v2 = vmul.f32 %v6370_v61, %v5994_v14  ;;  %v11233_v11 = vld [vmem:[#allocation18_spill] sm:$0xff]  ;;  %v1589_v14 = vmul.f32 %v6366_v63, %v5968_v5 }
  0xde   : > { %777 = vadd.xlane.f32.xlu1 %v776_v53  ;;  %774 = vadd.xlane.f32.xlu0 %v773_v17  ;;  %v788_v53 = vadd.f32 %v708_v13, %v707_v1  ;;  %v11226_v17 = vld [vmem:[#allocation44_spill] sm:$0xff]  ;;  %v1587_v1 = vmul.f32 %v6366_v63, %v5996_v15  ;;  %v1585_v13 = vmul.f32 %v6366_v63, %v5980_v9 }
  0xdf   : > { %v712_v34 = vmul.f32 %v6269_v19, %v11226_v17  ;;  %v716_v15 = vmul.f32 %v6269_v19, %v11231_v4  ;;  %v713_v9 = vmul.f32 %v6265_v52, %v11232_v7  ;;  %v1595_v4 = vmul.f32 %v6366_v63, %v6008_v21 }
  0xe0   : > { %v1596_v7 = vmul.f32 %v6370_v61, %v6010_v22  ;;  %v6416_v26 = vadd.f32 %v1592_v2, %v1591_v33  ;;  %v1594_v21 = vmul.f32 %v6370_v61, %v6022_v28  ;;  %v11238_v22 = vld [vmem:[#allocation52_spill] sm:$0xff]  ;;  %v1603_v2 = vmul.f32 %v6366_v63, %v6048_v47 }
  0xe1   : > { %v1602_v47 = vmul.f32 %v6370_v61, %v6054_v50 }
  0xe2   : > { %783 = vadd.xlane.f32.xlu1 %v782_v8  ;;  %780 = vadd.xlane.f32.xlu0 %v779_v30  ;;  %v1588_v8 = vmul.f32 %v6370_v61, %v5998_v16  ;;  %v1586_v30 = vmul.f32 %v6370_v61, %v5982_v10  ;;  %v714_v16 = vmul.f32 %v6269_v19, %v6164_v35 }
  0xe3   : > { %v794_v10 = vadd.f32 %v712_v34, %v711_v18  ;;  %11236 = vst [vmem:[#allocation76_spill] sm:$0xff] %v6416_v26  ;;  %v11237_v34 = vld [vmem:[#allocation51_spill] sm:$0xff]  ;;  %v1604_v26 = vmul.f32 %v6370_v61, %v6050_v48  ;;  %v1601_v48 = vmul.f32 %v6366_v63, %v6052_v49 }
  0xe4   : > { %v6412_v35 = vadd.f32 %v1588_v8, %v1587_v1  ;;  %v797_v18 = vadd.f32 %v714_v16, %v713_v9  ;;  %v719_v17 = vmul.f32 %v6265_v52, %v11237_v34  ;;  %v720_v1 = vmul.f32 %v6269_v19, %v11238_v22 }
  0xe5   : > { %v1599_v9 = vmul.f32 %v6366_v63, %v6032_v37  ;;  %v1597_v16 = vmul.f32 %v6366_v63, %v6036_v39  ;;  %v11243_v37 = vld [vmem:[#allocation55_spill] sm:$0xff]  ;;  %v11245_v39 = vld [vmem:[#allocation57_spill] sm:$0xff]  ;;  %v6464_v27 = vadd.f32 %v1604_v26, %v1603_v2  ;;  %v1606_v26 = vmul.f32 %v6370_v61, %v6070_v60 }
  0xe6   : > { %789 = vadd.xlane.f32.xlu1 %v788_v53  ;;  %786 = vadd.xlane.f32.xlu0 %v785_v42  ;;  %11234 = vst [vmem:[#allocation42_spill] sm:$0xff] %v6412_v35  ;;  %v6414_v42 = vadd.f32 %v1586_v30, %v1585_v13  ;;  %v800_v53 = vadd.f32 %v716_v15, %v715_v12  ;;  %v11239_v13 = vld [vmem:[#allocation53_spill] sm:$0xff]  ;;  %v11240_v30 = vld [vmem:[#allocation54_spill] sm:$0xff] }
  0xe7   : > { %v717_v8 = vmul.f32 %v6265_v52, %v11239_v13  ;;  %v718_v33 = vmul.f32 %v6269_v19, %v11240_v30  ;;  %v1600_v15 = vmul.f32 %v6370_v61, %v6034_v38  ;;  %v6440_v12 = vadd.f32 %v1596_v7, %v1595_v4  ;;  %v11244_v38 = vld [vmem:[#allocation56_spill] sm:$0xff]  ;;  %v11247_v7 = vld [vmem:[#allocation58_spill] sm:$0xff] }
  0xe8   : > { %11235 = vst [vmem:[#allocation75_spill] sm:$0xff] %v6414_v42  ;;  %v723_v28 = vmul.f32 %v6265_v52, %v11243_v37  ;;  %v724_v42 = vmul.f32 %v6269_v19, %v11244_v38  ;;  %v721_v35 = vmul.f32 %v6265_v52, %v11245_v39  ;;  %v806_v4 = vadd.f32 %v720_v1, %v719_v17 }
  0xe9   : > { %11242 = vst [vmem:[#allocation52_spill] sm:$0xff] %v6440_v12  ;;  %v6456_v12 = vadd.f32 %v1600_v15, %v1599_v9  ;;  %11250 = vst [vmem:[#allocation56_spill] sm:$0xff] %v6464_v27  ;;  %v1608_v17 = vmul.f32 %v6370_v61, %v6066_v58  ;;  %v11253_v15 = vld [vmem:[#allocation61_spill] sm:$0xff]  ;;  %v6484_v27 = vadd.f32 %v1602_v47, %v1601_v48  ;;  %v11258_v47 = vld [vmem:[#allocation64_spill] sm:$0xff] }
  0xea   : > { %795 = vadd.xlane.f32.xlu1 %v794_v10  ;;  %792 = vadd.xlane.f32.xlu0 %v791_v3  ;;  %v1598_v10 = vmul.f32 %v6370_v61, %v6038_v40  ;;  %v6438_v3 = vadd.f32 %v1590_v51, %v1589_v14  ;;  %v6452_v40 = vadd.f32 %v1594_v21, %v1593_v62 }
  0xeb   : > { %v803_v14 = vadd.f32 %v718_v33, %v717_v8  ;;  %v722_v51 = vmul.f32 %v6269_v19, %v11247_v7  ;;  %11248 = vst [vmem:[#allocation54_spill] sm:$0xff] %v6456_v12  ;;  %v1607_v21 = vmul.f32 %v6366_v63, %v6064_v57  ;;  %v1605_v62 = vmul.f32 %v6366_v63, %v6068_v59  ;;  %v11252_v8 = vld [vmem:[#allocation60_spill] sm:$0xff] }
  0xec   : > { %11241 = vst [vmem:[#allocation51_spill] sm:$0xff] %v6438_v3  ;;  %11246 = vst [vmem:[#allocation53_spill] sm:$0xff] %v6452_v40  ;;  %v6458_v3 = vadd.f32 %v1598_v10, %v1597_v16  ;;  %v728_v33 = vmul.f32 %v6269_v19, %v11252_v8  ;;  %v725_v16 = vmul.f32 %v6265_v52, %v11253_v15  ;;  %v11254_v10 = vld [vmem:[#allocation62_spill] sm:$0xff]  ;;  %v11257_v40 = vld [vmem:[#allocation63_spill] sm:$0xff] }
  0xed   : > { %v809_v9 = vadd.f32 %v722_v51, %v721_v35  ;;  %v726_v2 = vmul.f32 %v6269_v19, %v11254_v10  ;;  %11255 = vst [vmem:[#allocation57_spill] sm:$0xff] %v6484_v27  ;;  %v6488_v12 = vadd.f32 %v1608_v17, %v1607_v21  ;;  %v1612_v35 = vmul.f32 %v6370_v61, %v6082_v23  ;;  %v11260_v17 = vld [vmem:[#allocation65_spill] sm:$0xff] }
  0xee   : > { %801 = vadd.xlane.f32.xlu1 %v800_v53  ;;  %798 = vadd.xlane.f32.xlu0 %v797_v18  ;;  %11249 = vst [vmem:[#allocation55_spill] sm:$0xff] %v6458_v3  ;;  %v812_v53 = vadd.f32 %v724_v42, %v723_v28  ;;  %v11251_v18 = vld [vmem:[#allocation59_spill] sm:$0xff]  ;;  %v487_v28 = vsub.f32 1.0, %v6265_v52  ;;  %v488_v42 = vsub.f32 1.0, %v6269_v19  ;;  %v1611_v3 = vmul.f32 %v6366_v63, %v6080_v20  ;;  %v11266_v20 = vld [vmem:[#allocation17_spill] sm:$0xff] }
  0xef   : > { %v727_v1 = vmul.f32 %v6265_v52, %v11251_v18  ;;  %11256 = vst [vmem:[#allocation58_spill] sm:$0xff] %v6488_v12  ;;  %v731_v60 = vmul.f32 %v6265_v52, %v11257_v40  ;;  %v732_v48 = vmul.f32 %v6269_v19, %v11258_v47  ;;  %v6500_v27 = vadd.f32 %v1606_v26, %v1605_v62 }
  0xf0   : > { %v815_v21 = vadd.f32 %v726_v2, %v725_v16  ;;  %v729_v12 = vmul.f32 %v6265_v52, %v11260_v17  ;;  %v491_v23 = vcombine.low %v487_v28, %v488_v42  ;;  %v1613_v62 = vmul.f32 %v6366_v63, %v6100_v36 }
  0xf1   : > { %v818_v51 = vadd.f32 %v728_v33, %v727_v1  ;;  %11259 = vst [vmem:[#allocation59_spill] sm:$0xff] %v6500_v27  ;;  %v1615_v1 = vmul.f32 %v6366_v63, %v6092_v31  ;;  %v1616_v33 = vmul.f32 %v6370_v61, %v6094_v32  ;;  %v1619_v26 = vmul.f32 %v6366_v63, %v6121_v54  ;;  %v11261_v31 = vld [vmem:[#allocation66_spill] sm:$0xff] }
  0xf2   : > { %807 = vadd.xlane.f32.xlu1 %v806_v4  ;;  %804 = vadd.xlane.f32.xlu0 %v803_v14  ;;  %v1609_v4 = vmul.f32 %v6366_v63, %v6084_v24  ;;  %v1610_v14 = vmul.f32 %v6370_v61, %v6086_v25  ;;  %v730_v24 = vmul.f32 %v6269_v19, %v6233_v55  ;;  %v11265_v25 = vld [vmem:[#allocation44_spill] sm:$0xff] }
  0xf3   : > { %v1617_v16 = vmul.f32 %v6366_v63, %v11223_v43  ;;  %v824_v2 = vadd.f32 %v732_v48, %v731_v60  ;;  %v735_v28 = vmul.f32 %v6265_v52, %v11261_v31  ;;  %v736_v32 = vmul.f32 %v6269_v19, %v6243_v29  ;;  %v11263_v43 = vld [vmem:[#allocation19_spill] sm:$0xff] }
  0xf4   : > { %v1618_v36 = vmul.f32 %v6370_v61, %v11224_v44  ;;  %v733_v54 = vmul.f32 %v6265_v52, %v6247_v0  ;;  %v6531_v60 = vmul.f32 %v491_v23, %v11263_v43  ;;  %v6533_v48 = vadd.f32 %v1612_v35, %v1611_v3 }
  0xf5   : > { %v1623_v27 = vmul.f32 %v6366_v63, %v6142_v45  ;;  %v1624_v44 = vmul.f32 %v6370_v61, %v11265_v25  ;;  %v11267_v23 = vrot.slane %v6362_v46, %v11266_v20  ;;  %v11269_v45 = vrot.slane %v6362_v46, %v11233_v11 }
  0xf6   : > { %813 = vadd.xlane.f32.xlu1 %v812_v53  ;;  %810 = vadd.xlane.f32.xlu0 %v809_v9  ;;  %v1614_v53 = vmul.f32 %v6370_v61, %v6102_v41  ;;  %v1620_v9 = vmul.f32 %v6370_v61, %v6123_v56  ;;  %v821_v41 = vadd.f32 %v730_v24, %v729_v12  ;;  %v11262_v56 = vld [vmem:[#allocation67_spill] sm:$0xff] }
  0xf7   : > { %v734_v42 = vmul.f32 %v6269_v19, %v11262_v56  ;;  %11264 = vst [vmem:[#allocation60_spill] sm:$0xff] %v6531_v60  ;;  %v6541_v24 = vadd.f32 %v1616_v33, %v1615_v1  ;;  %v6551_v3 = vmul.f32 %v6265_v52, %v11267_v23  ;;  %v6557_v35 = vmul.f32 %v6269_v19, %v11269_v45 }
  0xf8   : > { %v6543_v12 = vadd.f32 %v1614_v53, %v1613_v62  ;;  %v6559_v25 = vadd.f32 %v1618_v36, %v1617_v16  ;;  %v830_v1 = vadd.f32 %v736_v32, %v735_v28  ;;  %v11272_v62 = vld [vmem:[#allocation46_spill] sm:$0xff]  ;;  %v1444_v52 = vrot.slane %v6531_v60, %v11266_v20  ;;  %v11274_v36 = vld [vmem:[#allocation48_spill] sm:$0xff] }
  0xf9   : > { %11268 = vst [vmem:[#allocation61_spill] sm:$0xff] %v6551_v3  ;;  %11270 = vst [vmem:[#allocation62_spill] sm:$0xff] %v6557_v35  ;;  %v827_v33 = vadd.f32 %v734_v42, %v733_v54  ;;  %v1622_v53 = vmul.f32 %v6370_v61, %v11272_v62  ;;  %v6569_v19 = vadd.f32 %v1624_v44, %v1623_v27  ;;  %v11276_v32 = vld [vmem:[#allocation50_spill] sm:$0xff]  ;;  %v1366_v43 = vsel %vm11049_vm1, %v6551_v3, 0.0 }
  0xfa   : > { %819 = vadd.xlane.f32.xlu1 %v818_v51  ;;  %816 = vadd.xlane.f32.xlu0 %v815_v21  ;;  %v6539_v51 = vadd.f32 %v1610_v14, %v1609_v4  ;;  %v6545_v21 = vadd.f32 %v1620_v9, %v1619_v26  ;;  %v11271_v4 = vld [vmem:[#allocation45_spill] sm:$0xff]  ;;  %v1448_v26 = vrot.slane %v6531_v60, %v11233_v11  ;;  %v11273_v9 = vld [vmem:[#allocation47_spill] sm:$0xff]  ;;  %v1367_v27 = vsel %vm11049_vm1, %v6557_v35, 0.0  ;;  %v6775_v11 = vld [vmem:[#allocation7 + $0x38] sm:$0xff] }
  0xfb   : > { %v1621_v14 = vmul.f32 %v6366_v63, %v11271_v4  ;;  %v1627_v16 = vmul.f32 %v6366_v63, %v11273_v9  ;;  %v1626_v54 = vmul.f32 %v6370_v61, %v11276_v32  ;;  %v1631_v42 = vmul.f32 %v6366_v63, %v11237_v34  ;;  %v6779_v60 = vld [vmem:[#allocation7 + $0x18] sm:$0xff]  ;;  %v11321_v35 = vld [vmem:[#allocation40_spill] sm:$0xff] }
  0xfc   : > { %v1632_v44 = vmul.f32 %v6370_v61, %v11238_v22  ;;  %v1629_v23 = vmul.f32 %v6366_v63, %v11239_v13  ;;  %v1630_v45 = vmul.f32 %v6370_v61, %v11240_v30  ;;  %v1635_v34 = vmul.f32 %v6366_v63, %v11243_v37 }
  0xfd   : > { %v1636_v4 = vmul.f32 %v6370_v61, %v11244_v38  ;;  %v1451_v62 = vsel %vm11049_vm1, %v1444_v52, 0.0  ;;  %v1452_v9 = vsel %vm11049_vm1, %v1448_v26, 0.0  ;;  %v1633_v22 = vmul.f32 %v6366_v63, %v11245_v39  ;;  %v11278_v26 = vld [vmem:[#allocation43_spill] sm:$0xff] }
  0xfe   : > { %825 = vadd.xlane.f32.xlu1 %v824_v2  ;;  %822 = vadd.xlane.f32.xlu0 %v821_v41  ;;  %v1628_v2 = vmul.f32 %v6370_v61, %v11274_v36  ;;  %v11275_v41 = vld [vmem:[#allocation49_spill] sm:$0xff]  ;;  %v1634_v13 = vmul.f32 %v6370_v61, %v11247_v7  ;;  %v1639_v30 = vmul.f32 %v6366_v63, %v11251_v18  ;;  %v11277_v7 = vld [vmem:[#allocation68_spill] sm:$0xff]  ;;  %v11279_v18 = vld [vmem:[#allocation70_spill] sm:$0xff] }
  0xff   : > { %v1625_v28 = vmul.f32 %v6366_v63, %v11275_v41  ;;  %v1640_v37 = vmul.f32 %v6370_v61, %v11252_v8  ;;  %v1637_v38 = vmul.f32 %v6366_v63, %v11253_v15  ;;  %v1643_v52 = vmul.f32 %v6366_v63, %v11257_v40  ;;  %11318 = vst [vmem:[#allocation49_spill] sm:$0xff] %v6775_v11 }
 0x100   : > { %v1644_v39 = vmul.f32 %v6370_v61, %v11258_v47  ;;  %vm1541_vm11 = vcmp.eq.s32.totalorder %v11277_v7, 1  ;;  %v1453_v36 = vadd.f32 %v1452_v9, %v1451_v62  ;;  %v1641_v8 = vmul.f32 %v6366_v63, %v11260_v17 }
 0x101   : > { %v1642_v15 = vmul.f32 %v6370_v61, %v6233_v55  ;;  %v6621_v41 = vadd.f32 %v1622_v53, %v1621_v14  ;;  %v6623_v40 = vadd.f32 %v1628_v2, %v1627_v16  ;;  %v1647_v47 = vmul.f32 %v6366_v63, %v11261_v31 }
 0x102   : > { %831 = vadd.xlane.f32.xlu1 %v830_v1  ;;  %828 = vadd.xlane.f32.xlu0 %v827_v33  ;;  %v1368_v1 = vadd.f32 %v1367_v27, %v1366_v43  ;;  %v1638_v33 = vmul.f32 %v6370_v61, %v11254_v10  ;;  %v11280_v10 = vld [vmem:[#allocation69_spill] sm:$0xff]  ;;  %v1648_v32 = vmul.f32 %v6370_v61, %v6243_v29  ;;  %v11281_v62 = vmov 0.0  }
 0x103   : > { %vm1542_vm12 = vcmp.eq.s32.totalorder %v11280_v10, 1  ;;  %v6629_v43 = vadd.f32 %v1626_v54, %v1625_v28  ;;  %v6631_v27 = vadd.f32 %v1632_v44, %v1631_v42  ;;  %v6633_v17 = vadd.f32 %v1630_v45, %v1629_v23  ;;  %v11284_v44 = vld [vmem:[#allocation20_spill] sm:$0xff]  ;;  %v11285_v45 = vld [vmem:[#allocation21_spill] sm:$0xff] }
 0x104   : > { %v6636_v55 = vsel %vm1541_vm11, 1.0, %v11281_v62  ;;  %v6638_v9 = vadd.f32 %v1636_v4, %v1635_v34  ;;  %v6640_v14 = vadd.f32 %v1634_v13, %v1633_v22  ;;  %v6642_v53 = vadd.f32 %v1640_v37, %v1639_v30  ;;  %v11286_v4 = vld [vmem:[#allocation24_spill] sm:$0xff]  ;;  %v11287_v13 = vld [vmem:[#allocation25_spill] sm:$0xff] }
 0x105   : > { %11282 = vst [vmem:[#allocation63_spill] sm:$0xff] %v6636_v55  ;;  %v6645_v31 = vsel %vm1542_vm12, 1.0, %v11281_v62  ;;  %v6647_v29 = vadd.f32 %v1638_v33, %v1637_v38  ;;  %v6649_v16 = vadd.f32 %v1644_v39, %v1643_v52  ;;  %v6651_v2 = vadd.f32 %v1642_v15, %v1641_v8  ;;  %v11290_v38 = vld [vmem:[#allocation28_spill] sm:$0xff]  ;;  %v11291_v52 = vld [vmem:[#allocation42_spill] sm:$0xff]  ;;  %v11292_v39 = vld [vmem:[#allocation75_spill] sm:$0xff] }
 0x106   : > { %1364 = vadd.xlane.f32.xlu1 %v11278_v26  ;;  %1359 = vadd.xlane.f32.xlu0 %v11279_v18  ;;  %11283 = vst [vmem:[#allocation64_spill] sm:$0xff] %v6645_v31  ;;  %v6653_v28 = vadd.f32 %v1648_v32, %v1647_v47  ;;  %v1645_v54 = vmul.f32 %v6366_v63, %v6247_v0  ;;  %v11288_v63 = vld [vmem:[#allocation22_spill] sm:$0xff]  ;;  %v11293_v26 = vld [vmem:[#allocation29_spill] sm:$0xff]  ;;  %v11296_v32 = vld [vmem:[#allocation32_spill] sm:$0xff] }
 0x107   : > { %v1646_v42 = vmul.f32 %v6370_v61, %v11262_v56  ;;  %v1745_v23 = vmul.f32 %v6636_v55, %v11284_v44  ;;  %v1746_v34 = vmul.f32 %v6645_v31, %v11285_v45  ;;  %v1747_v22 = vmul.f32 %v6636_v55, %v11286_v4  ;;  %v11289_v56 = vld [vmem:[#allocation23_spill] sm:$0xff]  ;;  %v11297_v45 = vld [vmem:[#allocation33_spill] sm:$0xff] }
 0x108   : > { %v1749_v30 = vmul.f32 %v6636_v55, %v5968_v5  ;;  %v1750_v0 = vmul.f32 %v6645_v31, %v5970_v6  ;;  %v1751_v61 = vmul.f32 %v6636_v55, %v11288_v63  ;;  %v1752_v37 = vmul.f32 %v6645_v31, %v11289_v56  ;;  %v11294_v5 = vld [vmem:[#allocation26_spill] sm:$0xff]  ;;  %v11295_v6 = vld [vmem:[#allocation27_spill] sm:$0xff] }
 0x109   : > { %v1753_v33 = vmul.f32 %v6636_v55, %v11290_v38  ;;  %v1754_v18 = vmul.f32 %v6645_v31, %v11293_v26  ;;  %v1756_v8 = vmul.f32 %v6645_v31, %v11295_v6  ;;  %v1757_v44 = vmul.f32 %v6636_v55, %v11296_v32  ;;  %v11299_v56 = vld [vmem:[#allocation31_spill] sm:$0xff]  ;;  %v11300_v26 = vld [vmem:[#allocation34_spill] sm:$0xff] }
 0x10a   : > { %1454 = vadd.xlane.f32.xlu1 %v1453_v36  ;;  %1369 = vadd.xlane.f32.xlu0 %v1368_v1  ;;  %v1748_v1 = vmul.f32 %v6645_v31, %v11287_v13  ;;  %v1755_v36 = vmul.f32 %v6636_v55, %v11294_v5  ;;  %v1758_v4 = vmul.f32 %v6645_v31, %v11297_v45  ;;  %v11298_v13 = vld [vmem:[#allocation30_spill] sm:$0xff]  ;;  %v11301_v6 = vld [vmem:[#allocation35_spill] sm:$0xff] }
 0x10b   : > { %v1759_v63 = vmul.f32 %v6636_v55, %v11298_v13  ;;  %v1760_v38 = vmul.f32 %v6645_v31, %v11299_v56  ;;  %v1763_v5 = vmul.f32 %v6636_v55, %v11300_v26  ;;  %v1764_v32 = vmul.f32 %v6645_v31, %v11301_v6  ;;  %v11302_v56 = vld [vmem:[#allocation76_spill] sm:$0xff] }
 0x10c   : > { %v6701_v10 = vadd.f32 %v1646_v42, %v1645_v54  ;;  %v6703_v45 = vadd.f32 %v1746_v34, %v1745_v23  ;;  %v6705_v13 = vadd.f32 %v1748_v1, %v1747_v22  ;;  %v6707_v7 = vadd.f32 %v1750_v0, %v1749_v30  ;;  %v6725_v1 = vld [vmem:[#allocation7 + $0x20] sm:$0xff] }
 0x10d   : > { %v6713_v46 = vadd.f32 %v1754_v18, %v1753_v33  ;;  %v6715_v26 = vadd.f32 %v1756_v8, %v1755_v36  ;;  %v6717_v42 = vadd.f32 %v1758_v4, %v1757_v44  ;;  %v6719_v23 = vadd.f32 %v1760_v38, %v1759_v63  ;;  %11306 = vst [vmem:[#allocation67_spill] sm:$0xff] %v6725_v1  ;;  %v6727_v30 = vld [vmem:[#allocation7] sm:$0xff]  ;;  %v6735_v33 = vld [vmem:[#allocation7 + $0x8] sm:$0xff]  ;;  %v11313_v63 = vld [vmem:[#allocation53_spill] sm:$0xff] }
 0x10e   : > { %1653 = vadd.xlane.f32.xlu1 %v11291_v52  ;;  %1650 = vadd.xlane.f32.xlu0 %v11292_v39  ;;  %v1761_v52 = vmul.f32 %v6636_v55, %v6052_v49  ;;  %v1762_v39 = vmul.f32 %v6645_v31, %v6054_v50  ;;  %v11303_v49 = vld [vmem:[#allocation51_spill] sm:$0xff]  ;;  %v6711_v50 = vadd.f32 %v1752_v37, %v1751_v61  ;;  %v6733_v37 = vld [vmem:[#allocation7 + $0x28] sm:$0xff]  ;;  %v11314_v38 = vld [vmem:[#allocation37_spill] sm:$0xff] }
 0x10f   : > { %v585_v15 = vpop.xlane.xlu1 %584  ;;  %v579_v47 = vpop.xlane.xlu0 %578  ;;  %11304 = vst [vmem:[#allocation65_spill] sm:$0xff] %v6717_v42  ;;  %11305 = vst [vmem:[#allocation66_spill] sm:$0xff] %v6719_v23  ;;  %v1767_v34 = vmul.f32 %v6636_v55, %v6064_v57  ;;  %v1768_v22 = vmul.f32 %v6645_v31, %v6066_v58  ;;  %v6731_v61 = vadd.f32 %v1764_v32, %v1763_v5  ;;  %v11311_v36 = vld [vmem:[#allocation36_spill] sm:$0xff]  ;;  %v11330_v42 = vld [vmem:[#allocation57_spill] sm:$0xff] }
 0x110   : > { %vm833_vm13 = vcmp.lt.f32.partialorder %v579_v47, -1.5  ;;  %vm835_vm14 = vcmp.lt.f32.partialorder %v585_v15, -1.5  ;;  %v6729_v0 = vadd.f32 %v1762_v39, %v1761_v52  ;;  %11309 = vst [vmem:[#allocation45_spill] sm:$0xff] %v6733_v37  ;;  %11310 = vst [vmem:[#allocation46_spill] sm:$0xff] %v6735_v33  ;;  %v1765_v18 = vmul.f32 %v6636_v55, %v6068_v59  ;;  %v11312_v4 = vld [vmem:[#allocation52_spill] sm:$0xff]  ;;  %v11315_v39 = vld [vmem:[#allocation38_spill] sm:$0xff] }
 0x111   : > { %11308 = vst [vmem:[#allocation44_spill] sm:$0xff] %v6731_v61  ;;  %v4914_v57 = vsel %vm833_vm13, 1.0, %v11281_v62  ;;  %v1766_v8 = vmul.f32 %v6645_v31, %v11311_v36  ;;  %v1771_v52 = vmul.f32 %v6636_v55, %v11314_v38  ;;  %v1772_v5 = vmul.f32 %v6645_v31, %v11315_v39  ;;  %v6773_v38 = vld [vmem:[#allocation7 + $0x10] sm:$0xff]  ;;  %v11320_v15 = vld [vmem:[#allocation39_spill] sm:$0xff] }
 0x112   : > { %1659 = vadd.xlane.f32.xlu1 %v11302_v56  ;;  %1656 = vadd.xlane.f32.xlu0 %v11303_v49  ;;  %11307 = vst [vmem:[#allocation19_spill] sm:$0xff] %v6729_v0  ;;  %v6753_v32 = vsel %vm835_vm14, %v6725_v1, 1e+30  ;;  %v4916_v59 = vsel %vm835_vm14, 1.0, %v11281_v62  ;;  %v6759_v56 = vsel %vm833_vm13, %v6727_v30, 1e+30  ;;  %v6763_v36 = vadd.f32 %v1768_v22, %v1767_v34 }
 0x113   : > { %v588_v6 = vpop.xlane.xlu1 %587  ;;  %v582_v54 = vpop.xlane.xlu0 %581  ;;  %v6761_v49 = vld [vmem:[#allocation7 + $0x30] sm:$0xff]  ;;  %v6781_v34 = vadd.f32 %v1766_v8, %v1765_v18  ;;  %v1769_v22 = vmul.f32 %v6636_v55, %v11320_v15  ;;  %v1770_v47 = vmul.f32 %v6645_v31, %v11321_v35  ;;  %v1025_v3 = vmin.f32 %v6759_v56, %v6753_v32  ;;  %v6814_v18 = vld [vmem:[#allocation7 + $0x40] sm:$0xff]  ;;  %v11329_v1 = vld [vmem:[#allocation56_spill] sm:$0xff] }
 0x114   : > { %vm834_vm15 = vcmp.lt.f32.partialorder %v582_v54, -1.5  ;;  %vm836_vm0 = vcmp.lt.f32.partialorder %v588_v6, -1.5  ;;  %11316 = vst [vmem:[#allocation47_spill] sm:$0xff] %v6761_v49  ;;  %11317 = vst [vmem:[#allocation48_spill] sm:$0xff] %v6763_v36  ;;  %v11323_v36 = vld [vmem:[#allocation55_spill] sm:$0xff]  ;;  %v6791_v61 = vadd.f32 %v1772_v5, %v1771_v52  ;;  %v6799_v15 = vld [vmem:[#allocation7 + $0x50] sm:$0xff] }
 0x115   : > { %v4915_v58 = vsel %vm834_vm15, 1.0, %v11281_v62  ;;  %v4917_v20 = vsel %vm836_vm0, 1.0, %v11281_v62  ;;  %11319 = vst [vmem:[#allocation50_spill] sm:$0xff] %v6781_v34  ;;  %v967_v8 = vsel %vm836_vm0, %v6761_v49, 1e+30  ;;  %11325 = vst [vmem:[#allocation70_spill] sm:$0xff] %v6799_v15  ;;  %v6816_v34 = vadd.f32 %v1770_v47, %v1769_v22 }
 0x116   : > { %v1403_v44 = vadd.f32 %v4915_v58, %v4914_v57  ;;  %1665 = vadd.xlane.f32.xlu1 %v11312_v4  ;;  %1662 = vadd.xlane.f32.xlu0 %v11313_v63  ;;  %v6767_v4 = vsel %vm835_vm14, %v6733_v37, 1e+30  ;;  %v6771_v63 = vsel %vm833_vm13, %v6735_v33, 1e+30  ;;  %11324 = vst [vmem:[#allocation43_spill] sm:$0xff] %v6791_v61  ;;  %11326 = vst [vmem:[#allocation20_spill] sm:$0xff] %v6814_v18 }
 0x117   : > { %v594_v57 = vpop.xlane.xlu1 %593  ;;  %v591_v58 = vpop.xlane.xlu0 %590  ;;  %v963_v35 = vsel %vm834_vm15, %v6773_v38, 1e+30  ;;  %v968_v52 = vsel %vm836_vm0, %v6775_v11, 1e+30  ;;  %v964_v5 = vsel %vm834_vm15, %v6779_v60, 1e+30 }
 0x118   : > { %v1404_v39 = vadd.f32 %v4916_v59, %v1403_v44  ;;  %vm837_vm2 = vcmp.lt.f32.partialorder %v591_v58, -1.5  ;;  %vm838_vm3 = vcmp.lt.f32.partialorder %v594_v57, -1.5  ;;  %v11322_v59 = vld [vmem:[#allocation54_spill] sm:$0xff]  ;;  %11327 = vst [vmem:[#allocation21_spill] sm:$0xff] %v6816_v34  ;;  %v5291_v61 = vld [vmem:[#allocation8 + $0xf0] sm:$0xff]  ;;  %v1026_v54 = vmin.f32 %v963_v35, %v967_v8 }
 0x119   : > { %v1775_v0 = vmul.f32 %v5291_v61, %v6636_v55  ;;  %v5292_v6 = vld [vmem:[#allocation8 + $0xf8] sm:$0xff]  ;;  %v1063_v22 = vmin.f32 %v964_v5, %v968_v52  ;;  %v6826_v47 = vld [vmem:[#allocation7 + $0x70] sm:$0xff]  ;;  %v969_v52 = vsel %vm837_vm2, %v6814_v18, 1e+30 }
 0x11a   : > { %v1405_v44 = vadd.f32 %v4917_v20, %v1404_v39  ;;  %1671 = vadd.xlane.f32.xlu1 %v11322_v59  ;;  %1668 = vadd.xlane.f32.xlu0 %v11323_v36  ;;  %v4918_v20 = vsel %vm837_vm2, 1.0, %v11281_v62  ;;  %v6810_v39 = vld [vmem:[#allocation7 + $0x58] sm:$0xff]  ;;  %v4919_v59 = vsel %vm838_vm3, 1.0, %v11281_v62  ;;  %v1776_v23 = vmul.f32 %v5292_v6, %v6645_v31  ;;  %v5293_v6 = vld [vmem:[#allocation8 + $0xe0] sm:$0xff]  ;;  %v6858_v18 = vld [vmem:[#allocation7 + $0x90] sm:$0xff] }
 0x11b   : > { %v600_v32 = vpop.xlane.xlu1 %599  ;;  %v6803_v56 = vpop.xlane.xlu0 %596  ;;  %v6828_v34 = vld [vmem:[#allocation7 + $0x78] sm:$0xff]  ;;  %11336 = vst [vmem:[#allocation28_spill] sm:$0xff] %v6858_v18 }
 0x11c   : > { %v1406_v36 = vadd.f32 %v4918_v20, %v1405_v44  ;;  %vm839_vm4 = vcmp.lt.f32.partialorder %v6803_v56, -1.5  ;;  %v971_v44 = vsel %vm838_vm3, %v6799_v15, 1e+30  ;;  %v6822_v20 = vld [vmem:[#allocation7 + $0x48] sm:$0xff]  ;;  %vm840_vm5 = vcmp.lt.f32.partialorder %v600_v32, -1.5  ;;  %11331 = vst [vmem:[#allocation25_spill] sm:$0xff] %v6828_v34 }
 0x11d   : > { %11328 = vst [vmem:[#allocation24_spill] sm:$0xff] %v6822_v20  ;;  %v4920_v61 = vsel %vm839_vm4, 1.0, %v11281_v62  ;;  %v1773_v15 = vmul.f32 %v5293_v6, %v6636_v55  ;;  %v970_v11 = vsel %vm837_vm2, %v6822_v20, 1e+30  ;;  %v4921_v33 = vsel %vm840_vm5, 1.0, %v11281_v62  ;;  %v6846_v6 = vld [vmem:[#allocation7 + $0x60] sm:$0xff] }
 0x11e   : > { %v1407_v37 = vadd.f32 %v4919_v59, %v1406_v36  ;;  %1677 = vadd.xlane.f32.xlu1 %v11329_v1  ;;  %1674 = vadd.xlane.f32.xlu0 %v11330_v42  ;;  %v5294_v36 = vld [vmem:[#allocation8 + $0xe8] sm:$0xff]  ;;  %v972_v42 = vsel %vm838_vm3, %v6810_v39, 1e+30  ;;  %v1028_v59 = vmin.f32 %v1026_v54, %v971_v44  ;;  %v6848_v49 = vadd.f32 %v1776_v23, %v1775_v0  ;;  %v11334_v54 = vld [vmem:[#allocation59_spill] sm:$0xff] }
 0x11f   : > { %v606_v8 = vpop.xlane.xlu1 %605  ;;  %v6833_v35 = vpop.xlane.xlu0 %602  ;;  %v1774_v1 = vmul.f32 %v5294_v36, %v6645_v31  ;;  %v975_v57 = vsel %vm840_vm5, %v6826_v47, 1e+30  ;;  %v976_v36 = vsel %vm840_vm5, %v6828_v34, 1e+30  ;;  %v1065_v58 = vmin.f32 %v1063_v22, %v972_v42  ;;  %v6856_v20 = vld [vmem:[#allocation7 + $0x68] sm:$0xff]  ;;  %v6875_v34 = vld [vmem:[#allocation7 + $0x98] sm:$0xff] }
 0x120   : > { %v1408_v5 = vadd.f32 %v4920_v61, %v1407_v37  ;;  %vm841_vm6 = vcmp.lt.f32.partialorder %v6833_v35, -1.5  ;;  %11332 = vst [vmem:[#allocation22_spill] sm:$0xff] %v6848_v49  ;;  %vm842_vm7 = vcmp.lt.f32.partialorder %v606_v8, -1.5  ;;  %v11333_v61 = vld [vmem:[#allocation58_spill] sm:$0xff]  ;;  %v1027_v44 = vmin.f32 %v1025_v3, %v969_v52  ;;  %11335 = vst [vmem:[#allocation23_spill] sm:$0xff] %v6856_v20  ;;  %v5295_v3 = vld [vmem:[#allocation8 + $0x110] sm:$0xff] }
 0x121   : > { %v4922_v23 = vsel %vm841_vm6, 1.0, %v11281_v62  ;;  %v6865_v32 = vadd.f32 %v1774_v1, %v1773_v15  ;;  %v1779_v22 = vmul.f32 %v5295_v3, %v6636_v55  ;;  %v11338_v42 = vmin.f32 %v6771_v63, %v6767_v4  ;;  %v6879_v1 = vld [vmem:[#allocation7 + $0x80] sm:$0xff]  ;;  %v6886_v3 = vld [vmem:[#allocation7 + $0x88] sm:$0xff]  ;;  %v6890_v63 = vld [vmem:[#allocation7 + $0xb0] sm:$0xff] }
 0x122   : > { %v1409_v37 = vadd.f32 %v4921_v33, %v1408_v5  ;;  %1683 = vadd.xlane.f32.xlu1 %v11333_v61  ;;  %1680 = vadd.xlane.f32.xlu0 %v11334_v54  ;;  %v973_v33 = vsel %vm839_vm4, %v6846_v6, 1e+30  ;;  %v1030_v61 = vmin.f32 %v1028_v59, %v975_v57  ;;  %v1067_v54 = vmin.f32 %v1065_v58, %v976_v36  ;;  %v6892_v59 = vld [vmem:[#allocation7 + $0xb8] sm:$0xff] }
 0x123   : > { %v612_v0 = vpop.xlane.xlu1 %611  ;;  %v6863_v49 = vpop.xlane.xlu0 %608  ;;  %11337 = vst [vmem:[#allocation42_spill] sm:$0xff] %v6865_v32  ;;  %v1064_v52 = vmin.f32 %v11338_v42, %v970_v11  ;;  %v4923_v15 = vsel %vm842_vm7, 1.0, %v11281_v62  ;;  %11339 = vst [vmem:[#allocation75_spill] sm:$0xff] %v6879_v1  ;;  %v1029_v4 = vmin.f32 %v1027_v44, %v973_v33  ;;  %v5296_v58 = vld [vmem:[#allocation8 + $0x118] sm:$0xff]  ;;  %v5297_v32 = vld [vmem:[#allocation8 + $0x100] sm:$0xff] }
 0x124   : > { %v1410_v5 = vadd.f32 %v4922_v23, %v1409_v37  ;;  %vm843_vm8 = vcmp.lt.f32.partialorder %v6863_v49, -1.5  ;;  %v974_v37 = vsel %vm839_vm4, %v6856_v20, 1e+30  ;;  %v979_v23 = vsel %vm842_vm7, %v6858_v18, 1e+30  ;;  %11340 = vst [vmem:[#allocation29_spill] sm:$0xff] %v6886_v3 }
 0x125   : > { %vm844_vm9 = vcmp.lt.f32.partialorder %v612_v0, -1.5  ;;  %11341 = vst [vmem:[#allocation26_spill] sm:$0xff] %v6890_v63  ;;  %11342 = vst [vmem:[#allocation27_spill] sm:$0xff] %v6892_v59  ;;  %v4924_v56 = vsel %vm843_vm8, 1.0, %v11281_v62  ;;  %v1780_v42 = vmul.f32 %v5296_v58, %v6645_v31  ;;  %v1066_v33 = vmin.f32 %v1064_v52, %v974_v37  ;;  %v6909_v20 = vld [vmem:[#allocation7 + $0xa0] sm:$0xff]  ;;  %v6919_v37 = vld [vmem:[#allocation7 + $0xd0] sm:$0xff] }
 0x126   : > { %v1411_v11 = vadd.f32 %v4923_v15, %v1410_v5  ;;  %1689 = vadd.xlane.f32.xlu1 %v6533_v48  ;;  %1686 = vadd.xlane.f32.xlu0 %v6539_v51  ;;  %v1777_v5 = vmul.f32 %v5297_v32, %v6636_v55  ;;  %v980_v48 = vsel %vm842_vm7, %v6875_v34, 1e+30  ;;  %v977_v51 = vsel %vm841_vm6, %v6879_v1, 1e+30  ;;  %v6935_v1 = vld [vmem:[#allocation7 + $0xc8] sm:$0xff] }
 0x127   : > { %v618_v57 = vpop.xlane.xlu1 %617  ;;  %v615_v36 = vpop.xlane.xlu0 %614  ;;  %v1032_v15 = vmin.f32 %v1030_v61, %v979_v23  ;;  %v978_v18 = vsel %vm841_vm6, %v6886_v3, 1e+30  ;;  %v4925_v58 = vsel %vm844_vm9, 1.0, %v11281_v62  ;;  %v983_v8 = vsel %vm844_vm9, %v6890_v63, 1e+30  ;;  %v6917_v61 = vld [vmem:[#allocation7 + $0xa8] sm:$0xff] }
 0x128   : > { %v1412_v44 = vadd.f32 %v4924_v56, %v1411_v11  ;;  %vm845_vm10 = vcmp.lt.f32.partialorder %v615_v36, -1.5  ;;  %v984_v32 = vsel %vm844_vm9, %v6892_v59, 1e+30  ;;  %vm846_vm11 = vcmp.lt.f32.partialorder %v618_v57, -1.5  ;;  %v5298_v3 = vld [vmem:[#allocation8 + $0x108] sm:$0xff]  ;;  %v6933_v59 = vld [vmem:[#allocation7 + $0xc0] sm:$0xff] }
 0x129   : > { %v1069_v52 = vmin.f32 %v1067_v54, %v980_v48  ;;  %v1031_v35 = vmin.f32 %v1029_v4, %v977_v51  ;;  %v4926_v23 = vsel %vm845_vm10, 1.0, %v11281_v62  ;;  %v1778_v0 = vmul.f32 %v5298_v3, %v6645_v31 }
 0x12a   : > { %v1413_v11 = vadd.f32 %v4925_v58, %v1412_v44  ;;  %1695 = vadd.xlane.f32.xlu1 %v6541_v24  ;;  %1692 = vadd.xlane.f32.xlu0 %v6543_v12  ;;  %v981_v24 = vsel %vm843_vm8, %v6909_v20, 1e+30  ;;  %v6927_v44 = vld [vmem:[#allocation7 + $0xd8] sm:$0xff]  ;;  %v6929_v54 = vadd.f32 %v1780_v42, %v1779_v22  ;;  %v1068_v4 = vmin.f32 %v1066_v33, %v978_v18  ;;  %v6946_v33 = vld [vmem:[#allocation7 + $0xf0] sm:$0xff] }
 0x12b   : > { %v624_v56 = vpop.xlane.xlu1 %623  ;;  %v621_v63 = vpop.xlane.xlu0 %620  ;;  %v1034_v48 = vmin.f32 %v1032_v15, %v983_v8  ;;  %v1071_v51 = vmin.f32 %v1069_v52, %v984_v32  ;;  %v4927_v58 = vsel %vm846_vm11, 1.0, %v11281_v62  ;;  %v982_v3 = vsel %vm843_vm8, %v6917_v61, 1e+30  ;;  %v6948_v15 = vld [vmem:[#allocation7 + $0xf8] sm:$0xff] }
 0x12c   : > { %v1414_v12 = vadd.f32 %v4926_v23, %v1413_v11  ;;  %vm847_vm12 = vcmp.lt.f32.partialorder %v621_v63, -1.5  ;;  %11343 = vst [vmem:[#allocation32_spill] sm:$0xff] %v6929_v54  ;;  %v987_v11 = vsel %vm846_vm11, %v6919_v37, 1e+30  ;;  %vm848_vm13 = vcmp.lt.f32.partialorder %v624_v56, -1.5  ;;  %11344 = vst [vmem:[#allocation33_spill] sm:$0xff] %v6948_v15 }
 0x12d   : > { %v1033_v18 = vmin.f32 %v1031_v35, %v981_v24  ;;  %v988_v42 = vsel %vm846_vm11, %v6927_v44, 1e+30  ;;  %v4928_v49 = vsel %vm847_vm12, 1.0, %v11281_v62  ;;  %v6952_v52 = vadd.f32 %v1778_v0, %v1777_v5  ;;  %v5299_v54 = vld [vmem:[#allocation8 + $0x130] sm:$0xff] }
 0x12e   : > { %v1415_v22 = vadd.f32 %v4927_v58, %v1414_v12  ;;  %1701 = vadd.xlane.f32.xlu1 %v6545_v21  ;;  %1698 = vadd.xlane.f32.xlu0 %v6559_v25  ;;  %v985_v21 = vsel %vm845_vm10, %v6933_v59, 1e+30  ;;  %v986_v25 = vsel %vm845_vm10, %v6935_v1, 1e+30  ;;  %v1070_v57 = vmin.f32 %v1068_v4, %v982_v3  ;;  %v6960_v12 = vld [vmem:[#allocation7 + $0xe0] sm:$0xff]  ;;  %v6962_v58 = vld [vmem:[#allocation7 + $0xe8] sm:$0xff] }
 0x12f   : > { %v630_v8 = vpop.xlane.xlu1 %629  ;;  %v627_v32 = vpop.xlane.xlu0 %626  ;;  %11345 = vst [vmem:[#allocation30_spill] sm:$0xff] %v6952_v52  ;;  %v1036_v23 = vmin.f32 %v1034_v48, %v987_v11  ;;  %v4929_v24 = vsel %vm848_vm13, 1.0, %v11281_v62  ;;  %11346 = vst [vmem:[#allocation31_spill] sm:$0xff] %v6962_v58  ;;  %v6965_v5 = vmul.f32 %v5299_v54, %v6636_v55  ;;  %v991_v0 = vsel %vm848_vm13, %v6946_v33, 1e+30  ;;  %v6977_v54 = vld [vmem:[#allocation7 + $0x100] sm:$0xff] }
 0x130   : > { %v1416_v35 = vadd.f32 %v4928_v49, %v1415_v22  ;;  %vm849_vm14 = vcmp.lt.f32.partialorder %v627_v32, -1.5  ;;  %v992_v36 = vsel %vm848_vm13, %v6948_v15, 1e+30  ;;  %vm850_vm15 = vcmp.lt.f32.partialorder %v630_v8, -1.5  ;;  %v6973_v22 = vld [vmem:[#allocation7 + $0x110] sm:$0xff]  ;;  %v6975_v49 = vld [vmem:[#allocation7 + $0x118] sm:$0xff] }
 0x131   : > { %v1073_v48 = vmin.f32 %v1071_v51, %v988_v42  ;;  %v1035_v3 = vmin.f32 %v1033_v18, %v985_v21  ;;  %v1072_v11 = vmin.f32 %v1070_v57, %v986_v25  ;;  %11347 = vst [vmem:[#allocation34_spill] sm:$0xff] %v6975_v49  ;;  %11348 = vst [vmem:[#allocation35_spill] sm:$0xff] %v6977_v54  ;;  %v4930_v52 = vsel %vm849_vm14, 1.0, %v11281_v62  ;;  %v6989_v25 = vld [vmem:[#allocation7 + $0x130] sm:$0xff] }
 0x132   : > { %v1417_v4 = vadd.f32 %v4929_v24, %v1416_v35  ;;  %1707 = vadd.xlane.f32.xlu1 %v6569_v19  ;;  %1704 = vadd.xlane.f32.xlu0 %v6621_v41  ;;  %v989_v35 = vsel %vm847_vm12, %v6960_v12, 1e+30  ;;  %v990_v19 = vsel %vm847_vm12, %v6962_v58, 1e+30  ;;  %v6985_v41 = vld [vmem:[#allocation7 + $0x108] sm:$0xff]  ;;  %v1038_v18 = vmin.f32 %v1036_v23, %v991_v0 }
 0x133   : > { %v636_v56 = vpop.xlane.xlu1 %635  ;;  %v633_v15 = vpop.xlane.xlu0 %632  ;;  %11349 = vst [vmem:[#allocation76_spill] sm:$0xff] %v6985_v41  ;;  %v1075_v42 = vmin.f32 %v1073_v48, %v992_v36  ;;  %v4931_v21 = vsel %vm850_vm15, 1.0, %v11281_v62  ;;  %v995_v57 = vsel %vm850_vm15, %v6973_v22, 1e+30  ;;  %v996_v24 = vsel %vm850_vm15, %v6975_v49, 1e+30 }
 0x134   : > { %v1418_v51 = vadd.f32 %v4930_v52, %v1417_v4  ;;  %vm851_vm0 = vcmp.lt.f32.partialorder %v633_v15, -1.5  ;;  %vm852_vm2 = vcmp.lt.f32.partialorder %v636_v56, -1.5  ;;  %v993_v63 = vsel %vm849_vm14, %v6977_v54, 1e+30  ;;  %v7001_v36 = vld [vmem:[#allocation7 + $0x138] sm:$0xff]  ;;  %v7003_v4 = vld [vmem:[#allocation7 + $0x120] sm:$0xff] }
 0x135   : > { %v1037_v52 = vmin.f32 %v1035_v3, %v989_v35  ;;  %v1074_v23 = vmin.f32 %v1072_v11, %v990_v19  ;;  %v994_v0 = vsel %vm849_vm14, %v6985_v41, 1e+30  ;;  %11350 = vst [vmem:[#allocation51_spill] sm:$0xff] %v7003_v4  ;;  %v7005_v48 = vld [vmem:[#allocation7 + $0x128] sm:$0xff]  ;;  %v4932_v8 = vsel %vm851_vm0, 1.0, %v11281_v62  ;;  %v7011_v3 = vld [vmem:[#allocation7 + $0x150] sm:$0xff] }
 0x136   : > { %v1419_v58 = vadd.f32 %v4931_v21, %v1418_v51  ;;  %1713 = vadd.xlane.f32.xlu1 %v6623_v40  ;;  %1710 = vadd.xlane.f32.xlu0 %v6629_v43  ;;  %11351 = vst [vmem:[#allocation36_spill] sm:$0xff] %v7005_v48  ;;  %v999_v40 = vsel %vm852_vm2, %v6989_v25, 1e+30  ;;  %11352 = vst [vmem:[#allocation52_spill] sm:$0xff] %v7011_v3  ;;  %v1040_v32 = vmin.f32 %v1038_v18, %v995_v57  ;;  %v7015_v21 = vld [vmem:[#allocation7 + $0x158] sm:$0xff]  ;;  %v7029_v56 = vld [vmem:[#allocation7 + $0x148] sm:$0xff] }
 0x137   : > { %v642_v54 = vpop.xlane.xlu1 %641  ;;  %v639_v51 = vpop.xlane.xlu0 %638  ;;  %v1077_v11 = vmin.f32 %v1075_v42, %v996_v24  ;;  %v1039_v35 = vmin.f32 %v1037_v52, %v993_v63  ;;  %v4933_v19 = vsel %vm852_vm2, 1.0, %v11281_v62  ;;  %v1000_v41 = vsel %vm852_vm2, %v7001_v36, 1e+30  ;;  %v7027_v24 = vld [vmem:[#allocation7 + $0x140] sm:$0xff]  ;;  %11353 = vst [vmem:[#allocation53_spill] sm:$0xff] %v7029_v56  ;;  %v7033_v52 = vld [vmem:[#allocation7 + $0x170] sm:$0xff] }
 0x138   : > { %v1420_v43 = vadd.f32 %v4932_v8, %v1419_v58  ;;  %vm854_vm3 = vcmp.lt.f32.partialorder %v642_v54, -1.5  ;;  %vm853_vm4 = vcmp.lt.f32.partialorder %v639_v51, -1.5  ;;  %v997_v49 = vsel %vm851_vm0, %v7003_v4, 1e+30  ;;  %11354 = vst [vmem:[#allocation37_spill] sm:$0xff] %v7033_v52  ;;  %v7057_v51 = vld [vmem:[#allocation7 + $0x190] sm:$0xff] }
 0x139   : > { %v998_v58 = vsel %vm851_vm0, %v7005_v48, 1e+30  ;;  %v1076_v18 = vmin.f32 %v1074_v23, %v994_v0  ;;  %v1042_v42 = vmin.f32 %v1040_v32, %v999_v40  ;;  %v1003_v57 = vsel %vm854_vm3, %v7011_v3, 1e+30  ;;  %v7037_v23 = vld [vmem:[#allocation7 + $0x178] sm:$0xff]  ;;  %v7041_v3 = vld [vmem:[#allocation7 + $0x160] sm:$0xff] }
 0x13a   : > { %v1421_v8 = vadd.f32 %v4933_v19, %v1420_v43  ;;  %1719 = vadd.xlane.f32.xlu1 %v6631_v27  ;;  %1716 = vadd.xlane.f32.xlu0 %v6633_v17  ;;  %v4934_v63 = vsel %vm853_vm4, 1.0, %v11281_v62  ;;  %v1004_v27 = vsel %vm854_vm3, %v7015_v21, 1e+30  ;;  %11355 = vst [vmem:[#allocation38_spill] sm:$0xff] %v7037_v23  ;;  %v1079_v0 = vmin.f32 %v1077_v11, %v1000_v41  ;;  %v7053_v11 = vld [vmem:[#allocation7 + $0x168] sm:$0xff] }
 0x13b   : > { %v648_v15 = vpop.xlane.xlu1 %647  ;;  %v645_v43 = vpop.xlane.xlu0 %644  ;;  %v1041_v40 = vmin.f32 %v1039_v35, %v997_v49  ;;  %v1078_v32 = vmin.f32 %v1076_v18, %v998_v58  ;;  %v4935_v19 = vsel %vm854_vm3, 1.0, %v11281_v62  ;;  %v1001_v48 = vsel %vm853_vm4, %v7027_v24, 1e+30  ;;  %v7059_v58 = vld [vmem:[#allocation7 + $0x198] sm:$0xff] }
 0x13c   : > { %v1422_v17 = vadd.f32 %v4934_v63, %v1421_v8  ;;  %vm856_vm5 = vcmp.lt.f32.partialorder %v648_v15, -1.5  ;;  %vm855_vm6 = vcmp.lt.f32.partialorder %v645_v43, -1.5  ;;  %v1002_v4 = vsel %vm853_vm4, %v7029_v56, 1e+30  ;;  %11356 = vst [vmem:[#allocation39_spill] sm:$0xff] %v7059_v58 }
 0x13d   : > { %v1007_v8 = vsel %vm856_vm5, %v7033_v52, 1e+30  ;;  %v1044_v49 = vmin.f32 %v1042_v42, %v1003_v57  ;;  %v1081_v41 = vmin.f32 %v1079_v0, %v1004_v27  ;;  %v1008_v54 = vsel %vm856_vm5, %v7037_v23, 1e+30  ;;  %v7063_v42 = vld [vmem:[#allocation7 + $0x180] sm:$0xff]  ;;  %v7067_v23 = vld [vmem:[#allocation7 + $0x188] sm:$0xff] }
 0x13e   : > { %v1423_v63 = vadd.f32 %v4935_v19, %v1422_v17  ;;  %1725 = vadd.xlane.f32.xlu1 %v6638_v9  ;;  %1722 = vadd.xlane.f32.xlu0 %v6640_v14  ;;  %v4936_v35 = vsel %vm855_vm6, 1.0, %v11281_v62  ;;  %v1005_v9 = vsel %vm855_vm6, %v7041_v3, 1e+30  ;;  %11357 = vst [vmem:[#allocation40_spill] sm:$0xff] %v7063_v42  ;;  %v1043_v57 = vmin.f32 %v1041_v40, %v1001_v48  ;;  %v7081_v40 = vld [vmem:[#allocation7 + $0x1b0] sm:$0xff] }
 0x13f   : > { %v654_v18 = vpop.xlane.xlu1 %653  ;;  %v651_v17 = vpop.xlane.xlu0 %650  ;;  %v1080_v27 = vmin.f32 %v1078_v32, %v1002_v4  ;;  %v1046_v0 = vmin.f32 %v1044_v49, %v1007_v8  ;;  %v4937_v19 = vsel %vm856_vm5, 1.0, %v11281_v62  ;;  %v1006_v52 = vsel %vm855_vm6, %v7053_v11, 1e+30  ;;  %v7083_v32 = vld [vmem:[#allocation7 + $0x1b8] sm:$0xff] }
 0x140   : > { %v1424_v14 = vadd.f32 %v4936_v35, %v1423_v63  ;;  %vm858_vm7 = vcmp.lt.f32.partialorder %v654_v18, -1.5  ;;  %vm857_vm8 = vcmp.lt.f32.partialorder %v651_v17, -1.5  ;;  %v1083_v4 = vmin.f32 %v1081_v41, %v1008_v54  ;;  %v7089_v41 = vld [vmem:[#allocation7 + $0x1a8] sm:$0xff] }
 0x141   : > { %v1011_v56 = vsel %vm858_vm7, %v7057_v51, 1e+30  ;;  %v1012_v63 = vsel %vm858_vm7, %v7059_v58, 1e+30  ;;  %v1045_v48 = vmin.f32 %v1043_v57, %v1005_v9  ;;  %v1009_v15 = vsel %vm857_vm8, %v7063_v42, 1e+30 }
 0x142   : > { %v1425_v35 = vadd.f32 %v4937_v19, %v1424_v14  ;;  %1731 = vadd.xlane.f32.xlu1 %v6642_v53  ;;  %1728 = vadd.xlane.f32.xlu0 %v6647_v29  ;;  %v4938_v43 = vsel %vm857_vm8, 1.0, %v11281_v62  ;;  %v1010_v14 = vsel %vm857_vm8, %v7067_v23, 1e+30  ;;  %v7087_v29 = vld [vmem:[#allocation7 + $0x1a0] sm:$0xff]  ;;  %11359 = vst [vmem:[#allocation55_spill] sm:$0xff] %v7089_v41  ;;  %v1082_v54 = vmin.f32 %v1080_v27, %v1006_v52  ;;  %v7101_v52 = vld [vmem:[#allocation7 + $0x1d8] sm:$0xff] }
 0x143   : > { %v660_v8 = vpop.xlane.xlu1 %659  ;;  %v657_v49 = vpop.xlane.xlu0 %656  ;;  %11358 = vst [vmem:[#allocation54_spill] sm:$0xff] %v7087_v29  ;;  %v1048_v9 = vmin.f32 %v1046_v0, %v1011_v56  ;;  %v1085_v57 = vmin.f32 %v1083_v4, %v1012_v63  ;;  %v4939_v19 = vsel %vm858_vm7, 1.0, %v11281_v62  ;;  %v1047_v42 = vmin.f32 %v1045_v48, %v1009_v15  ;;  %v7109_v4 = vld [vmem:[#allocation7 + $0x1c0] sm:$0xff]  ;;  %v7113_v15 = vld [vmem:[#allocation7 + $0x1c8] sm:$0xff] }
 0x144   : > { %v1426_v53 = vadd.f32 %v4938_v43, %v1425_v35  ;;  %vm860_vm9 = vcmp.lt.f32.partialorder %v660_v8, -1.5  ;;  %vm859_vm10 = vcmp.lt.f32.partialorder %v657_v49, -1.5  ;;  %v7099_v43 = vld [vmem:[#allocation7 + $0x1d0] sm:$0xff]  ;;  %v1084_v56 = vmin.f32 %v1082_v54, %v1010_v14  ;;  %11360 = vst [vmem:[#allocation56_spill] sm:$0xff] %v7109_v4  ;;  %11361 = vst [vmem:[#allocation57_spill] sm:$0xff] %v7113_v15 }
 0x145   : > { %v1015_v58 = vsel %vm860_vm9, %v7081_v40, 1e+30  ;;  %v1016_v17 = vsel %vm860_vm9, %v7083_v32, 1e+30  ;;  %v1013_v18 = vsel %vm859_vm10, %v7087_v29, 1e+30 }
 0x146   : > { %v1427_v35 = vadd.f32 %v4939_v19, %v1426_v53  ;;  %1737 = vadd.xlane.f32.xlu1 %v6649_v16  ;;  %1734 = vadd.xlane.f32.xlu0 %v6651_v2  ;;  %v1014_v27 = vsel %vm859_vm10, %v7089_v41, 1e+30  ;;  %v4940_v0 = vsel %vm859_vm10, 1.0, %v11281_v62  ;;  %v4941_v2 = vsel %vm860_vm9, 1.0, %v11281_v62 }
 0x147   : > { %v666_v63 = vpop.xlane.xlu1 %665  ;;  %v663_v16 = vpop.xlane.xlu0 %662  ;;  %v1050_v14 = vmin.f32 %v1048_v9, %v1015_v58  ;;  %v1087_v53 = vmin.f32 %v1085_v57, %v1016_v17  ;;  %v1049_v19 = vmin.f32 %v1047_v42, %v1013_v18  ;;  %v1086_v41 = vmin.f32 %v1084_v56, %v1014_v27  ;;  %v7125_v58 = vld [vmem:[#allocation7 + $0x1f8] sm:$0xff]  ;;  %v7133_v18 = vld [vmem:[#allocation7 + $0x1e0] sm:$0xff] }
 0x148   : > { %v1428_v48 = vadd.f32 %v4940_v0, %v1427_v35  ;;  %vm862_vm11 = vcmp.lt.f32.partialorder %v666_v63, -1.5  ;;  %vm861_vm12 = vcmp.lt.f32.partialorder %v663_v16, -1.5  ;;  %v7123_v35 = vld [vmem:[#allocation7 + $0x1f0] sm:$0xff]  ;;  %v7135_v0 = vld [vmem:[#allocation7 + $0x1e8] sm:$0xff] }
 0x149   : > { %v1019_v54 = vsel %vm862_vm11, %v7099_v43, 1e+30  ;;  %v1020_v49 = vsel %vm862_vm11, %v7101_v52, 1e+30  ;;  %v1017_v8 = vsel %vm861_vm12, %v7109_v4, 1e+30 }
 0x14a   : > { %v1429_v29 = vadd.f32 %v4941_v2, %v1428_v48  ;;  %1743 = vadd.xlane.f32.xlu1 %v6653_v28  ;;  %1740 = vadd.xlane.f32.xlu0 %v6701_v10  ;;  %v1052_v9 = vmin.f32 %v1050_v14, %v1019_v54  ;;  %v4943_v57 = vsel %vm862_vm11, 1.0, %v11281_v62  ;;  %v1018_v42 = vsel %vm861_vm12, %v7113_v15, 1e+30  ;;  %11362 = vst [vmem:[#allocation58_spill] sm:$0xff] %v7135_v0 }
 0x14b   : > { %v4942_v17 = vsel %vm861_vm12, 1.0, %v11281_v62  ;;  %v672_v56 = vpop.xlane.xlu1 %671  ;;  %v669_v28 = vpop.xlane.xlu0 %668  ;;  %v1089_v27 = vmin.f32 %v1087_v53, %v1020_v49  ;;  %v1051_v2 = vmin.f32 %v1049_v19, %v1017_v8  ;;  %v1088_v48 = vmin.f32 %v1086_v41, %v1018_v42  ;;  %v5300_v8 = vld [vmem:[#allocation8 + $0x138] sm:$0xff] }
 0x14c   : > { %v1430_v10 = vadd.f32 %v4942_v17, %v1429_v29  ;;  %vm864_vm13 = vcmp.lt.f32.partialorder %v672_v56, -1.5  ;;  %vm863_vm14 = vcmp.lt.f32.partialorder %v669_v28, -1.5  ;;  %v1784_v42 = vmul.f32 %v5300_v8, %v6645_v31  ;;  %v5301_v28 = vld [vmem:[#allocation8 + $0x150] sm:$0xff]  ;;  %v5305_v8 = vld [vmem:[#allocation8 + $0x178] sm:$0xff] }
 0x14d   : > { %v1023_v63 = vsel %vm864_vm13, %v7123_v35, 1e+30  ;;  %v1024_v14 = vsel %vm864_vm13, %v7125_v58, 1e+30  ;;  %v1021_v4 = vsel %vm863_vm14, %v7133_v18, 1e+30 }
 0x14e   : > { %v1054_v16 = vmin.f32 %v1052_v9, %v1023_v63  ;;  %v1091_v54 = vmin.f32 %v1089_v27, %v1024_v14  ;;  %v1431_v15 = vadd.f32 %v4943_v57, %v1430_v10  ;;  %1810 = vadd.xlane.f32.xlu0 %v6703_v45  ;;  %1813 = vadd.xlane.f32.xlu1 %v6705_v13  ;;  %v1022_v29 = vsel %vm863_vm14, %v7135_v0, 1e+30  ;;  %v11373_v0 = vld [vmem:[#allocation66_spill] sm:$0xff] }
 0x14f   : > { %v1053_v53 = vmin.f32 %v1051_v2, %v1021_v4  ;;  %v4944_v41 = vsel %vm863_vm14, 1.0, %v11281_v62  ;;  %v742_v49 = vpop.xlane.xlu1 %741  ;;  %v739_v19 = vpop.xlane.xlu0 %738  ;;  %v1090_v17 = vmin.f32 %v1088_v48, %v1022_v29  ;;  %v4945_v57 = vsel %vm864_vm13, 1.0, %v11281_v62  ;;  %v5303_v29 = vld [vmem:[#allocation8 + $0x120] sm:$0xff] }
 0x150   : > { %v1432_v9 = vadd.f32 %v4944_v41, %v1431_v15  ;;  %vm866_vm15 = vcmp.lt.f32.partialorder %v742_v49, -1.5  ;;  %vm865_vm0 = vcmp.lt.f32.partialorder %v739_v19, -1.5  ;;  %v1787_v4 = vmul.f32 %v5301_v28, %v6636_v55  ;;  %v5302_v15 = vld [vmem:[#allocation8 + $0x158] sm:$0xff]  ;;  %v5304_v41 = vld [vmem:[#allocation8 + $0x170] sm:$0xff] }
 0x151   : > { %v1055_v45 = vmin.f32 %v1053_v53, %v1054_v16  ;;  %v4947_v13 = vsel %vm866_vm15, 1.0, %v11281_v62  ;;  %v1092_v27 = vmin.f32 %v1090_v17, %v1091_v54  ;;  %v1788_v2 = vmul.f32 %v5302_v15, %v6645_v31  ;;  %v11369_v49 = vld [vmem:[#allocation49_spill] sm:$0xff] }
 0x152   : > { %v7152_v10 = vadd.f32 %v4945_v57, %v1432_v9  ;;  %1816 = vadd.xlane.f32.xlu0 %v6707_v7  ;;  %1819 = vadd.xlane.f32.xlu1 %v6711_v50  ;;  %v4946_v56 = vsel %vm865_vm0, 1.0, %v11281_v62  ;;  %v7160_v16 = vadd.f32 %v1784_v42, %v6965_v5  ;;  %v7163_v54 = vmul.f32 %v5303_v29, %v6636_v55  ;;  %v5306_v57 = vld [vmem:[#allocation8 + $0x128] sm:$0xff]  ;;  %v5307_v5 = vld [vmem:[#allocation8 + $0x140] sm:$0xff] }
 0x153   : > { %v1056_v48 = vrot.slane %v1055_v45, 4  ;;  %v748_v63 = vpop.xlane.xlu1 %747  ;;  %v745_v14 = vpop.xlane.xlu0 %744  ;;  %v1093_v53 = vrot.slane %v1092_v27, 4  ;;  %v1488_v7 = vadd.f32 %v4947_v13, %v4946_v56  ;;  %v1791_v50 = vmul.f32 %v5304_v41, %v6636_v55  ;;  %v5308_v56 = vld [vmem:[#allocation8 + $0x190] sm:$0xff]  ;;  %v5309_v41 = vld [vmem:[#allocation8 + $0x198] sm:$0xff] }
 0x154   : > { %11363 = vst [vmem:[#allocation59_spill] sm:$0xff] %v7152_v10  ;;  %11364 = vst [vmem:[#allocation77_spill] sm:$0xff] %v7163_v54  ;;  %v1792_v17 = vmul.f32 %v5305_v8, %v6645_v31  ;;  %vm868_vm2 = vcmp.lt.f32.partialorder %v748_v63, -1.5  ;;  %v7168_v28 = vmul.f32 %v5306_v57, %v6645_v31  ;;  %v7171_v42 = vmul.f32 %v5307_v5, %v6636_v55  ;;  %v11368_v10 = vld [vmem:[#allocation46_spill] sm:$0xff]  ;;  %v11370_v54 = vld [vmem:[#allocation65_spill] sm:$0xff] }
 0x155   : > { %v1057_v9 = vmin.f32 %v1055_v45, %v1056_v48  ;;  %v1094_v15 = vmin.f32 %v1092_v27, %v1093_v53  ;;  %v7174_v13 = vadd.f32 %v1788_v2, %v1787_v4  ;;  %v1795_v29 = vmul.f32 %v5308_v56, %v6636_v55  ;;  %v11367_v2 = vld [vmem:[#allocation47_spill] sm:$0xff] }
 0x156   : > { %11365 = vst [vmem:[#allocation78_spill] sm:$0xff] %v7168_v28  ;;  %11366 = vst [vmem:[#allocation79_spill] sm:$0xff] %v7171_v42  ;;  %1822 = vadd.xlane.f32.xlu0 %v6713_v46  ;;  %v1796_v45 = vmul.f32 %v5309_v41, %v6645_v31  ;;  %v1165_v8 = vsel %vm866_vm15, %v6773_v38, 1e+30  ;;  %v1166_v57 = vsel %vm866_vm15, %v6779_v60, 1e+30  ;;  %1825 = vadd.xlane.f32.xlu1 %v6715_v26 }
 0x157   : > { %v1058_v48 = vrot.slane %v1057_v9, 2  ;;  %vm867_vm3 = vcmp.lt.f32.partialorder %v745_v14, -1.5  ;;  %v754_v5 = vpop.xlane.xlu1 %753  ;;  %v751_v27 = vpop.xlane.xlu0 %750  ;;  %v1095_v46 = vrot.slane %v1094_v15, 2  ;;  %v1163_v4 = vsel %vm865_vm0, %v6727_v30, 1e+30 }
 0x158   : > { %v1169_v53 = vsel %vm868_vm2, %v11367_v2, 1e+30  ;;  %v7187_v56 = vadd.f32 %v1792_v17, %v1791_v50  ;;  %v1164_v38 = vsel %vm865_vm0, %v11368_v10, 1e+30  ;;  %v1170_v60 = vsel %vm868_vm2, %v11369_v49, 1e+30 }
 0x159   : > { %v1059_v41 = vmin.f32 %v1057_v9, %v1058_v48  ;;  %v4948_v42 = vsel %vm867_vm3, 1.0, %v11281_v62  ;;  %v1096_v26 = vmin.f32 %v1094_v15, %v1095_v46  ;;  %vm870_vm4 = vcmp.lt.f32.partialorder %v754_v5, -1.5  ;;  %v11371_v17 = vld [vmem:[#allocation67_spill] sm:$0xff]  ;;  %v11372_v10 = vld [vmem:[#allocation45_spill] sm:$0xff]  ;;  %v11374_v15 = vld [vmem:[#allocation70_spill] sm:$0xff] }
 0x15a   : > { %v1489_v28 = vadd.f32 %v4948_v42, %v1488_v7  ;;  %1828 = vadd.xlane.f32.xlu0 %v11370_v54  ;;  %v7196_v30 = vadd.f32 %v1796_v45, %v1795_v29  ;;  %v1228_v2 = vmin.f32 %v1165_v8, %v1169_v53  ;;  %v4949_v50 = vsel %vm868_vm2, 1.0, %v11281_v62  ;;  %1831 = vadd.xlane.f32.xlu1 %v11373_v0  ;;  %v11375_v53 = vld [vmem:[#allocation19_spill] sm:$0xff]  ;;  %v5310_v0 = vld [vmem:[#allocation8 + $0x1b0] sm:$0xff] }
 0x15b   : > { %v1167_v19 = vsel %vm867_vm3, %v11371_v17, 1e+30  ;;  %v1168_v9 = vsel %vm867_vm3, %v11372_v10, 1e+30  ;;  %v760_v48 = vpop.xlane.xlu1 %759  ;;  %v757_v49 = vpop.xlane.xlu0 %756  ;;  %v1060_v7 = vrot.slane %v1059_v41, 1  ;;  %v1265_v42 = vmin.f32 %v1166_v57, %v1170_v60  ;;  %v11376_v10 = vld [vmem:[#allocation20_spill] sm:$0xff] }
 0x15c   : > { %v1173_v54 = vsel %vm870_vm4, %v11374_v15, 1e+30  ;;  %v1174_v29 = vsel %vm870_vm4, %v6810_v39, 1e+30  ;;  %v1097_v63 = vrot.slane %v1096_v26, 1  ;;  %v1490_v45 = vadd.f32 %v4949_v50, %v1489_v28 }
 0x15d   : > { %vm869_vm5 = vcmp.lt.f32.partialorder %v751_v27, -1.5  ;;  %vm872_vm6 = vcmp.lt.f32.partialorder %v760_v48, -1.5  ;;  %v1227_v8 = vmin.f32 %v1163_v4, %v1167_v19  ;;  %v1264_v46 = vmin.f32 %v1164_v38, %v1168_v9  ;;  %v11377_v38 = vld [vmem:[#allocation44_spill] sm:$0xff] }
 0x15e   : > { %v4951_v14 = vsel %vm870_vm4, 1.0, %v11281_v62  ;;  %1834 = vadd.xlane.f32.xlu0 %v11375_v53  ;;  %v7213_v57 = vmul.f32 %v5310_v0, %v6636_v55  ;;  %v1230_v60 = vmin.f32 %v1228_v2, %v1173_v54  ;;  %v1267_v17 = vmin.f32 %v1265_v42, %v1174_v29  ;;  %1837 = vadd.xlane.f32.xlu1 %v11377_v38  ;;  %v11378_v19 = vld [vmem:[#allocation24_spill] sm:$0xff]  ;;  %v11379_v54 = vld [vmem:[#allocation25_spill] sm:$0xff] }
 0x15f   : > { %v1171_v39 = vsel %vm869_vm5, %v11376_v10, 1e+30  ;;  %v4950_v28 = vsel %vm869_vm5, 1.0, %v11281_v62  ;;  %v766_v50 = vpop.xlane.xlu1 %765  ;;  %v763_v4 = vpop.xlane.xlu0 %762  ;;  %v7220_v5 = vmin.f32 %v1059_v41, %v1060_v7  ;;  %v1172_v9 = vsel %vm869_vm5, %v11378_v19, 1e+30 }
 0x160   : > { %v1491_v15 = vadd.f32 %v4950_v28, %v1490_v45  ;;  %v1177_v2 = vsel %vm872_vm6, %v6826_v47, 1e+30  ;;  %v7226_v42 = vmin.f32 %v1096_v26, %v1097_v63  ;;  %v1178_v29 = vsel %vm872_vm6, %v11379_v54, 1e+30  ;;  %v11380_v45 = vld [vmem:[#allocation23_spill] sm:$0xff]  ;;  %v11381_v26 = vld [vmem:[#allocation48_spill] sm:$0xff] }
 0x161   : > { %vm871_vm7 = vcmp.lt.f32.partialorder %v757_v49, -1.5  ;;  %vm874_vm8 = vcmp.lt.f32.partialorder %v766_v50, -1.5  ;;  %v1229_v53 = vmin.f32 %v1227_v8, %v1171_v39  ;;  %vm873_vm9 = vcmp.lt.f32.partialorder %v763_v4, -1.5  ;;  %v11382_v8 = vld [vmem:[#allocation28_spill] sm:$0xff] }
 0x162   : > { %v1492_v0 = vadd.f32 %v4951_v14, %v1491_v15  ;;  %v4952_v10 = vsel %vm871_vm7, 1.0, %v11281_v62  ;;  %v1266_v41 = vmin.f32 %v1264_v46, %v1172_v9  ;;  %v1232_v7 = vmin.f32 %v1230_v60, %v1177_v2  ;;  %1843 = vadd.xlane.f32.xlu1 %v11381_v26  ;;  %v11383_v60 = vld [vmem:[#allocation75_spill] sm:$0xff]  ;;  %v11384_v2 = vld [vmem:[#allocation29_spill] sm:$0xff] }
 0x163   : > { %v1175_v27 = vsel %vm871_vm7, %v6846_v6, 1e+30  ;;  %v1176_v28 = vsel %vm871_vm7, %v11380_v45, 1e+30  ;;  %v772_v38 = vpop.xlane.xlu1 %771  ;;  %v769_v47 = vpop.xlane.xlu0 %768  ;;  %v1269_v63 = vmin.f32 %v1267_v17, %v1178_v29  ;;  %v4953_v49 = vsel %vm872_vm6, 1.0, %v11281_v62  ;;  %v11385_v29 = vld [vmem:[#allocation26_spill] sm:$0xff] }
 0x164   : > { %v1493_v19 = vadd.f32 %v4952_v10, %v1492_v0  ;;  %v1181_v14 = vsel %vm874_vm8, %v11382_v8, 1e+30  ;;  %v1182_v46 = vsel %vm874_vm8, %v6875_v34, 1e+30  ;;  %v1179_v6 = vsel %vm873_vm9, %v11383_v60, 1e+30 }
 0x165   : > { %v4954_v39 = vsel %vm873_vm9, 1.0, %v11281_v62  ;;  %vm876_vm10 = vcmp.lt.f32.partialorder %v772_v38, -1.5  ;;  %v1231_v9 = vmin.f32 %v1229_v53, %v1175_v27  ;;  %v1268_v15 = vmin.f32 %v1266_v41, %v1176_v28  ;;  %v11386_v10 = vld [vmem:[#allocation27_spill] sm:$0xff] }
 0x166   : > { %v1494_v17 = vadd.f32 %v4953_v49, %v1493_v19  ;;  %v1180_v48 = vsel %vm873_vm9, %v11384_v2, 1e+30  ;;  %v1234_v54 = vmin.f32 %v1232_v7, %v1181_v14  ;;  %v1185_v0 = vsel %vm876_vm10, %v11385_v29, 1e+30  ;;  %v11387_v8 = vld [vmem:[#allocation43_spill] sm:$0xff] }
 0x167   : > { %v1186_v34 = vsel %vm876_vm10, %v11386_v10, 1e+30  ;;  %vm875_vm11 = vcmp.lt.f32.partialorder %v769_v47, -1.5  ;;  %v778_v45 = vpop.xlane.xlu1 %777  ;;  %v775_v26 = vpop.xlane.xlu0 %774  ;;  %1849 = vadd.xlane.f32.xlu1 %v11387_v8  ;;  %v1271_v60 = vmin.f32 %v1269_v63, %v1182_v46  ;;  %v4955_v53 = vsel %vm874_vm8, 1.0, %v11281_v62  ;;  %v11389_v10 = vld [vmem:[#allocation33_spill] sm:$0xff] }
 0x168   : > { %v1233_v41 = vmin.f32 %v1231_v9, %v1179_v6  ;;  %v1495_v27 = vadd.f32 %v4954_v39, %v1494_v17  ;;  %v1270_v4 = vmin.f32 %v1268_v15, %v1180_v48  ;;  %v1183_v7 = vsel %vm875_vm11, %v6909_v20, 1e+30  ;;  %v11388_v20 = vld [vmem:[#allocation22_spill] sm:$0xff] }
 0x169   : > { %v4956_v28 = vsel %vm875_vm11, 1.0, %v11281_v62  ;;  %vm878_vm12 = vcmp.lt.f32.partialorder %v778_v45, -1.5  ;;  %v1236_v49 = vmin.f32 %v1234_v54, %v1185_v0  ;;  %v1273_v19 = vmin.f32 %v1271_v60, %v1186_v34  ;;  %v11391_v45 = vld [vmem:[#allocation31_spill] sm:$0xff] }
 0x16a   : > { %v4957_v14 = vsel %vm876_vm10, 1.0, %v11281_v62  ;;  %v1496_v2 = vadd.f32 %v4955_v53, %v1495_v27  ;;  %v1184_v50 = vsel %vm875_vm11, %v6917_v61, 1e+30  ;;  %v1189_v63 = vsel %vm878_vm12, %v6919_v37, 1e+30 }
 0x16b   : > { %vm877_vm13 = vcmp.lt.f32.partialorder %v775_v26, -1.5  ;;  %v784_v46 = vpop.xlane.xlu1 %783  ;;  %v781_v6 = vpop.xlane.xlu0 %780  ;;  %5259 = vrsqrt.f32 %v7220_v5  ;;  %1855 = vadd.xlane.f32.xlu1 %v11388_v20  ;;  %v1235_v39 = vmin.f32 %v1233_v41, %v1183_v7  ;;  %v1190_v38 = vsel %vm878_vm12, %v6927_v44, 1e+30  ;;  %v11390_v26 = vld [vmem:[#allocation32_spill] sm:$0xff] }
 0x16c   : > { %v1497_v9 = vadd.f32 %v4956_v28, %v1496_v2  ;;  %v1187_v15 = vsel %vm877_vm13, %v6933_v59, 1e+30  ;;  %v1188_v47 = vsel %vm877_vm13, %v6935_v1, 1e+30  ;;  %v4958_v61 = vsel %vm877_vm13, 1.0, %v11281_v62 }
 0x16d   : > { %vm880_vm14 = vcmp.lt.f32.partialorder %v784_v46, -1.5  ;;  %vm879_vm15 = vcmp.lt.f32.partialorder %v781_v6, -1.5  ;;  %v1272_v37 = vmin.f32 %v1270_v4, %v1184_v50  ;;  %v1238_v17 = vmin.f32 %v1236_v49, %v1189_v63  ;;  %v11392_v63 = vld [vmem:[#allocation34_spill] sm:$0xff]  ;;  %v11393_v6 = vld [vmem:[#allocation35_spill] sm:$0xff] }
 0x16e   : > { %v4959_v48 = vsel %vm878_vm12, 1.0, %v11281_v62  ;;  %v1498_v54 = vadd.f32 %v4957_v14, %v1497_v9  ;;  %v1275_v29 = vmin.f32 %v1273_v19, %v1190_v38  ;;  %v1193_v0 = vsel %vm880_vm14, %v6946_v33, 1e+30 }
 0x16f   : > { %v1194_v44 = vsel %vm880_vm14, %v11389_v10, 1e+30  ;;  %v1191_v1 = vsel %vm879_vm15, %v6960_v12, 1e+30  ;;  %v790_v59 = vpop.xlane.xlu1 %789  ;;  %v787_v34 = vpop.xlane.xlu0 %786  ;;  %1861 = vadd.xlane.f32.xlu1 %v11390_v26  ;;  %v1237_v8 = vmin.f32 %v1235_v39, %v1187_v15  ;;  %v1274_v60 = vmin.f32 %v1272_v37, %v1188_v47  ;;  %v11394_v39 = vld [vmem:[#allocation76_spill] sm:$0xff] }
 0x170   : > { %v1499_v53 = vadd.f32 %v4958_v61, %v1498_v54  ;;  %v1192_v41 = vsel %vm879_vm15, %v11391_v45, 1e+30  ;;  %v4961_v27 = vsel %vm880_vm14, 1.0, %v11281_v62  ;;  %v4960_v33 = vsel %vm879_vm15, 1.0, %v11281_v62 }
 0x171   : > { %vm882_vm0 = vcmp.lt.f32.partialorder %v790_v59, -1.5  ;;  %vm881_vm2 = vcmp.lt.f32.partialorder %v787_v34, -1.5  ;;  %v1240_v4 = vmin.f32 %v1238_v17, %v1193_v0  ;;  %v1277_v12 = vmin.f32 %v1275_v29, %v1194_v44  ;;  %v11395_v44 = vld [vmem:[#allocation51_spill] sm:$0xff]  ;;  %v11396_v59 = vld [vmem:[#allocation36_spill] sm:$0xff] }
 0x172   : > { %v1500_v7 = vadd.f32 %v4959_v48, %v1499_v53  ;;  %v1239_v28 = vmin.f32 %v1237_v8, %v1191_v1  ;;  %v1276_v49 = vmin.f32 %v1274_v60, %v1192_v41  ;;  %v1197_v19 = vsel %vm882_vm0, %v6973_v22, 1e+30 }
 0x173   : > { %v796_v14 = vpop.xlane.xlu1 %795  ;;  %v793_v2 = vpop.xlane.xlu0 %792  ;;  %vm1303_vm3 = vcmp.eq.f32.partialorder %v7220_v5, inf  ;;  %vm1305_vm4 = vcmp.eq.f32.partialorder %v7220_v5, 0.0  ;;  %1867 = vadd.xlane.f32.xlu1 %v7160_v16  ;;  %v1198_v46 = vsel %vm882_vm0, %v11392_v63, 1e+30  ;;  %v1195_v20 = vsel %vm881_vm2, %v11393_v6, 1e+30 }
 0x174   : > { %v1501_v50 = vadd.f32 %v4960_v33, %v1500_v7  ;;  %v1196_v9 = vsel %vm881_vm2, %v11394_v39, 1e+30  ;;  %v4962_v22 = vsel %vm881_vm2, 1.0, %v11281_v62  ;;  %vm884_vm5 = vcmp.lt.f32.partialorder %v796_v14, -1.5  ;;  %v5311_v39 = vld [vmem:[#allocation8 + $0x1b8] sm:$0xff] }
 0x175   : > { %vm883_vm6 = vcmp.lt.f32.partialorder %v793_v2, -1.5  ;;  %5261 = vrsqrt.f32 %v7226_v42  ;;  %v1242_v38 = vmin.f32 %v1240_v4, %v1197_v19  ;;  %v4963_v16 = vsel %vm882_vm0, 1.0, %v11281_v62  ;;  %v11398_v2 = vld [vmem:[#allocation61_spill] sm:$0xff] }
 0x176   : > { %v1502_v15 = vadd.f32 %v4961_v27, %v1501_v50  ;;  %v1201_v47 = vsel %vm884_vm5, %v6989_v25, 1e+30  ;;  %v1279_v61 = vmin.f32 %v1277_v12, %v1198_v46  ;;  %v1241_v37 = vmin.f32 %v1239_v28, %v1195_v20 }
 0x177   : > { %v1278_v17 = vmin.f32 %v1276_v49, %v1196_v9  ;;  %v1202_v48 = vsel %vm884_vm5, %v7001_v36, 1e+30  ;;  %v802_v54 = vpop.xlane.xlu1 %801  ;;  %v799_v29 = vpop.xlane.xlu0 %798  ;;  %1873 = vadd.xlane.f32.xlu1 %v7174_v13  ;;  %v1199_v1 = vsel %vm883_vm6, %v11395_v44, 1e+30  ;;  %v1200_v34 = vsel %vm883_vm6, %v11396_v59, 1e+30 }
 0x178   : > { %v5260_v0 = vpop.eup %5259  ;;  %v1503_v10 = vadd.f32 %v4962_v22, %v1502_v15  ;;  %v1306_v25 = vand.u32 2147483648, %v7220_v5  ;;  %v1244_v26 = vmin.f32 %v1242_v38, %v1201_v47  ;;  %v4965_v8 = vsel %vm884_vm5, 1.0, %v11281_v62  ;;  %v11397_v49 = vld [vmem:[#allocation52_spill] sm:$0xff]  ;;  %v11400_v38 = vld [vmem:[#allocation37_spill] sm:$0xff] }
 0x179   : > { %v4964_v36 = vsel %vm883_vm6, 1.0, %v11281_v62  ;;  %v1302_v60 = vmul.f32 %v5260_v0, %v7220_v5  ;;  %v1281_v13 = vmin.f32 %v1279_v61, %v1202_v48  ;;  %vm886_vm7 = vcmp.lt.f32.partialorder %v802_v54, -1.5 }
 0x17a   : > { %v1504_v53 = vadd.f32 %v4963_v16, %v1503_v10  ;;  %vm885_vm8 = vcmp.lt.f32.partialorder %v799_v29, -1.5  ;;  %v1243_v45 = vmin.f32 %v1241_v37, %v1199_v1  ;;  %v1280_v41 = vmin.f32 %v1278_v17, %v1200_v34 }
 0x17b   : > { %v1304_v27 = vsel %vm1303_vm3, %v7220_v5, %v1302_v60  ;;  %v1313_v33 = vand.u32 2147483648, %v7226_v42  ;;  %v808_v4 = vpop.xlane.xlu1 %807  ;;  %v805_v12 = vpop.xlane.xlu0 %804  ;;  %1879 = vadd.xlane.f32.xlu1 %v7187_v56  ;;  %vm1310_vm9 = vcmp.eq.f32.partialorder %v7226_v42, inf  ;;  %v1205_v19 = vsel %vm886_vm7, %v11397_v49, 1e+30  ;;  %v11399_v56 = vld [vmem:[#allocation53_spill] sm:$0xff]  ;;  %v11404_v49 = vld [vmem:[#allocation62_spill] sm:$0xff] }
 0x17c   : > { %v1505_v7 = vadd.f32 %v4964_v36, %v1504_v53  ;;  %v1307_v28 = vsel %vm1305_vm4, %v1306_v25, %v1304_v27  ;;  %v1206_v14 = vsel %vm886_vm7, %v7015_v21, 1e+30  ;;  %vm1312_vm10 = vcmp.eq.f32.partialorder %v7226_v42, 0.0 }
 0x17d   : > { %v1315_v50 = vmul.f32 %v1307_v28, %v11398_v2  ;;  %v1203_v63 = vsel %vm885_vm8, %v7027_v24, 1e+30  ;;  %v1204_v46 = vsel %vm885_vm8, %v11399_v56, 1e+30  ;;  %v4966_v5 = vsel %vm885_vm8, 1.0, %v11281_v62  ;;  %v11401_v24 = vld [vmem:[#allocation38_spill] sm:$0xff] }
 0x17e   : > { %v4967_v6 = vsel %vm886_vm7, 1.0, %v11281_v62  ;;  %v1506_v20 = vadd.f32 %v4965_v8, %v1505_v7  ;;  %vm888_vm11 = vcmp.lt.f32.partialorder %v808_v4, -1.5  ;;  %v1800_v21 = vmul.f32 %v5311_v39, %v6645_v31 }
 0x17f   : > { %v1246_v9 = vmin.f32 %v1244_v26, %v1205_v19  ;;  %v1283_v22 = vmin.f32 %v1281_v13, %v1206_v14  ;;  %v1209_v16 = vsel %vm888_vm11, %v11400_v38, 1e+30  ;;  %v1210_v15 = vsel %vm888_vm11, %v11401_v24, 1e+30  ;;  %v814_v47 = vpop.xlane.xlu1 %813  ;;  %v811_v61 = vpop.xlane.xlu0 %810  ;;  %1885 = vadd.xlane.f32.xlu1 %v7196_v30  ;;  %v11402_v13 = vld [vmem:[#allocation39_spill] sm:$0xff] }
 0x180   : > { %v1245_v37 = vmin.f32 %v1243_v45, %v1203_v63  ;;  %v1282_v17 = vmin.f32 %v1280_v41, %v1204_v46  ;;  %v1507_v48 = vadd.f32 %v4966_v5, %v1506_v20  ;;  %vm887_vm12 = vcmp.lt.f32.partialorder %v805_v12, -1.5  ;;  %v11403_v41 = vld [vmem:[#allocation40_spill] sm:$0xff] }
 0x181   : > { %v1318_v54 = vsel %vm11049_vm1, %v1315_v50, 0.0  ;;  %v1207_v29 = vsel %vm887_vm12, %v7041_v3, 1e+30  ;;  %v4968_v0 = vsel %vm887_vm12, 1.0, %v11281_v62  ;;  %vm890_vm13 = vcmp.lt.f32.partialorder %v814_v47, -1.5 }
 0x182   : > { %v5262_v10 = vpop.eup %5261  ;;  %v1248_v44 = vmin.f32 %v1246_v9, %v1209_v16  ;;  %v1285_v1 = vmin.f32 %v1283_v22, %v1210_v15  ;;  %v4969_v59 = vsel %vm888_vm11, 1.0, %v11281_v62  ;;  %v1508_v34 = vadd.f32 %v4967_v6, %v1507_v48  ;;  %v11405_v22 = vld [vmem:[#allocation54_spill] sm:$0xff]  ;;  %v11406_v16 = vld [vmem:[#allocation55_spill] sm:$0xff] }
 0x183   : > { %v1309_v30 = vmul.f32 %v5262_v10, %v7226_v42  ;;  %v1208_v25 = vsel %vm887_vm12, %v7053_v11, 1e+30  ;;  %v1247_v26 = vmin.f32 %v1245_v37, %v1207_v29  ;;  %v1213_v8 = vsel %vm890_vm13, %v7057_v51, 1e+30  ;;  %v820_v36 = vpop.xlane.xlu1 %819  ;;  %v817_v3 = vpop.xlane.xlu0 %816 }
 0x184   : > { %v1509_v60 = vadd.f32 %v4968_v0, %v1508_v34  ;;  %v1214_v53 = vsel %vm890_vm13, %v11402_v13, 1e+30  ;;  %vm889_vm14 = vcmp.lt.f32.partialorder %v811_v61, -1.5  ;;  %vm892_vm15 = vcmp.lt.f32.partialorder %v820_v36, -1.5  ;;  %v11407_v0 = vld [vmem:[#allocation56_spill] sm:$0xff] }
 0x185   : > { %v1311_v45 = vsel %vm1310_vm9, %v7226_v42, %v1309_v30  ;;  %v1211_v27 = vsel %vm889_vm14, %v11403_v41, 1e+30  ;;  %v1212_v11 = vsel %vm889_vm14, %v7067_v23, 1e+30  ;;  %v4970_v4 = vsel %vm889_vm14, 1.0, %v11281_v62  ;;  %v11412_v41 = vld [vmem:[#allocation58_spill] sm:$0xff] }
 0x186   : > { %v1314_v51 = vsel %vm1312_vm10, %v1313_v33, %v1311_v45  ;;  %v1284_v12 = vmin.f32 %v1282_v17, %v1208_v25  ;;  %v1250_v7 = vmin.f32 %v1248_v44, %v1213_v8  ;;  %v1510_v28 = vadd.f32 %v4969_v59, %v1509_v60  ;;  %v11408_v44 = vld [vmem:[#allocation57_spill] sm:$0xff] }
 0x187   : > { %v1316_v19 = vmul.f32 %v1314_v51, %v11404_v49  ;;  %v1287_v14 = vmin.f32 %v1285_v1, %v1214_v53  ;;  %v4971_v2 = vsel %vm890_vm13, 1.0, %v11281_v62  ;;  %v1249_v50 = vmin.f32 %v1247_v26, %v1211_v27  ;;  %v826_v63 = vpop.xlane.xlu1 %825  ;;  %v823_v56 = vpop.xlane.xlu0 %822  ;;  %v11411_v26 = vld [vmem:[#allocation50_spill] sm:$0xff]  ;;  %v5313_v49 = vld [vmem:[#allocation8 + $0x160] sm:$0xff] }
 0x188   : > { %v1286_v46 = vmin.f32 %v1284_v12, %v1212_v11  ;;  %v1511_v5 = vadd.f32 %v4970_v4, %v1510_v28  ;;  %v1217_v23 = vsel %vm892_vm15, %v7081_v40, 1e+30  ;;  %vm891_vm0 = vcmp.lt.f32.partialorder %v817_v3, -1.5 }
 0x189   : > { %v1319_v42 = vsel %vm11049_vm1, %v1316_v19, 0.0  ;;  %v1218_v33 = vsel %vm892_vm15, %v7083_v32, 1e+30  ;;  %v4973_v6 = vsel %vm892_vm15, 1.0, %v11281_v62  ;;  %v4972_v20 = vsel %vm891_vm0, 1.0, %v11281_v62  ;;  %v5314_v19 = vld [vmem:[#allocation8 + $0x168] sm:$0xff] }
 0x18a   : > { %v1320_v39 = vadd.f32 %v1319_v42, %v1318_v54  ;;  %v1512_v9 = vadd.f32 %v4971_v2, %v1511_v5  ;;  %v1215_v38 = vsel %vm891_vm0, %v11405_v22, 1e+30  ;;  %v1216_v24 = vsel %vm891_vm0, %v11406_v16, 1e+30  ;;  %v5319_v22 = vld [vmem:[#allocation8 + $0x1c0] sm:$0xff] }
 0x18b   : > { %v1252_v15 = vmin.f32 %v1250_v7, %v1217_v23  ;;  %vm894_vm2 = vcmp.lt.f32.partialorder %v826_v63, -1.5  ;;  %vm893_vm3 = vcmp.lt.f32.partialorder %v823_v56, -1.5  ;;  %v832_v40 = vpop.xlane.xlu1 %831  ;;  %v829_v47 = vpop.xlane.xlu0 %828  ;;  %v1890_v61 = vadd.f32 %v1800_v21, %v7213_v57  ;;  %v5312_v7 = vld [vmem:[#allocation8 + $0x148] sm:$0xff]  ;;  %v11415_v63 = vld [vmem:[#allocation21_spill] sm:$0xff] }
 0x18c   : > { %1321 = vadd.xlane.f32.xlu0 %v1320_v39  ;;  %v1289_v32 = vmin.f32 %v1287_v14, %v1218_v33  ;;  %v1513_v37 = vadd.f32 %v4972_v20, %v1512_v9  ;;  %v1221_v17 = vsel %vm894_vm2, %v7099_v43, 1e+30  ;;  %v1222_v48 = vsel %vm894_vm2, %v7101_v52, 1e+30  ;;  %v5316_v23 = vld [vmem:[#allocation8 + $0x188] sm:$0xff] }
 0x18d   : > { %v1251_v54 = vmin.f32 %v1249_v50, %v1215_v38  ;;  %v1288_v29 = vmin.f32 %v1286_v46, %v1216_v24  ;;  %v1219_v10 = vsel %vm893_vm3, %v11407_v0, 1e+30  ;;  %v1220_v1 = vsel %vm893_vm3, %v11408_v44, 1e+30  ;;  %1891 = vadd.xlane.f32.xlu1 %v1890_v61  ;;  %v5318_v39 = vld [vmem:[#allocation8 + $0x1a8] sm:$0xff]  ;;  %v5321_v0 = vld [vmem:[#allocation8 + $0x1e0] sm:$0xff] }
 0x18e   : > { %v1254_v59 = vmin.f32 %v1252_v15, %v1221_v17  ;;  %v4975_v57 = vsel %vm894_vm2, 1.0, %v11281_v62  ;;  %v1514_v21 = vadd.f32 %v4973_v6, %v1513_v37  ;;  %v4974_v43 = vsel %vm893_vm3, 1.0, %v11281_v62  ;;  %v5317_v6 = vld [vmem:[#allocation8 + $0x1a0] sm:$0xff]  ;;  %v11418_v37 = vld [vmem:[#allocation78_spill] sm:$0xff]  ;;  %v5322_v44 = vld [vmem:[#allocation8 + $0x1e8] sm:$0xff] }
 0x18f   : > { %v1291_v34 = vmin.f32 %v1289_v32, %v1222_v48  ;;  %v1253_v30 = vmin.f32 %v1251_v54, %v1219_v10  ;;  %vm896_vm4 = vcmp.lt.f32.partialorder %v832_v40, -1.5  ;;  %vm895_vm5 = vcmp.lt.f32.partialorder %v829_v47, -1.5  ;;  %v7389_v52 = vpop.xlane.xlu1 %1364  ;;  %v7391_v25 = vpop.xlane.xlu0 %1359  ;;  %v5320_v47 = vld [vmem:[#allocation8 + $0x1c8] sm:$0xff]  ;;  %v11417_v32 = vld [vmem:[#allocation77_spill] sm:$0xff]  ;;  %v11419_v17 = vld [vmem:[#allocation79_spill] sm:$0xff] }
 0x190   : > { %11409 = vst [vmem:[#allocation47_spill] sm:$0xff] %v7389_v52  ;;  %11410 = vst [vmem:[#allocation46_spill] sm:$0xff] %v7391_v25  ;;  %1840 = vadd.xlane.f32.xlu0 %v11411_v26  ;;  %v1290_v8 = vmin.f32 %v1288_v29, %v1220_v1  ;;  %v1515_v36 = vadd.f32 %v4974_v43, %v1514_v21  ;;  %v1225_v3 = vsel %vm896_vm4, %v7123_v35, 1e+30  ;;  %v1226_v60 = vsel %vm896_vm4, %v7125_v58, 1e+30 }
 0x191   : > { %v1256_v13 = vmin.f32 %v1254_v59, %v1225_v3  ;;  %v1293_v53 = vmin.f32 %v1291_v34, %v1226_v60  ;;  %v1223_v45 = vsel %vm895_vm5, %v7133_v18, 1e+30  ;;  %v1224_v27 = vsel %vm895_vm5, %v11412_v41, 1e+30  ;;  %v5315_v18 = vld [vmem:[#allocation8 + $0x180] sm:$0xff]  ;;  %v11420_v59 = vld [vmem:[#allocation42_spill] sm:$0xff] }
 0x192   : > { %v1516_v11 = vadd.f32 %v4975_v57, %v1515_v36  ;;  %v1255_v4 = vmin.f32 %v1253_v30, %v1223_v45  ;;  %v1292_v51 = vmin.f32 %v1290_v8, %v1224_v27  ;;  %v4976_v12 = vsel %vm895_vm5, 1.0, %v11281_v62  ;;  %v5323_v8 = vld [vmem:[#allocation8 + $0x1d0] sm:$0xff] }
 0x193   : > { %v1786_v28 = vmul.f32 %v5312_v7, %v6645_v31  ;;  %v1789_v35 = vmul.f32 %v5313_v49, %v6636_v55  ;;  %v1790_v58 = vmul.f32 %v5314_v19, %v6645_v31  ;;  %v7404_v14 = vpop.xlane.xlu1 %1454  ;;  %v7406_v2 = vpop.xlane.xlu0 %1369  ;;  %v1793_v50 = vmul.f32 %v5315_v18, %v6636_v55  ;;  %v11421_v7 = vld [vmem:[#allocation30_spill] sm:$0xff] }
 0x194   : > { %11413 = vst [vmem:[#allocation49_spill] sm:$0xff] %v7404_v14  ;;  %11414 = vst [vmem:[#allocation65_spill] sm:$0xff] %v7406_v2  ;;  %1846 = vadd.xlane.f32.xlu0 %v11415_v63  ;;  %v1257_v56 = vmin.f32 %v1255_v4, %v1256_v13  ;;  %v1294_v46 = vmin.f32 %v1292_v51, %v1293_v53  ;;  %v1517_v5 = vadd.f32 %v4976_v12, %v1516_v11  ;;  %v5324_v11 = vld [vmem:[#allocation8 + $0x1d8] sm:$0xff]  ;;  %v5325_v51 = vld [vmem:[#allocation8 + $0x1f0] sm:$0xff] }
 0x195   : > { %v1794_v42 = vmul.f32 %v5316_v23, %v6645_v31  ;;  %v4977_v33 = vsel %vm896_vm4, 1.0, %v11281_v62  ;;  %v1797_v20 = vmul.f32 %v5317_v6, %v6636_v55  ;;  %v1798_v9 = vmul.f32 %v5318_v39, %v6645_v31  ;;  %v7451_v18 = vld [vmem:[#allocation7 + $0x18] sm:$0xff]  ;;  %v7458_v23 = vld [vmem:[#allocation7] sm:$0xff]  ;;  %v7590_v14 = vld [vmem:[#allocation7 + $0xf0] sm:$0xff] }
 0x196   : > { %v1801_v38 = vmul.f32 %v5319_v22, %v6636_v55  ;;  %v1258_v16 = vrot.slane %v1257_v56, 4  ;;  %v1295_v24 = vrot.slane %v1294_v46, 4  ;;  %v7416_v15 = vadd.f32 %v4977_v33, %v1517_v5  ;;  %v5328_v63 = vld [vmem:[#allocation8 + $0x1f8] sm:$0xff]  ;;  %v7462_v33 = vld [vmem:[#allocation7 + $0x30] sm:$0xff] }
 0x197   : > { %v1802_v61 = vmul.f32 %v5320_v47, %v6645_v31  ;;  %v1863_v40 = vadd.f32 %v11418_v37, %v11417_v32  ;;  %v7422_v48 = vadd.f32 %v1786_v28, %v11419_v17  ;;  %v1654_v54 = vpop.xlane.xlu1 %1653  ;;  %v1651_v29 = vpop.xlane.xlu0 %1650  ;;  %v1805_v10 = vmul.f32 %v5321_v0, %v6636_v55 }
 0x198   : > { %11416 = vst [vmem:[#allocation67_spill] sm:$0xff] %v7416_v15  ;;  %v1806_v1 = vmul.f32 %v5322_v44, %v6645_v31  ;;  %1852 = vadd.xlane.f32.xlu0 %v11420_v59  ;;  %v1259_v57 = vmin.f32 %v1257_v56, %v1258_v16  ;;  %v1296_v21 = vmin.f32 %v1294_v46, %v1295_v24  ;;  %vm1906_vm6 = vcmp.lt.f32.partialorder %v1654_v54, -1.5  ;;  %v7474_v16 = vld [vmem:[#allocation7 + $0x20] sm:$0xff]  ;;  %v7491_v59 = vld [vmem:[#allocation7 + $0x50] sm:$0xff]  ;;  %v7614_v15 = vld [vmem:[#allocation7 + $0x118] sm:$0xff] }
 0x199   : > { %v7427_v43 = vadd.f32 %v1790_v58, %v1789_v35  ;;  %v7429_v34 = vadd.f32 %v1794_v42, %v1793_v50  ;;  %v4981_v30 = vsel %vm1906_vm6, 1.0, %v11281_v62  ;;  %v7433_v26 = vadd.f32 %v1798_v9, %v1797_v20  ;;  %v7447_v35 = vld [vmem:[#allocation7 + $0x10] sm:$0xff]  ;;  %v7466_v20 = vld [vmem:[#allocation7 + $0x8] sm:$0xff]  ;;  %v7470_v9 = vld [vmem:[#allocation7 + $0x38] sm:$0xff]  ;;  %11424 = vst [vmem:[#allocation70_spill] sm:$0xff] %v7614_v15 }
 0x19a   : > { %v1803_v36 = vmul.f32 %v5323_v8, %v6636_v55  ;;  %v1260_v3 = vrot.slane %v1259_v57, 2  ;;  %v1297_v60 = vrot.slane %v1296_v21, 2  ;;  %vm1905_vm7 = vcmp.lt.f32.partialorder %v1651_v29, -1.5  ;;  %v7484_v29 = vld [vmem:[#allocation7 + $0x28] sm:$0xff] }
 0x19b   : > { %v7436_v13 = vadd.f32 %v1802_v61, %v1801_v38  ;;  %v4980_v53 = vsel %vm1905_vm7, 1.0, %v11281_v62  ;;  %v1660_v45 = vpop.xlane.xlu1 %1659  ;;  %v1657_v41 = vpop.xlane.xlu0 %1656  ;;  %v7440_v27 = vadd.f32 %v1806_v1, %v1805_v10  ;;  %v1804_v4 = vmul.f32 %v5324_v11, %v6645_v31 }
 0x19c   : > { %v7444_v12 = vmul.f32 %v5325_v51, %v6636_v55  ;;  %1858 = vadd.xlane.f32.xlu0 %v11421_v7  ;;  %v1261_v28 = vmin.f32 %v1259_v57, %v1260_v3  ;;  %v1298_v49 = vmin.f32 %v1296_v21, %v1297_v60  ;;  %v2035_v19 = vsel %vm1906_vm6, %v7447_v35, 1e+30  ;;  %v7496_v21 = vld [vmem:[#allocation7 + $0x58] sm:$0xff]  ;;  %v7505_v51 = vld [vmem:[#allocation7 + $0x40] sm:$0xff] }
 0x19d   : > { %v2476_v58 = vadd.f32 %v4981_v30, %v4980_v53  ;;  %v2036_v50 = vsel %vm1906_vm6, %v7451_v18, 1e+30  ;;  %vm1908_vm8 = vcmp.lt.f32.partialorder %v1660_v45, -1.5  ;;  %vm1907_vm9 = vcmp.lt.f32.partialorder %v1657_v41, -1.5 }
 0x19e   : > { %v7456_v56 = vmul.f32 %v5328_v63, %v6645_v31  ;;  %v1262_v46 = vrot.slane %v1261_v28, 1  ;;  %v1299_v5 = vrot.slane %v1298_v49, 1  ;;  %v2033_v42 = vsel %vm1905_vm7, %v7458_v23, 1e+30  ;;  %v7515_v63 = vld [vmem:[#allocation7 + $0x78] sm:$0xff] }
 0x19f   : > { %v2039_v6 = vsel %vm1908_vm8, %v7462_v33, 1e+30  ;;  %v2034_v39 = vsel %vm1905_vm7, %v7466_v20, 1e+30  ;;  %v2040_v22 = vsel %vm1908_vm8, %v7470_v9, 1e+30  ;;  %v1666_v47 = vpop.xlane.xlu1 %1665  ;;  %v1663_v61 = vpop.xlane.xlu0 %1662  ;;  %v7500_v53 = vadd.f32 %v1804_v4, %v1803_v36 }
 0x1a0   : > { %v2098_v38 = vmin.f32 %v2035_v19, %v2039_v6  ;;  %v2037_v24 = vsel %vm1907_vm9, %v7474_v16, 1e+30  ;;  %1864 = vadd.xlane.f32.xlu0 %v1863_v40  ;;  %v7478_v32 = vmin.f32 %v1261_v28, %v1262_v46  ;;  %v7480_v37 = vmin.f32 %v1298_v49, %v1299_v5  ;;  %v7508_v28 = vld [vmem:[#allocation7 + $0x48] sm:$0xff] }
 0x1a1   : > { %v2135_v17 = vmin.f32 %v2036_v50, %v2040_v22  ;;  %v4983_v54 = vsel %vm1908_vm8, 1.0, %v11281_v62  ;;  %v2038_v0 = vsel %vm1907_vm9, %v7484_v29, 1e+30  ;;  %v2097_v10 = vmin.f32 %v2033_v42, %v2037_v24  ;;  %v7520_v24 = vld [vmem:[#allocation7 + $0x60] sm:$0xff] }
 0x1a2   : > { %v4982_v44 = vsel %vm1907_vm9, 1.0, %v11281_v62  ;;  %vm1910_vm10 = vcmp.lt.f32.partialorder %v1666_v47, -1.5  ;;  %5263 = vrsqrt.f32 %v7478_v32  ;;  %v2134_v40 = vmin.f32 %v2034_v39, %v2038_v0 }
 0x1a3   : > { %v2477_v1 = vadd.f32 %v4982_v44, %v2476_v58  ;;  %v2043_v57 = vsel %vm1910_vm10, %v7491_v59, 1e+30  ;;  %5265 = vrsqrt.f32 %v7480_v37  ;;  %v2044_v30 = vsel %vm1910_vm10, %v7496_v21, 1e+30  ;;  %v1672_v3 = vpop.xlane.xlu1 %1671  ;;  %v1669_v60 = vpop.xlane.xlu0 %1668  ;;  %v7512_v58 = vld [vmem:[#allocation7 + $0x70] sm:$0xff] }
 0x1a4   : > { %v2100_v8 = vmin.f32 %v2098_v38, %v2043_v57  ;;  %1870 = vadd.xlane.f32.xlu0 %v7422_v48  ;;  %v2137_v45 = vmin.f32 %v2135_v17, %v2044_v30  ;;  %vm1909_vm11 = vcmp.lt.f32.partialorder %v1663_v61, -1.5  ;;  %vm1912_vm12 = vcmp.lt.f32.partialorder %v1672_v3, -1.5  ;;  %v7523_v61 = vld [vmem:[#allocation7 + $0x68] sm:$0xff] }
 0x1a5   : > { %v2478_v41 = vadd.f32 %v4983_v54, %v2477_v1  ;;  %v4985_v11 = vsel %vm1910_vm10, 1.0, %v11281_v62  ;;  %v2041_v7 = vsel %vm1909_vm11, %v7505_v51, 1e+30  ;;  %v2042_v49 = vsel %vm1909_vm11, %v7508_v28, 1e+30  ;;  %v7530_v1 = vld [vmem:[#allocation7 + $0x98] sm:$0xff] }
 0x1a6   : > { %v4984_v36 = vsel %vm1909_vm11, 1.0, %v11281_v62  ;;  %v2099_v4 = vmin.f32 %v2097_v10, %v2041_v7  ;;  %v2136_v19 = vmin.f32 %v2134_v40, %v2042_v49  ;;  %v2047_v50 = vsel %vm1912_vm12, %v7512_v58, 1e+30  ;;  %v7527_v40 = vld [vmem:[#allocation7 + $0x90] sm:$0xff]  ;;  %v7539_v7 = vld [vmem:[#allocation7 + $0x80] sm:$0xff] }
 0x1a7   : > { %v2479_v48 = vadd.f32 %v4984_v36, %v2478_v41  ;;  %v2048_v46 = vsel %vm1912_vm12, %v7515_v63, 1e+30  ;;  %v2102_v5 = vmin.f32 %v2100_v8, %v2047_v50  ;;  %v4987_v42 = vsel %vm1912_vm12, 1.0, %v11281_v62  ;;  %v1678_v6 = vpop.xlane.xlu1 %1677  ;;  %v1675_v39 = vpop.xlane.xlu0 %1674  ;;  %v7542_v36 = vld [vmem:[#allocation7 + $0x88] sm:$0xff]  ;;  %v7547_v50 = vld [vmem:[#allocation7 + $0xb0] sm:$0xff] }
 0x1a8   : > { %vm1911_vm13 = vcmp.lt.f32.partialorder %v1669_v60, -1.5  ;;  %1876 = vadd.xlane.f32.xlu0 %v7427_v43  ;;  %v2139_v22 = vmin.f32 %v2137_v45, %v2048_v46  ;;  %vm1914_vm14 = vcmp.lt.f32.partialorder %v1678_v6, -1.5  ;;  %v7535_v30 = vadd.f32 %v7456_v56, %v7444_v12  ;;  %v7550_v46 = vld [vmem:[#allocation7 + $0xb8] sm:$0xff] }
 0x1a9   : > { %v2480_v38 = vadd.f32 %v4985_v11, %v2479_v48  ;;  %v2045_v47 = vsel %vm1911_vm13, %v7520_v24, 1e+30  ;;  %v2046_v17 = vsel %vm1911_vm13, %v7523_v61, 1e+30  ;;  %v4986_v10 = vsel %vm1911_vm13, 1.0, %v11281_v62 }
 0x1aa   : > { %v2101_v54 = vmin.f32 %v2099_v4, %v2045_v47  ;;  %v2138_v0 = vmin.f32 %v2136_v19, %v2046_v17  ;;  %v2051_v43 = vsel %vm1914_vm14, %v7527_v40, 1e+30  ;;  %v2052_v57 = vsel %vm1914_vm14, %v7530_v1, 1e+30  ;;  %v7558_v17 = vld [vmem:[#allocation7 + $0xa8] sm:$0xff] }
 0x1ab   : > { %v2481_v44 = vadd.f32 %v4986_v10, %v2480_v38  ;;  %v2104_v8 = vmin.f32 %v2102_v5, %v2051_v43  ;;  %v2141_v3 = vmin.f32 %v2139_v22, %v2052_v57  ;;  %v4989_v60 = vsel %vm1914_vm14, 1.0, %v11281_v62  ;;  %v1684_v45 = vpop.xlane.xlu1 %1683  ;;  %v1681_v41 = vpop.xlane.xlu0 %1680  ;;  %v7554_v38 = vld [vmem:[#allocation7 + $0xa0] sm:$0xff] }
 0x1ac   : > { %vm1913_vm15 = vcmp.lt.f32.partialorder %v1675_v39, -1.5  ;;  %1882 = vadd.xlane.f32.xlu0 %v7429_v34  ;;  %vm1325_vm0 = vcmp.eq.f32.partialorder %v7478_v32, inf  ;;  %vm1916_vm2 = vcmp.lt.f32.partialorder %v1684_v45, -1.5  ;;  %vm1915_vm3 = vcmp.lt.f32.partialorder %v1681_v41, -1.5 }
 0x1ad   : > { %v2482_v11 = vadd.f32 %v4987_v42, %v2481_v44  ;;  %v2049_v49 = vsel %vm1913_vm15, %v7539_v7, 1e+30  ;;  %v2050_v4 = vsel %vm1913_vm15, %v7542_v36, 1e+30  ;;  %v4988_v12 = vsel %vm1913_vm15, 1.0, %v11281_v62 }
 0x1ae   : > { %v2103_v56 = vmin.f32 %v2101_v54, %v2049_v49  ;;  %v2140_v19 = vmin.f32 %v2138_v0, %v2050_v4  ;;  %v2055_v34 = vsel %vm1916_vm2, %v7547_v50, 1e+30  ;;  %v2056_v5 = vsel %vm1916_vm2, %v7550_v46, 1e+30  ;;  %v7568_v4 = vld [vmem:[#allocation7 + $0xd0] sm:$0xff] }
 0x1af   : > { %v2483_v48 = vadd.f32 %v4988_v12, %v2482_v11  ;;  %v4991_v42 = vsel %vm1916_vm2, 1.0, %v11281_v62  ;;  %v5264_v6 = vpop.eup %5263  ;;  %v2106_v39 = vmin.f32 %v2104_v8, %v2055_v34  ;;  %v2143_v22 = vmin.f32 %v2141_v3, %v2056_v5  ;;  %v1690_v0 = vpop.xlane.xlu1 %1689  ;;  %v7579_v5 = vld [vmem:[#allocation7 + $0xc8] sm:$0xff] }
 0x1b0   : > { %v2053_v47 = vsel %vm1915_vm3, %v7554_v38, 1e+30  ;;  %v2054_v54 = vsel %vm1915_vm3, %v7558_v17, 1e+30  ;;  %v1687_v10 = vpop.xlane.xlu0 %1686  ;;  %v5266_v44 = vpop.eup %5265  ;;  %1888 = vadd.xlane.f32.xlu0 %v7433_v26  ;;  %v4990_v8 = vsel %vm1915_vm3, 1.0, %v11281_v62  ;;  %vm1327_vm4 = vcmp.eq.f32.partialorder %v7478_v32, 0.0 }
 0x1b1   : > { %v2484_v43 = vadd.f32 %v4989_v60, %v2483_v48  ;;  %v2105_v57 = vmin.f32 %v2103_v56, %v2053_v47  ;;  %v2142_v45 = vmin.f32 %v2140_v19, %v2054_v54  ;;  %vm1918_vm5 = vcmp.lt.f32.partialorder %v1690_v0, -1.5  ;;  %v7571_v26 = vld [vmem:[#allocation7 + $0xd8] sm:$0xff]  ;;  %v7575_v48 = vld [vmem:[#allocation7 + $0xc0] sm:$0xff] }
 0x1b2   : > { %vm1917_vm6 = vcmp.lt.f32.partialorder %v1687_v10, -1.5  ;;  %v1324_v3 = vmul.f32 %v5264_v6, %v7478_v32  ;;  %v1328_v11 = vand.u32 2147483648, %v7478_v32  ;;  %v2059_v12 = vsel %vm1918_vm5, %v7568_v4, 1e+30 }
 0x1b3   : > { %v2485_v49 = vadd.f32 %v4990_v8, %v2484_v43  ;;  %v2060_v60 = vsel %vm1918_vm5, %v7571_v26, 1e+30  ;;  %v4993_v41 = vsel %vm1918_vm5, 1.0, %v11281_v62  ;;  %v2108_v56 = vmin.f32 %v2106_v39, %v2059_v12  ;;  %v1696_v47 = vpop.xlane.xlu1 %1695 }
 0x1b4   : > { %v2145_v19 = vmin.f32 %v2143_v22, %v2060_v60  ;;  %v2057_v34 = vsel %vm1917_vm6, %v7575_v48, 1e+30  ;;  %v2058_v6 = vsel %vm1917_vm6, %v7579_v5, 1e+30  ;;  %v1693_v54 = vpop.xlane.xlu0 %1692  ;;  %1894 = vadd.xlane.f32.xlu0 %v7436_v13  ;;  %v4992_v39 = vsel %vm1917_vm6, 1.0, %v11281_v62  ;;  %v7593_v13 = vld [vmem:[#allocation7 + $0xf8] sm:$0xff] }
 0x1b5   : > { %v2486_v0 = vadd.f32 %v4991_v42, %v2485_v49  ;;  %v2107_v43 = vmin.f32 %v2105_v57, %v2057_v34  ;;  %v2144_v8 = vmin.f32 %v2142_v45, %v2058_v6  ;;  %vm1920_vm7 = vcmp.lt.f32.partialorder %v1696_v47, -1.5  ;;  %v7597_v49 = vld [vmem:[#allocation7 + $0xe0] sm:$0xff]  ;;  %v7601_v34 = vld [vmem:[#allocation7 + $0xe8] sm:$0xff] }
 0x1b6   : > { %vm1919_vm8 = vcmp.lt.f32.partialorder %v1693_v54, -1.5  ;;  %v1326_v22 = vsel %vm1325_vm0, %v7478_v32, %v1324_v3  ;;  %v1331_v12 = vmul.f32 %v5266_v44, %v7480_v37  ;;  %v2063_v2 = vsel %vm1920_vm7, %v7590_v14, 1e+30  ;;  %11422 = vst [vmem:[#allocation45_spill] sm:$0xff] %v7601_v34 }
 0x1b7   : > { %v2487_v60 = vadd.f32 %v4992_v39, %v2486_v0  ;;  %v2064_v42 = vsel %vm1920_vm7, %v7593_v13, 1e+30  ;;  %v4995_v10 = vsel %vm1920_vm7, 1.0, %v11281_v62  ;;  %v2110_v57 = vmin.f32 %v2108_v56, %v2063_v2  ;;  %v1702_v6 = vpop.xlane.xlu1 %1701 }
 0x1b8   : > { %v2147_v45 = vmin.f32 %v2145_v19, %v2064_v42  ;;  %v2061_v3 = vsel %vm1919_vm8, %v7597_v49, 1e+30  ;;  %v2062_v44 = vsel %vm1919_vm8, %v7601_v34, 1e+30  ;;  %v1699_v47 = vpop.xlane.xlu0 %1698  ;;  %1900 = vadd.xlane.f32.xlu0 %v7440_v27  ;;  %v4994_v2 = vsel %vm1919_vm8, 1.0, %v11281_v62  ;;  %v7611_v42 = vld [vmem:[#allocation7 + $0x110] sm:$0xff] }
 0x1b9   : > { %v2488_v0 = vadd.f32 %v4993_v41, %v2487_v60  ;;  %v2109_v39 = vmin.f32 %v2107_v43, %v2061_v3  ;;  %v2146_v52 = vmin.f32 %v2144_v8, %v2062_v44  ;;  %vm1922_vm9 = vcmp.lt.f32.partialorder %v1702_v6, -1.5  ;;  %11423 = vst [vmem:[#allocation66_spill] sm:$0xff] %v7611_v42  ;;  %v7618_v8 = vld [vmem:[#allocation7 + $0x100] sm:$0xff] }
 0x1ba   : > { %vm1921_vm10 = vcmp.lt.f32.partialorder %v1699_v47, -1.5  ;;  %v1329_v56 = vsel %vm1327_vm4, %v1328_v11, %v1326_v22  ;;  %vm1332_vm11 = vcmp.eq.f32.partialorder %v7480_v37, inf  ;;  %v2067_v25 = vsel %vm1922_vm9, %v7611_v42, 1e+30  ;;  %11425 = vst [vmem:[#allocation19_spill] sm:$0xff] %v7618_v8  ;;  %v7622_v11 = vld [vmem:[#allocation7 + $0x108] sm:$0xff] }
 0x1bb   : > { %v2489_v19 = vadd.f32 %v4994_v2, %v2488_v0  ;;  %v2068_v27 = vsel %vm1922_vm9, %v7614_v15, 1e+30  ;;  %v4997_v41 = vsel %vm1922_vm9, 1.0, %v11281_v62  ;;  %v2112_v54 = vmin.f32 %v2110_v57, %v2067_v25  ;;  %11426 = vst [vmem:[#allocation20_spill] sm:$0xff] %v7622_v11  ;;  %v1708_v60 = vpop.xlane.xlu1 %1707 }
 0x1bc   : > { %v2149_v43 = vmin.f32 %v2147_v45, %v2068_v27  ;;  %v2065_v32 = vsel %vm1921_vm10, %v7618_v8, 1e+30  ;;  %v2066_v22 = vsel %vm1921_vm10, %v7622_v11, 1e+30  ;;  %v1705_v3 = vpop.xlane.xlu0 %1704  ;;  %v4996_v2 = vsel %vm1921_vm10, 1.0, %v11281_v62  ;;  %v7633_v27 = vld [vmem:[#allocation7 + $0x130] sm:$0xff] }
 0x1bd   : > { %v2490_v44 = vadd.f32 %v4995_v10, %v2489_v19  ;;  %v2111_v6 = vmin.f32 %v2109_v39, %v2065_v32  ;;  %v2148_v0 = vmin.f32 %v2146_v52, %v2066_v22  ;;  %v1333_v25 = vsel %vm1332_vm11, %v7480_v37, %v1331_v12  ;;  %11427 = vst [vmem:[#allocation44_spill] sm:$0xff] %v7633_v27  ;;  %v7636_v10 = vld [vmem:[#allocation7 + $0x138] sm:$0xff] }
 0x1be   : > { %vm1334_vm12 = vcmp.eq.f32.partialorder %v7480_v37, 0.0  ;;  %v1335_v57 = vand.u32 2147483648, %v7480_v37  ;;  %vm1924_vm13 = vcmp.lt.f32.partialorder %v1708_v60, -1.5  ;;  %11428 = vst [vmem:[#allocation24_spill] sm:$0xff] %v7636_v10  ;;  %vm1923_vm14 = vcmp.lt.f32.partialorder %v1705_v3, -1.5  ;;  %v7640_v60 = vld [vmem:[#allocation7 + $0x120] sm:$0xff] }
 0x1bf   : > { %v2491_v45 = vadd.f32 %v4996_v2, %v2490_v44  ;;  %v2071_v11 = vsel %vm1924_vm13, %v7633_v27, 1e+30  ;;  %v2072_v52 = vsel %vm1924_vm13, %v7636_v10, 1e+30  ;;  %v4999_v47 = vsel %vm1924_vm13, 1.0, %v11281_v62  ;;  %v1714_v12 = vpop.xlane.xlu1 %1713  ;;  %11429 = vst [vmem:[#allocation25_spill] sm:$0xff] %v7640_v60 }
 0x1c0   : > { %v1336_v39 = vsel %vm1334_vm12, %v1335_v57, %v1333_v25  ;;  %v2114_v19 = vmin.f32 %v2112_v54, %v2071_v11  ;;  %v2151_v32 = vmin.f32 %v2149_v43, %v2072_v52  ;;  %v1711_v22 = vpop.xlane.xlu0 %1710  ;;  %v2069_v44 = vsel %vm1923_vm14, %v7640_v60, 1e+30  ;;  %v7643_v2 = vld [vmem:[#allocation7 + $0x128] sm:$0xff]  ;;  %v7648_v3 = vld [vmem:[#allocation7 + $0x150] sm:$0xff] }
 0x1c1   : > { %v1339_v15 = vcombine.low %v1329_v56, %v1336_v39  ;;  %v2492_v37 = vadd.f32 %v4997_v41, %v2491_v45  ;;  %11430 = vst [vmem:[#allocation23_spill] sm:$0xff] %v7643_v2  ;;  %v2070_v27 = vsel %vm1923_vm14, %v7643_v2, 1e+30  ;;  %v2113_v8 = vmin.f32 %v2111_v6, %v2069_v44  ;;  %v11431_v54 = vld [vmem:[#allocation60_spill] sm:$0xff]  ;;  %11432 = vst [vmem:[#allocation48_spill] sm:$0xff] %v7648_v3  ;;  %v7651_v41 = vld [vmem:[#allocation7 + $0x158] sm:$0xff] }
 0x1c2   : > { %v2150_v10 = vmin.f32 %v2148_v0, %v2070_v27  ;;  %v4998_v42 = vsel %vm1923_vm14, 1.0, %v11281_v62  ;;  %vm1926_vm15 = vcmp.lt.f32.partialorder %v1714_v12, -1.5  ;;  %11433 = vst [vmem:[#allocation28_spill] sm:$0xff] %v7651_v41  ;;  %vm1925_vm0 = vcmp.lt.f32.partialorder %v1711_v22, -1.5  ;;  %v11434_v27 = vld [vmem:[#allocation17_spill] sm:$0xff]  ;;  %v11435_v12 = vld [vmem:[#allocation18_spill] sm:$0xff] }
 0x1c3   : > { %v1341_v43 = vmul.f32 %v1339_v15, %v11431_v54  ;;  %v2493_v11 = vadd.f32 %v4998_v42, %v2492_v37  ;;  %v2075_v56 = vsel %vm1926_vm15, %v7648_v3, 1e+30  ;;  %v2076_v25 = vsel %vm1926_vm15, %v7651_v41, 1e+30  ;;  %v1720_v6 = vpop.xlane.xlu1 %1719  ;;  %v7657_v37 = vld [vmem:[#allocation7 + $0x140] sm:$0xff]  ;;  %v7660_v54 = vld [vmem:[#allocation7 + $0x148] sm:$0xff] }
 0x1c4   : > { %v2116_v57 = vmin.f32 %v2114_v19, %v2075_v56  ;;  %v2153_v45 = vmin.f32 %v2151_v32, %v2076_v25  ;;  %v5001_v52 = vsel %vm1926_vm15, 1.0, %v11281_v62  ;;  %v1717_v0 = vpop.xlane.xlu0 %1716  ;;  %11436 = vst [vmem:[#allocation75_spill] sm:$0xff] %v7657_v37  ;;  %v2073_v44 = vsel %vm1925_vm0, %v7657_v37, 1e+30  ;;  %11437 = vst [vmem:[#allocation29_spill] sm:$0xff] %v7660_v54  ;;  %v11462_v2 = vld [vmem:[#allocation16_spill] sm:$0xff] }
 0x1c5   : > { %v1346_v39 = vrot.slane %v1341_v43, %v11434_v27  ;;  %v1350_v15 = vrot.slane %v1341_v43, %v11435_v12  ;;  %v2494_v42 = vadd.f32 %v4999_v47, %v2493_v11  ;;  %v2074_v41 = vsel %vm1925_vm0, %v7660_v54, 1e+30  ;;  %v7666_v47 = vld [vmem:[#allocation7 + $0x170] sm:$0xff]  ;;  %v7669_v12 = vld [vmem:[#allocation7 + $0x178] sm:$0xff] }
 0x1c6   : > { %v2115_v19 = vmin.f32 %v2113_v8, %v2073_v44  ;;  %v5000_v32 = vsel %vm1925_vm0, 1.0, %v11281_v62  ;;  %vm1928_vm2 = vcmp.lt.f32.partialorder %v1720_v6, -1.5  ;;  %v2152_v25 = vmin.f32 %v2150_v10, %v2074_v41  ;;  %11438 = vst [vmem:[#allocation26_spill] sm:$0xff] %v7666_v47  ;;  %11439 = vst [vmem:[#allocation27_spill] sm:$0xff] %v7669_v12  ;;  %v7673_v10 = vld [vmem:[#allocation7 + $0x160] sm:$0xff] }
 0x1c7   : > { %v1353_v22 = vsel %vm11049_vm1, %v1346_v39, 0.0  ;;  %v1354_v56 = vsel %vm11049_vm1, %v1350_v15, 0.0  ;;  %v2495_v27 = vadd.f32 %v5000_v32, %v2494_v42  ;;  %v2079_v11 = vsel %vm1928_vm2, %v7666_v47, 1e+30  ;;  %v1726_v44 = vpop.xlane.xlu1 %1725  ;;  %11440 = vst [vmem:[#allocation43_spill] sm:$0xff] %v7673_v10  ;;  %v7676_v15 = vld [vmem:[#allocation7 + $0x168] sm:$0xff] }
 0x1c8   : > { %v1355_v43 = vadd.f32 %v1354_v56, %v1353_v22  ;;  %v2080_v37 = vsel %vm1928_vm2, %v7669_v12, 1e+30  ;;  %v5003_v8 = vsel %vm1928_vm2, 1.0, %v11281_v62  ;;  %v1723_v54 = vpop.xlane.xlu0 %1722  ;;  %v2118_v6 = vmin.f32 %v2116_v57, %v2079_v11  ;;  %11441 = vst [vmem:[#allocation22_spill] sm:$0xff] %v7676_v15  ;;  %v7680_v47 = vld [vmem:[#allocation7 + $0x190] sm:$0xff] }
 0x1c9   : > { %v2155_v3 = vmin.f32 %v2153_v45, %v2080_v37  ;;  %v2496_v39 = vadd.f32 %v5001_v52, %v2495_v27  ;;  %vm1927_vm3 = vcmp.lt.f32.partialorder %v1717_v0, -1.5  ;;  %vm1930_vm4 = vcmp.lt.f32.partialorder %v1726_v44, -1.5  ;;  %11442 = vst [vmem:[#allocation33_spill] sm:$0xff] %v7680_v47  ;;  %v7683_v45 = vld [vmem:[#allocation7 + $0x198] sm:$0xff]  ;;  %v7687_v44 = vld [vmem:[#allocation7 + $0x180] sm:$0xff] }
 0x1ca   : > { %1356 = vadd.xlane.f32.xlu1 %v1355_v43  ;;  %v2077_v41 = vsel %vm1927_vm3, %v7673_v10, 1e+30  ;;  %v2078_v42 = vsel %vm1927_vm3, %v7676_v15, 1e+30  ;;  %v5002_v32 = vsel %vm1927_vm3, 1.0, %v11281_v62  ;;  %11443 = vst [vmem:[#allocation32_spill] sm:$0xff] %v7683_v45 }
 0x1cb   : > { %v2117_v22 = vmin.f32 %v2115_v19, %v2077_v41  ;;  %v2154_v56 = vmin.f32 %v2152_v25, %v2078_v42  ;;  %v2497_v12 = vadd.f32 %v5002_v32, %v2496_v39  ;;  %v2083_v57 = vsel %vm1930_vm4, %v7680_v47, 1e+30  ;;  %v1732_v27 = vpop.xlane.xlu1 %1731  ;;  %11444 = vst [vmem:[#allocation31_spill] sm:$0xff] %v7687_v44  ;;  %v7690_v25 = vld [vmem:[#allocation7 + $0x188] sm:$0xff]  ;;  %v7695_v32 = vld [vmem:[#allocation7 + $0x1b0] sm:$0xff] }
 0x1cc   : > { %v2084_v52 = vsel %vm1930_vm4, %v7683_v45, 1e+30  ;;  %v2120_v0 = vmin.f32 %v2118_v6, %v2083_v57  ;;  %v5005_v37 = vsel %vm1930_vm4, 1.0, %v11281_v62  ;;  %vm1929_vm5 = vcmp.lt.f32.partialorder %v1723_v54, -1.5  ;;  %v1729_v43 = vpop.xlane.xlu0 %1728  ;;  %11445 = vst [vmem:[#allocation34_spill] sm:$0xff] %v7690_v25  ;;  %11446 = vst [vmem:[#allocation35_spill] sm:$0xff] %v7695_v32 }
 0x1cd   : > { %v2157_v11 = vmin.f32 %v2155_v3, %v2084_v52  ;;  %v2498_v15 = vadd.f32 %v5003_v8, %v2497_v12  ;;  %v2081_v19 = vsel %vm1929_vm5, %v7687_v44, 1e+30  ;;  %v2082_v39 = vsel %vm1929_vm5, %v7690_v25, 1e+30  ;;  %v7698_v12 = vld [vmem:[#allocation7 + $0x1b8] sm:$0xff] }
 0x1ce   : > { %1897 = vadd.xlane.f32.xlu1 %v7500_v53  ;;  %v2119_v41 = vmin.f32 %v2117_v22, %v2081_v19  ;;  %v2156_v42 = vmin.f32 %v2154_v56, %v2082_v39  ;;  %v5004_v6 = vsel %vm1929_vm5, 1.0, %v11281_v62  ;;  %vm1932_vm6 = vcmp.lt.f32.partialorder %v1732_v27, -1.5  ;;  %11447 = vst [vmem:[#allocation76_spill] sm:$0xff] %v7698_v12  ;;  %v7702_v19 = vld [vmem:[#allocation7 + $0x1a0] sm:$0xff]  ;;  %v7705_v27 = vld [vmem:[#allocation7 + $0x1a8] sm:$0xff] }
 0x1cf   : > { %v2499_v54 = vadd.f32 %v5004_v6, %v2498_v15  ;;  %v2087_v3 = vsel %vm1932_vm6, %v7695_v32, 1e+30  ;;  %v2088_v8 = vsel %vm1932_vm6, %v7698_v12, 1e+30  ;;  %v5007_v25 = vsel %vm1932_vm6, 1.0, %v11281_v62  ;;  %v1738_v53 = vpop.xlane.xlu1 %1737  ;;  %11448 = vst [vmem:[#allocation51_spill] sm:$0xff] %v7702_v19 }
 0x1d0   : > { %v2122_v57 = vmin.f32 %v2120_v0, %v2087_v3  ;;  %v2159_v52 = vmin.f32 %v2157_v11, %v2088_v8  ;;  %vm1931_vm7 = vcmp.lt.f32.partialorder %v1729_v43, -1.5  ;;  %v1735_v22 = vpop.xlane.xlu0 %1734  ;;  %11449 = vst [vmem:[#allocation36_spill] sm:$0xff] %v7705_v27  ;;  %vm1934_vm8 = vcmp.lt.f32.partialorder %v1738_v53, -1.5  ;;  %v7710_v3 = vld [vmem:[#allocation7 + $0x1d0] sm:$0xff] }
 0x1d1   : > { %v2500_v56 = vadd.f32 %v5005_v37, %v2499_v54  ;;  %v2085_v15 = vsel %vm1931_vm7, %v7702_v19, 1e+30  ;;  %v2086_v39 = vsel %vm1931_vm7, %v7705_v27, 1e+30  ;;  %v5006_v6 = vsel %vm1931_vm7, 1.0, %v11281_v62  ;;  %11450 = vst [vmem:[#allocation52_spill] sm:$0xff] %v7710_v3 }
 0x1d2   : > { %1903 = vadd.xlane.f32.xlu1 %v7535_v30  ;;  %v2121_v0 = vmin.f32 %v2119_v41, %v2085_v15  ;;  %v2158_v11 = vmin.f32 %v2156_v42, %v2086_v39  ;;  %vm1933_vm9 = vcmp.lt.f32.partialorder %v1735_v22, -1.5  ;;  %v2091_v37 = vsel %vm1934_vm8, %v7710_v3, 1e+30  ;;  %v7714_v54 = vld [vmem:[#allocation7 + $0x1d8] sm:$0xff]  ;;  %v7718_v19 = vld [vmem:[#allocation7 + $0x1c0] sm:$0xff]  ;;  %v7722_v41 = vld [vmem:[#allocation7 + $0x1c8] sm:$0xff] }
 0x1d3   : > { %v2501_v43 = vadd.f32 %v5006_v6, %v2500_v56  ;;  %11451 = vst [vmem:[#allocation61_spill] sm:$0xff] %v7714_v54  ;;  %v2092_v8 = vsel %vm1934_vm8, %v7714_v54, 1e+30  ;;  %v2124_v12 = vmin.f32 %v2122_v57, %v2091_v37  ;;  %11452 = vst [vmem:[#allocation53_spill] sm:$0xff] %v7718_v19  ;;  %v2089_v30 = vsel %vm1933_vm9, %v7718_v19, 1e+30  ;;  %v1744_v56 = vpop.xlane.xlu1 %1743 }
 0x1d4   : > { %v2161_v27 = vmin.f32 %v2159_v52, %v2092_v8  ;;  %11453 = vst [vmem:[#allocation37_spill] sm:$0xff] %v7722_v41  ;;  %v2090_v42 = vsel %vm1933_vm9, %v7722_v41, 1e+30  ;;  %v1741_v15 = vpop.xlane.xlu0 %1740  ;;  %v2123_v6 = vmin.f32 %v2121_v0, %v2089_v30  ;;  %v5008_v54 = vsel %vm1933_vm9, 1.0, %v11281_v62  ;;  %v7730_v37 = vld [vmem:[#allocation7 + $0x1f0] sm:$0xff]  ;;  %v7734_v41 = vld [vmem:[#allocation7 + $0x1f8] sm:$0xff] }
 0x1d5   : > { %v2502_v39 = vadd.f32 %v5007_v25, %v2501_v43  ;;  %v2160_v3 = vmin.f32 %v2158_v11, %v2090_v42  ;;  %v5009_v57 = vsel %vm1934_vm8, 1.0, %v11281_v62  ;;  %vm1936_vm10 = vcmp.lt.f32.partialorder %v1744_v56, -1.5  ;;  %11454 = vst [vmem:[#allocation38_spill] sm:$0xff] %v7730_v37  ;;  %11455 = vst [vmem:[#allocation39_spill] sm:$0xff] %v7734_v41  ;;  %v7738_v22 = vld [vmem:[#allocation7 + $0x1e0] sm:$0xff]  ;;  %v7742_v43 = vld [vmem:[#allocation7 + $0x1e8] sm:$0xff] }
 0x1d6   : > { %vm1935_vm11 = vcmp.lt.f32.partialorder %v1741_v15, -1.5  ;;  %v2095_v8 = vsel %vm1936_vm10, %v7730_v37, 1e+30  ;;  %v2096_v25 = vsel %vm1936_vm10, %v7734_v41, 1e+30  ;;  %11456 = vst [vmem:[#allocation40_spill] sm:$0xff] %v7738_v22 }
 0x1d7   : > { %v2503_v52 = vadd.f32 %v5008_v54, %v2502_v39  ;;  %v2126_v0 = vmin.f32 %v2124_v12, %v2095_v8  ;;  %v2163_v11 = vmin.f32 %v2161_v27, %v2096_v25  ;;  %v2093_v53 = vsel %vm1935_vm11, %v7738_v22, 1e+30  ;;  %11457 = vst [vmem:[#allocation62_spill] sm:$0xff] %v7742_v43  ;;  %v7748_v42 = vpop.xlane.xlu1 %1813 }
 0x1d8   : > { %v2094_v54 = vsel %vm1935_vm11, %v7742_v43, 1e+30  ;;  %v7746_v30 = vpop.xlane.xlu0 %1810  ;;  %v2125_v37 = vmin.f32 %v2123_v6, %v2093_v53  ;;  %v5010_v12 = vsel %vm1935_vm11, 1.0, %v11281_v62  ;;  %v5011_v27 = vsel %vm1936_vm10, 1.0, %v11281_v62 }
 0x1d9   : > { %v2504_v39 = vadd.f32 %v5009_v57, %v2503_v52  ;;  %v2162_v19 = vmin.f32 %v2160_v3, %v2094_v54  ;;  %vm1937_vm12 = vcmp.lt.f32.partialorder %v7746_v30, -1.5  ;;  %vm1938_vm13 = vcmp.lt.f32.partialorder %v7748_v42, -1.5  ;;  %v7940_v42 = vld [vmem:[#allocation8 + $0xa0] sm:$0xff] }
 0x1da   : > { %v2127_v8 = vmin.f32 %v2125_v37, %v2126_v0  ;;  %v5012_v43 = vsel %vm1937_vm12, 1.0, %v11281_v62  ;;  %v5013_v3 = vsel %vm1938_vm13, 1.0, %v11281_v62  ;;  %v7821_v60 = vsub.s32 2, %v11462_v2 }
 0x1db   : > { %v2164_v25 = vmin.f32 %v2162_v19, %v2163_v11  ;;  %v2505_v41 = vadd.f32 %v5010_v12, %v2504_v39  ;;  %v7766_v52 = vpop.xlane.xlu1 %1819  ;;  %v2561_v53 = vadd.f32 %v5013_v3, %v5012_v43  ;;  %v2238_v30 = vsel %vm1938_vm13, %v7451_v18, 1e+30 }
 0x1dc   : > { %v7762_v15 = vpop.xlane.xlu0 %1816  ;;  %v2128_v6 = vrot.slane %v2127_v8, 4  ;;  %vm1940_vm15 = vcmp.lt.f32.partialorder %v7766_v52, -1.5  ;;  %11463 = vst [vmem:[#allocation55_spill] sm:$0xff] %v7821_v60 }
 0x1dd   : > { %v2165_v56 = vrot.slane %v2164_v25, 4  ;;  %v7764_v57 = vadd.f32 %v5011_v27, %v2505_v41  ;;  %vm1939_vm14 = vcmp.lt.f32.partialorder %v7762_v15, -1.5  ;;  %v5015_v41 = vsel %vm1940_vm15, 1.0, %v11281_v62 }
 0x1de   : > { %v2129_v37 = vmin.f32 %v2127_v8, %v2128_v6  ;;  %v5014_v0 = vsel %vm1939_vm14, 1.0, %v11281_v62 }
 0x1df   : > { %11458 = vst [vmem:[#allocation54_spill] sm:$0xff] %v7764_v57  ;;  %v2166_v19 = vmin.f32 %v2164_v25, %v2165_v56  ;;  %v2562_v12 = vadd.f32 %v5014_v0, %v2561_v53  ;;  %v7778_v8 = vpop.xlane.xlu1 %1825 }
 0x1e0   : > { %v7772_v11 = vpop.xlane.xlu0 %1822  ;;  %v2130_v54 = vrot.slane %v2129_v37, 2  ;;  %vm1942_vm2 = vcmp.lt.f32.partialorder %v7778_v8, -1.5 }
 0x1e1   : > { %v2167_v39 = vrot.slane %v2166_v19, 2  ;;  %v2563_v25 = vadd.f32 %v5015_v41, %v2562_v12  ;;  %vm1941_vm0 = vcmp.lt.f32.partialorder %v7772_v11, -1.5  ;;  %v8006_v11 = vld [vmem:[#allocation8 + $0xe8] sm:$0xff] }
 0x1e2   : > { %v2131_v43 = vmin.f32 %v2129_v37, %v2130_v54  ;;  %v5016_v56 = vsel %vm1941_vm0, 1.0, %v11281_v62  ;;  %v5017_v37 = vsel %vm1942_vm2, 1.0, %v11281_v62 }
 0x1e3   : > { %v2168_v27 = vmin.f32 %v2166_v19, %v2167_v39  ;;  %v2564_v53 = vadd.f32 %v5016_v56, %v2563_v25  ;;  %v7791_v54 = vpop.xlane.xlu1 %1831 }
 0x1e4   : > { %v2132_v3 = vrot.slane %v2131_v43, 1  ;;  %v7781_v6 = vpop.xlane.xlu0 %1828  ;;  %vm1944_vm4 = vcmp.lt.f32.partialorder %v7791_v54, -1.5 }
 0x1e5   : > { %v2169_v57 = vrot.slane %v2168_v27, 1  ;;  %v2565_v19 = vadd.f32 %v5017_v37, %v2564_v53  ;;  %vm1943_vm3 = vcmp.lt.f32.partialorder %v7781_v6, -1.5 }
 0x1e6   : > { %v2133_v0 = vmin.f32 %v2131_v43, %v2132_v3  ;;  %v5018_v39 = vsel %vm1943_vm3, 1.0, %v11281_v62  ;;  %v5019_v43 = vsel %vm1944_vm4, 1.0, %v11281_v62 }
 0x1e7   : > { %v2170_v12 = vmin.f32 %v2168_v27, %v2169_v57  ;;  %v2566_v41 = vadd.f32 %v5018_v39, %v2565_v19  ;;  %v7806_v37 = vpop.xlane.xlu1 %1837  ;;  %v11459_v19 = vld [vmem:[#allocation71_spill] sm:$0xff]  ;;  %v11460_v39 = vld [vmem:[#allocation41_spill] sm:$0xff] }
 0x1e8   : > { %v7800_v25 = vpop.xlane.xlu0 %1834  ;;  %5267 = vrsqrt.f32 %v2133_v0  ;;  %vm1946_vm6 = vcmp.lt.f32.partialorder %v7806_v37, -1.5  ;;  %v1550_v22 = vrot.slane %v11460_v39, %v11459_v19  ;;  %vm2375_vm7 = vcmp.eq.f32.partialorder %v2133_v0, inf }
 0x1e9   : > { %vm1945_vm5 = vcmp.lt.f32.partialorder %v7800_v25, -1.5  ;;  %v2567_v3 = vadd.f32 %v5019_v43, %v2566_v41  ;;  %5269 = vrsqrt.f32 %v2170_v12  ;;  %v5021_v57 = vsel %vm1946_vm6, 1.0, %v11281_v62  ;;  %v11461_v43 = vld [vmem:[#allocation72_spill] sm:$0xff] }
 0x1ea   : > { %v5020_v56 = vsel %vm1945_vm5, 1.0, %v11281_v62  ;;  %v1554_v32 = vrot.slane %v11460_v39, %v11461_v43  ;;  %v2378_v45 = vand.u32 2147483648, %v2133_v0  ;;  %vm2377_vm8 = vcmp.eq.f32.partialorder %v2133_v0, 0.0 }
 0x1eb   : > { %v2568_v53 = vadd.f32 %v5020_v56, %v2567_v3  ;;  %v1557_v3 = vmul.f32 %v6636_v55, %v1550_v22  ;;  %vm2382_vm9 = vcmp.eq.f32.partialorder %v2170_v12, inf  ;;  %v2385_v19 = vand.u32 2147483648, %v2170_v12 }
 0x1ec   : > { %v1558_v10 = vmul.f32 %v6645_v31, %v1554_v32  ;;  %v7824_v39 = vsub.s32 6, %v11462_v2  ;;  %vm2384_vm10 = vcmp.eq.f32.partialorder %v2170_v12, 0.0 }
 0x1ed   : > { %v7812_v27 = vadd.f32 %v5021_v57, %v2568_v53 }
 0x1ee   : > { %11464 = vst [vmem:[#allocation56_spill] sm:$0xff] %v7824_v39 }
 0x1f5   : > { %v5268_v41 = vpop.eup %5267 }
 0x1f6   : > { %v2374_v56 = vmul.f32 %v5268_v41, %v2133_v0  ;;  %v5270_v44 = vpop.eup %5269 }
 0x1f7   : > { %v2381_v57 = vmul.f32 %v5270_v44, %v2170_v12 }
 0x1f8   : > { %v2376_v47 = vsel %vm2375_vm7, %v2133_v0, %v2374_v56  ;;  %v7828_v0 = vld [vmem:[%s5942_s9] sm:$0xff] }
 0x1f9   : > { %v2379_v53 = vsel %vm2377_vm8, %v2378_v45, %v2376_v47  ;;  %v2383_v22 = vsel %vm2382_vm9, %v2170_v12, %v2381_v57  ;;  %11465 = vst [vmem:[#allocation57_spill] sm:$0xff] %v7828_v0  ;;  %v7832_v47 = vrot.slane %v7828_v0, %v7821_v60  ;;  %v7836_v45 = vrot.slane %v7828_v0, %v7824_v39  ;;  %v7871_v39 = vld [vmem:[#allocation8 + $0x40] sm:$0xff] }
 0x1fa   : > { %v2387_v34 = vmul.f32 %v2379_v53, %v1557_v3  ;;  %v2386_v41 = vsel %vm2384_vm10, %v2385_v19, %v2383_v22  ;;  %v2431_v12 = vadd.f32 %v6645_v31, %v6636_v55  ;;  %v2439_v53 = vsel %vm11049_vm1, %v1557_v3, 0.0  ;;  %v7851_v22 = vpop.xlane.xlu1 %1843  ;;  %11469 = vst [vmem:[#allocation77_spill] sm:$0xff] %v7871_v39  ;;  %v7883_v0 = vld [vmem:[#allocation8 + $0x60] sm:$0xff] }
 0x1fb   : > { %v2388_v43 = vmul.f32 %v2386_v41, %v1558_v10  ;;  %11466 = vst [vmem:[#allocation50_spill] sm:$0xff] %v7832_v47  ;;  %11467 = vst [vmem:[#allocation58_spill] sm:$0xff] %v7836_v45  ;;  %v7847_v19 = vrot.slane %v7836_v45, %v7821_v60  ;;  %v2440_v57 = vsel %vm11049_vm1, %v1558_v10, 0.0  ;;  %v7853_v41 = vld [vmem:[#allocation8] sm:$0xff]  ;;  %vm1948_vm11 = vcmp.lt.f32.partialorder %v7851_v22, -1.5 }
 0x1fc   : > { %v2389_v56 = vsel %vm11049_vm1, %v2387_v34, 0.0  ;;  %v7843_v34 = vrot.slane %v7832_v47, %v7821_v60  ;;  %v7863_v47 = vld [vmem:[#allocation8 + $0x20] sm:$0xff]  ;;  %v7875_v60 = vld [vmem:[#allocation8 + $0x48] sm:$0xff]  ;;  %11472 = vst [vmem:[#allocation42_spill] sm:$0xff] %v7883_v0 }
 0x1fd   : > { %v2390_v44 = vsel %vm11049_vm1, %v2388_v43, 0.0  ;;  %v2441_v43 = vadd.f32 %v2440_v57, %v2439_v53  ;;  %11470 = vst [vmem:[#allocation78_spill] sm:$0xff] %v7875_v60 }
 0x1fe   : > { %v2391_v32 = vadd.f32 %v2390_v44, %v2389_v56  ;;  %v2659_v56 = vmul.f32 %v7853_v41, %v7843_v34  ;;  %v7857_v44 = vld [vmem:[#allocation8 + $0x8] sm:$0xff]  ;;  %v7861_v45 = vpop.xlane.xlu1 %1849  ;;  %v2663_v10 = vmul.f32 %v7863_v47, %v7843_v34  ;;  %v2679_v18 = vmul.f32 %v7940_v42, %v7843_v34 }
 0x200   : > { %2392 = vadd.xlane.f32.xlu0 %v2391_v32  ;;  %v2660_v32 = vmul.f32 %v7857_v44, %v7847_v19 }
 0x202   : > { %v2723_v3 = vadd.f32 %v2660_v32, %v2659_v56  ;;  %v2668_v56 = vmul.f32 %v7875_v60, %v7847_v19  ;;  %v7879_v32 = vpop.xlane.xlu1 %1855 }
 0x204   : > { %2432 = vadd.xlane.f32.xlu0 %v2431_v12  ;;  %v7867_v12 = vld [vmem:[#allocation8 + $0x28] sm:$0xff] }
 0x205   : > { %11468 = vst [vmem:[#allocation21_spill] sm:$0xff] %v7867_v12  ;;  %v2664_v53 = vmul.f32 %v7867_v12, %v7847_v19  ;;  %v7895_v12 = vld [vmem:[#allocation8 + $0x80] sm:$0xff] }
 0x206   : > { %v7893_v2 = vpop.xlane.xlu1 %1861  ;;  %11474 = vst [vmem:[#allocation60_spill] sm:$0xff] %v7895_v12 }
 0x207   : > { %v2729_v57 = vadd.f32 %v2664_v53, %v2663_v10  ;;  %v7887_v10 = vld [vmem:[#allocation8 + $0x68] sm:$0xff] }
 0x208   : > { %2442 = vadd.xlane.f32.xlu0 %v2441_v43  ;;  %v2667_v43 = vmul.f32 %v7871_v39, %v7843_v34  ;;  %11473 = vst [vmem:[#allocation30_spill] sm:$0xff] %v7887_v10  ;;  %v2672_v53 = vmul.f32 %v7887_v10, %v7847_v19  ;;  %v7909_v10 = vsel %vm1937_vm12, %v7466_v20, 1e+30 }
 0x20a   : > { %v2735_v55 = vadd.f32 %v2668_v56, %v2667_v43  ;;  %v7899_v43 = vld [vmem:[#allocation8 + $0x88] sm:$0xff] }
 0x20b   : > { %11475 = vst [vmem:[#allocation17_spill] sm:$0xff] %v7899_v43  ;;  %v2676_v56 = vmul.f32 %v7899_v43, %v7847_v19  ;;  %v2240_v43 = vsel %vm1939_vm14, %v7484_v29, 1e+30 }
 0x20c   : > { %2724 = vadd.xlane.f32.xlu0 %v2723_v3  ;;  %v2671_v3 = vmul.f32 %v7883_v0, %v7843_v34 }
 0x20e   : > { %v2741_v60 = vadd.f32 %v2672_v53, %v2671_v3  ;;  %v2241_v3 = vsel %vm1940_vm15, %v7462_v33, 1e+30  ;;  %v2242_v33 = vsel %vm1940_vm15, %v7470_v9, 1e+30 }
 0x20f   : > { %v2337_v29 = vmin.f32 %v2238_v30, %v2242_v33 }
 0x210   : > { %2730 = vadd.xlane.f32.xlu0 %v2729_v57  ;;  %v2675_v57 = vmul.f32 %v7895_v12, %v7843_v34 }
 0x212   : > { %v2747_v0 = vadd.f32 %v2676_v56, %v2675_v57  ;;  %v7959_v56 = vpop.xlane.xlu1 %1867 }
 0x214   : > { %2736 = vadd.xlane.f32.xlu0 %v2735_v55  ;;  %v2237_v55 = vsel %vm1938_vm13, %v7447_v35, 1e+30  ;;  %v2239_v35 = vsel %vm1939_vm14, %v7474_v16, 1e+30  ;;  %v7944_v16 = vld [vmem:[#allocation8 + $0xa8] sm:$0xff]  ;;  %vm1952_vm14 = vcmp.lt.f32.partialorder %v7879_v32, -1.5 }
 0x215   : > { %v7881_v31 = vpop.xlane.xlu0 %1321  ;;  %v2680_v9 = vmul.f32 %v7944_v16, %v7847_v19  ;;  %v2300_v52 = vmin.f32 %v2237_v55, %v2241_v3  ;;  %v2336_v3 = vmin.f32 %v7909_v10, %v2240_v43  ;;  %v5027_v43 = vsel %vm1952_vm14, 1.0, %v11281_v62 }
 0x216   : > { %11471 = vst [vmem:[#allocation79_spill] sm:$0xff] %v7881_v31  ;;  %v2235_v31 = vsel %vm1937_vm12, %v7458_v23, 1e+30  ;;  %v5023_v23 = vsel %vm1948_vm11, 1.0, %v11281_v62  ;;  %vm1950_vm12 = vcmp.lt.f32.partialorder %v7861_v45, -1.5 }
 0x217   : > { %v5025_v15 = vsel %vm1950_vm12, 1.0, %v11281_v62  ;;  %v2299_v55 = vmin.f32 %v2235_v31, %v2239_v35  ;;  %v2753_v33 = vadd.f32 %v2680_v9, %v2679_v18  ;;  %v7974_v35 = vld [vmem:[#allocation8 + $0xc8] sm:$0xff]  ;;  %v2244_v9 = vsel %vm1941_vm0, %v7508_v28, 1e+30 }
 0x218   : > { %2742 = vadd.xlane.f32.xlu0 %v2741_v60  ;;  %v2245_v60 = vsel %vm1942_vm2, %v7491_v59, 1e+30  ;;  %v2243_v59 = vsel %vm1941_vm0, %v7505_v51, 1e+30  ;;  %v2684_v8 = vmul.f32 %v7974_v35, %v7847_v19  ;;  %vm1954_vm0 = vcmp.lt.f32.partialorder %v7893_v2, -1.5 }
 0x219   : > { %v7891_v39 = vpop.xlane.xlu0 %1840  ;;  %v2261_v25 = vsel %vm1950_vm12, %v7568_v4, 1e+30 }
 0x21a   : > { %vm1947_vm7 = vcmp.lt.f32.partialorder %v7891_v39, -1.5  ;;  %v11476_v39 = vld [vmem:[#allocation68_spill] sm:$0xff] }
 0x21b   : > { %v5022_v20 = vsel %vm1947_vm7, 1.0, %v11281_v62  ;;  %vm2615_vm10 = vcmp.eq.s32.totalorder %v11476_v39, 2 }
 0x21c   : > { %v2570_v53 = vadd.f32 %v5022_v20, %v7812_v27  ;;  %2748 = vadd.xlane.f32.xlu0 %v2747_v0  ;;  %v2249_v0 = vsel %vm1944_vm4, %v7512_v58, 1e+30  ;;  %v2247_v58 = vsel %vm1943_vm3, %v7520_v24, 1e+30 }
 0x21d   : > { %v7938_v12 = vpop.xlane.xlu0 %1846 }
 0x21e   : > { %v2571_v27 = vadd.f32 %v5023_v23, %v2570_v53  ;;  %vm1949_vm13 = vcmp.lt.f32.partialorder %v7938_v12, -1.5  ;;  %v2246_v23 = vsel %vm1942_vm2, %v7496_v21, 1e+30  ;;  %v7970_v53 = vld [vmem:[#allocation8 + $0xc0] sm:$0xff]  ;;  %v2302_v21 = vmin.f32 %v2300_v52, %v2245_v60 }
 0x21f   : > { %v5024_v57 = vsel %vm1949_vm13, 1.0, %v11281_v62  ;;  %v2683_v31 = vmul.f32 %v7970_v53, %v7843_v34  ;;  %v2339_v51 = vmin.f32 %v2337_v29, %v2246_v23  ;;  %v2301_v52 = vmin.f32 %v2299_v55, %v2243_v59  ;;  %v8002_v23 = vld [vmem:[#allocation8 + $0xe0] sm:$0xff] }
 0x220   : > { %v2572_v20 = vadd.f32 %v5024_v57, %v2571_v27  ;;  %v2250_v27 = vsel %vm1944_vm4, %v7515_v63, 1e+30  ;;  %2754 = vadd.xlane.f32.xlu0 %v2753_v33  ;;  %v2687_v28 = vmul.f32 %v8002_v23, %v7843_v34  ;;  %v2688_v63 = vmul.f32 %v8006_v11, %v7847_v19 }
 0x221   : > { %v7968_v30 = vpop.xlane.xlu0 %1852  ;;  %v2759_v57 = vadd.f32 %v2684_v8, %v2683_v31  ;;  %v2304_v54 = vmin.f32 %v2302_v21, %v2249_v0  ;;  %v2341_v55 = vmin.f32 %v2339_v51, %v2250_v27  ;;  %v5029_v59 = vsel %vm1954_vm0, 1.0, %v11281_v62 }
 0x222   : > { %v2573_v10 = vadd.f32 %v5025_v15, %v2572_v20  ;;  %vm1951_vm15 = vcmp.lt.f32.partialorder %v7968_v30, -1.5  ;;  %v8000_v15 = vpop.xlane.xlu1 %1873  ;;  %v2253_v20 = vsel %vm1946_vm6, %v7527_v40, 1e+30  ;;  %v2338_v31 = vmin.f32 %v2336_v3, %v2244_v9  ;;  %v8033_v3 = vld [vmem:[#allocation8 + $0x108] sm:$0xff] }
 0x223   : > { %v5026_v18 = vsel %vm1951_vm15, 1.0, %v11281_v62  ;;  %v2248_v8 = vsel %vm1943_vm3, %v7523_v61, 1e+30  ;;  %v2254_v21 = vsel %vm1946_vm6, %v7530_v1, 1e+30  ;;  %v2303_v51 = vmin.f32 %v2301_v52, %v2247_v58 }
 0x224   : > { %v2574_v29 = vadd.f32 %v5026_v18, %v2573_v10  ;;  %2760 = vadd.xlane.f32.xlu0 %v2759_v57  ;;  %v2765_v0 = vadd.f32 %v2688_v63, %v2687_v28  ;;  %v2692_v61 = vmul.f32 %v8033_v3, %v7847_v19  ;;  %v2306_v6 = vmin.f32 %v2304_v54, %v2253_v20 }
 0x225   : > { %v7998_v60 = vpop.xlane.xlu0 %1858  ;;  %vm1956_vm3 = vcmp.lt.f32.partialorder %v7959_v56, -1.5  ;;  %v2343_v37 = vmin.f32 %v2341_v55, %v2254_v21  ;;  %v2257_v9 = vsel %vm1948_vm11, %v7547_v50, 1e+30  ;;  %v2340_v58 = vmin.f32 %v2338_v31, %v2248_v8  ;;  %v8061_v55 = vld [vmem:[#allocation8 + $0x120] sm:$0xff] }
 0x226   : > { %v2575_v24 = vadd.f32 %v5027_v43, %v2574_v29  ;;  %vm1953_vm2 = vcmp.lt.f32.partialorder %v7998_v60, -1.5  ;;  %v8029_v43 = vld [vmem:[#allocation8 + $0x100] sm:$0xff]  ;;  %v5031_v52 = vsel %vm1956_vm3, 1.0, %v11281_v62  ;;  %v8048_v29 = vpop.xlane.xlu1 %1879  ;;  %v2251_v57 = vsel %vm1945_vm5, %v7539_v7, 1e+30 }
 0x227   : > { %v5028_v33 = vsel %vm1953_vm2, 1.0, %v11281_v62  ;;  %v2691_v18 = vmul.f32 %v8029_v43, %v7843_v34  ;;  %v2258_v28 = vsel %vm1948_vm11, %v7550_v46, 1e+30  ;;  %v2252_v63 = vsel %vm1945_vm5, %v7542_v36, 1e+30 }
 0x228   : > { %v2576_v10 = vadd.f32 %v5028_v33, %v2575_v24  ;;  %2766 = vadd.xlane.f32.xlu0 %v2765_v0  ;;  %v2695_v20 = vmul.f32 %v8061_v55, %v7843_v34  ;;  %v2308_v46 = vmin.f32 %v2306_v6, %v2257_v9  ;;  %vm1958_vm6 = vcmp.lt.f32.partialorder %v8000_v15, -1.5  ;;  %v8087_v6 = vld [vmem:[#allocation8 + $0x140] sm:$0xff] }
 0x229   : > { %v8027_v40 = vpop.xlane.xlu0 %1864  ;;  %v2771_v24 = vadd.f32 %v2692_v61, %v2691_v18  ;;  %v2345_v36 = vmin.f32 %v2343_v37, %v2258_v28  ;;  %v5033_v33 = vsel %vm1958_vm6, 1.0, %v11281_v62  ;;  %v2305_v8 = vmin.f32 %v2303_v51, %v2251_v57  ;;  %v8091_v37 = vld [vmem:[#allocation8 + $0x148] sm:$0xff] }
 0x22a   : > { %v2577_v1 = vadd.f32 %v5029_v59, %v2576_v10  ;;  %vm1955_vm4 = vcmp.lt.f32.partialorder %v8027_v40, -1.5  ;;  %v8065_v59 = vld [vmem:[#allocation8 + $0x128] sm:$0xff]  ;;  %v2262_v21 = vsel %vm1950_vm12, %v7571_v26, 1e+30  ;;  %v2342_v0 = vmin.f32 %v2340_v58, %v2252_v63  ;;  %v8085_v61 = vpop.xlane.xlu1 %1885 }
 0x22b   : > { %v5030_v27 = vsel %vm1955_vm4, 1.0, %v11281_v62  ;;  %v2696_v7 = vmul.f32 %v8065_v59, %v7847_v19  ;;  %v2700_v51 = vmul.f32 %v8091_v37, %v7847_v19  ;;  %v8095_v45 = vmin.f32 %v2308_v46, %v2261_v25  ;;  %v11477_v46 = vld [vmem:[#allocation69_spill] sm:$0xff] }
 0x22c   : > { %v2578_v50 = vadd.f32 %v5030_v27, %v2577_v1  ;;  %2772 = vadd.xlane.f32.xlu0 %v2771_v24  ;;  %v2699_v1 = vmul.f32 %v8087_v6, %v7843_v34  ;;  %vm1960_vm8 = vcmp.lt.f32.partialorder %v8048_v29, -1.5  ;;  %v2255_v9 = vsel %vm1947_vm7, %v7554_v38, 1e+30 }
 0x22d   : > { %v8059_v54 = vpop.xlane.xlu0 %1870  ;;  %v2777_v4 = vadd.f32 %v2696_v7, %v2695_v20  ;;  %v5035_v27 = vsel %vm1960_vm8, 1.0, %v11281_v62  ;;  %v2256_v57 = vsel %vm1947_vm7, %v7558_v17, 1e+30  ;;  %v8116_v28 = vsel %vm1952_vm14, %v7590_v14, 1e+30  ;;  %v8124_v7 = vld [vmem:[#allocation8 + $0x168] sm:$0xff] }
 0x22e   : > { %v2579_v22 = vadd.f32 %v5031_v52, %v2578_v50  ;;  %vm1957_vm5 = vcmp.lt.f32.partialorder %v8059_v54, -1.5  ;;  %v8102_v52 = vmin.f32 %v2345_v36, %v2262_v21  ;;  %v8118_v50 = vld [vmem:[#allocation8 + $0x160] sm:$0xff]  ;;  %v2783_v20 = vadd.f32 %v2700_v51, %v2699_v1  ;;  %v8141_v21 = vpop.xlane.xlu1 %1891  ;;  %v11500_v54 = vld [vmem:[#allocation26_spill] sm:$0xff] }
 0x22f   : > { %v5032_v31 = vsel %vm1957_vm5, 1.0, %v11281_v62  ;;  %v2703_v63 = vmul.f32 %v8118_v50, %v7843_v34  ;;  %v2704_v17 = vmul.f32 %v8124_v7, %v7847_v19  ;;  %vm2616_vm11 = vcmp.eq.s32.totalorder %v11477_v46, 2 }
 0x230   : > { %v2580_v10 = vadd.f32 %v5032_v31, %v2579_v22  ;;  %2778 = vadd.xlane.f32.xlu0 %v2777_v4  ;;  %v2307_v14 = vmin.f32 %v2305_v8, %v2255_v9  ;;  %vm1962_vm7 = vcmp.lt.f32.partialorder %v8085_v61, -1.5  ;;  %v2344_v36 = vmin.f32 %v2342_v0, %v2256_v57 }
 0x231   : > { %v8083_v18 = vpop.xlane.xlu0 %1876  ;;  %v2259_v25 = vsel %vm1949_vm13, %v7575_v48, 1e+30  ;;  %v2260_v8 = vsel %vm1949_vm13, %v7579_v5, 1e+30  ;;  %v8149_v48 = vld [vmem:[#allocation8 + $0x180] sm:$0xff]  ;;  %v2789_v51 = vadd.f32 %v2704_v17, %v2703_v63  ;;  %v8162_v5 = vsel %vm2615_vm10, 1.0, %v11281_v62 }
 0x232   : > { %v2581_v26 = vadd.f32 %v5033_v33, %v2580_v10  ;;  %vm1959_vm9 = vcmp.lt.f32.partialorder %v8083_v18, -1.5  ;;  %v5037_v33 = vsel %vm1962_vm7, 1.0, %v11281_v62  ;;  %v2266_v10 = vsel %vm1952_vm14, %v7593_v13, 1e+30  ;;  %11479 = vst [vmem:[#allocation68_spill] sm:$0xff] %v8162_v5  ;;  %v11481_v17 = vld [vmem:[#allocation45_spill] sm:$0xff] }
 0x233   : > { %v5034_v58 = vsel %vm1959_vm9, 1.0, %v11281_v62  ;;  %v2707_v4 = vmul.f32 %v8149_v48, %v7843_v34  ;;  %v8167_v13 = vsel %vm2616_vm11, 1.0, %v11281_v62  ;;  %v2309_v32 = vmin.f32 %v2307_v14, %v2259_v25 }
 0x234   : > { %v2582_v38 = vadd.f32 %v5034_v58, %v2581_v26  ;;  %2784 = vadd.xlane.f32.xlu0 %v2783_v20  ;;  %v8155_v26 = vld [vmem:[#allocation8 + $0x188] sm:$0xff]  ;;  %11480 = vst [vmem:[#allocation69_spill] sm:$0xff] %v8167_v13  ;;  %vm1964_vm13 = vcmp.lt.f32.partialorder %v8141_v21, -1.5  ;;  %v2263_v58 = vsel %vm1951_vm15, %v7597_v49, 1e+30  ;;  %v2312_v63 = vmin.f32 %v8095_v45, %v8116_v28 }
 0x235   : > { %v8122_v24 = vpop.xlane.xlu0 %1882  ;;  %11478 = vst [vmem:[#allocation18_spill] sm:$0xff] %v8155_v26  ;;  %v2708_v12 = vmul.f32 %v8155_v26, %v7847_v19  ;;  %v5039_v57 = vsel %vm1964_vm13, 1.0, %v11281_v62  ;;  %v2349_v20 = vmin.f32 %v8102_v52, %v2266_v10  ;;  %v2264_v14 = vsel %vm1951_vm15, %v11481_v17, 1e+30  ;;  %v11526_v26 = vld [vmem:[#allocation39_spill] sm:$0xff] }
 0x236   : > { %v2583_v22 = vadd.f32 %v5035_v27, %v2582_v38  ;;  %vm1961_vm12 = vcmp.lt.f32.partialorder %v8122_v24, -1.5  ;;  %v2346_v27 = vmin.f32 %v2344_v36, %v2260_v8  ;;  %v11482_v36 = vld [vmem:[#allocation66_spill] sm:$0xff]  ;;  %v2820_v45 = vmul.f32 %v7857_v44, %v8167_v13  ;;  %v11483_v8 = vld [vmem:[#allocation19_spill] sm:$0xff] }
 0x237   : > { %v5036_v31 = vsel %vm1961_vm12, 1.0, %v11281_v62  ;;  %v2269_v49 = vsel %vm1954_vm0, %v11482_v36, 1e+30  ;;  %v2311_v52 = vmin.f32 %v2309_v32, %v2263_v58  ;;  %vm3689_vm15 = vcmp.eq.s32.totalorder %v11476_v39, 3  ;;  %v11486_v58 = vld [vmem:[#allocation21_spill] sm:$0xff] }
 0x238   : > { %v2584_v0 = vadd.f32 %v5036_v31, %v2583_v22  ;;  %2790 = vadd.xlane.f32.xlu0 %v2789_v51  ;;  %v2819_v31 = vmul.f32 %v7853_v41, %v8162_v5  ;;  %v2348_v30 = vmin.f32 %v2346_v27, %v2264_v14  ;;  %v2267_v10 = vsel %vm1953_vm2, %v11483_v8, 1e+30 }
 0x239   : > { %v8153_v1 = vpop.xlane.xlu0 %1888  ;;  %vm3690_vm11 = vcmp.eq.s32.totalorder %v11477_v46, 3  ;;  %v2823_v27 = vmul.f32 %v7863_v47, %v8162_v5  ;;  %v2313_v46 = vmin.f32 %v2311_v52, %v2267_v10  ;;  %v8217_v17 = vsel %vm3689_vm15, 1.0, %v11281_v62 }
 0x23a   : > { %v2585_v9 = vadd.f32 %v5037_v33, %v2584_v0  ;;  %vm1963_vm14 = vcmp.lt.f32.partialorder %v8153_v1, -1.5  ;;  %v2795_v33 = vadd.f32 %v2708_v12, %v2707_v4  ;;  %v11484_v4 = vld [vmem:[#allocation70_spill] sm:$0xff]  ;;  %v11485_v12 = vld [vmem:[#allocation20_spill] sm:$0xff]  ;;  %11487 = vst [vmem:[#allocation45_spill] sm:$0xff] %v8217_v17  ;;  %v8220_v2 = vsel %vm3690_vm11, 1.0, %v11281_v62 }
 0x23b   : > { %v5038_v38 = vsel %vm1963_vm14, 1.0, %v11281_v62  ;;  %v2270_v51 = vsel %vm1954_vm0, %v11484_v4, 1e+30  ;;  %v2268_v32 = vsel %vm1953_vm2, %v11485_v12, 1e+30  ;;  %11488 = vst [vmem:[#allocation66_spill] sm:$0xff] %v8220_v2 }
 0x23c   : > { %v2586_v22 = vadd.f32 %v5038_v38, %v2585_v9  ;;  %2796 = vadd.xlane.f32.xlu0 %v2795_v33  ;;  %v2883_v9 = vadd.f32 %v2820_v45, %v2819_v31  ;;  %v2314_v38 = vmin.f32 %v2312_v63, %v2269_v49  ;;  %v2351_v60 = vmin.f32 %v2349_v20, %v2270_v51  ;;  %v11490_v33 = vld [vmem:[#allocation25_spill] sm:$0xff]  ;;  %v11491_v45 = vld [vmem:[#allocation24_spill] sm:$0xff]  ;;  %v11492_v49 = vld [vmem:[#allocation23_spill] sm:$0xff] }
 0x23d   : > { %v8189_v25 = vpop.xlane.xlu0 %1894  ;;  %v2350_v14 = vmin.f32 %v2348_v30, %v2268_v32  ;;  %v2271_v31 = vsel %vm1955_vm4, %v11490_v33, 1e+30  ;;  %v2274_v63 = vsel %vm1956_vm3, %v11491_v45, 1e+30  ;;  %v2272_v52 = vsel %vm1955_vm4, %v11492_v49, 1e+30 }
 0x23e   : > { %v2587_v28 = vadd.f32 %v5039_v57, %v2586_v22  ;;  %vm1965_vm10 = vcmp.lt.f32.partialorder %v8189_v25, -1.5  ;;  %v2824_v57 = vmul.f32 %v11486_v58, %v8167_v13  ;;  %v11489_v22 = vld [vmem:[#allocation44_spill] sm:$0xff]  ;;  %v3893_v20 = vmul.f32 %v7853_v41, %v8217_v17  ;;  %v11494_v12 = vld [vmem:[#allocation75_spill] sm:$0xff] }
 0x23f   : > { %v5040_v0 = vsel %vm1965_vm10, 1.0, %v11281_v62  ;;  %v2273_v36 = vsel %vm1956_vm3, %v11489_v22, 1e+30  ;;  %v3894_v30 = vmul.f32 %v7857_v44, %v8220_v2  ;;  %v2315_v10 = vmin.f32 %v2313_v46, %v2271_v31  ;;  %v11493_v51 = vld [vmem:[#allocation48_spill] sm:$0xff]  ;;  %v11501_v49 = vld [vmem:[#allocation43_spill] sm:$0xff] }
 0x240   : > { %v8210_v39 = vadd.f32 %v5040_v0, %v2587_v28  ;;  %2884 = vadd.xlane.f32.xlu0 %v2883_v9  ;;  %v2889_v28 = vadd.f32 %v2824_v57, %v2823_v27  ;;  %v2316_v8 = vmin.f32 %v2314_v38, %v2273_v36  ;;  %v2353_v0 = vmin.f32 %v2351_v60, %v2274_v63  ;;  %v11495_v32 = vld [vmem:[#allocation28_spill] sm:$0xff]  ;;  %v11496_v27 = vld [vmem:[#allocation29_spill] sm:$0xff] }
 0x241   : > { %v2352_v4 = vmin.f32 %v2350_v14, %v2272_v52  ;;  %v2277_v56 = vsel %vm1958_vm6, %v11493_v51, 1e+30  ;;  %v2275_v40 = vsel %vm1957_vm5, %v11494_v12, 1e+30  ;;  %v2278_v9 = vsel %vm1958_vm6, %v11495_v32, 1e+30 }
 0x242   : > { %v2276_v57 = vsel %vm1957_vm5, %v11496_v27, 1e+30  ;;  %v3957_v38 = vadd.f32 %v3894_v30, %v3893_v20  ;;  %v3897_v46 = vmul.f32 %v7863_v47, %v8217_v17  ;;  %v3898_v60 = vmul.f32 %v11486_v58, %v8220_v2  ;;  %v11497_v14 = vld [vmem:[#allocation16_spill] sm:$0xff]  ;;  %v11503_v30 = vld [vmem:[#allocation22_spill] sm:$0xff]  ;;  %v11506_v12 = vld [vmem:[#allocation57_spill] sm:$0xff] }
 0x243   : > { %v8255_v22 = vsub.s32 3, %v11497_v14  ;;  %v2318_v36 = vmin.f32 %v2316_v8, %v2277_v56  ;;  %v2317_v33 = vmin.f32 %v2315_v10, %v2275_v40  ;;  %v8258_v15 = vsub.s32 7, %v11497_v14  ;;  %v11505_v51 = vld [vmem:[#allocation78_spill] sm:$0xff]  ;;  %v11511_v14 = vld [vmem:[#allocation32_spill] sm:$0xff] }
 0x244   : > { %2890 = vadd.xlane.f32.xlu0 %v2889_v28  ;;  %v2355_v31 = vmin.f32 %v2353_v0, %v2278_v9  ;;  %v2354_v45 = vmin.f32 %v2352_v4, %v2276_v57  ;;  %v2281_v63 = vsel %vm1960_vm8, %v11500_v54, 1e+30  ;;  %v2279_v52 = vsel %vm1959_vm9, %v11501_v49, 1e+30  ;;  %v11502_v28 = vld [vmem:[#allocation27_spill] sm:$0xff]  ;;  %v11504_v0 = vld [vmem:[#allocation77_spill] sm:$0xff] }
 0x245   : > { %11498 = vst [vmem:[#allocation19_spill] sm:$0xff] %v8255_v22  ;;  %11499 = vst [vmem:[#allocation70_spill] sm:$0xff] %v8258_v15  ;;  %v2282_v20 = vsel %vm1960_vm8, %v11502_v28, 1e+30  ;;  %v2280_v8 = vsel %vm1959_vm9, %v11503_v30, 1e+30  ;;  %v3963_v10 = vadd.f32 %v3898_v60, %v3897_v46  ;;  %v2827_v4 = vmul.f32 %v11504_v0, %v8162_v5 }
 0x246   : > { %v2828_v56 = vmul.f32 %v11505_v51, %v8167_v13  ;;  %v8278_v40 = vrot.slane %v11506_v12, %v8255_v22  ;;  %v2320_v32 = vmin.f32 %v2318_v36, %v2281_v63  ;;  %v2319_v9 = vmin.f32 %v2317_v33, %v2279_v52  ;;  %v11509_v57 = vld [vmem:[#allocation33_spill] sm:$0xff]  ;;  %v11510_v46 = vld [vmem:[#allocation31_spill] sm:$0xff]  ;;  %v11512_v36 = vld [vmem:[#allocation34_spill] sm:$0xff] }
 0x247   : > { %v8282_v29 = vrot.slane %v11506_v12, %v8258_v15  ;;  %v2357_v18 = vmin.f32 %v2355_v31, %v2282_v20  ;;  %v2356_v27 = vmin.f32 %v2354_v45, %v2280_v8  ;;  %v2283_v60 = vsel %vm1961_vm12, %v11510_v46, 1e+30  ;;  %v11513_v49 = vld [vmem:[#allocation42_spill] sm:$0xff]  ;;  %v11516_v46 = vld [vmem:[#allocation51_spill] sm:$0xff]  ;;  %v11517_v15 = vld [vmem:[#allocation36_spill] sm:$0xff] }
 0x248   : > { %3958 = vadd.xlane.f32.xlu0 %v3957_v38  ;;  %11507 = vst [vmem:[#allocation20_spill] sm:$0xff] %v8278_v40  ;;  %v2285_v38 = vsel %vm1962_vm7, %v11509_v57, 1e+30  ;;  %v2286_v54 = vsel %vm1962_vm7, %v11511_v14, 1e+30  ;;  %v3901_v31 = vmul.f32 %v11504_v0, %v8217_v17  ;;  %v3902_v45 = vmul.f32 %v11505_v51, %v8220_v2  ;;  %v11514_v28 = vld [vmem:[#allocation30_spill] sm:$0xff] }
 0x249   : > { %11508 = vst [vmem:[#allocation21_spill] sm:$0xff] %v8282_v29  ;;  %v2284_v33 = vsel %vm1961_vm12, %v11512_v36, 1e+30  ;;  %v2895_v63 = vadd.f32 %v2828_v56, %v2827_v4  ;;  %v2831_v52 = vmul.f32 %v11513_v49, %v8162_v5  ;;  %v2832_v20 = vmul.f32 %v11514_v28, %v8167_v13  ;;  %v11515_v4 = vld [vmem:[#allocation35_spill] sm:$0xff]  ;;  %v1901_v36 = vpop.xlane.xlu0 %1900 }
 0x24a   : > { %v8306_v61 = vrot.slane %v8278_v40, %v8255_v22  ;;  %v2322_v24 = vmin.f32 %v2320_v32, %v2285_v38  ;;  %v2321_v30 = vmin.f32 %v2319_v9, %v2283_v60  ;;  %v8312_v57 = vrot.slane %v8282_v29, %v8255_v22  ;;  %v11518_v38 = vld [vmem:[#allocation76_spill] sm:$0xff]  ;;  %v11525_v22 = vld [vmem:[#allocation38_spill] sm:$0xff] }
 0x24b   : > { %v2289_v56 = vsel %vm1964_vm13, %v11515_v4, 1e+30  ;;  %v2287_v14 = vsel %vm1963_vm14, %v11516_v46, 1e+30  ;;  %v2359_v40 = vmin.f32 %v2357_v18, %v2286_v54  ;;  %v2288_v32 = vsel %vm1963_vm14, %v11517_v15, 1e+30 }
 0x24c   : > { %3964 = vadd.xlane.f32.xlu0 %v3963_v10  ;;  %v2358_v10 = vmin.f32 %v2356_v27, %v2284_v33  ;;  %v3969_v9 = vadd.f32 %v3902_v45, %v3901_v31  ;;  %v2290_v60 = vsel %vm1964_vm13, %v11518_v38, 1e+30  ;;  %v2901_v27 = vadd.f32 %v2832_v20, %v2831_v52  ;;  %v11519_v54 = vld [vmem:[#allocation53_spill] sm:$0xff]  ;;  %v11524_v38 = vld [vmem:[#allocation62_spill] sm:$0xff] }
 0x24d   : > { %v3733_v33 = vmul.f32 %v7853_v41, %v8306_v61  ;;  %v3737_v4 = vmul.f32 %v7863_v47, %v8306_v61  ;;  %v2324_v46 = vmin.f32 %v2322_v24, %v2289_v56  ;;  %v2323_v29 = vmin.f32 %v2321_v30, %v2287_v14  ;;  %v11520_v31 = vld [vmem:[#allocation37_spill] sm:$0xff]  ;;  %v11521_v41 = vld [vmem:[#allocation52_spill] sm:$0xff] }
 0x24e   : > { %vm1967_vm0 = vcmp.lt.f32.partialorder %v1901_v36, -1.5  ;;  %v3734_v1 = vmul.f32 %v7857_v44, %v8312_v57  ;;  %v2360_v15 = vmin.f32 %v2358_v10, %v2288_v32  ;;  %v2291_v21 = vsel %vm1965_vm10, %v11519_v54, 1e+30  ;;  %v11522_v52 = vld [vmem:[#allocation61_spill] sm:$0xff]  ;;  %v11523_v30 = vld [vmem:[#allocation40_spill] sm:$0xff] }
 0x24f   : > { %v2292_v45 = vsel %vm1965_vm10, %v11520_v31, 1e+30  ;;  %v5042_v47 = vsel %vm1967_vm0, 1.0, %v11281_v62  ;;  %v2361_v44 = vmin.f32 %v2359_v40, %v2290_v60  ;;  %v2295_v10 = vsel %vm1967_vm0, %v11523_v30, 1e+30 }
 0x250   : > { %2896 = vadd.xlane.f32.xlu0 %v2895_v63  ;;  %v3738_v25 = vmul.f32 %v11486_v58, %v8312_v57  ;;  %v2325_v14 = vmin.f32 %v2323_v29, %v2291_v21  ;;  %v2362_v32 = vmin.f32 %v2360_v15, %v2292_v45  ;;  %v3797_v31 = vadd.f32 %v3734_v1, %v3733_v33 }
 0x251   : > { %v3905_v33 = vmul.f32 %v11513_v49, %v8217_v17 }
 0x252   : > { %v2327_v60 = vmin.f32 %v2325_v14, %v2295_v10  ;;  %v3803_v45 = vadd.f32 %v3738_v25, %v3737_v4  ;;  %v11531_v14 = vld [vmem:[#allocation60_spill] sm:$0xff] }
 0x253   : > { %v8308_v8 = vpop.xlane.xlu1 %1356 }
 0x254   : > { %3970 = vadd.xlane.f32.xlu0 %v3969_v9 }
 0x257   : > { %v1898_v18 = vpop.xlane.xlu1 %1897 }
 0x258   : > { %vm1966_vm2 = vcmp.lt.f32.partialorder %v1898_v18, -1.5  ;;  %v2296_v18 = vsel %vm1967_vm0, %v11524_v38, 1e+30  ;;  %2902 = vadd.xlane.f32.xlu0 %v2901_v27  ;;  %v11532_v38 = vld [vmem:[#allocation17_spill] sm:$0xff]  ;;  %vm2425_vm0 = vcmask 1041409  }
 0x259   : > { %v2293_v63 = vsel %vm1966_vm2, %v11521_v41, 1e+30  ;;  %v2294_v20 = vsel %vm1966_vm2, %v11522_v52, 1e+30  ;;  %v5041_v24 = vsel %vm1966_vm2, 1.0, %v11281_v62 }
 0x25a   : > { %v2589_v56 = vadd.f32 %v5041_v24, %v8210_v39  ;;  %v2326_v41 = vmin.f32 %v2324_v46, %v2293_v63  ;;  %v2363_v52 = vmin.f32 %v2361_v44, %v2294_v20  ;;  %v2364_v24 = vmin.f32 %v2362_v32, %v2296_v18  ;;  %v11528_v44 = vld [vmem:[#allocation67_spill] sm:$0xff] }
 0x25b   : > { %v1904_v54 = vpop.xlane.xlu1 %1903  ;;  %v1519_v10 = vrot.slane %v11528_v44, 4  ;;  %v2835_v32 = vmul.f32 %v11531_v14, %v8162_v5  ;;  %v2836_v18 = vmul.f32 %v11532_v38, %v8167_v13 }
 0x25c   : > { %vm1968_vm3 = vcmp.lt.f32.partialorder %v1904_v54, -1.5  ;;  %v2590_v40 = vadd.f32 %v5042_v47, %v2589_v56  ;;  %3798 = vadd.xlane.f32.xlu0 %v3797_v31  ;;  %v11529_v56 = vlaneseq }
 0x25d   : > { %v2297_v30 = vsel %vm1968_vm3, %v11525_v22, 1e+30  ;;  %v2298_v39 = vsel %vm1968_vm3, %v11526_v26, 1e+30  ;;  %v5043_v9 = vsel %vm1968_vm3, 1.0, %v11281_v62  ;;  %v3906_v26 = vmul.f32 %v11514_v28, %v8220_v2  ;;  %v11527_v22 = vld [vmem:[#allocation59_spill] sm:$0xff] }
 0x25e   : > { %v2328_v58 = vmin.f32 %v2326_v41, %v2297_v30  ;;  %v2365_v29 = vmin.f32 %v2363_v52, %v2298_v39  ;;  %v8353_v15 = vadd.f32 %v5043_v9, %v2590_v40  ;;  %v1434_v47 = vrot.slane %v11527_v22, 4 }
 0x25f   : > { %v8362_v27 = vand.u32 127, %v11529_v56  ;;  %v3975_v25 = vadd.f32 %v3906_v26, %v3905_v33  ;;  %v1520_v40 = vadd.f32 %v1519_v10, %v11528_v44  ;;  %v3741_v9 = vmul.f32 %v11504_v0, %v8306_v61  ;;  %v11533_v33 = vld [vmem:[#allocation79_spill] sm:$0xff] }
 0x260   : > { %v2329_v36 = vmin.f32 %v2327_v60, %v2328_v58  ;;  %v2366_v21 = vmin.f32 %v2364_v24, %v2365_v29  ;;  %3804 = vadd.xlane.f32.xlu0 %v3803_v45  ;;  %v1435_v31 = vadd.f32 %v1434_v47, %v11527_v22  ;;  %v2907_v60 = vadd.f32 %v2836_v18, %v2835_v32  ;;  %v11534_v47 = vld [vmem:[#allocation46_spill] sm:$0xff]  ;;  %v11535_v56 = vld [vmem:[#allocation63_spill] sm:$0xff]  ;;  %v11536_v18 = vld [vmem:[#allocation64_spill] sm:$0xff] }
 0x261   : > { %11530 = vst [vmem:[#allocation44_spill] sm:$0xff] %v8362_v27  ;;  %vm11079_vm4 = vcmp.eq.s32.totalorder %v8362_v27, 0  ;;  %v3742_v24 = vmul.f32 %v11505_v51, %v8312_v57  ;;  %vm11080_vm6 = vcmp.eq.s32.totalorder %v8362_v27, 1  ;;  %vm11099_vm5 = vcmp.eq.s32.totalorder %v8362_v27, 2 }
 0x262   : > { %v2330_v46 = vrot.slane %v2329_v36, 4  ;;  %v2367_v1 = vrot.slane %v2366_v21, 4  ;;  %v1436_v58 = vrot.slane %v1435_v31, 2  ;;  %v3910_v45 = vmul.f32 %v11532_v38, %v8220_v2 }
 0x263   : > { %v3809_v51 = vadd.f32 %v3742_v24, %v3741_v9  ;;  %vm11097_vm8 = vcmp.eq.s32.totalorder %v8362_v27, 3  ;;  %v2840_v44 = vmul.f32 %v7944_v16, %v8167_v13  ;;  %v1559_v32 = vsub.f32 1.0, %v11535_v56 }
 0x264   : > { %v2331_v63 = vmin.f32 %v2329_v36, %v2330_v46  ;;  %v2368_v20 = vmin.f32 %v2366_v21, %v2367_v1  ;;  %3976 = vadd.xlane.f32.xlu0 %v3975_v25  ;;  %v1521_v21 = vrot.slane %v1520_v40, 2  ;;  %v1526_v46 = vsel %vm11079_vm4, %v11533_v33, 0.0  ;;  %v11539_v33 = vld [vmem:[#allocation49_spill] sm:$0xff] }
 0x265   : > { %v3909_v1 = vmul.f32 %v11531_v14, %v8217_v17  ;;  %v1528_v0 = vsel %vm11080_vm6, %v8308_v8, %v1526_v46  ;;  %v1437_v26 = vadd.f32 %v1436_v58, %v1435_v31  ;;  %v2839_v8 = vmul.f32 %v7940_v42, %v8162_v5 }
 0x266   : > { %v2332_v54 = vrot.slane %v2331_v63, 2  ;;  %v2369_v4 = vrot.slane %v2368_v20, 2  ;;  %v1522_v22 = vadd.f32 %v1521_v21, %v1520_v40  ;;  %v3746_v40 = vmul.f32 %v11514_v28, %v8312_v57 }
 0x267   : > { %v1438_v10 = vrot.slane %v1437_v26, 1  ;;  %vm11096_vm9 = vcmp.eq.s32.totalorder %v8362_v27, 4  ;;  %vm11095_vm7 = vcmp.eq.s32.totalorder %v8362_v27, 5  ;;  %v3913_v9 = vmul.f32 %v7940_v42, %v8217_v17 }
 0x268   : > { %v2333_v41 = vmin.f32 %v2331_v63, %v2332_v54  ;;  %v2370_v52 = vmin.f32 %v2368_v20, %v2369_v4  ;;  %2908 = vadd.xlane.f32.xlu0 %v2907_v60  ;;  %v1530_v63 = vsel %vm11099_vm5, %v11534_v47, %v1528_v0  ;;  %v3981_v20 = vadd.f32 %v3910_v45, %v3909_v1  ;;  %v11537_v4 = vld [vmem:[#allocation47_spill] sm:$0xff] }
 0x269   : > { %v1560_v54 = vsub.f32 1.0, %v11536_v18  ;;  %v1532_v25 = vsel %vm11097_vm8, %v11537_v4, %v1530_v63  ;;  %v1523_v31 = vrot.slane %v1522_v22, 1  ;;  %v1439_v60 = vadd.f32 %v1438_v10, %v1437_v26 }
 0x26a   : > { %v2334_v30 = vrot.slane %v2333_v41, 1  ;;  %v2371_v39 = vrot.slane %v2370_v52, 1  ;;  %v3914_v24 = vmul.f32 %v7944_v16, %v8220_v2  ;;  %vm11062_vm12 = vcmp.eq.s32.totalorder %v8362_v27, 6 }
 0x26b   : > { %v1563_v58 = vcombine.low %v1559_v32, %v1560_v54  ;;  %vm11061_vm13 = vcmp.eq.s32.totalorder %v8362_v27, 7  ;;  %v2844_v47 = vmul.f32 %v7974_v35, %v8167_v13  ;;  %v8659_v27 = vld [vmem:[#allocation8 + $0x130] sm:$0xff] }
 0x26c   : > { %v2335_v29 = vmin.f32 %v2333_v41, %v2334_v30  ;;  %v8376_v36 = vmin.f32 %v2370_v52, %v2371_v39  ;;  %3810 = vadd.xlane.f32.xlu0 %v3809_v51  ;;  %v2913_v41 = vadd.f32 %v2840_v44, %v2839_v8  ;;  %v3745_v52 = vmul.f32 %v11513_v49, %v8306_v61  ;;  %v11538_v30 = vld [vmem:[#allocation65_spill] sm:$0xff] }
 0x26d   : > { %v1534_v39 = vsel %vm11096_vm9, %v11538_v30, %v1532_v25  ;;  %v1524_v49 = vadd.f32 %v1523_v31, %v1522_v22  ;;  %v3987_v45 = vadd.f32 %v3914_v24, %v3913_v9  ;;  %v2843_v22 = vmul.f32 %v7970_v53, %v8162_v5  ;;  %v11543_v24 = vld [vmem:[#allocation73_spill] sm:$0xff]  ;;  %11559 = vst [vmem:[#allocation33_spill] sm:$0xff] %v8659_v27 }
 0x26e   : > { %5271 = vrsqrt.f32 %v2335_v29  ;;  %v1536_v28 = vsel %vm11095_vm7, %v1439_v60, %v1534_v39  ;;  %v3815_v21 = vadd.f32 %v3746_v40, %v3745_v52  ;;  %v1564_v63 = vrot.slane %v1563_v58, 7  ;;  %v11541_v60 = vld [vmem:[#allocation71_spill] sm:$0xff]  ;;  %v11542_v39 = vld [vmem:[#allocation72_spill] sm:$0xff]  ;;  %v11544_v58 = vld [vmem:[#allocation74_spill] sm:$0xff] }
 0x26f   : > { %5273 = vrsqrt.f32 %v8376_v36  ;;  %v1538_v46 = vsel %vm11062_vm12, %v11539_v33, %v1536_v28  ;;  %vm2396_vm14 = vcmp.eq.f32.partialorder %v2335_v29, inf  ;;  %vm2398_vm10 = vcmp.eq.f32.partialorder %v2335_v29, 0.0 }
 0x270   : > { %3982 = vadd.xlane.f32.xlu0 %v3981_v20  ;;  %v8425_v0 = vsel %vm11061_vm13, %v1524_v49, %v1538_v46  ;;  %v2399_v20 = vand.u32 2147483648, %v2335_v29  ;;  %vm2403_vm15 = vcmp.eq.f32.partialorder %v8376_v36, inf  ;;  %v2406_v10 = vand.u32 2147483648, %v8376_v36 }
 0x271   : > { %11540 = vst [vmem:[#allocation25_spill] sm:$0xff] %v8425_v0  ;;  %vm2405_vm11 = vcmp.eq.f32.partialorder %v8376_v36, 0.0  ;;  %v1566_v54 = vmul.f32 %v11506_v12, %v1564_v63  ;;  %v2919_v25 = vadd.f32 %v2844_v47, %v2843_v22  ;;  %v3749_v31 = vmul.f32 %v11531_v14, %v8306_v61  ;;  %v8584_v0 = vld [vmem:[#allocation8 + $0xd0] sm:$0xff] }
 0x272   : > { %v3918_v12 = vmul.f32 %v7974_v35, %v8220_v2  ;;  %v2434_v14 = vsel %vm2425_vm0, %v11543_v24, 0.0 }
 0x273   : > { %v2521_v33 = vrot.slane %v1566_v54, %v11542_v39 }
 0x274   : > { %2914 = vadd.xlane.f32.xlu0 %v2913_v41 }
 0x275   : > { %v2525_v47 = vsel %vm2425_vm0, %v2521_v33, 0.0 }
 0x278   : > { %3816 = vadd.xlane.f32.xlu0 %v3815_v21  ;;  %v2517_v21 = vrot.slane %v1566_v54, %v11541_v60 }
 0x27a   : > { %v2524_v22 = vsel %vm2425_vm0, %v2517_v21, 0.0 }
 0x27b   : > { %v5272_v1 = vpop.eup %5271 }
 0x27c   : > { %v5274_v51 = vpop.eup %5273  ;;  %v2395_v26 = vmul.f32 %v5272_v1, %v2335_v29  ;;  %3988 = vadd.xlane.f32.xlu0 %v3987_v45  ;;  %v2848_v45 = vmul.f32 %v8006_v11, %v8167_v13 }
 0x27d   : > { %v2402_v8 = vmul.f32 %v5274_v51, %v8376_v36  ;;  %v2847_v51 = vmul.f32 %v8002_v23, %v8162_v5 }
 0x27e   : > { %v2397_v44 = vsel %vm2396_vm14, %v2335_v29, %v2395_v26  ;;  %v3750_v29 = vmul.f32 %v11532_v38, %v8312_v57  ;;  %v2435_v38 = vsel %vm2425_vm0, %v11544_v58, 0.0 }
 0x27f   : > { %v2400_v56 = vsel %vm2398_vm10, %v2399_v20, %v2397_v44  ;;  %v2404_v32 = vsel %vm2403_vm15, %v8376_v36, %v2402_v8  ;;  %v3917_v36 = vmul.f32 %v7970_v53, %v8217_v17  ;;  %v2436_v26 = vadd.f32 %v2435_v38, %v2434_v14  ;;  %v8499_v14 = vld [vmem:[#allocation8 + $0x58] sm:$0xff] }
 0x280   : > { %v2407_v18 = vsel %vm2405_vm11, %v2406_v10, %v2404_v32  ;;  %2920 = vadd.xlane.f32.xlu0 %v2919_v25  ;;  %v3821_v40 = vadd.f32 %v3750_v29, %v3749_v31  ;;  %v2925_v63 = vadd.f32 %v2848_v45, %v2847_v51  ;;  %v3753_v20 = vmul.f32 %v7940_v42, %v8306_v61  ;;  %v8481_v29 = vld [vmem:[#allocation8 + $0x30] sm:$0xff]  ;;  %v8513_v51 = vld [vmem:[#allocation8 + $0x78] sm:$0xff] }
 0x281   : > { %v2410_v4 = vcombine.low %v2400_v56, %v2407_v18  ;;  %v3993_v1 = vadd.f32 %v3918_v12, %v3917_v36  ;;  %v3754_v8 = vmul.f32 %v7944_v16, %v8312_v57  ;;  %v2526_v10 = vadd.f32 %v2525_v47, %v2524_v22  ;;  %v8467_v56 = vld [vmem:[#allocation8 + $0x10] sm:$0xff]  ;;  %v8471_v18 = vld [vmem:[#allocation8 + $0x18] sm:$0xff]  ;;  %v8522_v22 = vld [vmem:[#allocation7] sm:$0xff] }
 0x282   : > { %v2661_v32 = vmul.f32 %v8467_v56, %v7843_v34  ;;  %v3921_v42 = vmul.f32 %v8002_v23, %v8217_v17  ;;  %v3922_v16 = vmul.f32 %v8006_v11, %v8220_v2  ;;  %v2851_v12 = vmul.f32 %v8029_v43, %v8162_v5 }
 0x283   : > { %v2411_v41 = vrot.slane %v2410_v4, 7  ;;  %v3827_v4 = vadd.f32 %v3754_v8, %v3753_v20  ;;  %v2670_v58 = vmul.f32 %v8499_v14, %v7847_v19  ;;  %v2674_v45 = vmul.f32 %v8513_v51, %v7847_v19 }
 0x284   : > { %3822 = vadd.xlane.f32.xlu0 %v3821_v40  ;;  %v3999_v36 = vadd.f32 %v3922_v16, %v3921_v42  ;;  %v8543_v16 = vld [vmem:[#allocation7 + $0x20] sm:$0xff] }
 0x285   : > { %v2413_v52 = vmul.f32 %v2411_v41, %v1566_v54  ;;  %v2662_v54 = vmul.f32 %v8471_v18, %v7847_v19  ;;  %v2665_v41 = vmul.f32 %v8481_v29, %v7843_v34 }
 0x287   : > { %v2418_v30 = vrot.slane %v2413_v52, %v11541_v60  ;;  %v2422_v9 = vrot.slane %v2413_v52, %v11542_v39  ;;  %v2726_v31 = vadd.f32 %v2662_v54, %v2661_v32  ;;  %v8485_v52 = vld [vmem:[#allocation8 + $0x38] sm:$0xff]  ;;  %v2852_v60 = vmul.f32 %v8033_v3, %v8167_v13  ;;  %v8534_v32 = vld [vmem:[#allocation8 + $0x90] sm:$0xff] }
 0x288   : > { %3994 = vadd.xlane.f32.xlu0 %v3993_v1  ;;  %v2666_v40 = vmul.f32 %v8485_v52, %v7847_v19  ;;  %v2677_v54 = vmul.f32 %v8534_v32, %v7843_v34 }
 0x289   : > { %v2426_v49 = vsel %vm2425_vm0, %v2418_v30, 0.0  ;;  %v2427_v28 = vsel %vm2425_vm0, %v2422_v9, 0.0  ;;  %v8465_v44 = vpop.xlane.xlu0 %2392  ;;  %v8495_v9 = vld [vmem:[#allocation8 + $0x50] sm:$0xff]  ;;  %v2931_v38 = vadd.f32 %v2852_v60, %v2851_v12 }
 0x28a   : > { %v2428_v46 = vadd.f32 %v2427_v28, %v2426_v49  ;;  %11545 = vst [vmem:[#allocation24_spill] sm:$0xff] %v8465_v44  ;;  %v2732_v39 = vadd.f32 %v2666_v40, %v2665_v41  ;;  %v2669_v24 = vmul.f32 %v8495_v9, %v7843_v34  ;;  %v3757_v49 = vmul.f32 %v7970_v53, %v8306_v61  ;;  %v8548_v41 = vld [vmem:[#allocation7 + $0x28] sm:$0xff]  ;;  %v8663_v44 = vld [vmem:[#allocation8 + $0x138] sm:$0xff] }
 0x28b   : > { %v3758_v28 = vmul.f32 %v7974_v35, %v8312_v57  ;;  %v3925_v53 = vmul.f32 %v8029_v43, %v8217_v17  ;;  %v3926_v35 = vmul.f32 %v8033_v3, %v8220_v2  ;;  %11560 = vst [vmem:[#allocation31_spill] sm:$0xff] %v8663_v44 }
 0x28c   : > { %2429 = vadd.xlane.f32.xlu1 %v2428_v46  ;;  %2926 = vadd.xlane.f32.xlu0 %v2925_v63  ;;  %v2738_v33 = vadd.f32 %v2670_v58, %v2669_v24  ;;  %v8509_v46 = vld [vmem:[#allocation8 + $0x70] sm:$0xff]  ;;  %v8527_v63 = vld [vmem:[#allocation7 + $0x8] sm:$0xff]  ;;  %v2856_v24 = vmul.f32 %v8065_v59, %v8167_v13 }
 0x28d   : > { %v8479_v25 = vpop.xlane.xlu0 %2432  ;;  %v2673_v1 = vmul.f32 %v8509_v46, %v7843_v34 }
 0x28e   : > { %11546 = vst [vmem:[#allocation23_spill] sm:$0xff] %v8479_v25  ;;  %v8613_v25 = vld [vmem:[#allocation8 + $0xf8] sm:$0xff] }
 0x28f   : > { %11554 = vst [vmem:[#allocation27_spill] sm:$0xff] %v8613_v25 }
 0x290   : > { %2437 = vadd.xlane.f32.xlu1 %v2436_v26  ;;  %3828 = vadd.xlane.f32.xlu0 %v3827_v4  ;;  %v3833_v26 = vadd.f32 %v3758_v28, %v3757_v49  ;;  %v8538_v4 = vld [vmem:[#allocation8 + $0x98] sm:$0xff]  ;;  %v8559_v49 = vld [vmem:[#allocation8 + $0xb0] sm:$0xff] }
 0x291   : > { %v8493_v30 = vpop.xlane.xlu0 %2442  ;;  %v2678_v42 = vmul.f32 %v8538_v4, %v7847_v19  ;;  %v2681_v28 = vmul.f32 %v8559_v49, %v7843_v34 }
 0x292   : > { %11547 = vst [vmem:[#allocation48_spill] sm:$0xff] %v8493_v30  ;;  %v2685_v30 = vmul.f32 %v8584_v0, %v7843_v34 }
 0x294   : > { %2527 = vadd.xlane.f32.xlu1 %v2526_v10  ;;  %4000 = vadd.xlane.f32.xlu0 %v3999_v36  ;;  %v2744_v10 = vadd.f32 %v2674_v45, %v2673_v1  ;;  %v4005_v36 = vadd.f32 %v3926_v35, %v3925_v53  ;;  %v8568_v45 = vld [vmem:[#allocation7 + $0x40] sm:$0xff]  ;;  %v8573_v35 = vld [vmem:[#allocation7 + $0x48] sm:$0xff] }
 0x295   : > { %v8507_v21 = vpop.xlane.xlu0 %2724 }
 0x296   : > { %11548 = vst [vmem:[#allocation75_spill] sm:$0xff] %v8507_v21  ;;  %vm2979_vm2 = vcmp.lt.f32.partialorder %v8507_v21, -1.5  ;;  %v2690_v21 = vmul.f32 %v8613_v25, %v7847_v19  ;;  %v8634_v25 = vld [vmem:[#allocation8 + $0x110] sm:$0xff] }
 0x297   : > { %v3107_v47 = vsel %vm2979_vm2, %v8522_v22, 1e+30  ;;  %v3108_v20 = vsel %vm2979_vm2, %v8527_v63, 1e+30  ;;  %11556 = vst [vmem:[#allocation77_spill] sm:$0xff] %v8634_v25 }
 0x298   : > { %2727 = vadd.xlane.f32.xlu1 %v2726_v31  ;;  %2932 = vadd.xlane.f32.xlu0 %v2931_v38  ;;  %v2750_v38 = vadd.f32 %v2678_v42, %v2677_v54  ;;  %v3762_v42 = vmul.f32 %v8006_v11, %v8312_v57 }
 0x299   : > { %v8532_v8 = vpop.xlane.xlu0 %2730 }
 0x29a   : > { %11549 = vst [vmem:[#allocation28_spill] sm:$0xff] %v8532_v8  ;;  %vm2981_vm3 = vcmp.lt.f32.partialorder %v8532_v8, -1.5  ;;  %v8609_v8 = vld [vmem:[#allocation8 + $0xf0] sm:$0xff] }
 0x29b   : > { %v3111_v31 = vsel %vm2981_vm3, %v8543_v16, 1e+30  ;;  %v3112_v40 = vsel %vm2981_vm3, %v8548_v41, 1e+30  ;;  %11553 = vst [vmem:[#allocation43_spill] sm:$0xff] %v8609_v8 }
 0x29c   : > { %2733 = vadd.xlane.f32.xlu1 %v2732_v39  ;;  %v3171_v12 = vmin.f32 %v3107_v47, %v3111_v31  ;;  %v3208_v60 = vmin.f32 %v3108_v20, %v3112_v40  ;;  %3834 = vadd.xlane.f32.xlu0 %v3833_v26  ;;  %v2855_v39 = vmul.f32 %v8061_v55, %v8162_v5 }
 0x29d   : > { %v8557_v58 = vpop.xlane.xlu0 %2736  ;;  %v3761_v47 = vmul.f32 %v8002_v23, %v8306_v61 }
 0x29e   : > { %11550 = vst [vmem:[#allocation29_spill] sm:$0xff] %v8557_v58  ;;  %vm2983_vm14 = vcmp.lt.f32.partialorder %v8557_v58, -1.5  ;;  %v2937_v54 = vadd.f32 %v2856_v24, %v2855_v39  ;;  %v8588_v58 = vld [vmem:[#allocation8 + $0xd8] sm:$0xff]  ;;  %v3929_v39 = vmul.f32 %v8061_v55, %v8217_v17  ;;  %v3930_v24 = vmul.f32 %v8065_v59, %v8220_v2 }
 0x29f   : > { %v3115_v53 = vsel %vm2983_vm14, %v8568_v45, 1e+30  ;;  %v3116_v26 = vsel %vm2983_vm14, %v8573_v35, 1e+30  ;;  %v2686_v23 = vmul.f32 %v8588_v58, %v7847_v19 }
 0x2a0   : > { %2739 = vadd.xlane.f32.xlu1 %v2738_v33  ;;  %v8563_v33 = vld [vmem:[#allocation8 + $0xb8] sm:$0xff]  ;;  %v3173_v20 = vmin.f32 %v3171_v12, %v3115_v53  ;;  %4006 = vadd.xlane.f32.xlu0 %v4005_v36  ;;  %v8593_v36 = vld [vmem:[#allocation7 + $0x60] sm:$0xff]  ;;  %v8598_v12 = vld [vmem:[#allocation7 + $0x68] sm:$0xff] }
 0x2a1   : > { %v2682_v1 = vmul.f32 %v8563_v33, %v7847_v19  ;;  %v8582_v31 = vpop.xlane.xlu0 %2742 }
 0x2a2   : > { %11551 = vst [vmem:[#allocation16_spill] sm:$0xff] %v8582_v31  ;;  %vm2985_vm10 = vcmp.lt.f32.partialorder %v8582_v31, -1.5  ;;  %v2689_v31 = vmul.f32 %v8609_v8, %v7843_v34  ;;  %v8638_v8 = vld [vmem:[#allocation8 + $0x118] sm:$0xff] }
 0x2a3   : > { %v2756_v40 = vadd.f32 %v2682_v1, %v2681_v28  ;;  %v3119_v11 = vsel %vm2985_vm10, %v8593_v36, 1e+30  ;;  %v3839_v1 = vadd.f32 %v3762_v42, %v3761_v47  ;;  %11557 = vst [vmem:[#allocation78_spill] sm:$0xff] %v8638_v8 }
 0x2a4   : > { %2745 = vadd.xlane.f32.xlu1 %v2744_v10  ;;  %v3210_v10 = vmin.f32 %v3208_v60, %v3116_v26  ;;  %v3120_v60 = vsel %vm2985_vm10, %v8598_v12, 1e+30  ;;  %2938 = vadd.xlane.f32.xlu0 %v2937_v54  ;;  %v2762_v26 = vadd.f32 %v2686_v23, %v2685_v30  ;;  %v4011_v54 = vadd.f32 %v3930_v24, %v3929_v39  ;;  %v8643_v24 = vld [vmem:[#allocation7 + $0xa0] sm:$0xff] }
 0x2a5   : > { %v8607_v53 = vpop.xlane.xlu0 %2748  ;;  %v2859_v23 = vmul.f32 %v8087_v6, %v8162_v5  ;;  %v2768_v62 = vadd.f32 %v2690_v21, %v2689_v31  ;;  %v2694_v39 = vmul.f32 %v8638_v8, %v7847_v19  ;;  %v3765_v31 = vmul.f32 %v8029_v43, %v8306_v61 }
 0x2a6   : > { %v3212_v28 = vmin.f32 %v3210_v10, %v3120_v60  ;;  %11552 = vst [vmem:[#allocation26_spill] sm:$0xff] %v8607_v53  ;;  %vm2987_vm15 = vcmp.lt.f32.partialorder %v8607_v53, -1.5  ;;  %v8623_v10 = vld [vmem:[#allocation7 + $0x88] sm:$0xff]  ;;  %v2693_v53 = vmul.f32 %v8634_v25, %v7843_v34  ;;  %v2698_v43 = vmul.f32 %v8663_v44, %v7847_v19  ;;  %v8684_v44 = vld [vmem:[#allocation8 + $0x150] sm:$0xff] }
 0x2a7   : > { %v3124_v30 = vsel %vm2987_vm15, %v8623_v10, 1e+30  ;;  %11564 = vst [vmem:[#allocation30_spill] sm:$0xff] %v8684_v44 }
 0x2a8   : > { %2751 = vadd.xlane.f32.xlu1 %v2750_v38  ;;  %v3175_v38 = vmin.f32 %v3173_v20, %v3119_v11  ;;  %v8618_v20 = vld [vmem:[#allocation7 + $0x80] sm:$0xff]  ;;  %3840 = vadd.xlane.f32.xlu0 %v3839_v1  ;;  %v2860_v11 = vmul.f32 %v8091_v37, %v8167_v13  ;;  %v2774_v25 = vadd.f32 %v2694_v39, %v2693_v53 }
 0x2a9   : > { %v3123_v47 = vsel %vm2987_vm15, %v8618_v20, 1e+30  ;;  %v8632_v60 = vpop.xlane.xlu0 %2754  ;;  %v3934_v39 = vmul.f32 %v8091_v37, %v8220_v2 }
 0x2aa   : > { %v3177_v42 = vmin.f32 %v3175_v38, %v3123_v47  ;;  %11555 = vst [vmem:[#allocation22_spill] sm:$0xff] %v8632_v60  ;;  %vm2989_vm11 = vcmp.lt.f32.partialorder %v8632_v60, -1.5  ;;  %v2943_v47 = vadd.f32 %v2860_v11, %v2859_v23  ;;  %v2697_v60 = vmul.f32 %v8659_v27, %v7843_v34  ;;  %v8688_v27 = vld [vmem:[#allocation8 + $0x158] sm:$0xff] }
 0x2ab   : > { %v3127_v38 = vsel %vm2989_vm11, %v8643_v24, 1e+30  ;;  %11565 = vst [vmem:[#allocation35_spill] sm:$0xff] %v8688_v27 }
 0x2ac   : > { %2757 = vadd.xlane.f32.xlu1 %v2756_v40  ;;  %v3214_v40 = vmin.f32 %v3212_v28, %v3124_v30  ;;  %v8648_v28 = vld [vmem:[#allocation7 + $0xa8] sm:$0xff]  ;;  %v3179_v1 = vmin.f32 %v3177_v42, %v3127_v38  ;;  %4012 = vadd.xlane.f32.xlu0 %v4011_v54  ;;  %v3766_v30 = vmul.f32 %v8033_v3, %v8312_v57  ;;  %v8668_v54 = vld [vmem:[#allocation7 + $0xc0] sm:$0xff] }
 0x2ad   : > { %v3128_v21 = vsel %vm2989_vm11, %v8648_v28, 1e+30  ;;  %v8657_v8 = vpop.xlane.xlu0 %2760  ;;  %11561 = vst [vmem:[#allocation32_spill] sm:$0xff] %v8668_v54  ;;  %v3933_v42 = vmul.f32 %v8087_v6, %v8217_v17 }
 0x2ae   : > { %11558 = vst [vmem:[#allocation57_spill] sm:$0xff] %v8657_v8  ;;  %vm11022_vm0 = vcmp.lt.f32.partialorder %v8657_v8, -1.5  ;;  %v3845_v11 = vadd.f32 %v3766_v30, %v3765_v31  ;;  %v2701_v8 = vmul.f32 %v8684_v44, %v7843_v34  ;;  %v8693_v31 = vld [vmem:[#allocation7 + $0xe0] sm:$0xff]  ;;  %v2864_v30 = vmul.f32 %v8124_v7, %v8167_v13 }
 0x2af   : > { %v3131_v3 = vsel %vm11022_vm0, %v8668_v54, 1e+30  ;;  %11566 = vst [vmem:[#allocation51_spill] sm:$0xff] %v8693_v31  ;;  %v5461_v54 = vld [vmem:[#allocation8 + $0x198] sm:$0xff] }
 0x2b0   : > { %2763 = vadd.xlane.f32.xlu1 %v2762_v26  ;;  %v3216_v26 = vmin.f32 %v3214_v40, %v3128_v21  ;;  %v3181_v40 = vmin.f32 %v3179_v1, %v3131_v3  ;;  %2944 = vadd.xlane.f32.xlu0 %v2943_v47  ;;  %v2780_v21 = vadd.f32 %v2698_v43, %v2697_v60 }
 0x2b1   : > { %v8682_v38 = vpop.xlane.xlu0 %2766  ;;  %v2702_v1 = vmul.f32 %v8688_v27, %v7847_v19  ;;  %v2863_v47 = vmul.f32 %v8118_v50, %v8162_v5 }
 0x2b2   : > { %11563 = vst [vmem:[#allocation42_spill] sm:$0xff] %v8682_v38 }
 0x2b3   : > { %v2786_v44 = vadd.f32 %v2702_v1, %v2701_v8  ;;  %v3769_v1 = vmul.f32 %v8061_v55, %v8306_v61 }
 0x2b4   : > { %2769 = vadd.xlane.f32.xlu1 %v2768_v62  ;;  %v8673_v62 = vld [vmem:[#allocation7 + $0xc8] sm:$0xff]  ;;  %3846 = vadd.xlane.f32.xlu0 %v3845_v11  ;;  %v2949_v11 = vadd.f32 %v2864_v30, %v2863_v47  ;;  %v8737_v47 = vld [vmem:[#allocation7 + $0x120] sm:$0xff] }
 0x2b5   : > { %11562 = vst [vmem:[#allocation34_spill] sm:$0xff] %v8673_v62  ;;  %v3132_v53 = vsel %vm11022_vm0, %v8673_v62, 1e+30  ;;  %vm11034_vm0 = vcmp.lt.f32.partialorder %v8682_v38, -1.5  ;;  %v8707_v27 = vpop.xlane.xlu0 %2772  ;;  %11573 = vst [vmem:[#allocation40_spill] sm:$0xff] %v8737_v47  ;;  %v8742_v30 = vld [vmem:[#allocation7 + $0x128] sm:$0xff] }
 0x2b6   : > { %v3218_v23 = vmin.f32 %v3216_v26, %v3132_v53  ;;  %v3135_v26 = vsel %vm11034_vm0, %v8693_v31, 1e+30  ;;  %v4017_v53 = vadd.f32 %v3934_v39, %v3933_v42  ;;  %11568 = vst [vmem:[#allocation76_spill] sm:$0xff] %v8707_v27  ;;  %v8709_v31 = vld [vmem:[#allocation8 + $0x170] sm:$0xff]  ;;  %11574 = vst [vmem:[#allocation62_spill] sm:$0xff] %v8742_v30 }
 0x2b7   : > { %v3183_v43 = vmin.f32 %v3181_v40, %v3135_v26  ;;  %11569 = vst [vmem:[#allocation53_spill] sm:$0xff] %v8709_v31  ;;  %v2705_v38 = vmul.f32 %v8709_v31, %v7843_v34  ;;  %v8718_v40 = vld [vmem:[#allocation7 + $0x100] sm:$0xff]  ;;  %v3770_v26 = vmul.f32 %v8065_v59, %v8312_v57  ;;  %v5460_v31 = vld [vmem:[#allocation8 + $0x190] sm:$0xff] }
 0x2b8   : > { %2775 = vadd.xlane.f32.xlu1 %v2774_v25  ;;  %v8698_v25 = vld [vmem:[#allocation7 + $0xe8] sm:$0xff]  ;;  %11571 = vst [vmem:[#allocation52_spill] sm:$0xff] %v8718_v40  ;;  %4018 = vadd.xlane.f32.xlu0 %v4017_v53  ;;  %v2821_v53 = vmul.f32 %v8467_v56, %v8162_v5 }
 0x2b9   : > { %11567 = vst [vmem:[#allocation36_spill] sm:$0xff] %v8698_v25  ;;  %v3136_v60 = vsel %vm11034_vm0, %v8698_v25, 1e+30  ;;  %v8713_v25 = vld [vmem:[#allocation8 + $0x178] sm:$0xff]  ;;  %vm11042_vm0 = vcmp.lt.f32.partialorder %v8707_v27, -1.5  ;;  %v2710_v27 = vmul.f32 %v5461_v54, %v7847_v19  ;;  %v3938_v54 = vmul.f32 %v8124_v7, %v8220_v2 }
 0x2ba   : > { %v3220_v3 = vmin.f32 %v3218_v23, %v3136_v60  ;;  %11570 = vst [vmem:[#allocation37_spill] sm:$0xff] %v8713_v25  ;;  %v2706_v62 = vmul.f32 %v8713_v25, %v7847_v19  ;;  %v3139_v42 = vsel %vm11042_vm0, %v8718_v40, 1e+30  ;;  %v8723_v23 = vld [vmem:[#allocation7 + $0x108] sm:$0xff]  ;;  %v8732_v60 = vpop.xlane.xlu0 %2778  ;;  %v2709_v40 = vmul.f32 %v5460_v31, %v7843_v34 }
 0x2bb   : > { %v3140_v8 = vsel %vm11042_vm0, %v8723_v23, 1e+30  ;;  %v3185_v39 = vmin.f32 %v3183_v43, %v3139_v42  ;;  %11572 = vst [vmem:[#allocation61_spill] sm:$0xff] %v8732_v60  ;;  %vm11043_vm0 = vcmp.lt.f32.partialorder %v8732_v60, -1.5  ;;  %v3851_v31 = vadd.f32 %v3770_v26, %v3769_v1 }
 0x2bc   : > { %2781 = vadd.xlane.f32.xlu1 %v2780_v21  ;;  %v3222_v21 = vmin.f32 %v3220_v3, %v3140_v8  ;;  %v2792_v25 = vadd.f32 %v2706_v62, %v2705_v38  ;;  %v3143_v55 = vsel %vm11043_vm0, %v8737_v47, 1e+30  ;;  %v3144_v59 = vsel %vm11043_vm0, %v8742_v30, 1e+30  ;;  %2950 = vadd.xlane.f32.xlu0 %v2949_v11  ;;  %v8763_v8 = vld [vmem:[#allocation7 + $0x148] sm:$0xff] }
 0x2bd   : > { %v3187_v62 = vmin.f32 %v3185_v39, %v3143_v55  ;;  %v2798_v3 = vadd.f32 %v2710_v27, %v2709_v40  ;;  %v2822_v42 = vmul.f32 %v8471_v18, %v8167_v13  ;;  %11577 = vst [vmem:[#allocation59_spill] sm:$0xff] %v8763_v8  ;;  %v2867_v39 = vmul.f32 %v8149_v48, %v8162_v5 }
 0x2be   : > { %v3224_v38 = vmin.f32 %v3222_v21, %v3144_v59  ;;  %v8751_v43 = vpop.xlane.xlu0 %2784  ;;  %v11578_v21 = vld [vmem:[#allocation18_spill] sm:$0xff]  ;;  %v2825_v59 = vmul.f32 %v8481_v29, %v8162_v5 }
 0x2bf   : > { %11575 = vst [vmem:[#allocation38_spill] sm:$0xff] %v8751_v43  ;;  %vm11045_vm0 = vcmp.lt.f32.partialorder %v8751_v43, -1.5  ;;  %v2868_v1 = vmul.f32 %v11578_v21, %v8167_v13  ;;  %v2886_v55 = vadd.f32 %v2822_v42, %v2821_v53 }
 0x2c0   : > { %2787 = vadd.xlane.f32.xlu1 %v2786_v44  ;;  %v3937_v44 = vmul.f32 %v8118_v50, %v8217_v17  ;;  %v8758_v50 = vld [vmem:[#allocation7 + $0x140] sm:$0xff]  ;;  %v3148_v27 = vsel %vm11045_vm0, %v8763_v8, 1e+30  ;;  %3852 = vadd.xlane.f32.xlu0 %v3851_v31  ;;  %v2826_v8 = vmul.f32 %v8485_v52, %v8167_v13  ;;  %v3773_v31 = vmul.f32 %v8087_v6, %v8306_v61 }
 0x2c1   : > { %11576 = vst [vmem:[#allocation39_spill] sm:$0xff] %v8758_v50  ;;  %v3147_v7 = vsel %vm11045_vm0, %v8758_v50, 1e+30  ;;  %v3226_v11 = vmin.f32 %v3224_v38, %v3148_v27  ;;  %v5468_v6 = vld [vmem:[#allocation7 + $0x180] sm:$0xff] }
 0x2c2   : > { %v3189_v40 = vmin.f32 %v3187_v62, %v3147_v7  ;;  %v8772_v26 = vpop.xlane.xlu0 %2790  ;;  %v5467_v62 = vld [vmem:[#allocation7 + $0x168] sm:$0xff]  ;;  %v2955_v7 = vadd.f32 %v2868_v1, %v2867_v39  ;;  %v2892_v50 = vadd.f32 %v2826_v8, %v2825_v59  ;;  %v3941_v1 = vmul.f32 %v8149_v48, %v8217_v17 }
 0x2c3   : > { %11579 = vst [vmem:[#allocation67_spill] sm:$0xff] %v8772_v26  ;;  %vm11047_vm0 = vcmp.lt.f32.partialorder %v8772_v26, -1.5  ;;  %v5477_v26 = vld [vmem:[#allocation8 + $0x188] sm:$0xff] }
 0x2c4   : > { %2793 = vadd.xlane.f32.xlu1 %v2792_v25  ;;  %v4023_v25 = vadd.f32 %v3938_v54, %v3937_v44  ;;  %v5466_v44 = vld [vmem:[#allocation7 + $0x160] sm:$0xff]  ;;  %v3152_v38 = vsel %vm11047_vm0, %v5467_v62, 1e+30  ;;  %v3896_v62 = vmul.f32 %v8471_v18, %v8220_v2  ;;  %v3782_v43 = vmul.f32 %v5477_v26, %v8312_v57 }
 0x2c5   : > { %v3151_v54 = vsel %vm11047_vm0, %v5466_v44, 1e+30  ;;  %v3228_v42 = vmin.f32 %v3226_v11, %v3152_v38  ;;  %v3895_v44 = vmul.f32 %v8467_v56, %v8217_v17  ;;  %v3899_v38 = vmul.f32 %v8481_v29, %v8217_v17 }
 0x2c6   : > { %v3191_v53 = vmin.f32 %v3189_v40, %v3151_v54  ;;  %4024 = vadd.xlane.f32.xlu0 %v4023_v25  ;;  %v8787_v27 = vpop.xlane.xlu0 %2796  ;;  %v5469_v40 = vld [vmem:[#allocation7 + $0x188] sm:$0xff] }
 0x2c7   : > { %11580 = vst [vmem:[#allocation60_spill] sm:$0xff] %v8787_v27  ;;  %vm11048_vm0 = vcmp.lt.f32.partialorder %v8787_v27, -1.5  ;;  %v3960_v54 = vadd.f32 %v3896_v62, %v3895_v44 }
 0x2c8   : > { %2799 = vadd.xlane.f32.xlu1 %v2798_v3  ;;  %v3774_v3 = vmul.f32 %v8091_v37, %v8312_v57  ;;  %v3155_v37 = vsel %vm11048_vm0, %v5468_v6, 1e+30  ;;  %v3156_v25 = vsel %vm11048_vm0, %v5469_v40, 1e+30  ;;  %v2829_v6 = vmul.f32 %v8495_v9, %v8162_v5 }
 0x2c9   : > { %v8798_v39 = vmin.f32 %v3191_v53, %v3155_v37  ;;  %v8800_v8 = vmin.f32 %v3228_v42, %v3156_v25  ;;  %v8817_v53 = vld [vmem:[#allocation8 + $0x1a8] sm:$0xff]  ;;  %v2830_v37 = vmul.f32 %v8499_v14, %v8167_v13 }
 0x2ca   : > { %v3857_v11 = vadd.f32 %v3774_v3, %v3773_v31  ;;  %2956 = vadd.xlane.f32.xlu0 %v2955_v7  ;;  %v8806_v59 = vpop.xlane.xlu0 %2884  ;;  %v3900_v31 = vmul.f32 %v8485_v52, %v8220_v2  ;;  %v8813_v3 = vld [vmem:[#allocation8 + $0x1a0] sm:$0xff] }
 0x2cb   : > { %11581 = vst [vmem:[#allocation17_spill] sm:$0xff] %v8798_v39  ;;  %11582 = vst [vmem:[#allocation79_spill] sm:$0xff] %v8800_v8  ;;  %vm11060_vm0 = vcmp.lt.f32.partialorder %v8806_v59, -1.5  ;;  %v2871_v48 = vmul.f32 %v8813_v3, %v8162_v5 }
 0x2cc   : > { %2887 = vadd.xlane.f32.xlu1 %v2886_v55  ;;  %v3942_v55 = vmul.f32 %v11578_v21, %v8220_v2  ;;  %11583 = vst [vmem:[#allocation46_spill] sm:$0xff] %v8806_v59  ;;  %v2872_v21 = vmul.f32 %v8817_v53, %v8167_v13  ;;  %v8824_v42 = vsel %vm11060_vm0, %v8522_v22, 1e+30  ;;  %v8829_v7 = vsel %vm11060_vm0, %v8527_v63, 1e+30 }
 0x2cd   : > { %v3966_v62 = vadd.f32 %v3900_v31, %v3899_v38  ;;  %v5473_v31 = vld [vmem:[#allocation8 + $0x168] sm:$0xff] }
 0x2ce   : > { %3858 = vadd.xlane.f32.xlu0 %v3857_v11  ;;  %v8831_v44 = vpop.xlane.xlu0 %2890  ;;  %v2961_v11 = vadd.f32 %v2872_v21, %v2871_v48  ;;  %v3778_v8 = vmul.f32 %v5473_v31, %v8312_v57  ;;  %v3903_v48 = vmul.f32 %v8495_v9, %v8217_v17  ;;  %v3904_v21 = vmul.f32 %v8499_v14, %v8220_v2 }
 0x2cf   : > { %11584 = vst [vmem:[#allocation63_spill] sm:$0xff] %v8831_v44  ;;  %vm11059_vm1 = vcmp.lt.f32.partialorder %v8831_v44, -1.5  ;;  %v2898_v44 = vadd.f32 %v2830_v37, %v2829_v6  ;;  %v2834_v6 = vmul.f32 %v8513_v51, %v8167_v13 }
 0x2d0   : > { %2893 = vadd.xlane.f32.xlu1 %v2892_v50  ;;  %v4029_v50 = vadd.f32 %v3942_v55, %v3941_v1  ;;  %v8841_v40 = vsel %vm11059_vm1, %v8543_v16, 1e+30  ;;  %v8846_v25 = vsel %vm11059_vm1, %v8548_v41, 1e+30  ;;  %v3972_v31 = vadd.f32 %v3904_v21, %v3903_v48 }
 0x2d1   : > { %v3735_v21 = vmul.f32 %v8467_v56, %v8306_v61  ;;  %v3740_v56 = vmul.f32 %v8485_v52, %v8312_v57  ;;  %v2837_v52 = vmul.f32 %v8534_v32, %v8162_v5 }
 0x2d2   : > { %4030 = vadd.xlane.f32.xlu0 %v4029_v50  ;;  %v8854_v39 = vpop.xlane.xlu0 %3958  ;;  %v3945_v50 = vmul.f32 %v8813_v3, %v8217_v17 }
 0x2d3   : > { %11585 = vst [vmem:[#allocation64_spill] sm:$0xff] %v8854_v39  ;;  %vm11064_vm0 = vcmp.lt.f32.partialorder %v8854_v39, -1.5 }
 0x2d4   : > { %3961 = vadd.xlane.f32.xlu1 %v3960_v54  ;;  %v5472_v54 = vld [vmem:[#allocation8 + $0x160] sm:$0xff] }
 0x2d5   : > { %v3777_v38 = vmul.f32 %v5472_v54, %v8306_v61  ;;  %v3946_v54 = vmul.f32 %v8817_v53, %v8220_v2 }
 0x2d6   : > { %2962 = vadd.xlane.f32.xlu0 %v2961_v11  ;;  %v8864_v55 = vpop.xlane.xlu0 %3964  ;;  %v8870_v11 = vld [vmem:[#allocation8 + $0x1c0] sm:$0xff] }
 0x2d7   : > { %v3863_v1 = vadd.f32 %v3778_v8, %v3777_v38  ;;  %11586 = vst [vmem:[#allocation47_spill] sm:$0xff] %v8864_v55  ;;  %v4035_v37 = vadd.f32 %v3946_v54, %v3945_v50  ;;  %v2875_v8 = vmul.f32 %v8870_v11, %v8162_v5  ;;  %v8874_v38 = vld [vmem:[#allocation8 + $0x1c8] sm:$0xff]  ;;  %v5476_v54 = vld [vmem:[#allocation8 + $0x180] sm:$0xff]  ;;  %vm11067_vm13 = vcmp.lt.f32.partialorder %v8864_v55, -1.5 }
 0x2d8   : > { %3967 = vadd.xlane.f32.xlu1 %v3966_v62  ;;  %v2833_v62 = vmul.f32 %v8509_v46, %v8162_v5  ;;  %v2876_v59 = vmul.f32 %v8874_v38, %v8167_v13  ;;  %v3781_v27 = vmul.f32 %v5476_v54, %v8306_v61  ;;  %v8917_v54 = vld [vmem:[#allocation8 + $0x1e0] sm:$0xff] }
 0x2da   : > { %3864 = vadd.xlane.f32.xlu0 %v3863_v1  ;;  %v2904_v48 = vadd.f32 %v2834_v6, %v2833_v62  ;;  %v3736_v1 = vmul.f32 %v8471_v18, %v8312_v57  ;;  %v2967_v50 = vadd.f32 %v2876_v59, %v2875_v8  ;;  %v3869_v18 = vadd.f32 %v3782_v43, %v3781_v27 }
 0x2db   : > { %v2711_v59 = vmul.f32 %v8813_v3, %v7843_v34  ;;  %v2712_v62 = vmul.f32 %v8817_v53, %v7847_v19  ;;  %v2838_v43 = vmul.f32 %v8538_v4, %v8167_v13  ;;  %v3743_v27 = vmul.f32 %v8495_v9, %v8306_v61 }
 0x2dc   : > { %2899 = vadd.xlane.f32.xlu1 %v2898_v44  ;;  %v8878_v44 = vpop.xlane.xlu0 %2896  ;;  %v3800_v47 = vadd.f32 %v3736_v1, %v3735_v21  ;;  %v3950_v21 = vmul.f32 %v8874_v38, %v8220_v2  ;;  %v2879_v9 = vmul.f32 %v8917_v54, %v8162_v5 }
 0x2dd   : > { %11587 = vst [vmem:[#allocation65_spill] sm:$0xff] %v8878_v44  ;;  %v2801_v8 = vadd.f32 %v2712_v62, %v2711_v59  ;;  %vm11069_vm1 = vcmp.lt.f32.partialorder %v8878_v44, -1.5 }
 0x2de   : > { %4036 = vadd.xlane.f32.xlu0 %v4035_v37  ;;  %v3907_v37 = vmul.f32 %v8509_v46, %v8217_v17  ;;  %v3317_v62 = vsel %vm11069_vm1, %v8568_v45, 1e+30 }
 0x2e0   : > { %3973 = vadd.xlane.f32.xlu1 %v3972_v31  ;;  %v8886_v30 = vpop.xlane.xlu0 %3970  ;;  %v3739_v31 = vmul.f32 %v8481_v29, %v8306_v61  ;;  %v3908_v29 = vmul.f32 %v8513_v51, %v8220_v2 }
 0x2e2   : > { %2968 = vadd.xlane.f32.xlu0 %v2967_v50  ;;  %v3806_v26 = vadd.f32 %v3740_v56, %v3739_v31  ;;  %v3978_v50 = vadd.f32 %v3908_v29, %v3907_v37  ;;  %v8921_v31 = vld [vmem:[#allocation8 + $0x1e8] sm:$0xff]  ;;  %v2910_v56 = vadd.f32 %v2838_v43, %v2837_v52  ;;  %v3911_v29 = vmul.f32 %v8534_v32, %v8217_v17 }
 0x2e3   : > { %v3912_v52 = vmul.f32 %v8538_v4, %v8220_v2 }
 0x2e4   : > { %2905 = vadd.xlane.f32.xlu1 %v2904_v48  ;;  %v8896_v6 = vpop.xlane.xlu0 %2902  ;;  %v3949_v48 = vmul.f32 %v8870_v11, %v8217_v17 }
 0x2e5   : > { %11588 = vst [vmem:[#allocation49_spill] sm:$0xff] %v8896_v6  ;;  %vm11071_vm12 = vcmp.lt.f32.partialorder %v8896_v6, -1.5 }
 0x2e6   : > { %3870 = vadd.xlane.f32.xlu0 %v3869_v18  ;;  %v4041_v59 = vadd.f32 %v3950_v21, %v3949_v48  ;;  %v4384_v48 = vsel %vm11064_vm0, %v8527_v63, 1e+30  ;;  %v4387_v21 = vsel %vm11067_vm13, %v8543_v16, 1e+30  ;;  %v3321_v44 = vsel %vm11071_vm12, %v8593_v36, 1e+30 }
 0x2e7   : > { %v3322_v55 = vsel %vm11071_vm12, %v8598_v12, 1e+30 }
 0x2e8   : > { %3801 = vadd.xlane.f32.xlu1 %v3800_v47  ;;  %v3744_v47 = vmul.f32 %v8499_v14, %v8312_v57  ;;  %v8914_v1 = vpop.xlane.xlu0 %3798  ;;  %v2880_v14 = vmul.f32 %v8921_v31, %v8167_v13 }
 0x2ea   : > { %2802 = vadd.xlane.f32.xlu0 %v2801_v8  ;;  %v3812_v18 = vadd.f32 %v3744_v47, %v3743_v27  ;;  %v2973_v43 = vadd.f32 %v2880_v14, %v2879_v9  ;;  %v3785_v27 = vmul.f32 %v8813_v3, %v8306_v61  ;;  %v3786_v8 = vmul.f32 %v8817_v53, %v8312_v57 }
 0x2eb   : > { %v4383_v47 = vsel %vm11064_vm0, %v8522_v22, 1e+30  ;;  %v4388_v3 = vsel %vm11067_vm13, %v8548_v41, 1e+30  ;;  %v11589_v53 = vmin.f32 %v8824_v42, %v8841_v40  ;;  %v11590_v14 = vmin.f32 %v8829_v7, %v8846_v25 }
 0x2ec   : > { %3807 = vadd.xlane.f32.xlu1 %v3806_v26  ;;  %v3318_v26 = vsel %vm11069_vm1, %v8573_v35, 1e+30  ;;  %v8933_v37 = vpop.xlane.xlu0 %3804  ;;  %vm11072_vm0 = vcmp.lt.f32.partialorder %v8886_v30, -1.5  ;;  %vm4053_vm13 = vcmp.lt.f32.partialorder %v8914_v1, -1.5  ;;  %v2716_v42 = vmul.f32 %v8874_v38, %v7847_v19 }
 0x2ed   : > { %v3375_v9 = vmin.f32 %v11589_v53, %v3317_v62  ;;  %v3412_v39 = vmin.f32 %v11590_v14, %v3318_v26  ;;  %vm11073_vm1 = vcmp.lt.f32.partialorder %v8933_v37, -1.5  ;;  %v3984_v7 = vadd.f32 %v3912_v52, %v3911_v29 }
 0x2ee   : > { %4042 = vadd.xlane.f32.xlu0 %v4041_v59  ;;  %v2841_v40 = vmul.f32 %v8559_v49, %v8162_v5  ;;  %v2842_v25 = vmul.f32 %v8563_v33, %v8167_v13  ;;  %v4447_v59 = vmin.f32 %v4383_v47, %v4387_v21  ;;  %v4484_v62 = vmin.f32 %v4384_v48, %v4388_v3 }
 0x2ef   : > { %v4391_v26 = vsel %vm11072_vm0, %v8568_v45, 1e+30  ;;  %v3875_v53 = vadd.f32 %v3786_v8, %v3785_v27  ;;  %v3377_v14 = vmin.f32 %v3375_v9, %v3321_v44  ;;  %v3414_v6 = vmin.f32 %v3412_v39, %v3322_v55 }
 0x2f0   : > { %3979 = vadd.xlane.f32.xlu1 %v3978_v50  ;;  %v2715_v50 = vmul.f32 %v8870_v11, %v7843_v34  ;;  %v8972_v60 = vpop.xlane.xlu0 %3976  ;;  %v4181_v29 = vsel %vm4053_vm13, %v8522_v22, 1e+30  ;;  %v4182_v52 = vsel %vm4053_vm13, %v8527_v63, 1e+30  ;;  %v4185_v47 = vsel %vm11073_vm1, %v8543_v16, 1e+30 }
 0x2f1   : > { %v4186_v27 = vsel %vm11073_vm1, %v8548_v41, 1e+30  ;;  %vm4091_vm12 = vcmp.lt.f32.partialorder %v8972_v60, -1.5  ;;  %v3953_v22 = vmul.f32 %v8917_v54, %v8217_v17  ;;  %v3954_v63 = vmul.f32 %v8921_v31, %v8220_v2 }
 0x2f2   : > { %2974 = vadd.xlane.f32.xlu0 %v2973_v43  ;;  %v2807_v39 = vadd.f32 %v2716_v42, %v2715_v50  ;;  %v4449_v55 = vmin.f32 %v4447_v59, %v4391_v26  ;;  %v4282_v43 = vmin.f32 %v4182_v52, %v4186_v27  ;;  %v4395_v50 = vsel %vm4091_vm12, %v8593_v36, 1e+30 }
 0x2f3   : > { %v4396_v3 = vsel %vm4091_vm12, %v8598_v12, 1e+30  ;;  %v2916_v9 = vadd.f32 %v2842_v25, %v2841_v40  ;;  %v3747_v59 = vmul.f32 %v8509_v46, %v8306_v61  ;;  %v3790_v46 = vmul.f32 %v8874_v38, %v8312_v57 }
 0x2f4   : > { %2911 = vadd.xlane.f32.xlu1 %v2910_v56  ;;  %v4392_v56 = vsel %vm11072_vm0, %v8573_v35, 1e+30  ;;  %v8999_v8 = vpop.xlane.xlu0 %2908  ;;  %v4451_v25 = vmin.f32 %v4449_v55, %v4395_v50  ;;  %v2719_v52 = vmul.f32 %v8917_v54, %v7843_v34 }
 0x2f5   : > { %vm3019_vm0 = vcmp.lt.f32.partialorder %v8999_v8, -1.5  ;;  %v4486_v16 = vmin.f32 %v4484_v62, %v4392_v56  ;;  %v4047_v62 = vadd.f32 %v3954_v63, %v3953_v22  ;;  %v11592_v63 = vld [vmem:[#allocation54_spill] sm:$0xff] }
 0x2f6   : > { %v3325_v41 = vsel %vm3019_vm0, %v8618_v20, 1e+30  ;;  %v3326_v44 = vsel %vm3019_vm0, %v8623_v10, 1e+30  ;;  %3876 = vadd.xlane.f32.xlu0 %v3875_v53  ;;  %v2507_v55 = vrot.slane %v11592_v63, 4 }
 0x2f7   : > { %v9013_v48 = vmin.f32 %v3377_v14, %v3325_v41  ;;  %v9015_v21 = vmin.f32 %v3414_v6, %v3326_v44  ;;  %v3748_v6 = vmul.f32 %v8513_v51, %v8312_v57  ;;  %v4488_v53 = vmin.f32 %v4486_v16, %v4396_v3 }
 0x2f8   : > { %3813 = vadd.xlane.f32.xlu1 %v3812_v18  ;;  %v4245_v18 = vmin.f32 %v4181_v29, %v4185_v47  ;;  %v9023_v42 = vpop.xlane.xlu0 %3810  ;;  %v2720_v47 = vmul.f32 %v8921_v31, %v7847_v19  ;;  %v2592_v16 = vrot.slane %v8353_v15, 4 }
 0x2f9   : > { %vm11074_vm1 = vcmp.lt.f32.partialorder %v9023_v42, -1.5 }
 0x2fa   : > { %v4189_v26 = vsel %vm11074_vm1, %v8568_v45, 1e+30  ;;  %v4190_v40 = vsel %vm11074_vm1, %v8573_v35, 1e+30  ;;  %2808 = vadd.xlane.f32.xlu0 %v2807_v39  ;;  %v3818_v45 = vadd.f32 %v3748_v6, %v3747_v59  ;;  %v3915_v35 = vmul.f32 %v8559_v49, %v8217_v17 }
 0x2fb   : > { %v9040_v51 = vmin.f32 %v4245_v18, %v4189_v26  ;;  %v9042_v56 = vmin.f32 %v4282_v43, %v4190_v40  ;;  %v2845_v18 = vmul.f32 %v8584_v0, %v8162_v5  ;;  %v2846_v43 = vmul.f32 %v8588_v58, %v8167_v13 }
 0x2fc   : > { %3985 = vadd.xlane.f32.xlu1 %v3984_v7  ;;  %v3789_v7 = vmul.f32 %v8870_v11, %v8306_v61  ;;  %v9044_v14 = vpop.xlane.xlu0 %3982  ;;  %v3916_v11 = vmul.f32 %v8563_v33, %v8220_v2  ;;  %v3794_v26 = vmul.f32 %v8921_v31, %v8312_v57  ;;  %v2508_v40 = vadd.f32 %v2507_v55, %v11592_v63  ;;  %v11597_v63 = vld [vmem:[#allocation44_spill] sm:$0xff] }
 0x2fd   : > { %11591 = vst [vmem:[#allocation71_spill] sm:$0xff] %v9044_v14  ;;  %vm11075_vm1 = vcmp.lt.f32.partialorder %v9044_v14, -1.5 }
 0x2fe   : > { %v4399_v38 = vsel %vm11075_vm1, %v8618_v20, 1e+30  ;;  %v4400_v29 = vsel %vm11075_vm1, %v8623_v10, 1e+30  ;;  %4048 = vadd.xlane.f32.xlu0 %v4047_v62  ;;  %v3881_v22 = vadd.f32 %v3790_v46, %v3789_v7  ;;  %v3990_v44 = vadd.f32 %v3916_v11, %v3915_v35 }
 0x2ff   : > { %v9061_v27 = vmin.f32 %v4451_v25, %v4399_v38  ;;  %v9063_v39 = vmin.f32 %v4488_v53, %v4400_v29  ;;  %v3793_v62 = vmul.f32 %v8917_v54, %v8306_v61  ;;  %v2593_v7 = vadd.f32 %v2592_v16, %v8353_v15 }
 0x300   : > { %2917 = vadd.xlane.f32.xlu1 %v2916_v9  ;;  %v9067_v41 = vpop.xlane.xlu0 %2914  ;;  %v2813_v9 = vadd.f32 %v2720_v47, %v2719_v52  ;;  %v2922_v25 = vadd.f32 %v2846_v43, %v2845_v18  ;;  %v3919_v38 = vmul.f32 %v8584_v0, %v8217_v17  ;;  %v11599_v18 = vld [vmem:[#allocation43_spill] sm:$0xff] }
 0x301   : > { %11593 = vst [vmem:[#allocation72_spill] sm:$0xff] %v9067_v41  ;;  %vm11076_vm1 = vcmp.lt.f32.partialorder %v9067_v41, -1.5  ;;  %v2594_v35 = vrot.slane %v2593_v7, 2  ;;  %v2849_v43 = vmul.f32 %v11599_v18, %v8162_v5 }
 0x302   : > { %v3329_v50 = vsel %vm11076_vm1, %v8643_v24, 1e+30  ;;  %v3330_v3 = vsel %vm11076_vm1, %v8648_v28, 1e+30  ;;  %3882 = vadd.xlane.f32.xlu0 %v3881_v22  ;;  %v11596_v22 = vld [vmem:[#allocation24_spill] sm:$0xff] }
 0x303   : > { %v3381_v59 = vmin.f32 %v9013_v48, %v3329_v50  ;;  %v3418_v6 = vmin.f32 %v9015_v21, %v3330_v3  ;;  %v3751_v48 = vmul.f32 %v8534_v32, %v8306_v61  ;;  %v3752_v21 = vmul.f32 %v8538_v4, %v8312_v57  ;;  %v11600_v50 = vld [vmem:[#allocation27_spill] sm:$0xff] }
 0x304   : > { %3819 = vadd.xlane.f32.xlu1 %v3818_v45  ;;  %v9088_v46 = vpop.xlane.xlu0 %3816  ;;  %v3887_v45 = vadd.f32 %v3794_v26, %v3793_v62  ;;  %v2509_v32 = vrot.slane %v2508_v40, 2  ;;  %v2595_v47 = vadd.f32 %v2594_v35, %v2593_v7  ;;  %v2598_v55 = vsel %vm11079_vm4, %v11596_v22, 0.0 }
 0x305   : > { %11594 = vst [vmem:[#allocation73_spill] sm:$0xff] %v9088_v46  ;;  %vm11077_vm1 = vcmp.lt.f32.partialorder %v9088_v46, -1.5  ;;  %v3824_v4 = vadd.f32 %v3752_v21, %v3751_v48  ;;  %v2850_v3 = vmul.f32 %v11600_v50, %v8167_v13  ;;  %v2600_v7 = vrot.slane %v2598_v55, 7  ;;  %v11607_v55 = vld [vmem:[#allocation23_spill] sm:$0xff] }
 0x306   : > { %v4193_v54 = vsel %vm11077_vm1, %v8593_v36, 1e+30  ;;  %v4194_v15 = vsel %vm11077_vm1, %v8598_v12, 1e+30  ;;  %2814 = vadd.xlane.f32.xlu0 %v2813_v9  ;;  %v3920_v36 = vmul.f32 %v8588_v58, %v8220_v2  ;;  %v2510_v52 = vadd.f32 %v2509_v32, %v2508_v40  ;;  %v11602_v9 = vld [vmem:[#allocation34_spill] sm:$0xff] }
 0x307   : > { %v4249_v31 = vmin.f32 %v9040_v51, %v4193_v54  ;;  %v4286_v53 = vmin.f32 %v9042_v56, %v4194_v15  ;;  %v2596_v21 = vrot.slane %v2595_v47, 1  ;;  %v2928_v54 = vadd.f32 %v2850_v3, %v2849_v43  ;;  %v11608_v43 = vld [vmem:[#allocation77_spill] sm:$0xff] }
 0x308   : > { %3991 = vadd.xlane.f32.xlu1 %v3990_v44  ;;  %v9103_v11 = vpop.xlane.xlu0 %3988  ;;  %v3996_v44 = vadd.f32 %v3920_v36, %v3919_v38  ;;  %v2511_v48 = vrot.slane %v2510_v52, 1  ;;  %v3755_v15 = vmul.f32 %v8559_v49, %v8306_v61  ;;  %v11604_v38 = vmov 0.0  }
 0x309   : > { %11595 = vst [vmem:[#allocation74_spill] sm:$0xff] %v9103_v11  ;;  %vm11078_vm1 = vcmp.lt.f32.partialorder %v9103_v11, -1.5  ;;  %v9160_v36 = vsel %vm2979_vm2, 1.0, %v11604_v38  ;;  %v2853_v3 = vmul.f32 %v11608_v43, %v8162_v5  ;;  %v5112_v60 = vsel %vm4053_vm13, 1.0, %v11604_v38 }
 0x30a   : > { %v4403_v12 = vsel %vm11078_vm1, %v8643_v24, 1e+30  ;;  %v4404_v51 = vsel %vm11078_vm1, %v8648_v28, 1e+30  ;;  %3888 = vadd.xlane.f32.xlu0 %v3887_v45  ;;  %v3756_v45 = vmul.f32 %v8563_v33, %v8312_v57  ;;  %v9229_v33 = vsel %vm2985_vm10, 1.0, %v11604_v38 }
 0x30b   : > { %v4455_v56 = vmin.f32 %v9061_v27, %v4403_v12  ;;  %v4492_v29 = vmin.f32 %v9063_v39, %v4404_v51  ;;  %v11601_v27 = vld [vmem:[#allocation32_spill] sm:$0xff]  ;;  %v2512_v12 = vadd.f32 %v2511_v48, %v2510_v52  ;;  %v2597_v51 = vadd.f32 %v2596_v21, %v2595_v47  ;;  %v11609_v48 = vld [vmem:[#allocation78_spill] sm:$0xff] }
 0x30c   : > { %2923 = vadd.xlane.f32.xlu1 %v2922_v25  ;;  %v9121_v16 = vpop.xlane.xlu0 %2920  ;;  %v2854_v21 = vmul.f32 %v11609_v48, %v8167_v13  ;;  %vm11623_vm10 = vcmp.eq.s32.totalorder %v11597_v63, 7 }
 0x30d   : > { %11598 = vst [vmem:[#allocation18_spill] sm:$0xff] %v9121_v16  ;;  %vm3023_vm1 = vcmp.lt.f32.partialorder %v9121_v16, -1.5  ;;  %v9309_v16 = vld [vmem:[#allocation7 + $0x38] sm:$0xff] }
 0x30e   : > { %v3333_v39 = vsel %vm3023_vm1, %v11601_v27, 1e+30  ;;  %v3334_v62 = vsel %vm3023_vm1, %v11602_v9, 1e+30 }
 0x30f   : > { %v9134_v26 = vmin.f32 %v3381_v59, %v3333_v39  ;;  %v9136_v40 = vmin.f32 %v3418_v6, %v3334_v62 }
 0x310   : > { %3825 = vadd.xlane.f32.xlu1 %v3824_v4  ;;  %v9138_v25 = vpop.xlane.xlu0 %3822 }
 0x311   : > { %11603 = vst [vmem:[#allocation54_spill] sm:$0xff] %v9138_v25  ;;  %vm4061_vm4 = vcmp.lt.f32.partialorder %v9138_v25, -1.5 }
 0x312   : > { %v4197_v59 = vsel %vm4061_vm4, %v8618_v20, 1e+30  ;;  %v4198_v6 = vsel %vm4061_vm4, %v8623_v10, 1e+30  ;;  %v3830_v20 = vadd.f32 %v3756_v45, %v3755_v15  ;;  %v3923_v10 = vmul.f32 %v11599_v18, %v8217_v17 }
 0x313   : > { %v9153_v4 = vmin.f32 %v4249_v31, %v4197_v59  ;;  %v9155_v49 = vmin.f32 %v4286_v53, %v4198_v6  ;;  %v3924_v31 = vmul.f32 %v11600_v50, %v8220_v2  ;;  %v5048_v15 = vsel %vm2981_vm3, 1.0, %v11604_v38 }
 0x314   : > { %3997 = vadd.xlane.f32.xlu1 %v3996_v44  ;;  %v9162_v22 = vpop.xlane.xlu0 %3994  ;;  %v3759_v59 = vmul.f32 %v8584_v0, %v8306_v61  ;;  %v3760_v6 = vmul.f32 %v8588_v58, %v8312_v57  ;;  %v11613_v0 = vld [vmem:[#allocation48_spill] sm:$0xff] }
 0x315   : > { %v2430_v32 = vpop.xlane.xlu1 %2429  ;;  %11606 = vst [vmem:[#allocation24_spill] sm:$0xff] %v9162_v22 }
 0x316   : > { %v2602_v35 = vsel %vm11080_vm6, %v2430_v32, %v2600_v7  ;;  %vm4097_vm6 = vcmp.lt.f32.partialorder %v9162_v22, -1.5  ;;  %v3836_v25 = vadd.f32 %v3760_v6, %v3759_v59 }
 0x317   : > { %v2603_v44 = vsel %vm11099_vm5, %v11607_v55, %v2602_v35  ;;  %v4407_v52 = vsel %vm4097_vm6, %v11601_v27, 1e+30  ;;  %v4408_v47 = vsel %vm4097_vm6, %v11602_v9, 1e+30  ;;  %v3928_v35 = vmul.f32 %v11609_v48, %v8220_v2 }
 0x318   : > { %2929 = vadd.xlane.f32.xlu1 %v2928_v54  ;;  %v9182_v62 = vmin.f32 %v4455_v56, %v4407_v52  ;;  %v9184_v7 = vmin.f32 %v4492_v29, %v4408_v47  ;;  %v9191_v32 = vpop.xlane.xlu0 %2926  ;;  %v4002_v56 = vadd.f32 %v3924_v31, %v3923_v10  ;;  %v3927_v29 = vmul.f32 %v11608_v43, %v8217_v17  ;;  %v11615_v31 = vld [vmem:[#allocation36_spill] sm:$0xff] }
 0x319   : > { %v2438_v53 = vpop.xlane.xlu1 %2437  ;;  %11611 = vst [vmem:[#allocation43_spill] sm:$0xff] %v9191_v32  ;;  %vm3025_vm2 = vcmp.lt.f32.partialorder %v9191_v32, -1.5  ;;  %v2934_v47 = vadd.f32 %v2854_v21, %v2853_v3  ;;  %v9234_v32 = vsel %vm2987_vm15, 1.0, %v11604_v38  ;;  %v11620_v21 = vld [vmem:[#allocation31_spill] sm:$0xff] }
 0x31a   : > { %v2604_v39 = vsel %vm11097_vm8, %v2438_v53, %v2603_v44  ;;  %v9205_v53 = vsel %vm2983_vm14, 1.0, %v11604_v38  ;;  %v9218_v44 = vsel %vm3025_vm2, %v11615_v31, 1e+30  ;;  %vm11622_vm14 = vcmp.eq.s32.totalorder %v11597_v63, 6  ;;  %v9306_v63 = vld [vmem:[#allocation7 + $0x30] sm:$0xff] }
 0x31b   : > { %v2606_v45 = vrot.slane %v2604_v39, 1  ;;  %v3422_v54 = vmin.f32 %v9136_v40, %v9218_v44  ;;  %v11619_v40 = vld [vmem:[#allocation33_spill] sm:$0xff]  ;;  %v9248_v44 = vsel %vm2989_vm11, 1.0, %v11604_v38  ;;  %vm11625_vm11 = vcmask 1040384  }
 0x31c   : > { %3831 = vadd.xlane.f32.xlu1 %v3830_v20  ;;  %v11614_v20 = vld [vmem:[#allocation51_spill] sm:$0xff]  ;;  %v2857_v3 = vmul.f32 %v11619_v40, %v8162_v5  ;;  %v3931_v14 = vmul.f32 %v11619_v40, %v8217_v17  ;;  %v9341_v40 = vld [vmem:[#allocation7 + $0x58] sm:$0xff] }
 0x31d   : > { %v2528_v55 = vpop.xlane.xlu1 %2527  ;;  %v2608_v58 = vsel %vm11096_vm9, %v11613_v0, %v2606_v45  ;;  %v9213_v10 = vsel %vm3025_vm2, %v11614_v20, 1e+30  ;;  %11634 = vst [vmem:[#allocation23_spill] sm:$0xff] %v9341_v40 }
 0x31e   : > { %v2609_v52 = vsel %vm11095_vm7, %v2512_v12, %v2608_v58  ;;  %v3385_v39 = vmin.f32 %v9134_v26, %v9213_v10  ;;  %v9236_v12 = vpop.xlane.xlu0 %3828  ;;  %v9239_v26 = vadd.f32 %v3928_v35, %v3927_v29  ;;  %v2858_v58 = vmul.f32 %v11620_v21, %v8167_v13  ;;  %v11628_v10 = vld [vmem:[#allocation57_spill] sm:$0xff] }
 0x31f   : > { %v2611_v22 = vrot.slane %v2609_v52, 7  ;;  %11618 = vst [vmem:[#allocation27_spill] sm:$0xff] %v9236_v12  ;;  %vm4063_vm3 = vcmp.lt.f32.partialorder %v9236_v12, -1.5 }
 0x320   : > { %4003 = vadd.xlane.f32.xlu1 %v4002_v56  ;;  %v9255_v56 = vsel %vm4063_vm3, %v8643_v24, 1e+30  ;;  %v9260_v29 = vsel %vm4063_vm3, %v8648_v28, 1e+30  ;;  %v3763_v28 = vmul.f32 %v11599_v18, %v8306_v61 }
 0x321   : > { %v2613_v59 = vsel %vm11622_vm14, %v2528_v55, %v2611_v22  ;;  %v2728_v6 = vpop.xlane.xlu1 %2727  ;;  %v11624_v55 = vld [vmem:[#allocation25_spill] sm:$0xff]  ;;  %vm11629_vm14 = vcmp.lt.f32.partialorder %v11628_v10, -1.5  ;;  %v9289_v22 = vld [vmem:[#allocation7 + $0x18] sm:$0xff] }
 0x322   : > { %v2614_v35 = vsel %vm11623_vm10, %v2597_v51, %v2613_v59  ;;  %vm2980_vm15 = vcmp.lt.f32.partialorder %v2728_v6, -1.5  ;;  %v9273_v0 = vpop.xlane.xlu0 %4000  ;;  %v3764_v51 = vmul.f32 %v11600_v50, %v8312_v57  ;;  %v9282_v59 = vsel %vm11629_vm14, 1.0, %v11604_v38  ;;  %v9284_v6 = vld [vmem:[#allocation7 + $0x10] sm:$0xff] }
 0x323   : > { %v9270_v45 = vsel %vm11625_vm11, %v11624_v55, %v2614_v35  ;;  %v5047_v24 = vsel %vm2980_vm15, 1.0, %v11604_v38  ;;  %11627 = vst [vmem:[#allocation34_spill] sm:$0xff] %v9273_v0  ;;  %v3109_v35 = vsel %vm2980_vm15, %v9284_v6, 1e+30  ;;  %vm11148_vm10 = vcmp.lt.f32.partialorder %v9273_v0, -1.5 }
 0x324   : > { %11626 = vst [vmem:[#allocation32_spill] sm:$0xff] %v9270_v45  ;;  %v3550_v55 = vadd.f32 %v5047_v24, %v9160_v36  ;;  %2935 = vadd.xlane.f32.xlu1 %v2934_v47  ;;  %v3110_v18 = vsel %vm2980_vm15, %v9289_v22, 1e+30  ;;  %v9295_v50 = vsel %vm11148_vm10, %v11614_v20, 1e+30  ;;  %v2940_v45 = vadd.f32 %v2858_v58, %v2857_v3  ;;  %v11631_v24 = vld [vmem:[#allocation52_spill] sm:$0xff] }
 0x325   : > { %v2734_v52 = vpop.xlane.xlu1 %2733  ;;  %v9300_v10 = vsel %vm11148_vm10, %v11615_v31, 1e+30  ;;  %v9315_v3 = vadd.f32 %v3764_v51, %v3763_v28  ;;  %v11632_v28 = vld [vmem:[#allocation42_spill] sm:$0xff] }
 0x326   : > { %vm2982_vm11 = vcmp.lt.f32.partialorder %v2734_v52, -1.5  ;;  %v3551_v36 = vadd.f32 %v5048_v15, %v3550_v55  ;;  %v9313_v46 = vpop.xlane.xlu0 %2932 }
 0x327   : > { %v3113_v12 = vsel %vm2982_vm11, %v9306_v63, 1e+30  ;;  %v3114_v11 = vsel %vm2982_vm11, %v9309_v16, 1e+30  ;;  %v5049_v0 = vsel %vm2982_vm11, 1.0, %v11604_v38  ;;  %11630 = vst [vmem:[#allocation75_spill] sm:$0xff] %v9313_v46 }
 0x328   : > { %v3172_v15 = vmin.f32 %v3109_v35, %v3113_v12  ;;  %v3209_v58 = vmin.f32 %v3110_v18, %v3114_v11  ;;  %v3552_v52 = vadd.f32 %v5049_v0, %v3551_v36  ;;  %3837 = vadd.xlane.f32.xlu1 %v3836_v25  ;;  %vm11144_vm15 = vcmp.lt.f32.partialorder %v9313_v46, -1.5  ;;  %v9338_v35 = vld [vmem:[#allocation7 + $0x50] sm:$0xff]  ;;  %v11636_v46 = vld [vmem:[#allocation30_spill] sm:$0xff] }
 0x329   : > { %v2740_v55 = vpop.xlane.xlu1 %2739  ;;  %v3341_v47 = vsel %vm11144_vm15, %v11631_v24, 1e+30  ;;  %v3342_v41 = vsel %vm11144_vm15, %v8723_v23, 1e+30  ;;  %v3932_v12 = vmul.f32 %v11620_v21, %v8220_v2  ;;  %vm11633_vm11 = vcmp.lt.f32.partialorder %v11632_v28, -1.5 }
 0x32a   : > { %vm2984_vm14 = vcmp.lt.f32.partialorder %v2740_v55, -1.5  ;;  %v3553_v11 = vadd.f32 %v9205_v53, %v3552_v52  ;;  %v9329_v25 = vmin.f32 %v3385_v39, %v3341_v47  ;;  %v9331_v0 = vmin.f32 %v3422_v54, %v3342_v41  ;;  %v9345_v53 = vpop.xlane.xlu0 %3834 }
 0x32b   : > { %v9336_v51 = vsel %vm11633_vm11, 1.0, %v11604_v38  ;;  %v3117_v18 = vsel %vm2984_vm14, %v9338_v35, 1e+30  ;;  %v3118_v21 = vsel %vm2984_vm14, %v9341_v40, 1e+30  ;;  %v5051_v36 = vsel %vm2984_vm14, 1.0, %v11604_v38 }
 0x32c   : > { %11635 = vst [vmem:[#allocation77_spill] sm:$0xff] %v9345_v53  ;;  %v3174_v39 = vmin.f32 %v3172_v15, %v3117_v18  ;;  %v3211_v41 = vmin.f32 %v3209_v58, %v3118_v21  ;;  %v3554_v54 = vadd.f32 %v5051_v36, %v3553_v11  ;;  %4009 = vadd.xlane.f32.xlu1 %v9239_v26  ;;  %vm11141_vm11 = vcmp.lt.f32.partialorder %v9345_v53, -1.5  ;;  %v9368_v18 = vld [vmem:[#allocation7 + $0x70] sm:$0xff]  ;;  %v11660_v53 = vld [vmem:[#allocation39_spill] sm:$0xff] }
 0x32d   : > { %v2746_v47 = vpop.xlane.xlu1 %2745  ;;  %v4205_v52 = vsel %vm11141_vm11, %v11601_v27, 1e+30  ;;  %v4206_v55 = vsel %vm11141_vm11, %v11602_v9, 1e+30  ;;  %v4014_v28 = vadd.f32 %v3932_v12, %v3931_v14  ;;  %v2861_v40 = vmul.f32 %v11636_v46, %v8162_v5  ;;  %v9371_v9 = vld [vmem:[#allocation7 + $0x78] sm:$0xff] }
 0x32e   : > { %vm2986_vm14 = vcmp.lt.f32.partialorder %v2746_v47, -1.5  ;;  %v3555_v15 = vadd.f32 %v9229_v33, %v3554_v54  ;;  %v11637_v26 = vmin.f32 %v9153_v4, %v9255_v56  ;;  %v11638_v11 = vmin.f32 %v9155_v49, %v9260_v29  ;;  %v9375_v21 = vpop.xlane.xlu0 %4006  ;;  %v11640_v4 = vld [vmem:[#allocation35_spill] sm:$0xff]  ;;  %v11641_v29 = vld [vmem:[#allocation76_spill] sm:$0xff] }
 0x32f   : > { %v3121_v14 = vsel %vm2986_vm14, %v9368_v18, 1e+30  ;;  %v3122_v12 = vsel %vm2986_vm14, %v9371_v9, 1e+30  ;;  %v5053_v33 = vsel %vm2986_vm14, 1.0, %v11604_v38  ;;  %11639 = vst [vmem:[#allocation78_spill] sm:$0xff] %v9375_v21  ;;  %v2862_v56 = vmul.f32 %v11640_v4, %v8167_v13 }
 0x330   : > { %v9361_v58 = vmin.f32 %v11637_v26, %v4205_v52  ;;  %v9366_v27 = vmin.f32 %v11638_v11, %v4206_v55  ;;  %v3176_v36 = vmin.f32 %v3174_v39, %v3121_v14  ;;  %v3213_v54 = vmin.f32 %v3211_v41, %v3122_v12  ;;  %2941 = vadd.xlane.f32.xlu1 %v2940_v45  ;;  %v9407_v12 = vld [vmem:[#allocation7 + $0x98] sm:$0xff] }
 0x331   : > { %v3556_v49 = vadd.f32 %v5053_v33, %v3555_v15  ;;  %vm11128_vm7 = vcmp.lt.f32.partialorder %v9375_v21, -1.5  ;;  %vm11642_vm9 = vcmp.lt.f32.partialorder %v11641_v29, -1.5  ;;  %v2752_v52 = vpop.xlane.xlu1 %2751  ;;  %v3767_v39 = vmul.f32 %v11608_v43, %v8306_v61 }
 0x332   : > { %v9383_v47 = vsel %vm11642_vm9, 1.0, %v11604_v38  ;;  %v4415_v55 = vsel %vm11128_vm7, %v11631_v24, 1e+30  ;;  %v4416_v26 = vsel %vm11128_vm7, %v8723_v23, 1e+30  ;;  %vm2988_vm14 = vcmp.lt.f32.partialorder %v2752_v52, -1.5  ;;  %v9411_v33 = vpop.xlane.xlu0 %2938 }
 0x333   : > { %v3557_v45 = vadd.f32 %v9234_v32, %v3556_v49  ;;  %v11643_v41 = vmin.f32 %v9182_v62, %v9295_v50  ;;  %v11644_v11 = vmin.f32 %v9184_v7, %v9300_v10  ;;  %v9404_v24 = vld [vmem:[#allocation7 + $0x90] sm:$0xff]  ;;  %v3126_v43 = vsel %vm2988_vm14, %v9407_v12, 1e+30  ;;  %11645 = vst [vmem:[#allocation28_spill] sm:$0xff] %v9411_v33 }
 0x334   : > { %v3125_v23 = vsel %vm2988_vm14, %v9404_v24, 1e+30  ;;  %v5055_v32 = vsel %vm2988_vm14, 1.0, %v11604_v38  ;;  %v3768_v62 = vmul.f32 %v11609_v48, %v8312_v57  ;;  %v3215_v49 = vmin.f32 %v3213_v54, %v3126_v43  ;;  %3843 = vadd.xlane.f32.xlu1 %v9315_v3  ;;  %v11646_v10 = vld [vmem:[#allocation61_spill] sm:$0xff]  ;;  %v11649_v48 = vld [vmem:[#allocation62_spill] sm:$0xff] }
 0x335   : > { %v9397_v15 = vmin.f32 %v11643_v41, %v4415_v55  ;;  %v9402_v14 = vmin.f32 %v11644_v11, %v4416_v26  ;;  %v3178_v50 = vmin.f32 %v3176_v36, %v3125_v23  ;;  %v3558_v7 = vadd.f32 %v5055_v32, %v3557_v45  ;;  %v2758_v52 = vpop.xlane.xlu1 %2757  ;;  %v11648_v26 = vld [vmem:[#allocation40_spill] sm:$0xff]  ;;  %v9440_v11 = vld [vmem:[#allocation7 + $0xb8] sm:$0xff] }
 0x336   : > { %vm11125_vm9 = vcmp.lt.f32.partialorder %v9411_v33, -1.5  ;;  %vm11647_vm8 = vcmp.lt.f32.partialorder %v11646_v10, -1.5  ;;  %v2946_v55 = vadd.f32 %v2862_v56, %v2861_v40  ;;  %vm2990_vm14 = vcmp.lt.f32.partialorder %v2758_v52, -1.5  ;;  %v9437_v40 = vld [vmem:[#allocation7 + $0xb0] sm:$0xff]  ;;  %v9444_v10 = vpop.xlane.xlu0 %3840 }
 0x337   : > { %v9420_v29 = vsel %vm11647_vm8, 1.0, %v11604_v38  ;;  %v9425_v41 = vsel %vm11125_vm9, %v11648_v26, 1e+30  ;;  %v9430_v36 = vsel %vm11125_vm9, %v11649_v48, 1e+30  ;;  %v3559_v3 = vadd.f32 %v9248_v44, %v3558_v7  ;;  %11650 = vst [vmem:[#allocation29_spill] sm:$0xff] %v9444_v10 }
 0x338   : > { %v3129_v56 = vsel %vm2990_vm14, %v9437_v40, 1e+30  ;;  %v3130_v23 = vsel %vm2990_vm14, %v9440_v11, 1e+30  ;;  %v5057_v43 = vsel %vm2990_vm14, 1.0, %v11604_v38  ;;  %v3848_v32 = vadd.f32 %v3768_v62, %v3767_v39  ;;  %4015 = vadd.xlane.f32.xlu1 %v4014_v28 }
 0x339   : > { %v3180_v44 = vmin.f32 %v3178_v50, %v3129_v56  ;;  %v3217_v7 = vmin.f32 %v3215_v49, %v3130_v23  ;;  %v3560_v52 = vadd.f32 %v5057_v43, %v3559_v3  ;;  %vm11100_vm8 = vcmp.lt.f32.partialorder %v9444_v10, -1.5  ;;  %v2764_v45 = vpop.xlane.xlu1 %2763  ;;  %v11651_v49 = vld [vmem:[#allocation38_spill] sm:$0xff]  ;;  %v9471_v3 = vld [vmem:[#allocation7 + $0xd0] sm:$0xff] }
 0x33a   : > { %v9450_v54 = vsel %vm11100_vm8, %v11614_v20, 1e+30  ;;  %v9455_v33 = vsel %vm11100_vm8, %v11615_v31, 1e+30  ;;  %v3935_v39 = vmul.f32 %v11636_v46, %v8217_v17  ;;  %v3936_v62 = vmul.f32 %v11640_v4, %v8220_v2  ;;  %11653 = vst [vmem:[#allocation48_spill] sm:$0xff] %v9471_v3  ;;  %v9474_v56 = vld [vmem:[#allocation7 + $0xd8] sm:$0xff] }
 0x33b   : > { %vm2992_vm14 = vcmp.lt.f32.partialorder %v2764_v45, -1.5  ;;  %v3561_v28 = vadd.f32 %v9282_v59, %v3560_v52  ;;  %vm11652_vm5 = vcmp.lt.f32.partialorder %v11651_v49, -1.5  ;;  %11654 = vst [vmem:[#allocation51_spill] sm:$0xff] %v9474_v56  ;;  %v9478_v45 = vpop.xlane.xlu0 %4012  ;;  %v11656_v10 = vld [vmem:[#allocation53_spill] sm:$0xff] }
 0x33c   : > { %v9469_v31 = vsel %vm11652_vm5, 1.0, %v11604_v38  ;;  %v3133_v46 = vsel %vm2992_vm14, %v9471_v3, 1e+30  ;;  %v3134_v4 = vsel %vm2992_vm14, %v9474_v56, 1e+30  ;;  %v5059_v59 = vsel %vm2992_vm14, 1.0, %v11604_v38  ;;  %2947 = vadd.xlane.f32.xlu1 %v2946_v55 }
 0x33d   : > { %11655 = vst [vmem:[#allocation36_spill] sm:$0xff] %v9478_v45  ;;  %v3182_v23 = vmin.f32 %v3180_v44, %v3133_v46  ;;  %v3219_v43 = vmin.f32 %v3217_v7, %v3134_v4  ;;  %v3562_v52 = vadd.f32 %v5059_v59, %v3561_v28  ;;  %vm11115_vm8 = vcmp.lt.f32.partialorder %v9478_v45, -1.5  ;;  %v2770_v49 = vpop.xlane.xlu1 %2769  ;;  %v11657_v44 = vld [vmem:[#allocation37_spill] sm:$0xff]  ;;  %v9503_v4 = vld [vmem:[#allocation7 + $0xf8] sm:$0xff]  ;;  %v11661_v56 = vld [vmem:[#allocation59_spill] sm:$0xff] }
 0x33e   : > { %v9484_v20 = vsel %vm11115_vm8, %v11648_v26, 1e+30  ;;  %v9489_v50 = vsel %vm11115_vm8, %v11649_v48, 1e+30  ;;  %v2865_v21 = vmul.f32 %v11656_v10, %v8162_v5  ;;  %v2866_v7 = vmul.f32 %v11657_v44, %v8167_v13  ;;  %v9500_v46 = vld [vmem:[#allocation7 + $0xf0] sm:$0xff]  ;;  %11659 = vst [vmem:[#allocation26_spill] sm:$0xff] %v9503_v4 }
 0x33f   : > { %vm2994_vm5 = vcmp.lt.f32.partialorder %v2770_v49, -1.5  ;;  %v3563_v55 = vadd.f32 %v9336_v51, %v3562_v52  ;;  %11658 = vst [vmem:[#allocation16_spill] sm:$0xff] %v9500_v46  ;;  %v4020_v44 = vadd.f32 %v3936_v62, %v3935_v39  ;;  %v9507_v49 = vpop.xlane.xlu0 %2944  ;;  %v5496_v3 = vld [vmem:[#allocation8 + $0x130] sm:$0xff] }
 0x340   : > { %v3137_v48 = vsel %vm2994_vm5, %v9500_v46, 1e+30  ;;  %v3138_v10 = vsel %vm2994_vm5, %v9503_v4, 1e+30  ;;  %v5061_v59 = vsel %vm2994_vm5, 1.0, %v11604_v38  ;;  %3849 = vadd.xlane.f32.xlu1 %v3848_v32  ;;  %vm11113_vm14 = vcmp.lt.f32.partialorder %v9507_v49, -1.5 }
 0x341   : > { %v3184_v51 = vmin.f32 %v3182_v23, %v3137_v48  ;;  %v3221_v52 = vmin.f32 %v3219_v43, %v3138_v10  ;;  %v3564_v45 = vadd.f32 %v5061_v59, %v3563_v55  ;;  %v2776_v26 = vpop.xlane.xlu1 %2775  ;;  %v2952_v28 = vadd.f32 %v2866_v7, %v2865_v21  ;;  %v9531_v7 = vld [vmem:[#allocation7 + $0x118] sm:$0xff]  ;;  %v9543_v59 = vld [vmem:[#allocation8 + $0x170] sm:$0xff] }
 0x342   : > { %v3349_v46 = vsel %vm11113_vm14, %v11660_v53, 1e+30  ;;  %v3350_v4 = vsel %vm11113_vm14, %v11661_v56, 1e+30  ;;  %v3771_v39 = vmul.f32 %v5496_v3, %v8306_v61  ;;  %vm2996_vm5 = vcmp.lt.f32.partialorder %v2776_v26, -1.5  ;;  %v9528_v53 = vld [vmem:[#allocation7 + $0x110] sm:$0xff] }
 0x343   : > { %v3565_v62 = vadd.f32 %v9383_v47, %v3564_v45  ;;  %v11662_v32 = vmin.f32 %v9329_v25, %v9425_v41  ;;  %v11664_v21 = vmin.f32 %v9331_v0, %v9430_v36  ;;  %v3141_v56 = vsel %vm2996_vm5, %v9528_v53, 1e+30  ;;  %v5499_v45 = vld [vmem:[#allocation8 + $0x138] sm:$0xff]  ;;  %v9536_v41 = vpop.xlane.xlu0 %3846 }
 0x344   : > { %v3142_v3 = vsel %vm2996_vm5, %v9531_v7, 1e+30  ;;  %v5063_v47 = vsel %vm2996_vm5, 1.0, %v11604_v38  ;;  %v3772_v25 = vmul.f32 %v5499_v45, %v8312_v57  ;;  %11666 = vst [vmem:[#allocation22_spill] sm:$0xff] %v9536_v41  ;;  %v3186_v55 = vmin.f32 %v3184_v51, %v3141_v56  ;;  %4021 = vadd.xlane.f32.xlu1 %v4020_v44  ;;  %v9547_v51 = vld [vmem:[#allocation8 + $0x178] sm:$0xff] }
 0x345   : > { %v9521_v23 = vmin.f32 %v11662_v32, %v3349_v46  ;;  %v9526_v43 = vmin.f32 %v11664_v21, %v3350_v4  ;;  %v3223_v26 = vmin.f32 %v3221_v52, %v3142_v3  ;;  %v3566_v0 = vadd.f32 %v5063_v47, %v3565_v62  ;;  %v2782_v36 = vpop.xlane.xlu1 %2781  ;;  %v5500_v46 = vld [vmem:[#allocation7 + $0x100] sm:$0xff]  ;;  %v5501_v4 = vld [vmem:[#allocation7 + $0x108] sm:$0xff]  ;;  %v9562_v47 = vld [vmem:[#allocation7 + $0x130] sm:$0xff] }
 0x346   : > { %vm11114_vm14 = vcmp.lt.f32.partialorder %v9536_v41, -1.5  ;;  %v3939_v32 = vmul.f32 %v9543_v59, %v8217_v17  ;;  %v3940_v44 = vmul.f32 %v9547_v51, %v8220_v2  ;;  %vm2998_vm5 = vcmp.lt.f32.partialorder %v2782_v36, -1.5 }
 0x347   : > { %11663 = vst [vmem:[#allocation33_spill] sm:$0xff] %v9521_v23  ;;  %11665 = vst [vmem:[#allocation31_spill] sm:$0xff] %v9526_v43  ;;  %v4213_v48 = vsel %vm11114_vm14, %v5500_v46, 1e+30  ;;  %v4214_v10 = vsel %vm11114_vm14, %v5501_v4, 1e+30  ;;  %v3567_v52 = vadd.f32 %v9420_v29, %v3566_v0  ;;  %v11667_v62 = vmin.f32 %v9361_v58, %v9450_v54  ;;  %v9569_v4 = vpop.xlane.xlu0 %4018 }
 0x348   : > { %v11669_v56 = vmin.f32 %v9366_v27, %v9455_v33  ;;  %v3145_v45 = vsel %vm2998_vm5, %v9562_v47, 1e+30  ;;  %v9565_v46 = vld [vmem:[#allocation7 + $0x138] sm:$0xff]  ;;  %v5065_v29 = vsel %vm2998_vm5, 1.0, %v11604_v38  ;;  %v3854_v0 = vadd.f32 %v3772_v25, %v3771_v39  ;;  %11671 = vst [vmem:[#allocation52_spill] sm:$0xff] %v9569_v4  ;;  %2953 = vadd.xlane.f32.xlu1 %v2952_v28  ;;  %v11672_v27 = vld [vmem:[#allocation67_spill] sm:$0xff] }
 0x349   : > { %v9555_v21 = vmin.f32 %v11667_v62, %v4213_v48  ;;  %v3146_v36 = vsel %vm2998_vm5, %v9565_v46, 1e+30  ;;  %v3188_v58 = vmin.f32 %v3186_v55, %v3145_v45  ;;  %v3568_v48 = vadd.f32 %v5065_v29, %v3567_v52  ;;  %v9580_v25 = vld [vmem:[#allocation7 + $0x148] sm:$0xff]  ;;  %v9596_v45 = vld [vmem:[#allocation7 + $0x150] sm:$0xff]  ;;  %v9599_v29 = vld [vmem:[#allocation7 + $0x158] sm:$0xff] }
 0x34a   : > { %v9560_v3 = vmin.f32 %v11669_v56, %v4214_v10  ;;  %v3225_v54 = vmin.f32 %v3223_v26, %v3146_v36  ;;  %vm11118_vm14 = vcmp.lt.f32.partialorder %v9569_v4, -1.5  ;;  %vm11673_vm8 = vcmp.lt.f32.partialorder %v11672_v27, -1.5  ;;  %v2788_v10 = vpop.xlane.xlu1 %2787  ;;  %v9575_v56 = vld [vmem:[#allocation7 + $0x140] sm:$0xff]  ;;  %11675 = vst [vmem:[#allocation30_spill] sm:$0xff] %v9580_v25  ;;  %11680 = vst [vmem:[#allocation61_spill] sm:$0xff] %v9596_v45  ;;  %v5516_v23 = vld [vmem:[#allocation7 + $0x190] sm:$0xff] }
 0x34b   : > { %11668 = vst [vmem:[#allocation25_spill] sm:$0xff] %v9555_v21  ;;  %v5068_v33 = vsel %vm11673_vm8, 1.0, %v11604_v38  ;;  %v4026_v62 = vadd.f32 %v3940_v44, %v3939_v32  ;;  %11674 = vst [vmem:[#allocation42_spill] sm:$0xff] %v9575_v56  ;;  %v4423_v39 = vsel %vm11118_vm14, %v9575_v56, 1e+30  ;;  %vm3000_vm5 = vcmp.lt.f32.partialorder %v2788_v10, -1.5 }
 0x34c   : > { %11670 = vst [vmem:[#allocation57_spill] sm:$0xff] %v9560_v3  ;;  %v4424_v28 = vsel %vm11118_vm14, %v9580_v25, 1e+30  ;;  %v3569_v55 = vadd.f32 %v9469_v31, %v3568_v48  ;;  %v11676_v26 = vmin.f32 %v9397_v15, %v9484_v20  ;;  %v11678_v32 = vmin.f32 %v9402_v14, %v9489_v50  ;;  %11681 = vst [vmem:[#allocation40_spill] sm:$0xff] %v9599_v29  ;;  %v9603_v48 = vld [vmem:[#allocation8 + $0x190] sm:$0xff]  ;;  %v9607_v20 = vpop.xlane.xlu0 %2950  ;;  %v5513_v56 = vld [vmem:[#allocation8 + $0x158] sm:$0xff] }
 0x34d   : > { %v3149_v36 = vsel %vm3000_vm5, %v9596_v45, 1e+30  ;;  %v3150_v27 = vsel %vm3000_vm5, %v9599_v29, 1e+30  ;;  %v5067_v31 = vsel %vm3000_vm5, 1.0, %v11604_v38  ;;  %v2869_v15 = vmul.f32 %v9603_v48, %v8162_v5  ;;  %11682 = vst [vmem:[#allocation62_spill] sm:$0xff] %v9607_v20  ;;  %3855 = vadd.xlane.f32.xlu1 %v3854_v0 }
 0x34e   : > { %v9589_v52 = vmin.f32 %v11676_v26, %v4423_v39  ;;  %v9594_v44 = vmin.f32 %v11678_v32, %v4424_v28  ;;  %v3190_v14 = vmin.f32 %v3188_v58, %v3149_v36  ;;  %v3227_v50 = vmin.f32 %v3225_v54, %v3150_v27  ;;  %v9609_v39 = vld [vmem:[#allocation8 + $0x198] sm:$0xff]  ;;  %v2794_v26 = vpop.xlane.xlu1 %2793  ;;  %v5512_v25 = vld [vmem:[#allocation8 + $0x150] sm:$0xff]  ;;  %v11683_v3 = vld [vmem:[#allocation60_spill] sm:$0xff] }
 0x34f   : > { %v3570_v10 = vadd.f32 %v5067_v31, %v3569_v55  ;;  %v2870_v28 = vmul.f32 %v9609_v39, %v8167_v13  ;;  %vm3002_vm8 = vcmp.lt.f32.partialorder %v2794_v26, -1.5  ;;  %vm11684_vm5 = vcmp.lt.f32.partialorder %v11683_v3, -1.5  ;;  %v5514_v54 = vld [vmem:[#allocation7 + $0x170] sm:$0xff]  ;;  %v5515_v55 = vld [vmem:[#allocation7 + $0x178] sm:$0xff]  ;;  %v11714_v4 = vld [vmem:[#allocation72_spill] sm:$0xff] }
 0x350   : > { %11677 = vst [vmem:[#allocation35_spill] sm:$0xff] %v9589_v52  ;;  %11679 = vst [vmem:[#allocation76_spill] sm:$0xff] %v9594_v44  ;;  %v3775_v44 = vmul.f32 %v5512_v25, %v8306_v61  ;;  %v3776_v52 = vmul.f32 %v5513_v56, %v8312_v57  ;;  %v5070_v58 = vsel %vm11684_vm5, 1.0, %v11604_v38  ;;  %v3153_v0 = vsel %vm3002_vm8, %v5514_v54, 1e+30  ;;  %v9619_v31 = vpop.xlane.xlu0 %3852  ;;  %v5517_v29 = vld [vmem:[#allocation7 + $0x198] sm:$0xff] }
 0x351   : > { %v3571_v32 = vadd.f32 %v5068_v33, %v3570_v10  ;;  %v3154_v36 = vsel %vm3002_vm8, %v5515_v55, 1e+30  ;;  %v5069_v27 = vsel %vm3002_vm8, 1.0, %v11604_v38  ;;  %11685 = vst [vmem:[#allocation38_spill] sm:$0xff] %v9619_v31  ;;  %v3192_v26 = vmin.f32 %v3190_v14, %v3153_v0  ;;  %4027 = vadd.xlane.f32.xlu1 %v4026_v62 }
 0x352   : > { %v3229_v33 = vmin.f32 %v3227_v50, %v3154_v36  ;;  %v2958_v25 = vadd.f32 %v2870_v28, %v2869_v15  ;;  %v2800_v21 = vpop.xlane.xlu1 %2799  ;;  %v3860_v43 = vadd.f32 %v3776_v52, %v3775_v44  ;;  %v3943_v55 = vmul.f32 %v9603_v48, %v8217_v17  ;;  %v9641_v28 = vld [vmem:[#allocation8 + $0x1b8] sm:$0xff] }
 0x353   : > { %v3572_v10 = vadd.f32 %v5069_v27, %v3571_v32  ;;  %vm3004_vm14 = vcmp.lt.f32.partialorder %v2800_v21, -1.5  ;;  %v3944_v21 = vmul.f32 %v9609_v39, %v8220_v2  ;;  %v11691_v32 = vld [vmem:[#allocation63_spill] sm:$0xff]  ;;  %vm11715_vm11 = vcmp.lt.f32.partialorder %v11714_v4, -1.5 }
 0x354   : > { %v3157_v3 = vsel %vm3004_vm14, %v5516_v23, 1e+30  ;;  %v3158_v45 = vsel %vm3004_vm14, %v5517_v29, 1e+30  ;;  %v5071_v54 = vsel %vm3004_vm14, 1.0, %v11604_v38  ;;  %v9624_v20 = vpop.xlane.xlu0 %4024  ;;  %v11689_v23 = vld [vmem:[#allocation46_spill] sm:$0xff] }
 0x355   : > { %v3573_v56 = vadd.f32 %v5070_v58, %v3572_v10  ;;  %11686 = vst [vmem:[#allocation53_spill] sm:$0xff] %v9624_v20  ;;  %v9626_v14 = vmin.f32 %v3192_v26, %v3157_v3  ;;  %v9628_v50 = vmin.f32 %v3229_v33, %v3158_v45  ;;  %2959 = vadd.xlane.f32.xlu1 %v2958_v25  ;;  %vm11690_vm8 = vcmp.lt.f32.partialorder %v11689_v23, -1.5  ;;  %v9637_v29 = vld [vmem:[#allocation8 + $0x1b0] sm:$0xff] }
 0x356   : > { %v5078_v52 = vsel %vm11690_vm8, 1.0, %v11604_v38  ;;  %v2888_v44 = vpop.xlane.xlu1 %2887  ;;  %v2873_v15 = vmul.f32 %v9637_v29, %v8162_v5  ;;  %v2874_v45 = vmul.f32 %v9641_v28, %v8167_v13  ;;  %vm11692_vm5 = vcmp.lt.f32.partialorder %v11691_v32, -1.5  ;;  %v11694_v33 = vld [vmem:[#allocation65_spill] sm:$0xff] }
 0x357   : > { %11687 = vst [vmem:[#allocation37_spill] sm:$0xff] %v9626_v14  ;;  %11688 = vst [vmem:[#allocation39_spill] sm:$0xff] %v9628_v50  ;;  %v9630_v62 = vadd.f32 %v5071_v54, %v3573_v56  ;;  %vm3012_vm14 = vcmp.lt.f32.partialorder %v2888_v44, -1.5  ;;  %v5080_v58 = vsel %vm11692_vm5, 1.0, %v11604_v38  ;;  %v4032_v26 = vadd.f32 %v3944_v21, %v3943_v55  ;;  %v9710_v14 = vld [vmem:[#allocation8 + $0x1d8] sm:$0xff] }
 0x358   : > { %v5079_v0 = vsel %vm3012_vm14, 1.0, %v11604_v38  ;;  %v9649_v36 = vpop.xlane.xlu0 %2956  ;;  %vm11695_vm8 = vcmp.lt.f32.partialorder %v11694_v33, -1.5  ;;  %v2964_v56 = vadd.f32 %v2874_v45, %v2873_v15  ;;  %v9655_v3 = vsel %vm3012_vm14, %v9284_v6, 1e+30 }
 0x359   : > { %11693 = vst [vmem:[#allocation59_spill] sm:$0xff] %v9649_v36  ;;  %v3635_v27 = vadd.f32 %v5079_v0, %v5078_v52  ;;  %3861 = vadd.xlane.f32.xlu1 %v3860_v43  ;;  %v5082_v10 = vsel %vm11695_vm8, 1.0, %v11604_v38  ;;  %v9658_v54 = vsel %vm3012_vm14, %v9289_v22, 1e+30  ;;  %v3779_v21 = vmul.f32 %v9543_v59, %v8306_v61  ;;  %v11697_v0 = vld [vmem:[#allocation64_spill] sm:$0xff]  ;;  %v11712_v36 = vld [vmem:[#allocation71_spill] sm:$0xff] }
 0x35a   : > { %v2894_v25 = vpop.xlane.xlu1 %2893  ;;  %vm11698_vm14 = vcmp.lt.f32.partialorder %v11697_v0, -1.5  ;;  %v3947_v0 = vmul.f32 %v9637_v29, %v8217_v17  ;;  %v3948_v45 = vmul.f32 %v9641_v28, %v8220_v2 }
 0x35b   : > { %vm3014_vm5 = vcmp.lt.f32.partialorder %v2894_v25, -1.5  ;;  %v3636_v23 = vadd.f32 %v5080_v58, %v3635_v27  ;;  %v3780_v58 = vmul.f32 %v9547_v51, %v8312_v57  ;;  %v5144_v27 = vsel %vm11698_vm14, 1.0, %v11604_v38  ;;  %v11699_v25 = vld [vmem:[#allocation47_spill] sm:$0xff] }
 0x35c   : > { %v9661_v44 = vsel %vm3014_vm5, %v9306_v63, 1e+30  ;;  %v9664_v43 = vsel %vm3014_vm5, %v9309_v16, 1e+30  ;;  %v5081_v55 = vsel %vm3014_vm5, 1.0, %v11604_v38  ;;  %v9669_v52 = vpop.xlane.xlu0 %3858  ;;  %vm11700_vm5 = vcmp.lt.f32.partialorder %v11699_v25, -1.5 }
 0x35d   : > { %11696 = vst [vmem:[#allocation67_spill] sm:$0xff] %v9669_v52  ;;  %v3637_v32 = vadd.f32 %v5081_v55, %v3636_v23  ;;  %4033 = vadd.xlane.f32.xlu1 %v4032_v26  ;;  %v5146_v15 = vsel %vm11700_vm5, 1.0, %v11604_v38  ;;  %v3866_v55 = vadd.f32 %v3780_v58, %v3779_v21  ;;  %vm11702_vm5 = vcmp.lt.f32.partialorder %v8886_v30, -1.5 }
 0x35e   : > { %v9680_v33 = vpop.xlane.xlu1 %3961  ;;  %v5148_v25 = vsel %vm11702_vm5, 1.0, %v11604_v38  ;;  %v2878_v30 = vmul.f32 %v9710_v14, %v8167_v13  ;;  %v3784_v52 = vmul.f32 %v9609_v39, %v8312_v57  ;;  %v2713_v39 = vmul.f32 %v9637_v29, %v7843_v34 }
 0x35f   : > { %vm4086_vm8 = vcmp.lt.f32.partialorder %v9680_v33, -1.5  ;;  %v3638_v59 = vadd.f32 %v5082_v10, %v3637_v32 }
 0x360   : > { %v5145_v26 = vsel %vm4086_vm8, 1.0, %v11604_v38  ;;  %v9689_v23 = vpop.xlane.xlu0 %4030 }
 0x361   : > { %11701 = vst [vmem:[#allocation60_spill] sm:$0xff] %v9689_v23  ;;  %v4709_v51 = vadd.f32 %v5145_v26, %v5144_v27  ;;  %2965 = vadd.xlane.f32.xlu1 %v2964_v56  ;;  %v4038_v27 = vadd.f32 %v3948_v45, %v3947_v0  ;;  %v9706_v26 = vld [vmem:[#allocation8 + $0x1d0] sm:$0xff]  ;;  %v3783_v23 = vmul.f32 %v9603_v48, %v8306_v61 }
 0x362   : > { %v9695_v10 = vpop.xlane.xlu1 %3967  ;;  %v2877_v50 = vmul.f32 %v9706_v26, %v8162_v5 }
 0x363   : > { %vm4088_vm14 = vcmp.lt.f32.partialorder %v9695_v10, -1.5  ;;  %v4710_v32 = vadd.f32 %v5146_v15, %v4709_v51  ;;  %v3872_v48 = vadd.f32 %v3784_v52, %v3783_v23 }
 0x364   : > { %v5147_v56 = vsel %vm4088_vm14, 1.0, %v11604_v38  ;;  %v9704_v21 = vpop.xlane.xlu0 %2962 }
 0x365   : > { %11703 = vst [vmem:[#allocation46_spill] sm:$0xff] %v9704_v21  ;;  %v4711_v58 = vadd.f32 %v5147_v56, %v4710_v32  ;;  %3867 = vadd.xlane.f32.xlu1 %v3866_v55  ;;  %v11704_v21 = vld [vmem:[#allocation49_spill] sm:$0xff]  ;;  %v2970_v56 = vadd.f32 %v2878_v30, %v2877_v50  ;;  %v2714_v30 = vmul.f32 %v9641_v28, %v7847_v19 }
 0x366   : > { %v9714_v15 = vpop.xlane.xlu1 %2899  ;;  %vm11705_vm9 = vcmp.lt.f32.partialorder %v11704_v21, -1.5 }
 0x367   : > { %vm3016_vm5 = vcmp.lt.f32.partialorder %v9714_v15, -1.5  ;;  %v4712_v51 = vadd.f32 %v5148_v25, %v4711_v58  ;;  %v5084_v55 = vsel %vm11705_vm9, 1.0, %v11604_v38  ;;  %v5150_v58 = vsel %vm4091_vm12, 1.0, %v11604_v38 }
 0x368   : > { %v5083_v45 = vsel %vm3016_vm5, 1.0, %v11604_v38  ;;  %v9723_v0 = vpop.xlane.xlu0 %3864  ;;  %vm11709_vm12 = vcmp.lt.f32.partialorder %v8933_v37, -1.5  ;;  %v3788_v37 = vmul.f32 %v9641_v28, %v8312_v57  ;;  %v3319_v4 = vsel %vm3016_vm5, %v9338_v35, 1e+30 }
 0x369   : > { %11706 = vst [vmem:[#allocation63_spill] sm:$0xff] %v9723_v0  ;;  %v3639_v32 = vadd.f32 %v5083_v45, %v3638_v59  ;;  %4039 = vadd.xlane.f32.xlu1 %v4038_v27  ;;  %v5114_v1 = vsel %vm11709_vm12, 1.0, %v11604_v38  ;;  %vm11713_vm12 = vcmp.lt.f32.partialorder %v11712_v36, -1.5  ;;  %v9832_v15 = vmul.f32 %v9710_v14, %v8312_v57 }
 0x36a   : > { %v9729_v25 = vpop.xlane.xlu1 %3973 }
 0x36b   : > { %vm4090_vm7 = vcmp.lt.f32.partialorder %v9729_v25, -1.5  ;;  %v3640_v21 = vadd.f32 %v5084_v55, %v3639_v32 }
 0x36c   : > { %v5149_v59 = vsel %vm4090_vm7, 1.0, %v11604_v38  ;;  %v9738_v50 = vpop.xlane.xlu0 %4036 }
 0x36d   : > { %11707 = vst [vmem:[#allocation65_spill] sm:$0xff] %v9738_v50  ;;  %v4713_v27 = vadd.f32 %v5149_v59, %v4712_v51  ;;  %2971 = vadd.xlane.f32.xlu1 %v2970_v56  ;;  %v5086_v51 = vsel %vm3019_vm0, 1.0, %v11604_v38  ;;  %v2804_v56 = vadd.f32 %v2714_v30, %v2713_v39  ;;  %v3952_v59 = vmul.f32 %v9710_v14, %v8220_v2 }
 0x36e   : > { %v2906_v55 = vpop.xlane.xlu1 %2905  ;;  %v3787_v39 = vmul.f32 %v9637_v29, %v8306_v61  ;;  %vm11711_vm0 = vcmp.lt.f32.partialorder %v9023_v42, -1.5 }
 0x36f   : > { %vm3018_vm9 = vcmp.lt.f32.partialorder %v2906_v55, -1.5  ;;  %v9744_v45 = vadd.f32 %v5150_v58, %v4713_v27  ;;  %v3951_v58 = vmul.f32 %v9706_v26, %v8217_v17  ;;  %v9765_v27 = vld [vmem:[#allocation8 + $0x1f0] sm:$0xff]  ;;  %v5116_v0 = vsel %vm11711_vm0, 1.0, %v11604_v38 }
 0x370   : > { %v5085_v52 = vsel %vm3018_vm9, 1.0, %v11604_v38  ;;  %v9754_v23 = vpop.xlane.xlu0 %2968  ;;  %v3955_v29 = vmul.f32 %v9765_v27, %v8217_v17  ;;  %v5088_v17 = vsel %vm11715_vm11, 1.0, %v11604_v38  ;;  %v4386_v55 = vsel %vm4086_vm8, %v9289_v22, 1e+30 }
 0x371   : > { %11708 = vst [vmem:[#allocation64_spill] sm:$0xff] %v9754_v23  ;;  %v3641_v32 = vadd.f32 %v5085_v52, %v3640_v21  ;;  %3873 = vadd.xlane.f32.xlu1 %v3872_v48  ;;  %v2881_v23 = vmul.f32 %v9765_v27, %v8162_v5  ;;  %v9769_v21 = vld [vmem:[#allocation8 + $0x1f8] sm:$0xff]  ;;  %v2717_v52 = vmul.f32 %v9706_v26, %v7843_v34 }
 0x372   : > { %v9763_v8 = vpop.xlane.xlu1 %3801  ;;  %v2882_v48 = vmul.f32 %v9769_v21, %v8167_v13  ;;  %v2718_v13 = vmul.f32 %v9710_v14, %v7847_v19  ;;  %v4044_v28 = vadd.f32 %v3952_v59, %v3951_v58 }
 0x373   : > { %vm4054_vm13 = vcmp.lt.f32.partialorder %v9763_v8, -1.5  ;;  %v9776_v30 = vadd.f32 %v5086_v51, %v3641_v32  ;;  %v3956_v51 = vmul.f32 %v9769_v21, %v8220_v2  ;;  %v3878_v2 = vadd.f32 %v3788_v37, %v3787_v39 }
 0x374   : > { %v5113_v5 = vsel %vm4054_vm13, 1.0, %v11604_v38  ;;  %v9785_v50 = vpop.xlane.xlu0 %3870  ;;  %v2976_v31 = vadd.f32 %v2882_v48, %v2881_v23  ;;  %v2810_v36 = vadd.f32 %v2718_v13, %v2717_v52  ;;  %v11718_v23 = vld [vmem:[#allocation23_spill] sm:$0xff]  ;;  %v4385_v48 = vsel %vm4086_vm8, %v9284_v6, 1e+30 }
 0x375   : > { %11710 = vst [vmem:[#allocation47_spill] sm:$0xff] %v9785_v50  ;;  %v4624_v32 = vadd.f32 %v5113_v5, %v5112_v60  ;;  %2805 = vadd.xlane.f32.xlu1 %v2804_v56  ;;  %v5152_v50 = vsel %vm11713_vm12, 1.0, %v11604_v38  ;;  %v11716_v5 = vld [vmem:[#allocation73_spill] sm:$0xff]  ;;  %v9811_v58 = vadd.f32 %v3956_v51, %v3955_v29  ;;  %v3320_v59 = vsel %vm3016_vm5, %v11718_v23, 1e+30 }
 0x376   : > { %v3808_v20 = vpop.xlane.xlu1 %3807  ;;  %vm11717_vm10 = vcmp.lt.f32.partialorder %v11716_v5, -1.5  ;;  %v9828_v37 = vmul.f32 %v9706_v26, %v8306_v61  ;;  %v3324_v52 = vsel %vm3018_vm9, %v9371_v9, 1e+30  ;;  %v11719_v51 = vmin.f32 %v9655_v3, %v9661_v44 }
 0x377   : > { %vm4056_vm15 = vcmp.lt.f32.partialorder %v3808_v20, -1.5  ;;  %v4625_v41 = vadd.f32 %v5114_v1, %v4624_v32  ;;  %v9805_v60 = vsel %vm11717_vm10, 1.0, %v11604_v38  ;;  %v11720_v26 = vmin.f32 %v9658_v54, %v9664_v43 }
 0x378   : > { %v5115_v42 = vsel %vm4056_vm15, 1.0, %v11604_v38  ;;  %v9809_v56 = vpop.xlane.xlu0 %2802  ;;  %v3376_v32 = vmin.f32 %v11719_v51, %v3319_v4  ;;  %v4390_v3 = vsel %vm4088_vm14, %v9309_v16, 1e+30  ;;  %v4393_v54 = vsel %vm4090_vm7, %v9338_v35, 1e+30 }
 0x379   : > { %v4626_v1 = vadd.f32 %v5115_v42, %v4625_v41  ;;  %4045 = vadd.xlane.f32.xlu1 %v4044_v28  ;;  %vm3005_vm10 = vcmp.lt.f32.partialorder %v9809_v56, -1.5  ;;  %v3323_v41 = vsel %vm3018_vm9, %v9368_v18, 1e+30  ;;  %v3413_v28 = vmin.f32 %v11720_v26, %v3320_v59 }
 0x37a   : > { %v3980_v39 = vpop.xlane.xlu1 %3979  ;;  %v5072_v13 = vsel %vm3005_vm10, 1.0, %v11604_v38  ;;  %v3378_v43 = vmin.f32 %v3376_v32, %v3323_v41  ;;  %v4183_v33 = vsel %vm4054_vm13, %v9284_v6, 1e+30  ;;  %v4187_v4 = vsel %vm4056_vm15, %v9306_v63, 1e+30 }
 0x37b   : > { %vm4092_vm11 = vcmp.lt.f32.partialorder %v3980_v39, -1.5  ;;  %v9839_v29 = vadd.f32 %v5072_v13, %v9630_v62  ;;  %v4627_v5 = vadd.f32 %v5116_v0, %v4626_v1  ;;  %v4389_v62 = vsel %vm4088_vm14, %v9306_v63, 1e+30 }
 0x37c   : > { %v5151_v14 = vsel %vm4092_vm11, 1.0, %v11604_v38  ;;  %v3415_v0 = vmin.f32 %v3413_v28, %v3324_v52  ;;  %v4188_v10 = vsel %vm4056_vm15, %v9309_v16, 1e+30  ;;  %v4184_v6 = vsel %vm4054_vm13, %v9289_v22, 1e+30 }
 0x37d   : > { %v4715_v44 = vadd.f32 %v5151_v14, %v9744_v45  ;;  %2977 = vadd.xlane.f32.xlu1 %v2976_v31  ;;  %v4448_v31 = vmin.f32 %v4385_v48, %v4389_v62  ;;  %v4485_v16 = vmin.f32 %v4386_v55, %v4390_v3  ;;  %v4394_v20 = vsel %vm4090_vm7, %v11718_v23, 1e+30 }
 0x37e   : > { %v2912_v42 = vpop.xlane.xlu1 %2911  ;;  %v4283_v48 = vmin.f32 %v4184_v6, %v4188_v10  ;;  %v4397_v32 = vsel %vm4092_vm11, %v9368_v18, 1e+30  ;;  %v4398_v22 = vsel %vm4092_vm11, %v9371_v9, 1e+30  ;;  %v2721_v39 = vmul.f32 %v9765_v27, %v7843_v34 }
 0x37f   : > { %vm3020_vm8 = vcmp.lt.f32.partialorder %v2912_v42, -1.5  ;;  %v4716_v45 = vadd.f32 %v5152_v50, %v4715_v44  ;;  %v4246_v50 = vmin.f32 %v4183_v33, %v4187_v4  ;;  %v4450_v26 = vmin.f32 %v4448_v31, %v4393_v54  ;;  %v11721_v54 = vld [vmem:[#allocation74_spill] sm:$0xff] }
 0x380   : > { %v3327_v59 = vsel %vm3020_vm8, %v9404_v24, 1e+30  ;;  %v3328_v1 = vsel %vm3020_vm8, %v9407_v12, 1e+30  ;;  %v5087_v13 = vsel %vm3020_vm8, 1.0, %v11604_v38  ;;  %v4487_v25 = vmin.f32 %v4485_v16, %v4394_v20 }
 0x381   : > { %v9875_v41 = vmin.f32 %v3378_v43, %v3327_v59  ;;  %v9877_v52 = vmin.f32 %v3415_v0, %v3328_v1  ;;  %v3643_v63 = vadd.f32 %v5087_v13, %v9776_v30  ;;  %3879 = vadd.xlane.f32.xlu1 %v3878_v2  ;;  %v4452_v44 = vmin.f32 %v4450_v26, %v4397_v32 }
 0x382   : > { %v3814_v51 = vpop.xlane.xlu1 %3813  ;;  %vm11722_vm14 = vcmp.lt.f32.partialorder %v11721_v54, -1.5  ;;  %v5090_v10 = vsel %vm3023_vm1, 1.0, %v11604_v38  ;;  %v5156_v26 = vsel %vm4097_vm6, 1.0, %v11604_v38 }
 0x383   : > { %vm4058_vm15 = vcmp.lt.f32.partialorder %v3814_v51, -1.5  ;;  %v3644_v8 = vadd.f32 %v5088_v17, %v3643_v63  ;;  %v2722_v17 = vmul.f32 %v9769_v21, %v7847_v19  ;;  %v5154_v43 = vsel %vm11722_vm14, 1.0, %v11604_v38 }
 0x384   : > { %v4191_v30 = vsel %vm4058_vm15, %v9338_v35, 1e+30  ;;  %v4192_v2 = vsel %vm4058_vm15, %v11718_v23, 1e+30  ;;  %v5117_v28 = vsel %vm4058_vm15, 1.0, %v11604_v38  ;;  %v4489_v35 = vmin.f32 %v4487_v25, %v4398_v22 }
 0x385   : > { %v9890_v14 = vmin.f32 %v4246_v50, %v4191_v30  ;;  %v9892_v55 = vmin.f32 %v4283_v48, %v4192_v2  ;;  %v4628_v62 = vadd.f32 %v5117_v28, %v4627_v5  ;;  %2811 = vadd.xlane.f32.xlu1 %v2810_v36  ;;  %v2816_v31 = vadd.f32 %v2722_v17, %v2721_v39  ;;  %v11727_v39 = vld [vmem:[#allocation48_spill] sm:$0xff] }
 0x386   : > { %v3986_v3 = vpop.xlane.xlu1 %3985  ;;  %v3796_v63 = vmul.f32 %v9769_v21, %v8312_v57  ;;  %v5120_v48 = vsel %vm4061_vm4, 1.0, %v11604_v38 }
 0x387   : > { %vm4094_vm7 = vcmp.lt.f32.partialorder %v3986_v3, -1.5  ;;  %v4629_v23 = vadd.f32 %v9805_v60, %v4628_v62  ;;  %v3884_v60 = vadd.f32 %v9832_v15, %v9828_v37  ;;  %v5092_v3 = vsel %vm3025_vm2, 1.0, %v11604_v38  ;;  %v11738_v62 = vld [vmem:[#allocation78_spill] sm:$0xff] }
 0x388   : > { %v4401_v0 = vsel %vm4094_vm7, %v9404_v24, 1e+30  ;;  %v4402_v36 = vsel %vm4094_vm7, %v9407_v12, 1e+30  ;;  %v5153_v5 = vsel %vm4094_vm7, 1.0, %v11604_v38  ;;  %vm11739_vm15 = vcmp.lt.f32.partialorder %v11738_v62, -1.5 }
 0x389   : > { %v9905_v33 = vmin.f32 %v4452_v44, %v4401_v0  ;;  %v9907_v34 = vmin.f32 %v4489_v35, %v4402_v36  ;;  %v4717_v19 = vadd.f32 %v5153_v5, %v4716_v45  ;;  %4051 = vadd.xlane.f32.xlu1 %v9811_v58  ;;  %v3795_v58 = vmul.f32 %v9765_v27, %v8306_v61  ;;  %v11728_v44 = vld [vmem:[#allocation51_spill] sm:$0xff] }
 0x38a   : > { %v2918_v42 = vpop.xlane.xlu1 %2917 }
 0x38b   : > { %vm3022_vm5 = vcmp.lt.f32.partialorder %v2918_v42, -1.5  ;;  %v4718_v59 = vadd.f32 %v5154_v43, %v4717_v19  ;;  %v3890_v57 = vadd.f32 %v3796_v63, %v3795_v58 }
 0x38c   : > { %v3331_v1 = vsel %vm3022_vm5, %v9437_v40, 1e+30  ;;  %v3332_v13 = vsel %vm3022_vm5, %v9440_v11, 1e+30  ;;  %v5089_v6 = vsel %vm3022_vm5, 1.0, %v11604_v38 }
 0x38d   : > { %v3382_v45 = vmin.f32 %v9875_v41, %v3331_v1  ;;  %v3419_v37 = vmin.f32 %v9877_v52, %v3332_v13  ;;  %v3645_v15 = vadd.f32 %v5089_v6, %v3644_v8  ;;  %3885 = vadd.xlane.f32.xlu1 %v3884_v60  ;;  %v11730_v13 = vld [vmem:[#allocation34_spill] sm:$0xff]  ;;  %v11736_v8 = vld [vmem:[#allocation77_spill] sm:$0xff] }
 0x38e   : > { %v3820_v16 = vpop.xlane.xlu1 %3819  ;;  %vm11731_vm13 = vcmp.lt.f32.partialorder %v11730_v13, -1.5  ;;  %vm11737_vm11 = vcmp.lt.f32.partialorder %v11736_v8, -1.5 }
 0x38f   : > { %vm4060_vm1 = vcmp.lt.f32.partialorder %v3820_v16, -1.5  ;;  %v3646_v20 = vadd.f32 %v5090_v10, %v3645_v15  ;;  %v5158_v6 = vsel %vm11731_vm13, 1.0, %v11604_v38 }
 0x390   : > { %v4195_v51 = vsel %vm4060_vm1, %v9368_v18, 1e+30  ;;  %v4196_v61 = vsel %vm4060_vm1, %v9371_v9, 1e+30  ;;  %v5119_v27 = vsel %vm4060_vm1, 1.0, %v11604_v38 }
 0x391   : > { %v4250_v41 = vmin.f32 %v9890_v14, %v4195_v51  ;;  %v4287_v52 = vmin.f32 %v9892_v55, %v4196_v61  ;;  %v4630_v32 = vadd.f32 %v5119_v27, %v4629_v23  ;;  %2817 = vadd.xlane.f32.xlu1 %v2816_v31  ;;  %v11735_v61 = vld [vmem:[#allocation26_spill] sm:$0xff] }
 0x392   : > { %v3992_v21 = vpop.xlane.xlu1 %3991 }
 0x393   : > { %vm4096_vm9 = vcmp.lt.f32.partialorder %v3992_v21, -1.5  ;;  %v4631_v22 = vadd.f32 %v5120_v48, %v4630_v32  ;;  %v11734_v48 = vld [vmem:[#allocation16_spill] sm:$0xff] }
 0x394   : > { %v4405_v18 = vsel %vm4096_vm9, %v9437_v40, 1e+30  ;;  %v4406_v9 = vsel %vm4096_vm9, %v9440_v11, 1e+30  ;;  %v5155_v30 = vsel %vm4096_vm9, 1.0, %v11604_v38 }
 0x395   : > { %v4456_v2 = vmin.f32 %v9905_v33, %v4405_v18  ;;  %v4493_v28 = vmin.f32 %v9907_v34, %v4406_v9  ;;  %v4719_v25 = vadd.f32 %v5155_v30, %v4718_v59  ;;  %3891 = vadd.xlane.f32.xlu1 %v3890_v57  ;;  %v5122_v34 = vsel %vm4063_vm3, 1.0, %v11604_v38 }
 0x396   : > { %v2924_v14 = vpop.xlane.xlu1 %2923 }
 0x397   : > { %vm3024_vm4 = vcmp.lt.f32.partialorder %v2924_v14, -1.5  ;;  %v4720_v55 = vadd.f32 %v5156_v26, %v4719_v25  ;;  %v5124_v26 = vsel %vm11737_vm11, 1.0, %v11604_v38 }
 0x398   : > { %v3335_v17 = vsel %vm3024_vm4, %v11727_v39, 1e+30  ;;  %v3336_v35 = vsel %vm3024_vm4, %v11728_v44, 1e+30  ;;  %v5091_v23 = vsel %vm3024_vm4, 1.0, %v11604_v38 }
 0x399   : > { %v3384_v54 = vmin.f32 %v3382_v45, %v3335_v17  ;;  %v3421_v43 = vmin.f32 %v3419_v37, %v3336_v35  ;;  %v3647_v0 = vadd.f32 %v5091_v23, %v3646_v20  ;;  %v11732_v20 = vld [vmem:[#allocation75_spill] sm:$0xff] }
 0x39a   : > { %v3826_v36 = vpop.xlane.xlu1 %3825  ;;  %vm11733_vm0 = vcmp.lt.f32.partialorder %v11732_v20, -1.5 }
 0x39b   : > { %vm4062_vm6 = vcmp.lt.f32.partialorder %v3826_v36, -1.5  ;;  %v3648_v5 = vadd.f32 %v5092_v3, %v3647_v0  ;;  %v5094_v50 = vsel %vm11733_vm0, 1.0, %v11604_v38  ;;  %v5160_v3 = vsel %vm11739_vm15, 1.0, %v11604_v38  ;;  %v11740_v36 = vld [vmem:[#allocation28_spill] sm:$0xff] }
 0x39c   : > { %v4199_v19 = vsel %vm4062_vm6, %v9404_v24, 1e+30  ;;  %v4200_v60 = vsel %vm4062_vm6, %v9407_v12, 1e+30  ;;  %v5121_v42 = vsel %vm4062_vm6, 1.0, %v11604_v38  ;;  %vm11741_vm14 = vcmp.lt.f32.partialorder %v11740_v36, -1.5 }
 0x39d   : > { %v4252_v4 = vmin.f32 %v4250_v41, %v4199_v19  ;;  %v4289_v10 = vmin.f32 %v4287_v52, %v4200_v60  ;;  %v4632_v31 = vadd.f32 %v5121_v42, %v4631_v22 }
 0x39e   : > { %v3998_v59 = vpop.xlane.xlu1 %3997 }
 0x39f   : > { %vm4098_vm2 = vcmp.lt.f32.partialorder %v3998_v59, -1.5  ;;  %v4633_v1 = vadd.f32 %v5122_v34, %v4632_v31  ;;  %v11742_v59 = vld [vmem:[#allocation29_spill] sm:$0xff] }
 0x3a0   : > { %v4409_v58 = vsel %vm4098_vm2, %v11727_v39, 1e+30  ;;  %v4410_v45 = vsel %vm4098_vm2, %v11728_v44, 1e+30  ;;  %v5157_v24 = vsel %vm4098_vm2, 1.0, %v11604_v38  ;;  %vm11743_vm1 = vcmp.lt.f32.partialorder %v11742_v59, -1.5 }
 0x3a1   : > { %v4458_v37 = vmin.f32 %v4456_v2, %v4409_v58  ;;  %v4495_v12 = vmin.f32 %v4493_v28, %v4410_v45  ;;  %v4721_v15 = vadd.f32 %v5157_v24, %v4720_v55  ;;  %vm11746_vm2 = vcmp.lt.f32.partialorder %v9507_v49, -1.5 }
 0x3a2   : > { %v2930_v63 = vpop.xlane.xlu1 %2929 }
 0x3a3   : > { %vm3026_vm3 = vcmp.lt.f32.partialorder %v2930_v63, -1.5  ;;  %v4722_v16 = vadd.f32 %v5158_v6, %v4721_v15  ;;  %v11744_v63 = vld [vmem:[#allocation36_spill] sm:$0xff] }
 0x3a4   : > { %v3339_v51 = vsel %vm3026_vm3, %v11734_v48, 1e+30  ;;  %v3340_v27 = vsel %vm3026_vm3, %v11735_v61, 1e+30  ;;  %v5093_v41 = vsel %vm3026_vm3, 1.0, %v11604_v38  ;;  %vm11745_vm4 = vcmp.lt.f32.partialorder %v11744_v63, -1.5  ;;  %v10046_v63 = vpop.xlane.xlu0 %4042 }
 0x3a5   : > { %v3386_v52 = vmin.f32 %v3384_v54, %v3339_v51  ;;  %v3423_v32 = vmin.f32 %v3421_v43, %v3340_v27  ;;  %v3649_v57 = vadd.f32 %v5093_v41, %v3648_v5  ;;  %v5096_v5 = vsel %vm11741_vm14, 1.0, %v11604_v38 }
 0x3a6   : > { %v3832_v21 = vpop.xlane.xlu1 %3831 }
 0x3a7   : > { %vm4064_vm12 = vcmp.lt.f32.partialorder %v3832_v21, -1.5  ;;  %v3650_v22 = vadd.f32 %v5094_v50, %v3649_v57 }
 0x3a8   : > { %v4203_v18 = vsel %vm4064_vm12, %v9437_v40, 1e+30  ;;  %v4204_v9 = vsel %vm4064_vm12, %v9440_v11, 1e+30  ;;  %v5123_v30 = vsel %vm4064_vm12, 1.0, %v11604_v38 }
 0x3a9   : > { %v4254_v2 = vmin.f32 %v4252_v4, %v4203_v18  ;;  %v4291_v28 = vmin.f32 %v4289_v10, %v4204_v9  ;;  %v4634_v25 = vadd.f32 %v5123_v30, %v4633_v1  ;;  %v5126_v1 = vsel %vm11743_vm1, 1.0, %v11604_v38 }
 0x3aa   : > { %v4004_v14 = vpop.xlane.xlu1 %4003 }
 0x3ab   : > { %vm4100_vm8 = vcmp.lt.f32.partialorder %v4004_v14, -1.5  ;;  %v4635_v55 = vadd.f32 %v5124_v26, %v4634_v25 }
 0x3ac   : > { %v4413_v17 = vsel %vm4100_vm8, %v11734_v48, 1e+30  ;;  %v4414_v35 = vsel %vm4100_vm8, %v11735_v61, 1e+30  ;;  %v5159_v40 = vsel %vm4100_vm8, 1.0, %v11604_v38 }
 0x3ad   : > { %v4460_v23 = vmin.f32 %v4458_v37, %v4413_v17  ;;  %v4497_v11 = vmin.f32 %v4495_v12, %v4414_v35  ;;  %v4723_v54 = vadd.f32 %v5159_v40, %v4722_v16  ;;  %v5162_v16 = vsel %vm11745_vm4, 1.0, %v11604_v38  ;;  %v11749_v40 = vld [vmem:[#allocation52_spill] sm:$0xff] }
 0x3ae   : > { %v2936_v43 = vpop.xlane.xlu1 %2935  ;;  %vm11750_vm12 = vcmp.lt.f32.partialorder %v11749_v40, -1.5 }
 0x3af   : > { %vm3028_vm7 = vcmp.lt.f32.partialorder %v2936_v43, -1.5  ;;  %v4724_v0 = vadd.f32 %v5160_v3, %v4723_v54 }
 0x3b0   : > { %v3343_v33 = vsel %vm3028_vm7, %v9528_v53, 1e+30  ;;  %v3344_v34 = vsel %vm3028_vm7, %v9531_v7, 1e+30  ;;  %v5095_v19 = vsel %vm3028_vm7, 1.0, %v11604_v38 }
 0x3b1   : > { %v3388_v60 = vmin.f32 %v3386_v52, %v3343_v33  ;;  %v3425_v42 = vmin.f32 %v3423_v32, %v3344_v34  ;;  %v3651_v4 = vadd.f32 %v5095_v19, %v3650_v22  ;;  %v5098_v32 = vsel %vm11746_vm2, 1.0, %v11604_v38  ;;  %v11752_v19 = vld [vmem:[#allocation61_spill] sm:$0xff] }
 0x3b2   : > { %v3838_v10 = vpop.xlane.xlu1 %3837 }
 0x3b3   : > { %vm4066_vm5 = vcmp.lt.f32.partialorder %v3838_v10, -1.5  ;;  %v3652_v31 = vadd.f32 %v5096_v5, %v3651_v4  ;;  %v11751_v5 = vld [vmem:[#allocation62_spill] sm:$0xff] }
 0x3b4   : > { %v4207_v13 = vsel %vm4066_vm5, %v11727_v39, 1e+30  ;;  %v4208_v6 = vsel %vm4066_vm5, %v11728_v44, 1e+30  ;;  %v5125_v58 = vsel %vm4066_vm5, 1.0, %v11604_v38  ;;  %vm3033_vm11 = vcmp.lt.f32.partialorder %v11751_v5, -1.5 }
 0x3b5   : > { %v9988_v45 = vmin.f32 %v4254_v2, %v4207_v13  ;;  %v9990_v24 = vmin.f32 %v4291_v28, %v4208_v6  ;;  %v4636_v37 = vadd.f32 %v5125_v58, %v4635_v55  ;;  %v11747_v2 = vld [vmem:[#allocation22_spill] sm:$0xff]  ;;  %v5100_v34 = vsel %vm3033_vm11, 1.0, %v11604_v38 }
 0x3b6   : > { %v4010_v12 = vpop.xlane.xlu1 %4009  ;;  %vm11748_vm3 = vcmp.lt.f32.partialorder %v11747_v2, -1.5 }
 0x3b7   : > { %vm4102_vm9 = vcmp.lt.f32.partialorder %v4010_v12, -1.5  ;;  %v4637_v15 = vadd.f32 %v5126_v1, %v4636_v37  ;;  %v5128_v28 = vsel %vm11748_vm3, 1.0, %v11604_v38  ;;  %v11754_v1 = vld [vmem:[#allocation38_spill] sm:$0xff] }
 0x3b8   : > { %v4417_v20 = vsel %vm4102_vm9, %v9528_v53, 1e+30  ;;  %v4418_v39 = vsel %vm4102_vm9, %v9531_v7, 1e+30  ;;  %v5161_v44 = vsel %vm4102_vm9, 1.0, %v11604_v38  ;;  %vm4071_vm15 = vcmp.lt.f32.partialorder %v11754_v1, -1.5 }
 0x3b9   : > { %v9998_v50 = vmin.f32 %v4460_v23, %v4417_v20  ;;  %v10000_v51 = vmin.f32 %v4497_v11, %v4418_v39  ;;  %v4725_v27 = vadd.f32 %v5161_v44, %v4724_v0  ;;  %v5164_v23 = vsel %vm11750_vm12, 1.0, %v11604_v38  ;;  %v11755_v20 = vld [vmem:[#allocation53_spill] sm:$0xff] }
 0x3ba   : > { %v2942_v41 = vpop.xlane.xlu1 %2941  ;;  %v5130_v6 = vsel %vm4071_vm15, 1.0, %v11604_v38  ;;  %vm4107_vm14 = vcmp.lt.f32.partialorder %v11755_v20, -1.5  ;;  %v11762_v1 = vld [vmem:[#allocation25_spill] sm:$0xff] }
 0x3bb   : > { %vm3030_vm6 = vcmp.lt.f32.partialorder %v2942_v41, -1.5  ;;  %v4726_v52 = vadd.f32 %v5162_v16, %v4725_v27 }
 0x3bc   : > { %v3347_v57 = vsel %vm3030_vm6, %v9562_v47, 1e+30  ;;  %v3348_v21 = vsel %vm3030_vm6, %v9565_v46, 1e+30  ;;  %v5097_v22 = vsel %vm3030_vm6, 1.0, %v11604_v38 }
 0x3bd   : > { %v3390_v8 = vmin.f32 %v3388_v60, %v3347_v57  ;;  %v3427_v26 = vmin.f32 %v3425_v42, %v3348_v21  ;;  %v3653_v18 = vadd.f32 %v5097_v22, %v3652_v31  ;;  %v11753_v60 = vld [vmem:[#allocation40_spill] sm:$0xff]  ;;  %v10066_v22 = vpop.xlane.xlu0 %2974 }
 0x3be   : > { %v3844_v9 = vpop.xlane.xlu1 %3843 }
 0x3bf   : > { %vm4068_vm13 = vcmp.lt.f32.partialorder %v3844_v9, -1.5  ;;  %v3654_v30 = vadd.f32 %v5098_v32, %v3653_v18  ;;  %v11756_v32 = vld [vmem:[#allocation59_spill] sm:$0xff] }
 0x3c0   : > { %v4211_v25 = vsel %vm4068_vm13, %v11734_v48, 1e+30  ;;  %v4212_v49 = vsel %vm4068_vm13, %v11735_v61, 1e+30  ;;  %v5127_v14 = vsel %vm4068_vm13, 1.0, %v11604_v38  ;;  %vm3035_vm1 = vcmp.lt.f32.partialorder %v11756_v32, -1.5 }
 0x3c1   : > { %v4258_v55 = vmin.f32 %v9988_v45, %v4211_v25  ;;  %v4295_v62 = vmin.f32 %v9990_v24, %v4212_v49  ;;  %v4638_v3 = vadd.f32 %v5127_v14, %v4637_v15  ;;  %v5102_v21 = vsel %vm3035_vm1, 1.0, %v11604_v38  ;;  %v11757_v9 = vld [vmem:[#allocation67_spill] sm:$0xff] }
 0x3c2   : > { %v4016_v17 = vpop.xlane.xlu1 %4015  ;;  %vm4073_vm4 = vcmp.lt.f32.partialorder %v11757_v9, -1.5  ;;  %v5524_v49 = vld [vmem:[#allocation7 + $0x160] sm:$0xff] }
 0x3c3   : > { %vm4104_vm0 = vcmp.lt.f32.partialorder %v4016_v17, -1.5  ;;  %v4639_v35 = vadd.f32 %v5128_v28, %v4638_v3  ;;  %v5132_v2 = vsel %vm4073_vm4, 1.0, %v11604_v38  ;;  %v3353_v14 = vsel %vm3033_vm11, %v5524_v49, 1e+30  ;;  %v5525_v3 = vld [vmem:[#allocation7 + $0x168] sm:$0xff] }
 0x3c4   : > { %v4421_v11 = vsel %vm4104_vm0, %v9562_v47, 1e+30  ;;  %v4422_v48 = vsel %vm4104_vm0, %v9565_v46, 1e+30  ;;  %v5163_v61 = vsel %vm4104_vm0, 1.0, %v11604_v38 }
 0x3c5   : > { %v4464_v54 = vmin.f32 %v9998_v50, %v4421_v11  ;;  %v4501_v43 = vmin.f32 %v10000_v51, %v4422_v48  ;;  %v4727_v0 = vadd.f32 %v5163_v61, %v4726_v52  ;;  %v3354_v17 = vsel %vm3033_vm11, %v5525_v3, 1e+30  ;;  %v5526_v48 = vld [vmem:[#allocation7 + $0x120] sm:$0xff] }
 0x3c6   : > { %v2948_v36 = vpop.xlane.xlu1 %2947  ;;  %v4217_v61 = vsel %vm4071_vm15, %v5526_v48, 1e+30 }
 0x3c7   : > { %vm3032_vm8 = vcmp.lt.f32.partialorder %v2948_v36, -1.5  ;;  %v4728_v33 = vadd.f32 %v5164_v23, %v4727_v0  ;;  %v11759_v36 = vld [vmem:[#allocation33_spill] sm:$0xff] }
 0x3c8   : > { %v3351_v47 = vsel %vm3032_vm8, %v11752_v19, 1e+30  ;;  %v3352_v46 = vsel %vm3032_vm8, %v11753_v60, 1e+30  ;;  %v5099_v42 = vsel %vm3032_vm8, 1.0, %v11604_v38  ;;  %v3393_v5 = vmin.f32 %v11759_v36, %v3353_v14  ;;  %v10159_v36 = vld [vmem:[#allocation7 + $0x1a8] sm:$0xff] }
 0x3c9   : > { %v10031_v4 = vmin.f32 %v3390_v8, %v3351_v47  ;;  %v10033_v10 = vmin.f32 %v3427_v26, %v3352_v46  ;;  %v3655_v31 = vadd.f32 %v5099_v42, %v3654_v30  ;;  %v4428_v47 = vsel %vm4107_vm14, %v5525_v3, 1e+30  ;;  %v10109_v46 = vld [vmem:[#allocation7 + $0x180] sm:$0xff] }
 0x3ca   : > { %v3850_v59 = vpop.xlane.xlu1 %3849  ;;  %v3357_v42 = vsel %vm3035_vm1, %v10109_v46, 1e+30 }
 0x3cb   : > { %vm4070_vm7 = vcmp.lt.f32.partialorder %v3850_v59, -1.5  ;;  %v3656_v13 = vadd.f32 %v5100_v34, %v3655_v31  ;;  %v11761_v31 = vld [vmem:[#allocation46_spill] sm:$0xff] }
 0x3cc   : > { %v4215_v58 = vsel %vm4070_vm7, %v9528_v53, 1e+30  ;;  %v4216_v45 = vsel %vm4070_vm7, %v9531_v7, 1e+30  ;;  %v5129_v24 = vsel %vm4070_vm7, 1.0, %v11604_v38  ;;  %v5166_v53 = vsel %vm4107_vm14, 1.0, %v11604_v38 }
 0x3cd   : > { %v10042_v37 = vmin.f32 %v4258_v55, %v4215_v58  ;;  %v10044_v12 = vmin.f32 %v4295_v62, %v4216_v45  ;;  %v4640_v15 = vadd.f32 %v5129_v24, %v4639_v35  ;;  %v10083_v55 = vpop.xlane.xlu0 %3876  ;;  %v11758_v35 = vld [vmem:[#allocation60_spill] sm:$0xff]  ;;  %vm3037_vm3 = vcmp.lt.f32.partialorder %v11761_v31, -1.5 }
 0x3ce   : > { %v4022_v16 = vpop.xlane.xlu1 %4021  ;;  %vm4109_vm2 = vcmp.lt.f32.partialorder %v11758_v35, -1.5  ;;  %v5104_v45 = vsel %vm3037_vm3, 1.0, %v11604_v38 }
 0x3cf   : > { %vm4106_vm5 = vcmp.lt.f32.partialorder %v4022_v16, -1.5  ;;  %v4641_v39 = vadd.f32 %v5130_v6, %v4640_v15  ;;  %v5168_v23 = vsel %vm4109_vm2, 1.0, %v11604_v38  ;;  %v11763_v6 = vld [vmem:[#allocation57_spill] sm:$0xff]  ;;  %v11764_v16 = vld [vmem:[#allocation35_spill] sm:$0xff] }
 0x3d0   : > { %v4425_v7 = vsel %vm4106_vm5, %v11752_v19, 1e+30  ;;  %v4426_v44 = vsel %vm4106_vm5, %v11753_v60, 1e+30  ;;  %v5165_v50 = vsel %vm4106_vm5, 1.0, %v11604_v38 }
 0x3d1   : > { %v10055_v51 = vmin.f32 %v4464_v54, %v4425_v7  ;;  %v10057_v27 = vmin.f32 %v4501_v43, %v4426_v44  ;;  %v4729_v41 = vadd.f32 %v5165_v50, %v4728_v33  ;;  %v5527_v54 = vld [vmem:[#allocation7 + $0x128] sm:$0xff]  ;;  %v11760_v33 = vld [vmem:[#allocation31_spill] sm:$0xff]  ;;  %v4427_v19 = vsel %vm4107_vm14, %v5524_v49, 1e+30  ;;  %v10121_v24 = vpop.xlane.xlu0 %2808  ;;  %v11765_v7 = vld [vmem:[#allocation42_spill] sm:$0xff] }
 0x3d2   : > { %v10059_v52 = vpop.xlane.xlu1 %2953  ;;  %v4218_v43 = vsel %vm4071_vm15, %v5527_v54, 1e+30  ;;  %v3430_v34 = vmin.f32 %v11760_v33, %v3354_v17  ;;  %v4467_v20 = vmin.f32 %v11764_v16, %v4427_v19  ;;  %v4221_v44 = vsel %vm4073_vm4, %v11765_v7, 1e+30  ;;  %v10192_v7 = vld [vmem:[#allocation7 + $0x1c8] sm:$0xff] }
 0x3d3   : > { %vm3034_vm9 = vcmp.lt.f32.partialorder %v10059_v52, -1.5  ;;  %v4730_v57 = vadd.f32 %v5166_v53, %v4729_v41  ;;  %v4298_v58 = vmin.f32 %v11763_v6, %v4218_v43  ;;  %v11766_v41 = vld [vmem:[#allocation76_spill] sm:$0xff]  ;;  %v10154_v43 = vld [vmem:[#allocation7 + $0x1a0] sm:$0xff] }
 0x3d4   : > { %v5101_v8 = vsel %vm3034_vm9, 1.0, %v11604_v38 }
 0x3d5   : > { %v3657_v26 = vadd.f32 %v5101_v8, %v3656_v13  ;;  %v4261_v13 = vmin.f32 %v11762_v1, %v4217_v61  ;;  %v11767_v8 = vld [vmem:[#allocation30_spill] sm:$0xff]  ;;  %v11769_v61 = vld [vmem:[#allocation65_spill] sm:$0xff] }
 0x3d6   : > { %v10071_v18 = vpop.xlane.xlu1 %3855  ;;  %vm4111_vm8 = vcmp.lt.f32.partialorder %v11769_v61, -1.5 }
 0x3d7   : > { %vm4072_vm6 = vcmp.lt.f32.partialorder %v10071_v18, -1.5  ;;  %v3658_v30 = vadd.f32 %v5102_v21, %v3657_v26  ;;  %v3395_v21 = vmin.f32 %v3393_v5, %v3357_v42  ;;  %v4222_v26 = vsel %vm4073_vm4, %v11767_v8, 1e+30 }
 0x3d8   : > { %v5131_v28 = vsel %vm4072_vm6, 1.0, %v11604_v38  ;;  %v4263_v17 = vmin.f32 %v4261_v13, %v4221_v44  ;;  %v3362_v5 = vsel %vm3037_vm3, %v10159_v36, 1e+30  ;;  %v4435_v31 = vsel %vm4111_vm8, %v10154_v43, 1e+30 }
 0x3d9   : > { %v4642_v25 = vadd.f32 %v5131_v28, %v4641_v39  ;;  %v5529_v39 = vld [vmem:[#allocation7 + $0x188] sm:$0xff]  ;;  %v5170_v1 = vsel %vm4111_vm8, 1.0, %v11604_v38  ;;  %vm3041_vm4 = vcmp.lt.f32.partialorder %v10066_v22, -1.5 }
 0x3da   : > { %v10085_v62 = vpop.xlane.xlu1 %4027  ;;  %v3358_v53 = vsel %vm3035_vm1, %v5529_v39, 1e+30  ;;  %v4432_v32 = vsel %vm4109_vm2, %v5529_v39, 1e+30  ;;  %vm4113_vm1 = vcmp.lt.f32.partialorder %v10046_v63, -1.5 }
 0x3db   : > { %vm4108_vm13 = vcmp.lt.f32.partialorder %v10085_v62, -1.5  ;;  %v4643_v40 = vadd.f32 %v5132_v2, %v4642_v25  ;;  %v4431_v2 = vsel %vm4109_vm2, %v10109_v46, 1e+30  ;;  %v11768_v25 = vld [vmem:[#allocation63_spill] sm:$0xff]  ;;  %v3432_v14 = vmin.f32 %v3430_v34, %v3358_v53  ;;  %v10166_v34 = vpop.xlane.xlu0 %4048 }
 0x3dc   : > { %v5167_v11 = vsel %vm4108_vm13, 1.0, %v11604_v38  ;;  %vm4075_vm12 = vcmp.lt.f32.partialorder %v11768_v25, -1.5  ;;  %v4469_v48 = vmin.f32 %v4467_v20, %v4431_v2  ;;  %v10187_v20 = vld [vmem:[#allocation7 + $0x1c0] sm:$0xff] }
 0x3dd   : > { %v4731_v0 = vadd.f32 %v5167_v11, %v4730_v57  ;;  %v4504_v57 = vmin.f32 %v11766_v41, %v4428_v47  ;;  %v5134_v9 = vsel %vm4075_vm12, 1.0, %v11604_v38  ;;  %v4300_v11 = vmin.f32 %v4298_v58, %v4222_v26  ;;  %v11770_v47 = vld [vmem:[#allocation64_spill] sm:$0xff]  ;;  %v11771_v58 = vld [vmem:[#allocation47_spill] sm:$0xff] }
 0x3de   : > { %v10107_v60 = vpop.xlane.xlu1 %2959  ;;  %v4225_v33 = vsel %vm4075_vm12, %v5524_v49, 1e+30  ;;  %v4226_v19 = vsel %vm4075_vm12, %v5525_v3, 1e+30  ;;  %vm3039_vm15 = vcmp.lt.f32.partialorder %v11770_v47, -1.5  ;;  %v3434_v6 = vmin.f32 %v3432_v14, %v3362_v5  ;;  %v11773_v5 = vld [vmem:[#allocation79_spill] sm:$0xff] }
 0x3df   : > { %vm3036_vm0 = vcmp.lt.f32.partialorder %v10107_v60, -1.5  ;;  %v4732_v59 = vadd.f32 %v5168_v23, %v4731_v0  ;;  %v10152_v54 = vmin.f32 %v4504_v57, %v4432_v32  ;;  %v3361_v0 = vsel %vm3037_vm3, %v10154_v43, 1e+30  ;;  %v10208_v26 = vpop.xlane.xlu0 %3882 }
 0x3e0   : > { %v5103_v15 = vsel %vm3036_vm0, 1.0, %v11604_v38  ;;  %v4436_v49 = vsel %vm4111_vm8, %v10159_v36, 1e+30  ;;  %v3397_v13 = vmin.f32 %v3395_v21, %v3361_v0  ;;  %vm4077_vm14 = vcmp.lt.f32.partialorder %v11771_v58, -1.5 }
 0x3e1   : > { %v3659_v50 = vadd.f32 %v5103_v15, %v3658_v30  ;;  %v4265_v15 = vmin.f32 %v4263_v17, %v4225_v33  ;;  %v4302_v16 = vmin.f32 %v4300_v11, %v4226_v19  ;;  %v3365_v53 = vsel %vm3039_vm15, %v10187_v20, 1e+30  ;;  %v5534_v19 = vld [vmem:[#allocation7 + $0x1e0] sm:$0xff] }
 0x3e2   : > { %v10139_v28 = vpop.xlane.xlu1 %3861  ;;  %v3366_v44 = vsel %vm3039_vm15, %v10192_v7, 1e+30  ;;  %v4471_v41 = vmin.f32 %v4469_v48, %v4435_v31  ;;  %v4508_v57 = vmin.f32 %v10152_v54, %v4436_v49  ;;  %v5106_v21 = vsel %vm3039_vm15, 1.0, %v11604_v38  ;;  %v11772_v54 = vld [vmem:[#allocation17_spill] sm:$0xff] }
 0x3e3   : > { %vm4074_vm11 = vcmp.lt.f32.partialorder %v10139_v28, -1.5  ;;  %v3660_v30 = vadd.f32 %v5104_v45, %v3659_v50  ;;  %v4229_v8 = vsel %vm4077_vm14, %v10109_v46, 1e+30  ;;  %v10213_v32 = vmin.f32 %v3397_v13, %v3365_v53 }
 0x3e4   : > { %v5133_v23 = vsel %vm4074_vm11, 1.0, %v11604_v38  ;;  %v10215_v25 = vmin.f32 %v3434_v6, %v3366_v44  ;;  %v4230_v14 = vsel %vm4077_vm14, %v5529_v39, 1e+30  ;;  %v5136_v46 = vsel %vm4077_vm14, 1.0, %v11604_v38  ;;  %v2815_v6 = vpop.xlane.xlu0 %2814 }
 0x3e5   : > { %v4644_v35 = vadd.f32 %v5133_v23, %v4643_v40  ;;  %v3160_v23 = vsel %vm3005_vm10, %v10159_v36, 1e+30  ;;  %v4267_v48 = vmin.f32 %v4265_v15, %v4229_v8  ;;  %v4439_v39 = vsel %vm4113_vm1, %v10187_v20, 1e+30 }
 0x3e6   : > { %v10168_v40 = vpop.xlane.xlu1 %4033  ;;  %v4304_v61 = vmin.f32 %v4302_v16, %v4230_v14  ;;  %vm4079_vm3 = vcmp.lt.f32.partialorder %v10083_v55, -1.5  ;;  %v3232_v33 = vmin.f32 %v11773_v5, %v3160_v23  ;;  %v10246_v47 = vsel %vm3041_vm4, %v5534_v19, 1e+30 }
 0x3e7   : > { %vm4110_vm7 = vcmp.lt.f32.partialorder %v10168_v40, -1.5  ;;  %v4645_v42 = vadd.f32 %v5134_v9, %v4644_v35  ;;  %v3159_v9 = vsel %vm3005_vm10, %v10154_v43, 1e+30  ;;  %v4440_v35 = vsel %vm4113_vm1, %v10192_v7, 1e+30 }
 0x3e8   : > { %v5169_v3 = vsel %vm4110_vm7, 1.0, %v11604_v38  ;;  %v3195_v0 = vmin.f32 %v11772_v54, %v3159_v9  ;;  %v10248_v49 = vmin.f32 %v4471_v41, %v4439_v39  ;;  %vm3007_vm10 = vcmp.lt.f32.partialorder %v10121_v24, -1.5  ;;  %v10430_v24 = vld [vmem:[#allocation7 + $0x1d8] sm:$0xff] }
 0x3e9   : > { %v4733_v45 = vadd.f32 %v5169_v3, %v4732_v59  ;;  %v5535_v3 = vld [vmem:[#allocation7 + $0x1e8] sm:$0xff]  ;;  %v5108_v16 = vsel %vm3041_vm4, 1.0, %v11604_v38  ;;  %vm4115_vm8 = vcmp.lt.f32.partialorder %v10166_v34, -1.5  ;;  %v3163_v41 = vsel %vm3007_vm10, %v10187_v20, 1e+30 }
 0x3ea   : > { %v10197_v50 = vpop.xlane.xlu1 %2965  ;;  %v10255_v13 = vsel %vm3041_vm4, %v5535_v3, 1e+30  ;;  %v3164_v8 = vsel %vm3007_vm10, %v10192_v7, 1e+30  ;;  %vm4081_vm15 = vcmp.lt.f32.partialorder %v10208_v26, -1.5  ;;  %vm3009_vm14 = vcmp.lt.f32.partialorder %v2815_v6, -1.5 }
 0x3eb   : > { %vm3038_vm5 = vcmp.lt.f32.partialorder %v10197_v50, -1.5  ;;  %v4734_v59 = vadd.f32 %v5170_v1, %v4733_v45  ;;  %v5172_v1 = vsel %vm4113_vm1, 1.0, %v11604_v38  ;;  %v10260_v45 = vmin.f32 %v4508_v57, %v4440_v35  ;;  %v10425_v26 = vld [vmem:[#allocation7 + $0x1d0] sm:$0xff] }
 0x3ec   : > { %v5105_v2 = vsel %vm3038_vm5, 1.0, %v11604_v38  ;;  %v10299_v55 = vmin.f32 %v3195_v0, %v3163_v41  ;;  %v10307_v23 = vmin.f32 %v3232_v33, %v3164_v8  ;;  %v4237_v39 = vsel %vm4081_vm15, %v10187_v20, 1e+30 }
 0x3ed   : > { %v3661_v17 = vadd.f32 %v5105_v2, %v3660_v30  ;;  %v10321_v35 = vsel %vm4115_vm8, 1.0, %v11604_v38  ;;  %v10327_v54 = vsel %vm3009_vm14, %v5534_v19, 1e+30  ;;  %v10332_v20 = vsel %vm3009_vm14, %v5535_v3, 1e+30 }
 0x3ee   : > { %v10229_v11 = vpop.xlane.xlu1 %3867 }
 0x3ef   : > { %vm4076_vm2 = vcmp.lt.f32.partialorder %v10229_v11, -1.5  ;;  %v3662_v30 = vadd.f32 %v5106_v21, %v3661_v17  ;;  %v5138_v21 = vsel %vm4079_vm3, 1.0, %v11604_v38  ;;  %v5074_v17 = vsel %vm3007_vm10, 1.0, %v11604_v38 }
 0x3f0   : > { %v5135_v56 = vsel %vm4076_vm2, 1.0, %v11604_v38 }
 0x3f1   : > { %v4646_v31 = vadd.f32 %v5135_v56, %v4645_v42  ;;  %v4233_v42 = vsel %vm4079_vm3, %v10154_v43, 1e+30  ;;  %v4234_v43 = vsel %vm4079_vm3, %v10159_v36, 1e+30  ;;  %v10294_v36 = vsel %vm4115_vm8, %v5534_v19, 1e+30 }
 0x3f2   : > { %v10258_v58 = vpop.xlane.xlu1 %4039  ;;  %v4269_v22 = vmin.f32 %v4267_v48, %v4233_v42  ;;  %v4306_v14 = vmin.f32 %v4304_v61, %v4234_v43  ;;  %v10311_v48 = vsel %vm4115_vm8, %v5535_v3, 1e+30  ;;  %v4238_v56 = vsel %vm4081_vm15, %v10192_v7, 1e+30  ;;  %v10355_v42 = vld [vmem:[#allocation7 + $0x170] sm:$0xff] }
 0x3f3   : > { %vm4112_vm12 = vcmp.lt.f32.partialorder %v10258_v58, -1.5  ;;  %v4647_v63 = vadd.f32 %v5136_v46, %v4646_v31  ;;  %v3889_v46 = vpop.xlane.xlu0 %3888  ;;  %v10344_v7 = vsel %vm4081_vm15, 1.0, %v11604_v38  ;;  %v10409_v43 = vld [vmem:[#allocation7 + $0x1b0] sm:$0xff] }
 0x3f4   : > { %v5171_v53 = vsel %vm4112_vm12, 1.0, %v11604_v38  ;;  %vm4083_vm4 = vcmp.lt.f32.partialorder %v3889_v46, -1.5  ;;  %v10339_v5 = vmin.f32 %v4269_v22, %v4237_v39  ;;  %v10349_v31 = vmin.f32 %v4306_v14, %v4238_v56  ;;  %v10390_v39 = vld [vmem:[#allocation7 + $0x198] sm:$0xff] }
 0x3f5   : > { %v4735_v57 = vadd.f32 %v5171_v53, %v4734_v59  ;;  %v10365_v41 = vsel %vm4083_vm4, %v5534_v19, 1e+30  ;;  %v10375_v8 = vsel %vm4083_vm4, %v5535_v3, 1e+30  ;;  %v3360_v3 = vsel %vm3036_vm0, %v10390_v39, 1e+30 }
 0x3f6   : > { %v10290_v2 = vpop.xlane.xlu1 %2971  ;;  %v5541_v56 = vld [vmem:[#allocation7 + $0x138] sm:$0xff]  ;;  %v4437_v40 = vsel %vm4112_vm12, %v10409_v43, 1e+30 }
 0x3f7   : > { %vm3040_vm1 = vcmp.lt.f32.partialorder %v10290_v2, -1.5  ;;  %v10297_v59 = vadd.f32 %v5172_v1, %v4735_v57  ;;  %v10353_v1 = vsel %vm3009_vm14, 1.0, %v11604_v38  ;;  %v10367_v57 = vld [vmem:[#allocation7 + $0x178] sm:$0xff] }
 0x3f8   : > { %v5107_v9 = vsel %vm3040_vm1, 1.0, %v11604_v38  ;;  %v3356_v6 = vsel %vm3034_vm9, %v10367_v57, 1e+30  ;;  %v3367_v34 = vsel %vm3040_vm1, %v10425_v26, 1e+30  ;;  %v5547_v2 = vld [vmem:[#allocation7 + $0x158] sm:$0xff] }
 0x3f9   : > { %v3663_v61 = vadd.f32 %v5107_v9, %v3662_v30  ;;  %v10385_v9 = vld [vmem:[#allocation7 + $0x190] sm:$0xff]  ;;  %v3368_v50 = vsel %vm3040_vm1, %v10430_v24, 1e+30  ;;  %v4224_v44 = vsel %vm4074_vm11, %v5547_v2, 1e+30 }
 0x3fa   : > { %v10329_v0 = vpop.xlane.xlu1 %3873  ;;  %v3359_v52 = vsel %vm3036_vm0, %v10385_v9, 1e+30  ;;  %v4433_v15 = vsel %vm4110_vm7, %v10385_v9, 1e+30 }
 0x3fb   : > { %vm4078_vm3 = vcmp.lt.f32.partialorder %v10329_v0, -1.5  ;;  %v10335_v30 = vadd.f32 %v5108_v16, %v3663_v61  ;;  %v3355_v16 = vsel %vm3034_vm9, %v10355_v42, 1e+30  ;;  %v5540_v61 = vld [vmem:[#allocation7 + $0x130] sm:$0xff] }
 0x3fc   : > { %v5137_v33 = vsel %vm4078_vm3, 1.0, %v11604_v38  ;;  %v3394_v19 = vmin.f32 %v10031_v4, %v3355_v16  ;;  %v4219_v4 = vsel %vm4072_vm6, %v5540_v61, 1e+30 }
 0x3fd   : > { %v4648_v53 = vadd.f32 %v5137_v33, %v4647_v63  ;;  %v10379_v63 = vsel %vm4083_vm4, 1.0, %v11604_v38  ;;  %v4220_v33 = vsel %vm4072_vm6, %v5541_v56, 1e+30  ;;  %v4262_v60 = vmin.f32 %v10042_v37, %v4219_v4  ;;  %v5546_v4 = vld [vmem:[#allocation7 + $0x150] sm:$0xff] }
 0x3fe   : > { %v10372_v22 = vpop.xlane.xlu1 %2805  ;;  %11774 = vst [vmem:[#allocation49_spill] sm:$0xff] %v10379_v63  ;;  %v4430_v37 = vsel %vm4108_vm13, %v10367_v57, 1e+30 }
 0x3ff   : > { %vm3006_vm10 = vcmp.lt.f32.partialorder %v10372_v22, -1.5  ;;  %v10382_v14 = vadd.f32 %v5138_v21, %v4648_v53  ;;  %v3431_v21 = vmin.f32 %v10033_v10, %v3356_v6  ;;  %v4429_v53 = vsel %vm4108_vm13, %v10355_v42, 1e+30  ;;  %v10414_v6 = vld [vmem:[#allocation7 + $0x1b8] sm:$0xff] }
 0x400   : > { %v5073_v46 = vsel %vm3006_vm10, 1.0, %v11604_v38  ;;  %v3363_v10 = vsel %vm3038_vm5, %v10409_v43, 1e+30  ;;  %v3364_v18 = vsel %vm3038_vm5, %v10414_v6, 1e+30 }
 0x401   : > { %v3576_v16 = vadd.f32 %v5073_v46, %v9839_v29  ;;  %v3396_v46 = vmin.f32 %v3394_v19, %v3359_v52  ;;  %v3433_v61 = vmin.f32 %v3431_v21, %v3360_v3  ;;  %v4299_v21 = vmin.f32 %v10044_v12, %v4220_v33  ;;  %v10454_v33 = vld [vmem:[#allocation7 + $0x1f0] sm:$0xff] }
 0x402   : > { %v10419_v29 = vpop.xlane.xlu1 %4045  ;;  %v4468_v12 = vmin.f32 %v10055_v51, %v4429_v53  ;;  %v4505_v51 = vmin.f32 %v10057_v27, %v4430_v37  ;;  %v11776_v27 = vmin.f32 %v10215_v25, %v10255_v13  ;;  %v4231_v25 = vsel %vm4078_vm3, %v10385_v9, 1e+30 }
 0x403   : > { %vm4114_vm9 = vcmp.lt.f32.partialorder %v10419_v29, -1.5  ;;  %v10422_v56 = vadd.f32 %v5074_v17, %v3576_v16  ;;  %v3398_v17 = vmin.f32 %v3396_v46, %v3363_v10  ;;  %v3435_v52 = vmin.f32 %v3433_v61, %v3364_v18  ;;  %v10457_v46 = vld [vmem:[#allocation7 + $0x1f8] sm:$0xff] }
 0x404   : > { %v5173_v19 = vsel %vm4114_vm9, 1.0, %v11604_v38  ;;  %v4223_v16 = vsel %vm4074_vm11, %v5546_v4, 1e+30  ;;  %v4301_v37 = vmin.f32 %v4299_v21, %v4224_v44  ;;  %v4441_v44 = vsel %vm4114_vm9, %v10425_v26, 1e+30 }
 0x405   : > { %v4737_v3 = vadd.f32 %v5173_v19, %v10297_v59  ;;  %v3400_v63 = vmin.f32 %v3398_v17, %v3367_v34  ;;  %v3437_v10 = vmin.f32 %v3435_v52, %v3368_v50  ;;  %v4434_v34 = vsel %vm4110_vm7, %v10390_v39, 1e+30 }
 0x406   : > { %v2978_v62 = vpop.xlane.xlu1 %2977  ;;  %v4264_v53 = vmin.f32 %v4262_v60, %v4223_v16  ;;  %v4227_v17 = vsel %vm4076_vm2, %v10355_v42, 1e+30  ;;  %v4228_v52 = vsel %vm4076_vm2, %v10367_v57, 1e+30  ;;  %v4470_v42 = vmin.f32 %v4468_v12, %v4433_v15 }
 0x407   : > { %vm3042_vm6 = vcmp.lt.f32.partialorder %v2978_v62, -1.5  ;;  %v10451_v59 = vadd.f32 %v10321_v35, %v4737_v3  ;;  %v4507_v4 = vmin.f32 %v4505_v51, %v4434_v34  ;;  %v4438_v16 = vsel %vm4112_vm12, %v10414_v6, 1e+30 }
 0x408   : > { %v3371_v18 = vsel %vm3042_vm6, %v10454_v33, 1e+30  ;;  %v3372_v28 = vsel %vm3042_vm6, %v10457_v46, 1e+30  ;;  %v5109_v61 = vsel %vm3042_vm6, 1.0, %v11604_v38  ;;  %v4266_v57 = vmin.f32 %v4264_v53, %v4227_v17 }
 0x409   : > { %v3402_v50 = vmin.f32 %v3400_v63, %v3371_v18  ;;  %v3439_v19 = vmin.f32 %v3437_v10, %v3372_v28  ;;  %v10465_v35 = vadd.f32 %v5109_v61, %v10335_v30  ;;  %v11775_v30 = vmin.f32 %v10213_v32, %v10246_v47 }
 0x40a   : > { %v3880_v3 = vpop.xlane.xlu1 %3879  ;;  %v4303_v32 = vmin.f32 %v4301_v37, %v4228_v52  ;;  %v4472_v47 = vmin.f32 %v4470_v42, %v4437_v40  ;;  %v4509_v58 = vmin.f32 %v4507_v4, %v4438_v16  ;;  %v4442_v12 = vsel %vm4114_vm9, %v10430_v24, 1e+30 }
 0x40b   : > { %v3403_v63 = vmin.f32 %v11775_v30, %v3402_v50  ;;  %v3440_v60 = vmin.f32 %v11776_v27, %v3439_v19  ;;  %vm4080_vm13 = vcmp.lt.f32.partialorder %v3880_v3, -1.5  ;;  %v4268_v28 = vmin.f32 %v4266_v57, %v4231_v25  ;;  %v11780_v25 = vld [vmem:[#allocation39_spill] sm:$0xff] }
 0x40c   : > { %v5139_v11 = vsel %vm4080_vm13, 1.0, %v11604_v38  ;;  %v3161_v50 = vsel %vm3006_vm10, %v10409_v43, 1e+30  ;;  %v3162_v29 = vsel %vm3006_vm10, %v10414_v6, 1e+30  ;;  %v4474_v19 = vmin.f32 %v4472_v47, %v4441_v44 }
 0x40d   : > { %v3404_v2 = vrot.slane %v3403_v63, 4  ;;  %v3441_v62 = vrot.slane %v3440_v60, 4  ;;  %v4650_v13 = vadd.f32 %v5139_v11, %v10382_v14  ;;  %v4232_v14 = vsel %vm4078_vm3, %v10390_v39, 1e+30 }
 0x40e   : > { %v2812_v15 = vpop.xlane.xlu1 %2811  ;;  %v4236_v37 = vsel %vm4080_vm13, %v10414_v6, 1e+30  ;;  %v11777_v16 = vmin.f32 %v10248_v49, %v10294_v36  ;;  %v4305_v6 = vmin.f32 %v4303_v32, %v4232_v14  ;;  %vm3499_vm9 = vcmask 1042434  }
 0x40f   : > { %v3405_v21 = vmin.f32 %v3403_v63, %v3404_v2  ;;  %v3442_v10 = vmin.f32 %v3440_v60, %v3441_v62  ;;  %vm3008_vm0 = vcmp.lt.f32.partialorder %v2812_v15, -1.5  ;;  %v4651_v9 = vadd.f32 %v10344_v7, %v4650_v13  ;;  %v11779_v62 = vld [vmem:[#allocation37_spill] sm:$0xff] }
 0x410   : > { %v5075_v18 = vsel %vm3008_vm0, 1.0, %v11604_v38  ;;  %v4511_v7 = vmin.f32 %v4509_v58, %v4442_v12  ;;  %v3165_v42 = vsel %vm3008_vm0, %v10425_v26, 1e+30  ;;  %v3196_v47 = vmin.f32 %v11779_v62, %v3161_v50 }
 0x411   : > { %v3406_v61 = vrot.slane %v3405_v21, 2  ;;  %v3443_v34 = vrot.slane %v3442_v10, 2  ;;  %v3578_v51 = vadd.f32 %v5075_v18, %v10422_v56  ;;  %v4235_v56 = vsel %vm4080_vm13, %v10409_v43, 1e+30 }
 0x412   : > { %v4052_v53 = vpop.xlane.xlu1 %4051  ;;  %v11778_v43 = vmin.f32 %v10260_v45, %v10311_v48  ;;  %v3233_v13 = vmin.f32 %v11780_v25, %v3162_v29  ;;  %v4307_v49 = vmin.f32 %v4305_v6, %v4236_v37  ;;  %v3198_v36 = vmin.f32 %v3196_v47, %v3165_v42 }
 0x413   : > { %v3407_v17 = vmin.f32 %v3405_v21, %v3406_v61  ;;  %v3444_v52 = vmin.f32 %v3442_v10, %v3443_v34  ;;  %vm4116_vm11 = vcmp.lt.f32.partialorder %v4052_v53, -1.5  ;;  %v3579_v30 = vadd.f32 %v10353_v1, %v3578_v51 }
 0x414   : > { %v4445_v0 = vsel %vm4116_vm11, %v10454_v33, 1e+30  ;;  %v4446_v39 = vsel %vm4116_vm11, %v10457_v46, 1e+30  ;;  %v5175_v40 = vsel %vm4116_vm11, 1.0, %v11604_v38  ;;  %v4270_v10 = vmin.f32 %v4268_v28, %v4235_v56 }
 0x415   : > { %v3408_v63 = vrot.slane %v3407_v17, 1  ;;  %v3445_v27 = vrot.slane %v3444_v52, 1  ;;  %v4476_v22 = vmin.f32 %v4474_v19, %v4445_v0  ;;  %v4513_v60 = vmin.f32 %v4511_v7, %v4446_v39 }
 0x416   : > { %v10522_v4 = vadd.f32 %v5175_v40, %v10451_v59  ;;  %v3886_v11 = vpop.xlane.xlu1 %3885  ;;  %v3166_v59 = vsel %vm3008_vm0, %v10430_v24, 1e+30  ;;  %v11782_v39 = vmin.f32 %v10307_v23, %v10332_v20 }
 0x417   : > { %v10524_v57 = vmin.f32 %v3407_v17, %v3408_v63  ;;  %v10526_v1 = vmin.f32 %v3444_v52, %v3445_v27  ;;  %v4477_v2 = vmin.f32 %v11777_v16, %v4476_v22  ;;  %v4514_v3 = vmin.f32 %v11778_v43, %v4513_v60 }
 0x418   : > { %vm4082_vm7 = vcmp.lt.f32.partialorder %v3886_v11, -1.5  ;;  %v3235_v18 = vmin.f32 %v3233_v13, %v3166_v59  ;;  %v4310_v27 = vmin.f32 %v10349_v31, %v10375_v8 }
 0x419   : > { %5275 = vrsqrt.f32 %v10524_v57  ;;  %v4478_v44 = vrot.slane %v4477_v2, 4  ;;  %v4515_v21 = vrot.slane %v4514_v3, 4  ;;  %v4239_v58 = vsel %vm4082_vm7, %v10425_v26, 1e+30 }
 0x41a   : > { %v2818_v45 = vpop.xlane.xlu1 %2817  ;;  %5277 = vrsqrt.f32 %v10526_v1  ;;  %v5141_v12 = vsel %vm4082_vm7, 1.0, %v11604_v38  ;;  %v4240_v14 = vsel %vm4082_vm7, %v10430_v24, 1e+30  ;;  %v4272_v29 = vmin.f32 %v4270_v10, %v4239_v58 }
 0x41b   : > { %v4479_v48 = vmin.f32 %v4477_v2, %v4478_v44  ;;  %v4516_v32 = vmin.f32 %v4514_v3, %v4515_v21  ;;  %v4652_v61 = vadd.f32 %v5141_v12, %v4651_v9  ;;  %vm3010_vm5 = vcmp.lt.f32.partialorder %v2818_v45, -1.5  ;;  %v11785_v21 = vld [vmem:[#allocation68_spill] sm:$0xff]  ;;  %v11786_v45 = vld [vmem:[#allocation69_spill] sm:$0xff] }
 0x41c   : > { %v3169_v28 = vsel %vm3010_vm5, %v10454_v33, 1e+30  ;;  %v3170_v50 = vsel %vm3010_vm5, %v10457_v46, 1e+30  ;;  %v5077_v51 = vsel %vm3010_vm5, 1.0, %v11604_v38  ;;  %v4309_v24 = vmin.f32 %v4307_v49, %v4240_v14 }
 0x41d   : > { %v4480_v15 = vrot.slane %v4479_v48, 2  ;;  %v4517_v34 = vrot.slane %v4516_v32, 2  ;;  %v3200_v26 = vmin.f32 %v3198_v36, %v3169_v28  ;;  %v3237_v19 = vmin.f32 %v3235_v18, %v3170_v50  ;;  %v11787_v18 = vld [vmem:[#allocation45_spill] sm:$0xff] }
 0x41e   : > { %v3892_v53 = vpop.xlane.xlu1 %3891  ;;  %v10546_v52 = vadd.f32 %v5077_v51, %v3579_v30  ;;  %v11781_v9 = vmin.f32 %v10299_v55, %v10327_v54  ;;  %v2633_v10 = vsub.f32 1.0, %v11785_v21  ;;  %vm3470_vm12 = vcmp.eq.f32.partialorder %v10524_v57, inf }
 0x41f   : > { %v4481_v7 = vmin.f32 %v4479_v48, %v4480_v15  ;;  %v4518_v17 = vmin.f32 %v4516_v32, %v4517_v34  ;;  %vm4084_vm2 = vcmp.lt.f32.partialorder %v3892_v53, -1.5  ;;  %v3238_v40 = vmin.f32 %v11782_v39, %v3237_v19 }
 0x420   : > { %v3201_v0 = vmin.f32 %v11781_v9, %v3200_v26  ;;  %v4243_v63 = vsel %vm4084_vm2, %v10454_v33, 1e+30  ;;  %v4244_v30 = vsel %vm4084_vm2, %v10457_v46, 1e+30  ;;  %v5143_v23 = vsel %vm4084_vm2, 1.0, %v11604_v38  ;;  %v11784_v46 = vld [vmem:[#allocation49_spill] sm:$0xff] }
 0x421   : > { %v4482_v22 = vrot.slane %v4481_v7, 1  ;;  %v4519_v60 = vrot.slane %v4518_v17, 1  ;;  %v3239_v37 = vrot.slane %v3238_v40, 4  ;;  %v4274_v42 = vmin.f32 %v4272_v29, %v4243_v63  ;;  %v11788_v26 = vld [vmem:[#allocation66_spill] sm:$0xff] }
 0x422   : > { %v3202_v56 = vrot.slane %v3201_v0, 4  ;;  %v4311_v11 = vmin.f32 %v4309_v24, %v4244_v30  ;;  %v11783_v33 = vmin.f32 %v10339_v5, %v10365_v41  ;;  %v4653_v2 = vadd.f32 %v11784_v46, %v4652_v61 }
 0x423   : > { %v10558_v16 = vmin.f32 %v4481_v7, %v4482_v22  ;;  %v10560_v55 = vmin.f32 %v4518_v17, %v4519_v60  ;;  %v3240_v20 = vmin.f32 %v3238_v40, %v3239_v37  ;;  %v2634_v48 = vsub.f32 1.0, %v11786_v45  ;;  %v11789_v22 = vld [vmem:[#allocation55_spill] sm:$0xff]  ;;  %v11790_v60 = vld [vmem:[#allocation41_spill] sm:$0xff]  ;;  %v11791_v37 = vld [vmem:[#allocation56_spill] sm:$0xff] }
 0x424   : > { %v3203_v54 = vmin.f32 %v3201_v0, %v3202_v56  ;;  %v4275_v31 = vmin.f32 %v11783_v33, %v4274_v42  ;;  %v4312_v8 = vmin.f32 %v4310_v27, %v4311_v11  ;;  %v10569_v25 = vadd.f32 %v5143_v23, %v4653_v2 }
 0x425   : > { %5279 = vrsqrt.f32 %v10558_v16  ;;  %v3241_v6 = vrot.slane %v3240_v20, 2  ;;  %v3707_v14 = vsub.f32 1.0, %v11787_v18  ;;  %v3473_v29 = vand.u32 2147483648, %v10524_v57 }
 0x426   : > { %v5276_v43 = vpop.eup %5275  ;;  %5281 = vrsqrt.f32 %v10560_v55  ;;  %v3204_v3 = vrot.slane %v3203_v54, 2  ;;  %v4276_v62 = vrot.slane %v4275_v31, 4  ;;  %v4313_v47 = vrot.slane %v4312_v8, 4 }
 0x427   : > { %v5278_v38 = vpop.eup %5277  ;;  %v3242_v59 = vmin.f32 %v3240_v20, %v3241_v6  ;;  %v3469_v5 = vmul.f32 %v5276_v43, %v10524_v57  ;;  %vm3477_vm8 = vcmp.eq.f32.partialorder %v10526_v1, inf  ;;  %v3708_v19 = vsub.f32 1.0, %v11788_v26  ;;  %v11793_v20 = vld [vmem:[#allocation70_spill] sm:$0xff] }
 0x428   : > { %v3205_v13 = vmin.f32 %v3203_v54, %v3204_v3  ;;  %v4277_v44 = vmin.f32 %v4275_v31, %v4276_v62  ;;  %v4314_v41 = vmin.f32 %v4312_v8, %v4313_v47  ;;  %v3476_v12 = vmul.f32 %v5278_v38, %v10526_v1  ;;  %v5550_v62 = vld [vmem:[%s5942_s9] sm:$0xff] }
 0x429   : > { %v3243_v36 = vrot.slane %v3242_v59, 1  ;;  %v3471_v28 = vsel %vm3470_vm12, %v10524_v57, %v3469_v5  ;;  %vm3472_vm15 = vcmp.eq.f32.partialorder %v10524_v57, 0.0  ;;  %v3480_v24 = vand.u32 2147483648, %v10526_v1 }
 0x42a   : > { %v3206_v49 = vrot.slane %v3205_v13, 1  ;;  %v4278_v58 = vrot.slane %v4277_v44, 2  ;;  %v4315_v32 = vrot.slane %v4314_v41, 2  ;;  %v3478_v53 = vsel %vm3477_vm8, %v10526_v1, %v3476_v12 }
 0x42b   : > { %v10579_v15 = vmin.f32 %v3242_v59, %v3243_v36  ;;  %v3474_v17 = vsel %vm3472_vm15, %v3473_v29, %v3471_v28  ;;  %v2637_v0 = vcombine.low %v2633_v10, %v2634_v48  ;;  %vm3479_vm14 = vcmp.eq.f32.partialorder %v10526_v1, 0.0  ;;  %v11792_v1 = vld [vmem:[#allocation19_spill] sm:$0xff] }
 0x42c   : > { %v10577_v61 = vmin.f32 %v3205_v13, %v3206_v49  ;;  %v4279_v34 = vmin.f32 %v4277_v44, %v4278_v58  ;;  %v4316_v50 = vmin.f32 %v4314_v41, %v4315_v32  ;;  %v3481_v40 = vsel %vm3479_vm14, %v3480_v24, %v3478_v53 }
 0x42d   : > { %v3484_v27 = vcombine.low %v3474_v17, %v3481_v40  ;;  %v2624_v30 = vrot.slane %v11790_v60, %v11789_v22  ;;  %v3711_v56 = vcombine.low %v3707_v14, %v3708_v19  ;;  %v2628_v42 = vrot.slane %v11790_v60, %v11791_v37 }
 0x42e   : > { %v4280_v51 = vrot.slane %v4279_v34, 1  ;;  %5283 = vrsqrt.f32 %v10577_v61  ;;  %v4317_v7 = vrot.slane %v4316_v50, 1  ;;  %v2638_v11 = vrot.slane %v2637_v0, 6 }
 0x42f   : > { %5285 = vrsqrt.f32 %v10579_v15  ;;  %v3698_v23 = vrot.slane %v11790_v60, %v11792_v1  ;;  %v3702_v33 = vrot.slane %v11790_v60, %v11793_v20  ;;  %vm4544_vm1 = vcmp.eq.f32.partialorder %v10558_v16, inf }
 0x430   : > { %v10590_v9 = vmin.f32 %v4279_v34, %v4280_v51  ;;  %v10593_v39 = vmin.f32 %v4316_v50, %v4317_v7  ;;  %v4547_v31 = vand.u32 2147483648, %v10558_v16  ;;  %vm4546_vm4 = vcmp.eq.f32.partialorder %v10558_v16, 0.0 }
 0x431   : > { %vm4551_vm3 = vcmp.eq.f32.partialorder %v10560_v55, inf  ;;  %v4554_v2 = vand.u32 2147483648, %v10560_v55  ;;  %v3712_v43 = vrot.slane %v3711_v56, 5  ;;  %vm4553_vm10 = vcmp.eq.f32.partialorder %v10560_v55, 0.0 }
 0x432   : > { %v5280_v63 = vpop.eup %5279  ;;  %5287 = vrsqrt.f32 %v10590_v9  ;;  %v10616_v47 = vmul.f32 %v5550_v62, %v2638_v11  ;;  %v3485_v38 = vrot.slane %v3484_v27, 6  ;;  %v10619_v44 = vmul.f32 %v11785_v21, %v2624_v30 }
 0x433   : > { %v5282_v57 = vpop.eup %5281  ;;  %5289 = vrsqrt.f32 %v10593_v39  ;;  %v4543_v54 = vmul.f32 %v5280_v63, %v10558_v16  ;;  %v10625_v41 = vmul.f32 %v11787_v18, %v3698_v23  ;;  %v10628_v10 = vmul.f32 %v11788_v26, %v3702_v33 }
 0x434   : > { %v4550_v8 = vmul.f32 %v5282_v57, %v10560_v55  ;;  %vm3449_vm6 = vcmp.eq.f32.partialorder %v10577_v61, inf  ;;  %vm3451_vm13 = vcmp.eq.f32.partialorder %v10577_v61, 0.0  ;;  %v3487_v58 = vmul.f32 %v3485_v38, %v10616_v47  ;;  %v11798_v38 = vld [vmem:[#allocation50_spill] sm:$0xff] }
 0x435   : > { %v4545_v46 = vsel %vm4544_vm1, %v10558_v16, %v4543_v54  ;;  %v10622_v16 = vmul.f32 %v11786_v45, %v2628_v42  ;;  %v3452_v48 = vand.u32 2147483648, %v10577_v61  ;;  %vm3456_vm0 = vcmp.eq.f32.partialorder %v10579_v15, inf }
 0x436   : > { %v4548_v3 = vsel %vm4546_vm4, %v4547_v31, %v4545_v46  ;;  %v4552_v6 = vsel %vm4551_vm3, %v10560_v55, %v4550_v8  ;;  %v10630_v55 = vmul.f32 %v5550_v62, %v3712_v43  ;;  %vm3458_vm11 = vcmp.eq.f32.partialorder %v10579_v15, 0.0 }
 0x437   : > { %v4555_v13 = vsel %vm4553_vm10, %v4554_v2, %v4552_v6  ;;  %v3459_v34 = vand.u32 2147483648, %v10579_v15  ;;  %vm4523_vm7 = vcmp.eq.f32.partialorder %v10590_v9, inf  ;;  %vm4525_vm5 = vcmp.eq.f32.partialorder %v10590_v9, 0.0 }
 0x438   : > { %v4558_v59 = vcombine.low %v4548_v3, %v4555_v13  ;;  %v4526_v19 = vand.u32 2147483648, %v10590_v9  ;;  %v3496_v0 = vrot.slane %v3487_v58, %v11791_v37  ;;  %vm11794_vm2 = vcmask 1040384  }
 0x439   : > { %vm4530_vm12 = vcmp.eq.f32.partialorder %v10593_v39, inf  ;;  %v4533_v57 = vand.u32 2147483648, %v10593_v39  ;;  %vm11795_vm8 = vmmov %vm11794_vm2  ;;  %vm4532_vm15 = vcmp.eq.f32.partialorder %v10593_v39, 0.0  ;;  %vm4573_vm1 = vcmask 1043459  }
 0x43a   : > { %v4559_v12 = vrot.slane %v4558_v59, 5  ;;  %v3501_v33 = vsel %vm3499_vm9, %v3496_v0, 0.0  ;;  %vm11796_vm14 = vmmov %vm11794_vm2  ;;  %v3505_v62 = vadd.f32 %v11786_v45, %v11785_v21  ;;  %v3508_v13 = vsel %vm3499_vm9, %v11798_v38, 0.0  ;;  %v11799_v59 = vld [vmem:[#allocation58_spill] sm:$0xff] }
 0x43b   : > { %v5284_v5 = vpop.eup %5283  ;;  %vm11797_vm4 = vmmov %vm11794_vm2 }
 0x43c   : > { %v5286_v49 = vpop.eup %5285  ;;  %v3448_v36 = vmul.f32 %v5284_v5, %v10577_v61  ;;  %v3509_v5 = vsel %vm3499_vm9, %v11799_v59, 0.0  ;;  %vm11800_vm3 = vmmov %vm11794_vm2 }
 0x43d   : > { %v3455_v32 = vmul.f32 %v5286_v49, %v10579_v15  ;;  %v3513_v21 = vsel %vm11800_vm3, %v10619_v44, 0.0  ;;  %vm11801_vm10 = vmmov %vm11794_vm2 }
 0x43e   : > { %v3450_v14 = vsel %vm3449_vm6, %v10577_v61, %v3448_v36  ;;  %v3492_v61 = vrot.slane %v3487_v58, %v11789_v22  ;;  %v4579_v36 = vadd.f32 %v11788_v26, %v11787_v18  ;;  %v3510_v58 = vadd.f32 %v3509_v5, %v3508_v13  ;;  %vm11804_vm6 = vmmov %vm11794_vm2 }
 0x43f   : > { %v5288_v28 = vpop.eup %5287  ;;  %v3453_v50 = vsel %vm3451_vm13, %v3452_v48, %v3450_v14  ;;  %v3457_v29 = vsel %vm3456_vm0, %v10579_v15, %v3455_v32  ;;  %v4561_v15 = vmul.f32 %v4559_v12, %v10630_v55  ;;  %v3591_v48 = vrot.slane %v10616_v47, %v11789_v22  ;;  %v11802_v12 = vld [vmem:[#allocation20_spill] sm:$0xff]  ;;  %vm11805_vm13 = vmmov %vm11794_vm2 }
 0x440   : > { %v5290_v51 = vpop.eup %5289  ;;  %v3460_v53 = vsel %vm3458_vm11, %v3459_v34, %v3457_v29  ;;  %v3461_v7 = vmul.f32 %v3453_v50, %v10619_v44  ;;  %v4522_v17 = vmul.f32 %v5288_v28, %v10590_v9  ;;  %v3500_v11 = vsel %vm3499_vm9, %v3492_v61, 0.0  ;;  %v11803_v34 = vld [vmem:[#allocation21_spill] sm:$0xff] }
 0x441   : > { %v3462_v24 = vmul.f32 %v3460_v53, %v10622_v16  ;;  %v4529_v40 = vmul.f32 %v5290_v51, %v10593_v39  ;;  %v4566_v8 = vrot.slane %v4561_v15, %v11792_v1  ;;  %v4570_v46 = vrot.slane %v4561_v15, %v11793_v20 }
 0x442   : > { %v3463_v63 = vsel %vm11794_vm2, %v3461_v7, 0.0  ;;  %v4524_v27 = vsel %vm4523_vm7, %v10590_v9, %v4522_v17  ;;  %v3502_v2 = vadd.f32 %v3501_v33, %v3500_v11  ;;  %v3595_v32 = vrot.slane %v10616_v47, %v11791_v37 }
 0x443   : > { %v3464_v60 = vsel %vm11795_vm8, %v3462_v24, 0.0  ;;  %v4527_v30 = vsel %vm4525_vm5, %v4526_v19, %v4524_v27  ;;  %v4531_v56 = vsel %vm4530_vm12, %v10593_v39, %v4529_v40  ;;  %v4574_v3 = vsel %vm4573_vm1, %v4566_v8, 0.0  ;;  %v11806_v40 = vld [vmem:[#allocation44_spill] sm:$0xff] }
 0x444   : > { %v3465_v42 = vadd.f32 %v3464_v60, %v3463_v63  ;;  %v4534_v23 = vsel %vm4532_vm15, %v4533_v57, %v4531_v56  ;;  %v4535_v54 = vmul.f32 %v4527_v30, %v10625_v41  ;;  %v4575_v6 = vsel %vm4573_vm1, %v4570_v46, 0.0 }
 0x445   : > { %v4536_v31 = vmul.f32 %v4534_v23, %v10628_v10  ;;  %v4576_v49 = vadd.f32 %v4575_v6, %v4574_v3  ;;  %v3514_v45 = vsel %vm11801_vm10, %v10622_v16, 0.0  ;;  %v4582_v14 = vsel %vm4573_vm1, %v11802_v12, 0.0 }
 0x446   : > { %3466 = vadd.xlane.f32.xlu0 %v3465_v42  ;;  %v4537_v9 = vsel %vm11796_vm14, %v4535_v54, 0.0  ;;  %v4583_v18 = vsel %vm4573_vm1, %v11803_v34, 0.0  ;;  %v3515_v26 = vadd.f32 %v3514_v45, %v3513_v21  ;;  %v3598_v22 = vsel %vm3499_vm9, %v3591_v48, 0.0 }
 0x447   : > { %v4538_v39 = vsel %vm11797_vm4, %v4536_v31, 0.0  ;;  %v4584_v28 = vadd.f32 %v4583_v18, %v4582_v14  ;;  %v3599_v37 = vsel %vm3499_vm9, %v3595_v32, 0.0  ;;  %v4587_v47 = vsel %vm11804_vm6, %v10625_v41, 0.0 }
 0x448   : > { %v4539_v43 = vadd.f32 %v4538_v39, %v4537_v9  ;;  %v4588_v44 = vsel %vm11805_vm13, %v10628_v10, 0.0  ;;  %v4665_v16 = vrot.slane %v10630_v55, %v11792_v1  ;;  %v4669_v50 = vrot.slane %v10630_v55, %v11793_v20 }
 0x449   : > { %v3600_v29 = vadd.f32 %v3599_v37, %v3598_v22  ;;  %v4589_v19 = vadd.f32 %v4588_v44, %v4587_v47  ;;  %v3581_v10 = vrot.slane %v10546_v52, 4  ;;  %v3666_v7 = vrot.slane %v10465_v35, 4  ;;  %v11821_v47 = vld [vmem:[#allocation32_spill] sm:$0xff] }
 0x44a   : > { %3503 = vadd.xlane.f32.xlu0 %v3502_v2  ;;  %4540 = vadd.xlane.f32.xlu1 %v4539_v43  ;;  %v4672_v51 = vsel %vm4573_vm1, %v4665_v16, 0.0  ;;  %v4673_v53 = vsel %vm4573_vm1, %v4669_v50, 0.0  ;;  %v4655_v20 = vrot.slane %v10569_v25, 4  ;;  %v4740_v17 = vrot.slane %v10522_v4, 4 }
 0x44b   : > { %v4674_v41 = vadd.f32 %v4673_v53, %v4672_v51  ;;  %v3582_v1 = vadd.f32 %v3581_v10, %v10546_v52  ;;  %v3667_v61 = vadd.f32 %v3666_v7, %v10465_v35  ;;  %vm11807_vm9 = vcmp.eq.s32.totalorder %v11806_v40, 0 }
 0x44c   : > { %v4656_v0 = vadd.f32 %v4655_v20, %v10569_v25  ;;  %v4741_v30 = vadd.f32 %v4740_v17, %v10522_v4  ;;  %vm11808_vm0 = vmmov %vm11807_vm9  ;;  %vm11809_vm11 = vcmp.eq.s32.totalorder %v11806_v40, 1  ;;  %vm11810_vm7 = vcmp.eq.s32.totalorder %v11806_v40, 2 }
 0x44d   : > { %v3583_v24 = vrot.slane %v3582_v1, 2  ;;  %v3668_v57 = vrot.slane %v3667_v61, 2  ;;  %vm11811_vm5 = vcmp.eq.s32.totalorder %v11806_v40, 3  ;;  %vm11812_vm2 = vmmov %vm11809_vm11  ;;  %vm11815_vm15 = vcmp.eq.s32.totalorder %v11806_v40, 4 }
 0x44e   : > { %4577 = vadd.xlane.f32.xlu0 %v4576_v49  ;;  %3506 = vadd.xlane.f32.xlu1 %v3505_v62  ;;  %v4657_v56 = vrot.slane %v4656_v0, 2  ;;  %v4742_v33 = vrot.slane %v4741_v30, 2  ;;  %vm11813_vm12 = vmmov %vm11810_vm7  ;;  %vm11816_vm14 = vcmp.eq.s32.totalorder %v11806_v40, 5  ;;  %vm4764_vm1 = vcmask 1041408  }
 0x44f   : > { %v3584_v52 = vadd.f32 %v3583_v24, %v3582_v1  ;;  %v3669_v23 = vadd.f32 %v3668_v57, %v3667_v61  ;;  %vm11814_vm8 = vmmov %vm11811_vm5  ;;  %vm11818_vm3 = vcmp.eq.s32.totalorder %v11806_v40, 6  ;;  %vm11820_vm6 = vcmp.eq.s32.totalorder %v11806_v40, 7 }
 0x450   : > { %v4658_v8 = vadd.f32 %v4657_v56, %v4656_v0  ;;  %v4743_v6 = vadd.f32 %v4742_v33, %v4741_v30  ;;  %vm11817_vm4 = vmmov %vm11815_vm15  ;;  %vm4766_vm13 = vcmask 1042432  }
 0x451   : > { %v3585_v31 = vrot.slane %v3584_v52, 1  ;;  %v3670_v43 = vrot.slane %v3669_v23, 1  ;;  %vm11819_vm10 = vmmov %vm11816_vm14 }
 0x452   : > { %4580 = vadd.xlane.f32.xlu0 %v4579_v36  ;;  %3511 = vadd.xlane.f32.xlu1 %v3510_v58  ;;  %v4659_v62 = vrot.slane %v4658_v8, 1  ;;  %v4744_v21 = vrot.slane %v4743_v6, 1 }
 0x453   : > { %v3586_v59 = vadd.f32 %v3585_v31, %v3584_v52  ;;  %v3671_v14 = vadd.f32 %v3670_v43, %v3669_v23 }
 0x454   : > { %v4660_v45 = vadd.f32 %v4659_v62, %v4658_v8  ;;  %v4745_v16 = vadd.f32 %v4744_v21, %v4743_v6 }
 0x456   : > { %3516 = vadd.xlane.f32.xlu0 %v3515_v26  ;;  %4585 = vadd.xlane.f32.xlu1 %v4584_v28 }
 0x45a   : > { %3601 = vadd.xlane.f32.xlu0 %v3600_v29  ;;  %4590 = vadd.xlane.f32.xlu1 %v4589_v19 }
 0x45e   : > { %4675 = vadd.xlane.f32.xlu1 %v4674_v41 }
 0x4cf   : > { %v3467_v55 = vpop.xlane.xlu0 %3466 }
 0x4d0   : > { %v3672_v15 = vsel %vm11807_vm9, %v3467_v55, 0.0  ;;  %vm11822_vm9 = vmmov %vm11818_vm3 }
 0x4d1   : > { %v3674_v60 = vrot.slane %v3672_v15, 6 }
 0x4d3   : > { %v4541_v63 = vpop.xlane.xlu1 %4540  ;;  %v3504_v27 = vpop.xlane.xlu0 %3503 }
 0x4d4   : > { %v4746_v42 = vsel %vm11808_vm0, %v4541_v63, 0.0  ;;  %v3676_v25 = vsel %vm11809_vm11, %v3504_v27, %v3674_v60  ;;  %vm11823_vm0 = vmmov %vm11820_vm6 }
 0x4d5   : > { %v4748_v54 = vrot.slane %v4746_v42, 5 }
 0x4d7   : > { %v3507_v35 = vpop.xlane.xlu1 %3506  ;;  %v4578_v11 = vpop.xlane.xlu0 %4577 }
 0x4d8   : > { %v3677_v46 = vsel %vm11810_vm7, %v3507_v35, %v3676_v25  ;;  %v4750_v3 = vsel %vm11812_vm2, %v4578_v11, %v4748_v54 }
 0x4db   : > { %v3512_v4 = vpop.xlane.xlu1 %3511  ;;  %v4581_v9 = vpop.xlane.xlu0 %4580 }
 0x4dc   : > { %v3678_v39 = vsel %vm11811_vm5, %v3512_v4, %v3677_v46  ;;  %v4751_v38 = vsel %vm11813_vm12, %v4581_v9, %v4750_v3 }
 0x4dd   : > { %v3680_v2 = vrot.slane %v3678_v39, 2 }
 0x4df   : > { %v4586_v13 = vpop.xlane.xlu1 %4585  ;;  %v3517_v5 = vpop.xlane.xlu0 %3516 }
 0x4e0   : > { %v4752_v49 = vsel %vm11814_vm8, %v4586_v13, %v4751_v38  ;;  %v3682_v36 = vsel %vm11815_vm15, %v3517_v5, %v3680_v2 }
 0x4e1   : > { %v4754_v58 = vrot.slane %v4752_v49, 3  ;;  %v3683_v48 = vsel %vm11816_vm14, %v3586_v59, %v3682_v36 }
 0x4e2   : > { %v3685_v32 = vrot.slane %v3683_v48, 6 }
 0x4e3   : > { %v4591_v12 = vpop.xlane.xlu1 %4590  ;;  %v3602_v34 = vpop.xlane.xlu0 %3601 }
 0x4e4   : > { %v4756_v18 = vsel %vm11817_vm4, %v4591_v12, %v4754_v58  ;;  %v3687_v26 = vsel %vm11818_vm3, %v3602_v34, %v3685_v32 }
 0x4e5   : > { %v4757_v28 = vsel %vm11819_vm10, %v4660_v45, %v4756_v18  ;;  %v3688_v22 = vsel %vm11820_vm6, %v3671_v14, %v3687_v26 }
 0x4e6   : > { %v4759_v37 = vrot.slane %v4757_v28, 5  ;;  %v4765_v44 = vsel %vm4764_vm1, %v11821_v47, %v3688_v22 }
 0x4e7   : > { %v4676_v50 = vpop.xlane.xlu1 %4675 }
 0x4e8   : > { %v4761_v29 = vsel %vm11822_vm9, %v4676_v50, %v4759_v37 }
 0x4e9   : > { %v4762_v19 = vsel %vm11823_vm0, %v4745_v16, %v4761_v29 }
 0x4ea   : > { %v4767_v51 = vsel %vm4766_vm13, %v4765_v44, %v4762_v19 }
 0x4eb   : > { %4768 = vst [vmem:[%s280_s28] sm:$0xf] %v4767_v51 }
 0x4ec   : > { %5672 = shalt.err (!%p5669_p4)
}
 0x4ed   : > { %s5673_s2 = scalar_lea.hbm %s10752_s27, 64  ;;  %s5677_s7 = scalar_lea.hbm %s10793_s4, 128 }
 0x4ee   : > { %p5674_p10 = scmp.ne.s32.totalorder %s10752_s27, %s5673_s2  ;;  %p5678_p11 = scmp.lt.s32.totalorder %s10752_s27, %s10793_s4 }
 0x4ef   : > { %p5679_p2 = scmp.lt.s32.totalorder %s5677_s7, %s5673_s2 }
 0x4f0   : > { %p5675_p0 = pnand %p5674_p10, %p11824_p7 }
 0x4f1   : > { %p5680_p6 = por %p5679_p2, %p5678_p11 }
 0x4f2   : > { %p5676_p8 = pneg %p5675_p0 }
 0x4f4   : > { %p5681_p12 = pnand %p5680_p6, %p5676_p8 }
 0x4f6   : > { %5684 = shalt.err (!%p5681_p12)
}
 0x4f7   : > { %5194 = dma.vmem_to_hbm [thread:$0]  (%p11824_p7), %s4784_s24, 64, %s10752_s27, %s4770_s19  }
 0x4f8 PF: > { %s4795_s9 = sand.u32 1, %s5723_s15   ;;  %p11825_p9 = scmp.ne.s32.totalorder %s11151_s22, 0 }
 0x4f9   : > { %p11826_p13 = scmp.ge.s32.totalorder %s5735_s18, 2  ;;  %s4796_s21 = scalar_lea.sflag [#allocation4], %s4795_s9 }
 0x4fb   : > { %p5211_p5 = pnand %p11826_p13, %p11825_p9 }
 0x4fd   : > { %p5212_p1 = pneg %p5211_p5 }
 0x4ff   : > { %5718 = dma.done.wait (%p5212_p1), %s4796_s21, 64  }
 0x500   : > { %5720 = vsyncadd (%p5212_p1), %s4796_s21, 4294967232  ;;  %p21_p3 = scmp.ge.s32.totalorder %s5843_s11, 4   ;;  %s11827_s15 = smov %s5727_s16 }
 0x501   : > { %s11828_s16 = smov %s5731_s17  ;;  %s11829_s17 = smov %s5859_s20 }
 0x502   : > { %s11830_s18 = smov %s5843_s11  ;;  %23 = sbr.rel (!%p21_p3) target bundleno = 10 (0xa), region = 102 }
 0x507   :  { %4801 = vsyncpa [#allocation3], 1 }
 0x508   :  { %4803 = vsyncpa [#allocation3 + $0x1], 1 }
 0x509   :  { %4804 = vsyncpa [#allocation6], 1 }
 0x50a   :  { %4806 = vsyncpa [#allocation6 + $0x1], 1 }
 0x50b   :  { %4807 = vsyncpa [#allocation9], 1 }
 0x50c   :  { %4808 = vsyncpa [#allocation4], 1 }
 0x50d   :  { %4810 = vsyncpa [#allocation4 + $0x1], 1 }

</bundles_post_ra>
